<compile_context>
chip_gen: v7x
topology: tpu7x:2x2x1
jax: 0.10.0
libtpu: 0.0.40
codegen_flags: <defaults>
</compile_context>

<pallas_src>
import jax
import jax.numpy as jnp
from jax.experimental import pallas as pl
from jax.experimental.pallas import tpu as pltpu

# ---------------------------------------------------------------------------
# Model hyper-parameters (module defaults)
# ---------------------------------------------------------------------------
XYZ_MULTIRES = 4
EXP_MULTIRES = 2
T_MULTIRES = -2
POSE_MULTIRES = 2
LDMK_MULTIRES = 10
EXP_DIM = 6
N_LDMK = 4

XYZ_CH = 3 * (1 + 2 * XYZ_MULTIRES)                  # 27
EXP_CH = EXP_DIM * (1 + 2 * EXP_MULTIRES)            # 30
T_CH = 0                                             # t_multires=-2 -> empty
POSE_CH = 3 * (1 + 2 * POSE_MULTIRES)                # 15
LDMK_CH = (N_LDMK * 2) * (1 + 2 * LDMK_MULTIRES)     # 168
IN_CH = XYZ_CH + EXP_CH + T_CH + POSE_CH + LDMK_CH   # 240
FRAME_CH = IN_CH - XYZ_CH                            # 213 per-frame channels

MLP_D = 8
MLP_W = 128
SKIP_LAYER = 5            # pts_linears[5] == Linear(W + input_ch, W)
OUT_CH = 3                # deform_3d=True, pred_rgb_shift=False
OUT_STORE = 8             # padded head width (full extent of output array)

TM = 1024                 # points per grid step


# ---------------------------------------------------------------------------
# Positional embedding (Embedder.embed) -- glue, plain JAX
# ---------------------------------------------------------------------------
def positional_embed(x, multires):
    """x: [B, d] -> [B, d*(1+2*multires)] (order: x, sin(f0 x), cos(f0 x), ...)."""
    if multires == -1:
        return x
    if multires < -1:
        return x[..., :0]
    freqs = 2.0 ** jnp.linspace(0.0, float(multires - 1), multires)
    parts = [x]
    for f in freqs:
        parts.append(jnp.sin(x * f))
        parts.append(jnp.cos(x * f))
    return jnp.concatenate(parts, axis=-1)


# ---------------------------------------------------------------------------
# Pallas kernel: 8-layer MLPDecoder (skip at layer 5) with frame-folded biases
# ---------------------------------------------------------------------------
def mlp_kernel(x_ref,
               w0x, w1, w2, w3, w4, w5x, w5h, w6, w7, wout,
               fb0, b1, b2, b3, b4, fb5, b6, b7, bout,
               o_ref):
    x = x_ref[...]                                           # (TM, 27) bf16

    def lin_relu(h, w_ref, b_ref):
        y = jnp.dot(h, w_ref[...], preferred_element_type=jnp.float32) + b_ref[...]
        return jnp.maximum(y, 0.0).astype(jnp.bfloat16)      # bias/ReLU in f32

    # layer 0: xyz part in-kernel, frame part folded into fb0 (f32, exact)
    h = lin_relu(x, w0x, fb0)
    h = lin_relu(h, w1, b1)                                  # layers 1..4
    h = lin_relu(h, w2, b2)
    h = lin_relu(h, w3, b3)
    h = lin_relu(h, w4, b4)

    # skip (i==4): cat([input, h]) @ W5  ==  x@W5[:27] + frame_fold + h@W5[240:]
    y5 = (jnp.dot(x, w5x[...], preferred_element_type=jnp.float32)
          + jnp.dot(h, w5h[...], preferred_element_type=jnp.float32)
          + fb5[...])
    h = jnp.maximum(y5, 0.0).astype(jnp.bfloat16)

    h = lin_relu(h, w6, b6)                                  # layers 6, 7
    h = lin_relu(h, w7, b7)

    # output_linear (out_rescale=1, act=None), 8-lane padded head; the last
    # dim equals the full output-array extent -> contiguous (TM,8) DMA store.
    o_ref[...] = jnp.dot(h, wout[...], preferred_element_type=jnp.float32) + bout[...]


def run_deform_mlp(xyz_emb, fb0, fb5, p, tm=TM):
    """xyz_emb: [BN, 27] bf16; fb0/fb5: [1,128] f32 frame-folded biases."""
    bn = xyz_emb.shape[0]
    bn_pad = pl.cdiv(bn, tm) * tm
    if bn_pad != bn:
        xyz_emb = jnp.pad(xyz_emb, ((0, bn_pad - bn), (0, 0)))

    weight_args = [p['w0x'], p['w1'], p['w2'], p['w3'], p['w4'],
                   p['w5x'], p['w5h'], p['w6'], p['w7'], p['wout']]
    bias_args = [fb0, p['b1'], p['b2'], p['b3'], p['b4'],
                 fb5, p['b6'], p['b7'], p['bout']]

    def const_spec(a):
        return pl.BlockSpec(a.shape, lambda i: (0, 0))

    in_specs = ([pl.BlockSpec((tm, XYZ_CH), lambda i: (i, 0))]
                + [const_spec(a) for a in weight_args]
                + [const_spec(a) for a in bias_args])

    # per point: two 27x128 matmuls, seven 128x128, one 128x8
    flops = 2 * bn_pad * (2 * XYZ_CH * MLP_W + 7 * MLP_W * MLP_W
                          + MLP_W * OUT_STORE)
    bytes_accessed = (bn_pad * (XYZ_CH * 2 + OUT_STORE * 4)
                      + sum(int(a.size) * a.dtype.itemsize
                            for a in weight_args + bias_args))

    out = pl.pallas_call(
        mlp_kernel,
        out_shape=jax.ShapeDtypeStruct((bn_pad, OUT_STORE), jnp.float32),
        grid_spec=pltpu.PrefetchScalarGridSpec(
            num_scalar_prefetch=0,
            grid=(bn_pad // tm,),
            in_specs=in_specs,
            out_specs=pl.BlockSpec((tm, OUT_STORE), lambda i: (i, 0)),
        ),
        compiler_params=pltpu.CompilerParams(dimension_semantics=("parallel",)),
        cost_estimate=pl.CostEstimate(flops=flops, transcendentals=0,
                                      bytes_accessed=bytes_accessed),
    )(xyz_emb, *weight_args, *bias_args)
    return out[:bn, :OUT_CH]


# ---------------------------------------------------------------------------
# Parameter init (PyTorch-Linear-style uniform; output head = 0 by default)
# ---------------------------------------------------------------------------
def _linear(key, in_dim, out_dim, zero=False):
    if zero:
        return (jnp.zeros((in_dim, out_dim), jnp.float32),
                jnp.zeros((1, out_dim), jnp.float32))
    kw, kb = jax.random.split(key)
    bound = 1.0 / (in_dim ** 0.5)
    w = jax.random.uniform(kw, (in_dim, out_dim), jnp.float32, -bound, bound)
    b = jax.random.uniform(kb, (1, out_dim), jnp.float32, -bound, bound)
    return w, b


def init_params(key, zero_output=True):
    dims = []
    for i in range(MLP_D):
        if i == 0:
            dims.append((IN_CH, MLP_W))
        elif i == SKIP_LAYER:
            dims.append((MLP_W + IN_CH, MLP_W))
        else:
            dims.append((MLP_W, MLP_W))
    keys = jax.random.split(key, MLP_D + 1)
    weights, biases = [], []
    for k, (din, dout) in zip(keys[:MLP_D], dims):
        w, b = _linear(k, din, dout)
        weights.append(w)
        biases.append(b)
    # output_linear: init_zero_output=True -> exactly zero
    wout, bout = _linear(keys[-1], MLP_W, OUT_CH, zero=zero_output)
    weights.append(wout)
    biases.append(bout)
    return weights, biases


def prepare_params(weights, biases):
    """Split W0/W5 into xyz / frame / hidden parts, pad the head, cast to bf16."""
    w0 = weights[0]
    w5 = weights[SKIP_LAYER]
    p = {
        'w0x': w0[:XYZ_CH].astype(jnp.bfloat16),
        'w0f': w0[XYZ_CH:],                                  # (213,128) f32, folded
        'b0': biases[0],
        'w5x': w5[:XYZ_CH].astype(jnp.bfloat16),
        'w5f': w5[XYZ_CH:IN_CH],                             # (213,128) f32, folded
        'w5h': w5[IN_CH:].astype(jnp.bfloat16),
        'b5': biases[SKIP_LAYER],
    }
    for i in (1, 2, 3, 4, 6, 7):
        p[f'w{i}'] = weights[i].astype(jnp.bfloat16)
        p[f'b{i}'] = biases[i]
    wout = jnp.zeros((MLP_W, OUT_STORE), jnp.float32).at[:, :OUT_CH].set(weights[8])
    bout = jnp.zeros((1, OUT_STORE), jnp.float32).at[:, :OUT_CH].set(biases[8])
    p['wout'] = wout.astype(jnp.bfloat16)
    p['bout'] = bout
    return p


# ---------------------------------------------------------------------------
# LiftDeformNetwork.forward (deform_type='mlp' path)
# ---------------------------------------------------------------------------
def lift_deform_forward(prepared, xyz, t, exp, pose, ldmks):
    """
    xyz: [B, N, 3], t: [B, 1], exp: [B, 6], pose: [B, 3], ldmks: [B, 8]
    returns (xyz_shift [B,N,3], color_shift [B,N,3], net_out [B*N,3])
    """
    B, N, _ = xyz.shape
    assert B == 1, "currently only support single batch"

    xyz_flat = xyz.reshape(B * N, 3)
    xyz_emb = positional_embed(xyz_flat, XYZ_MULTIRES).astype(jnp.float32)   # [BN,27]

    # Per-frame channels (identical for every point): fold once into biases.
    frame_emb = jnp.concatenate([
        positional_embed(exp, EXP_MULTIRES),
        positional_embed(t, T_MULTIRES),            # empty (0 channels)
        positional_embed(pose, POSE_MULTIRES),
        positional_embed(ldmks, LDMK_MULTIRES),
    ], axis=-1).astype(jnp.float32)                 # [1, 213]
    fb0 = frame_emb @ prepared['w0f'] + prepared['b0']       # [1,128] f32
    fb5 = frame_emb @ prepared['w5f'] + prepared['b5']       # [1,128] f32

    net_out = run_deform_mlp(xyz_emb.astype(jnp.bfloat16), fb0, fb5, prepared)

    # pred_rgb_shift=False -> color_shift zeros; deform_3d=True -> no padding
    xyz_shift = net_out.reshape(B, N, OUT_CH)
    color_shift = jnp.zeros((B, N, 3), dtype=net_out.dtype)
    # The reference module zeroes xyz_shift right before returning.
    xyz_shift = jnp.zeros_like(xyz_shift)
    return xyz_shift, color_shift, net_out


# ---------------------------------------------------------------------------
# Pure-JAX f32 reference (original 240-wide formulation) for validation
# ---------------------------------------------------------------------------
def build_net_in_full(xyz, t, exp, pose, ldmks):
    B, N, _ = xyz.shape

    def transform(v):
        return jnp.broadcast_to(v[:, None, :], (B, N, v.shape[-1])).reshape(B * N, -1)

    xyz_flat = xyz.reshape(B * N, 3)
    return jnp.concatenate([
        positional_embed(xyz_flat, XYZ_MULTIRES),
        transform(positional_embed(exp, EXP_MULTIRES)),
        transform(positional_embed(t, T_MULTIRES)),
        transform(positional_embed(pose, POSE_MULTIRES)),
        transform(positional_embed(ldmks, LDMK_MULTIRES)),
    ], axis=-1).astype(jnp.float32)


def deform_mlp_reference(net_in, weights, biases):
    x = net_in
    h = x
    for i in range(MLP_D):
        h = h @ weights[i] + biases[i]
        h = jnp.maximum(h, 0.0)
        if i == 4:                                   # skips=[4]
            h = jnp.concatenate([x, h], axis=-1)
    return h @ weights[8] + biases[8]


# ---------------------------------------------------------------------------
if __name__ == "__main__":
    key = jax.random.PRNGKey(0)
    k = jax.random.split(key, 7)

    B, N = 1, 2000                       # pads to 2048 -> grid of 2 at TM=1024
    xyz = jax.random.uniform(k[0], (B, N, 3), jnp.float32, -1.0, 1.0)
    t = jnp.zeros((B, 1), jnp.float32)
    exp = jax.random.normal(k[1], (B, EXP_DIM), jnp.float32)
    pose = jax.random.normal(k[2], (B, 3), jnp.float32)
    ldmks = jax.random.uniform(k[3], (B, N_LDMK * 2), jnp.float32)

    # Module-faithful params (zero-initialized output head).
    params = init_params(k[4], zero_output=True)
    prepared = prepare_params(*params)
    xyz_shift, color_shift, net_out = lift_deform_forward(
        prepared, xyz, t, exp, pose, ldmks)
    jax.block_until_ready((xyz_shift, color_shift, net_out))

    assert xyz_shift.shape == (B, N, 3)
    assert color_shift.shape == (B, N, 3)
    assert net_out.shape == (B * N, 3)
    # init_zero_output=True -> net_out is exactly zero.
    assert float(jnp.max(jnp.abs(net_out))) == 0.0

    # Correctness validation with a NON-zero output head (a zero head would
    # hide any wiring bug in the matmul path).
    vparams = init_params(k[5], zero_output=False)
    vprepared = prepare_params(*vparams)
    _, _, net_out_v = lift_deform_forward(vprepared, xyz, t, exp, pose, ldmks)
    ref = deform_mlp_reference(build_net_in_full(xyz, t, exp, pose, ldmks), *vparams)
    err = float(jnp.max(jnp.abs(net_out_v - ref)))
    scale = float(jnp.max(jnp.abs(ref))) + 1e-6
    assert err <= 0.05 * scale + 1e-3, (err, scale)

    print("KERNEL_OK")
</pallas_src>

<mosaic_0001>
module attributes {stable_mosaic.version = 11 : i64} {
  func.func @mlp_kernel(%arg0: i32, %arg1: memref<1024x27xbf16, #tpu.memory_space<vmem>>, %arg2: memref<27x128xbf16, #tpu.memory_space<vmem>>, %arg3: memref<128x128xbf16, #tpu.memory_space<vmem>>, %arg4: memref<128x128xbf16, #tpu.memory_space<vmem>>, %arg5: memref<128x128xbf16, #tpu.memory_space<vmem>>, %arg6: memref<128x128xbf16, #tpu.memory_space<vmem>>, %arg7: memref<27x128xbf16, #tpu.memory_space<vmem>>, %arg8: memref<128x128xbf16, #tpu.memory_space<vmem>>, %arg9: memref<128x128xbf16, #tpu.memory_space<vmem>>, %arg10: memref<128x128xbf16, #tpu.memory_space<vmem>>, %arg11: memref<128x8xbf16, #tpu.memory_space<vmem>>, %arg12: memref<1x128xf32, #tpu.memory_space<vmem>>, %arg13: memref<1x128xf32, #tpu.memory_space<vmem>>, %arg14: memref<1x128xf32, #tpu.memory_space<vmem>>, %arg15: memref<1x128xf32, #tpu.memory_space<vmem>>, %arg16: memref<1x128xf32, #tpu.memory_space<vmem>>, %arg17: memref<1x128xf32, #tpu.memory_space<vmem>>, %arg18: memref<1x128xf32, #tpu.memory_space<vmem>>, %arg19: memref<1x128xf32, #tpu.memory_space<vmem>>, %arg20: memref<1x8xf32, #tpu.memory_space<vmem>>, %arg21: memref<1024x8xf32, #tpu.memory_space<vmem>>) attributes {dimension_semantics = [#tpu.dimension_semantics<parallel>], iteration_bounds = array<i64: 2>, scalar_prefetch = 0 : i64, scratch_operands = 0 : i64, tpu.core_type = #tpu.core_type<tc>, window_params = [{transform_indices = @transform_0, window_bounds = array<i64: 1024, 27>}, {pipeline_mode = #tpu.pipeline_mode<synchronous>, transform_indices = @transform_1, window_bounds = array<i64: 27, 128>}, {pipeline_mode = #tpu.pipeline_mode<synchronous>, transform_indices = @transform_2, window_bounds = array<i64: 128, 128>}, {pipeline_mode = #tpu.pipeline_mode<synchronous>, transform_indices = @transform_3, window_bounds = array<i64: 128, 128>}, {pipeline_mode = #tpu.pipeline_mode<synchronous>, transform_indices = @transform_4, window_bounds = array<i64: 128, 128>}, {pipeline_mode = #tpu.pipeline_mode<synchronous>, transform_indices = @transform_5, window_bounds = array<i64: 128, 128>}, {pipeline_mode = #tpu.pipeline_mode<synchronous>, transform_indices = @transform_6, window_bounds = array<i64: 27, 128>}, {pipeline_mode = #tpu.pipeline_mode<synchronous>, transform_indices = @transform_7, window_bounds = array<i64: 128, 128>}, {pipeline_mode = #tpu.pipeline_mode<synchronous>, transform_indices = @transform_8, window_bounds = array<i64: 128, 128>}, {pipeline_mode = #tpu.pipeline_mode<synchronous>, transform_indices = @transform_9, window_bounds = array<i64: 128, 128>}, {pipeline_mode = #tpu.pipeline_mode<synchronous>, transform_indices = @transform_10, window_bounds = array<i64: 128, 8>}, {pipeline_mode = #tpu.pipeline_mode<synchronous>, transform_indices = @transform_11, window_bounds = array<i64: 1, 128>}, {pipeline_mode = #tpu.pipeline_mode<synchronous>, transform_indices = @transform_12, window_bounds = array<i64: 1, 128>}, {pipeline_mode = #tpu.pipeline_mode<synchronous>, transform_indices = @transform_13, window_bounds = array<i64: 1, 128>}, {pipeline_mode = #tpu.pipeline_mode<synchronous>, transform_indices = @transform_14, window_bounds = array<i64: 1, 128>}, {pipeline_mode = #tpu.pipeline_mode<synchronous>, transform_indices = @transform_15, window_bounds = array<i64: 1, 128>}, {pipeline_mode = #tpu.pipeline_mode<synchronous>, transform_indices = @transform_16, window_bounds = array<i64: 1, 128>}, {pipeline_mode = #tpu.pipeline_mode<synchronous>, transform_indices = @transform_17, window_bounds = array<i64: 1, 128>}, {pipeline_mode = #tpu.pipeline_mode<synchronous>, transform_indices = @transform_18, window_bounds = array<i64: 1, 128>}, {pipeline_mode = #tpu.pipeline_mode<synchronous>, transform_indices = @transform_19, window_bounds = array<i64: 1, 8>}, {transform_indices = @transform_20, window_bounds = array<i64: 1024, 8>}]} {
    %c0 = arith.constant 0 : index
    %c0_0 = arith.constant 0 : index
    %0 = vector.load %arg1[%c0, %c0_0] : memref<1024x27xbf16, #tpu.memory_space<vmem>>, vector<1024x27xbf16>
    %c0_1 = arith.constant 0 : index
    %c0_2 = arith.constant 0 : index
    %1 = vector.load %arg2[%c0_1, %c0_2] : memref<27x128xbf16, #tpu.memory_space<vmem>>, vector<27x128xbf16>
    %cst = arith.constant dense<0.000000e+00> : vector<1024x128xf32>
    %2 = tpu.matmul %0, %1, %cst {dimension_numbers = #tpu.dot_dimension_numbers<[1], [0], [0], [1], [0, 0, 1, 1], [], []>} : vector<1024x27xbf16>, vector<27x128xbf16>, vector<1024x128xf32> -> vector<1024x128xf32>
    %c0_3 = arith.constant 0 : index
    %c0_4 = arith.constant 0 : index
    %3 = vector.load %arg12[%c0_3, %c0_4] : memref<1x128xf32, #tpu.memory_space<vmem>>, vector<1x128xf32>
    %4 = vector.broadcast %3 : vector<1x128xf32> to vector<1024x128xf32>
    %5 = arith.addf %2, %4 : vector<1024x128xf32>
    %cst_5 = arith.constant 0.000000e+00 : f32
    %6 = vector.broadcast %cst_5 : f32 to vector<1024x128xf32>
    %7 = arith.maximumf %5, %6 : vector<1024x128xf32>
    %8 = arith.truncf %7 : vector<1024x128xf32> to vector<1024x128xbf16>
    %c0_6 = arith.constant 0 : index
    %c0_7 = arith.constant 0 : index
    %9 = vector.load %arg3[%c0_6, %c0_7] : memref<128x128xbf16, #tpu.memory_space<vmem>>, vector<128x128xbf16>
    %cst_8 = arith.constant dense<0.000000e+00> : vector<1024x128xf32>
    %10 = tpu.matmul %8, %9, %cst_8 {dimension_numbers = #tpu.dot_dimension_numbers<[1], [0], [0], [1], [0, 0, 1, 1], [], []>} : vector<1024x128xbf16>, vector<128x128xbf16>, vector<1024x128xf32> -> vector<1024x128xf32>
    %c0_9 = arith.constant 0 : index
    %c0_10 = arith.constant 0 : index
    %11 = vector.load %arg13[%c0_9, %c0_10] : memref<1x128xf32, #tpu.memory_space<vmem>>, vector<1x128xf32>
    %12 = vector.broadcast %11 : vector<1x128xf32> to vector<1024x128xf32>
    %13 = arith.addf %10, %12 : vector<1024x128xf32>
    %cst_11 = arith.constant 0.000000e+00 : f32
    %14 = vector.broadcast %cst_11 : f32 to vector<1024x128xf32>
    %15 = arith.maximumf %13, %14 : vector<1024x128xf32>
    %16 = arith.truncf %15 : vector<1024x128xf32> to vector<1024x128xbf16>
    %c0_12 = arith.constant 0 : index
    %c0_13 = arith.constant 0 : index
    %17 = vector.load %arg4[%c0_12, %c0_13] : memref<128x128xbf16, #tpu.memory_space<vmem>>, vector<128x128xbf16>
    %cst_14 = arith.constant dense<0.000000e+00> : vector<1024x128xf32>
    %18 = tpu.matmul %16, %17, %cst_14 {dimension_numbers = #tpu.dot_dimension_numbers<[1], [0], [0], [1], [0, 0, 1, 1], [], []>} : vector<1024x128xbf16>, vector<128x128xbf16>, vector<1024x128xf32> -> vector<1024x128xf32>
    %c0_15 = arith.constant 0 : index
    %c0_16 = arith.constant 0 : index
    %19 = vector.load %arg14[%c0_15, %c0_16] : memref<1x128xf32, #tpu.memory_space<vmem>>, vector<1x128xf32>
    %20 = vector.broadcast %19 : vector<1x128xf32> to vector<1024x128xf32>
    %21 = arith.addf %18, %20 : vector<1024x128xf32>
    %cst_17 = arith.constant 0.000000e+00 : f32
    %22 = vector.broadcast %cst_17 : f32 to vector<1024x128xf32>
    %23 = arith.maximumf %21, %22 : vector<1024x128xf32>
    %24 = arith.truncf %23 : vector<1024x128xf32> to vector<1024x128xbf16>
    %c0_18 = arith.constant 0 : index
    %c0_19 = arith.constant 0 : index
    %25 = vector.load %arg5[%c0_18, %c0_19] : memref<128x128xbf16, #tpu.memory_space<vmem>>, vector<128x128xbf16>
    %cst_20 = arith.constant dense<0.000000e+00> : vector<1024x128xf32>
    %26 = tpu.matmul %24, %25, %cst_20 {dimension_numbers = #tpu.dot_dimension_numbers<[1], [0], [0], [1], [0, 0, 1, 1], [], []>} : vector<1024x128xbf16>, vector<128x128xbf16>, vector<1024x128xf32> -> vector<1024x128xf32>
    %c0_21 = arith.constant 0 : index
    %c0_22 = arith.constant 0 : index
    %27 = vector.load %arg15[%c0_21, %c0_22] : memref<1x128xf32, #tpu.memory_space<vmem>>, vector<1x128xf32>
    %28 = vector.broadcast %27 : vector<1x128xf32> to vector<1024x128xf32>
    %29 = arith.addf %26, %28 : vector<1024x128xf32>
    %cst_23 = arith.constant 0.000000e+00 : f32
    %30 = vector.broadcast %cst_23 : f32 to vector<1024x128xf32>
    %31 = arith.maximumf %29, %30 : vector<1024x128xf32>
    %32 = arith.truncf %31 : vector<1024x128xf32> to vector<1024x128xbf16>
    %c0_24 = arith.constant 0 : index
    %c0_25 = arith.constant 0 : index
    %33 = vector.load %arg6[%c0_24, %c0_25] : memref<128x128xbf16, #tpu.memory_space<vmem>>, vector<128x128xbf16>
    %cst_26 = arith.constant dense<0.000000e+00> : vector<1024x128xf32>
    %34 = tpu.matmul %32, %33, %cst_26 {dimension_numbers = #tpu.dot_dimension_numbers<[1], [0], [0], [1], [0, 0, 1, 1], [], []>} : vector<1024x128xbf16>, vector<128x128xbf16>, vector<1024x128xf32> -> vector<1024x128xf32>
    %c0_27 = arith.constant 0 : index
    %c0_28 = arith.constant 0 : index
    %35 = vector.load %arg16[%c0_27, %c0_28] : memref<1x128xf32, #tpu.memory_space<vmem>>, vector<1x128xf32>
    %36 = vector.broadcast %35 : vector<1x128xf32> to vector<1024x128xf32>
    %37 = arith.addf %34, %36 : vector<1024x128xf32>
    %cst_29 = arith.constant 0.000000e+00 : f32
    %38 = vector.broadcast %cst_29 : f32 to vector<1024x128xf32>
    %39 = arith.maximumf %37, %38 : vector<1024x128xf32>
    %40 = arith.truncf %39 : vector<1024x128xf32> to vector<1024x128xbf16>
    %c0_30 = arith.constant 0 : index
    %c0_31 = arith.constant 0 : index
    %41 = vector.load %arg7[%c0_30, %c0_31] : memref<27x128xbf16, #tpu.memory_space<vmem>>, vector<27x128xbf16>
    %cst_32 = arith.constant dense<0.000000e+00> : vector<1024x128xf32>
    %42 = tpu.matmul %0, %41, %cst_32 {dimension_numbers = #tpu.dot_dimension_numbers<[1], [0], [0], [1], [0, 0, 1, 1], [], []>} : vector<1024x27xbf16>, vector<27x128xbf16>, vector<1024x128xf32> -> vector<1024x128xf32>
    %c0_33 = arith.constant 0 : index
    %c0_34 = arith.constant 0 : index
    %43 = vector.load %arg8[%c0_33, %c0_34] : memref<128x128xbf16, #tpu.memory_space<vmem>>, vector<128x128xbf16>
    %cst_35 = arith.constant dense<0.000000e+00> : vector<1024x128xf32>
    %44 = tpu.matmul %40, %43, %cst_35 {dimension_numbers = #tpu.dot_dimension_numbers<[1], [0], [0], [1], [0, 0, 1, 1], [], []>} : vector<1024x128xbf16>, vector<128x128xbf16>, vector<1024x128xf32> -> vector<1024x128xf32>
    %45 = arith.addf %42, %44 : vector<1024x128xf32>
    %c0_36 = arith.constant 0 : index
    %c0_37 = arith.constant 0 : index
    %46 = vector.load %arg17[%c0_36, %c0_37] : memref<1x128xf32, #tpu.memory_space<vmem>>, vector<1x128xf32>
    %47 = vector.broadcast %46 : vector<1x128xf32> to vector<1024x128xf32>
    %48 = arith.addf %45, %47 : vector<1024x128xf32>
    %cst_38 = arith.constant 0.000000e+00 : f32
    %49 = vector.broadcast %cst_38 : f32 to vector<1024x128xf32>
    %50 = arith.maximumf %48, %49 : vector<1024x128xf32>
    %51 = arith.truncf %50 : vector<1024x128xf32> to vector<1024x128xbf16>
    %c0_39 = arith.constant 0 : index
    %c0_40 = arith.constant 0 : index
    %52 = vector.load %arg9[%c0_39, %c0_40] : memref<128x128xbf16, #tpu.memory_space<vmem>>, vector<128x128xbf16>
    %cst_41 = arith.constant dense<0.000000e+00> : vector<1024x128xf32>
    %53 = tpu.matmul %51, %52, %cst_41 {dimension_numbers = #tpu.dot_dimension_numbers<[1], [0], [0], [1], [0, 0, 1, 1], [], []>} : vector<1024x128xbf16>, vector<128x128xbf16>, vector<1024x128xf32> -> vector<1024x128xf32>
    %c0_42 = arith.constant 0 : index
    %c0_43 = arith.constant 0 : index
    %54 = vector.load %arg18[%c0_42, %c0_43] : memref<1x128xf32, #tpu.memory_space<vmem>>, vector<1x128xf32>
    %55 = vector.broadcast %54 : vector<1x128xf32> to vector<1024x128xf32>
    %56 = arith.addf %53, %55 : vector<1024x128xf32>
    %cst_44 = arith.constant 0.000000e+00 : f32
    %57 = vector.broadcast %cst_44 : f32 to vector<1024x128xf32>
    %58 = arith.maximumf %56, %57 : vector<1024x128xf32>
    %59 = arith.truncf %58 : vector<1024x128xf32> to vector<1024x128xbf16>
    %c0_45 = arith.constant 0 : index
    %c0_46 = arith.constant 0 : index
    %60 = vector.load %arg10[%c0_45, %c0_46] : memref<128x128xbf16, #tpu.memory_space<vmem>>, vector<128x128xbf16>
    %cst_47 = arith.constant dense<0.000000e+00> : vector<1024x128xf32>
    %61 = tpu.matmul %59, %60, %cst_47 {dimension_numbers = #tpu.dot_dimension_numbers<[1], [0], [0], [1], [0, 0, 1, 1], [], []>} : vector<1024x128xbf16>, vector<128x128xbf16>, vector<1024x128xf32> -> vector<1024x128xf32>
    %c0_48 = arith.constant 0 : index
    %c0_49 = arith.constant 0 : index
    %62 = vector.load %arg19[%c0_48, %c0_49] : memref<1x128xf32, #tpu.memory_space<vmem>>, vector<1x128xf32>
    %63 = vector.broadcast %62 : vector<1x128xf32> to vector<1024x128xf32>
    %64 = arith.addf %61, %63 : vector<1024x128xf32>
    %cst_50 = arith.constant 0.000000e+00 : f32
    %65 = vector.broadcast %cst_50 : f32 to vector<1024x128xf32>
    %66 = arith.maximumf %64, %65 : vector<1024x128xf32>
    %67 = arith.truncf %66 : vector<1024x128xf32> to vector<1024x128xbf16>
    %c0_51 = arith.constant 0 : index
    %c0_52 = arith.constant 0 : index
    %68 = vector.load %arg11[%c0_51, %c0_52] : memref<128x8xbf16, #tpu.memory_space<vmem>>, vector<128x8xbf16>
    %cst_53 = arith.constant dense<0.000000e+00> : vector<1024x8xf32>
    %69 = tpu.matmul %67, %68, %cst_53 {dimension_numbers = #tpu.dot_dimension_numbers<[1], [0], [0], [1], [0, 0, 1, 1], [], []>} : vector<1024x128xbf16>, vector<128x8xbf16>, vector<1024x8xf32> -> vector<1024x8xf32>
    %c0_54 = arith.constant 0 : index
    %c0_55 = arith.constant 0 : index
    %70 = vector.load %arg20[%c0_54, %c0_55] : memref<1x8xf32, #tpu.memory_space<vmem>>, vector<1x8xf32>
    %71 = vector.broadcast %70 : vector<1x8xf32> to vector<1024x8xf32>
    %72 = arith.addf %69, %71 : vector<1024x8xf32>
    %c0_56 = arith.constant 0 : index
    %c0_57 = arith.constant 0 : index
    %73 = vector.load %arg21[%c0_56, %c0_57] : memref<1024x8xf32, #tpu.memory_space<vmem>>, vector<1024x8xf32>
    tpu.vector_store %arg21[%c0_56, %c0_57], %72 {strides = array<i32>} : memref<1024x8xf32, #tpu.memory_space<vmem>>, vector<1024x8xf32>,
    return
  }
  func.func @transform_0(%arg0: i32) -> (i32, i32) {
    %c0_i32 = arith.constant 0 : i32
    %c0_i32_0 = arith.constant 0 : i32
    return %arg0, %c0_i32 : i32, i32
  }
  func.func @transform_1(%arg0: i32) -> (i32, i32) {
    %c0_i32 = arith.constant 0 : i32
    %c0_i32_0 = arith.constant 0 : i32
    %c0_i32_1 = arith.constant 0 : i32
    return %c0_i32, %c0_i32_0 : i32, i32
  }
  func.func @transform_2(%arg0: i32) -> (i32, i32) {
    %c0_i32 = arith.constant 0 : i32
    %c0_i32_0 = arith.constant 0 : i32
    %c0_i32_1 = arith.constant 0 : i32
    return %c0_i32, %c0_i32_0 : i32, i32
  }
  func.func @transform_3(%arg0: i32) -> (i32, i32) {
    %c0_i32 = arith.constant 0 : i32
    %c0_i32_0 = arith.constant 0 : i32
    %c0_i32_1 = arith.constant 0 : i32
    return %c0_i32, %c0_i32_0 : i32, i32
  }
  func.func @transform_4(%arg0: i32) -> (i32, i32) {
    %c0_i32 = arith.constant 0 : i32
    %c0_i32_0 = arith.constant 0 : i32
    %c0_i32_1 = arith.constant 0 : i32
    return %c0_i32, %c0_i32_0 : i32, i32
  }
  func.func @transform_5(%arg0: i32) -> (i32, i32) {
    %c0_i32 = arith.constant 0 : i32
    %c0_i32_0 = arith.constant 0 : i32
    %c0_i32_1 = arith.constant 0 : i32
    return %c0_i32, %c0_i32_0 : i32, i32
  }
  func.func @transform_6(%arg0: i32) -> (i32, i32) {
    %c0_i32 = arith.constant 0 : i32
    %c0_i32_0 = arith.constant 0 : i32
    %c0_i32_1 = arith.constant 0 : i32
    return %c0_i32, %c0_i32_0 : i32, i32
  }
  func.func @transform_7(%arg0: i32) -> (i32, i32) {
    %c0_i32 = arith.constant 0 : i32
    %c0_i32_0 = arith.constant 0 : i32
    %c0_i32_1 = arith.constant 0 : i32
    return %c0_i32, %c0_i32_0 : i32, i32
  }
  func.func @transform_8(%arg0: i32) -> (i32, i32) {
    %c0_i32 = arith.constant 0 : i32
    %c0_i32_0 = arith.constant 0 : i32
    %c0_i32_1 = arith.constant 0 : i32
    return %c0_i32, %c0_i32_0 : i32, i32
  }
  func.func @transform_9(%arg0: i32) -> (i32, i32) {
    %c0_i32 = arith.constant 0 : i32
    %c0_i32_0 = arith.constant 0 : i32
    %c0_i32_1 = arith.constant 0 : i32
    return %c0_i32, %c0_i32_0 : i32, i32
  }
  func.func @transform_10(%arg0: i32) -> (i32, i32) {
    %c0_i32 = arith.constant 0 : i32
    %c0_i32_0 = arith.constant 0 : i32
    %c0_i32_1 = arith.constant 0 : i32
    return %c0_i32, %c0_i32_0 : i32, i32
  }
  func.func @transform_11(%arg0: i32) -> (i32, i32) {
    %c0_i32 = arith.constant 0 : i32
    %c0_i32_0 = arith.constant 0 : i32
    %c0_i32_1 = arith.constant 0 : i32
    return %c0_i32, %c0_i32_0 : i32, i32
  }
  func.func @transform_12(%arg0: i32) -> (i32, i32) {
    %c0_i32 = arith.constant 0 : i32
    %c0_i32_0 = arith.constant 0 : i32
    %c0_i32_1 = arith.constant 0 : i32
    return %c0_i32, %c0_i32_0 : i32, i32
  }
  func.func @transform_13(%arg0: i32) -> (i32, i32) {
    %c0_i32 = arith.constant 0 : i32
    %c0_i32_0 = arith.constant 0 : i32
    %c0_i32_1 = arith.constant 0 : i32
    return %c0_i32, %c0_i32_0 : i32, i32
  }
  func.func @transform_14(%arg0: i32) -> (i32, i32) {
    %c0_i32 = arith.constant 0 : i32
    %c0_i32_0 = arith.constant 0 : i32
    %c0_i32_1 = arith.constant 0 : i32
    return %c0_i32, %c0_i32_0 : i32, i32
  }
  func.func @transform_15(%arg0: i32) -> (i32, i32) {
    %c0_i32 = arith.constant 0 : i32
    %c0_i32_0 = arith.constant 0 : i32
    %c0_i32_1 = arith.constant 0 : i32
    return %c0_i32, %c0_i32_0 : i32, i32
  }
  func.func @transform_16(%arg0: i32) -> (i32, i32) {
    %c0_i32 = arith.constant 0 : i32
    %c0_i32_0 = arith.constant 0 : i32
    %c0_i32_1 = arith.constant 0 : i32
    return %c0_i32, %c0_i32_0 : i32, i32
  }
  func.func @transform_17(%arg0: i32) -> (i32, i32) {
    %c0_i32 = arith.constant 0 : i32
    %c0_i32_0 = arith.constant 0 : i32
    %c0_i32_1 = arith.constant 0 : i32
    return %c0_i32, %c0_i32_0 : i32, i32
  }
  func.func @transform_18(%arg0: i32) -> (i32, i32) {
    %c0_i32 = arith.constant 0 : i32
    %c0_i32_0 = arith.constant 0 : i32
    %c0_i32_1 = arith.constant 0 : i32
    return %c0_i32, %c0_i32_0 : i32, i32
  }
  func.func @transform_19(%arg0: i32) -> (i32, i32) {
    %c0_i32 = arith.constant 0 : i32
    %c0_i32_0 = arith.constant 0 : i32
    %c0_i32_1 = arith.constant 0 : i32
    return %c0_i32, %c0_i32_0 : i32, i32
  }
  func.func @transform_20(%arg0: i32) -> (i32, i32) {
    %c0_i32 = arith.constant 0 : i32
    %c0_i32_0 = arith.constant 0 : i32
    return %arg0, %c0_i32 : i32, i32
  }
}

</mosaic_0001>

<bundles_post_ra>
// kernel: tpu_custom_call.1
= control target key start
LH: loop header
LB: loop body
LE: loop exit
PB: predicated region body
PF: predicated region fallthrough
CT: control target
= control target key end

     0   :  { %s14227_s0 = inlined_call_operand.vmem [shape: bf16[2048,27], index: 0, kind: input, shape index: {}]   ;;  %s14228_s1 = inlined_call_operand.vmem [shape: bf16[27,128], index: 1, kind: input, shape index: {}]   ;;  %s14229_s2 = inlined_call_operand.vmem [shape: bf16[128,128], index: 2, kind: input, shape index: {}]   ;;  %s14230_s3 = inlined_call_operand.vmem [shape: bf16[128,128], index: 3, kind: input, shape index: {}]   ;;  %s14231_s4 = inlined_call_operand.vmem [shape: bf16[128,128], index: 4, kind: input, shape index: {}]   ;;  %s14232_s5 = inlined_call_operand.vmem [shape: bf16[128,128], index: 5, kind: input, shape index: {}]   ;;  %s14233_s6 = inlined_call_operand.vmem [shape: bf16[27,128], index: 6, kind: input, shape index: {}]   ;;  %s14234_s7 = inlined_call_operand.vmem [shape: bf16[128,128], index: 7, kind: input, shape index: {}]   ;;  %s14235_s8 = inlined_call_operand.vmem [shape: bf16[128,128], index: 8, kind: input, shape index: {}]   ;;  %s14236_s9 = inlined_call_operand.vmem [shape: bf16[128,128], index: 9, kind: input, shape index: {}]   ;;  %s14237_s10 = inlined_call_operand.vmem [shape: bf16[128,8], index: 10, kind: input, shape index: {}]   ;;  %s14238_s11 = inlined_call_operand.vmem [shape: f32[1,128], index: 11, kind: input, shape index: {}]   ;;  %s14239_s12 = inlined_call_operand.vmem [shape: f32[1,128], index: 12, kind: input, shape index: {}]   ;;  %s14240_s13 = inlined_call_operand.vmem [shape: f32[1,128], index: 13, kind: input, shape index: {}]   ;;  %s14241_s14 = inlined_call_operand.vmem [shape: f32[1,128], index: 14, kind: input, shape index: {}]   ;;  %s14242_s15 = inlined_call_operand.vmem [shape: f32[1,128], index: 15, kind: input, shape index: {}]   ;;  %s14243_s16 = inlined_call_operand.vmem [shape: f32[1,128], index: 16, kind: input, shape index: {}]   ;;  %s14244_s17 = inlined_call_operand.vmem [shape: f32[1,128], index: 17, kind: input, shape index: {}]   ;;  %s14245_s18 = inlined_call_operand.vmem [shape: f32[1,128], index: 18, kind: input, shape index: {}]   ;;  %s14246_s19 = inlined_call_operand.vmem [shape: f32[1,8], index: 19, kind: input, shape index: {}]   ;;  %s14247_s20 = inlined_call_operand.vmem [shape: f32[2048,8], index: 20, kind: output, shape index: {}]  }
   0x1   :  { %14252 = sst [smem:[#allocation2_spill]] %s14227_s0 }
   0x2   :  { %14253 = sst [smem:[#allocation3_spill]] %s14228_s1  ;;  %s12064_s1 = smov 0  }
   0x3   :  { %14254 = sst [smem:[#allocation4_spill]] %s14229_s2 }
   0x4   :  { %14255 = sst [smem:[#allocation5_spill]] %s14230_s3 }
   0x5   :  { %14256 = sst [smem:[#allocation6_spill]] %s14231_s4 }
   0x6 LB: > { %s9189_s22 = sadd.s32 4294967295, %s11956_s1   ;;  %p9193_p0 = scmp.ge.s32.totalorder %s11956_s1, 1  ;;  %s11956_s1 = sphi %s12064_s1, %s30_s1  }
   0x7   : > { %p563_p1 = scmp.lt.s32.totalorder %s11956_s1, 3 }
   0x9   : > { %p564_p2 = pnand %p9193_p0, %p563_p1 }
   0xa   : > { %s14257_s2 = sld [smem:[#allocation3_spill]] (!%p564_p2)  ;;  %vm1297_vm0 = vcmask (!%p564_p2), 1044480   ;;  %vm1298_vm1 = vcmask (!%p564_p2), 1045504   ;;  %s9194_s26 = sshll.u32 (!%p564_p2), %s9189_s22, 7  ;;  %v11958_v2 = vmov (!%p564_p2), 65535   ;;  %vm1104_vm2 = vcmask (!%p564_p2), 220160  }
   0xb   : > { %567 = sbr.rel (%p564_p2) target bundleno = 2557 (0x9fd), region = 100  ;;  %v1299_v3 = vsel (!%p564_p2), %vm1297_vm0, 4294967295, %v11958_v2  ;;  %p622_p3 = scmp.lt.s32.totalorder (!%p564_p2), %s9194_s26, 255  ;;  %vm9004_vm3 = vcmask (!%p564_p2), 64512  }
   0xc   : > { %v12078_v4 = vsel (!%p564_p2), %vm1298_vm1, %v1299_v3, 0  ;;  %s14258_s29 = sld [smem:[#allocation2_spill]] (!%p564_p2)  ;;  %s14259_s22 = sld [smem:[#allocation5_spill]] (!%p564_p2) }
   0xd   : > { %s14260_s25 = sld [smem:[#allocation4_spill]] (!%p564_p2)  ;;  %s14261_s4 = sld [smem:[#allocation6_spill]] (!%p564_p2) }
  0x10   : > { %v11746_v0 = vld [vmem:[%s14257_s2] sm:$0xff] (!%p564_p2)   ;;  %v11747_v1 = vld [vmem:[%s14257_s2 + $0x8] sm:$0x3f] (!%p564_p2)  }
  0x11   : > { %10177 = vmatprep.subr.bf16.mxu0 (!%p564_p2), %v11746_v0  ;;  %v1302_v5 = vand.u32 (!%p564_p2), %v11747_v1, %v12078_v4 }
  0x12   : > { %10178 = vmatpush3.bf16.msra.mxu0 %v11746_v0  ;;  %s14263_s26 = smov (!%p622_p3, %s9194_s26), 255  ;;  %v11796_v23 = vld [vmem:[%s14259_s22] sm:$0xff]   ;;  %v11813_v42 = vld [vmem:[%s14259_s22 + $0x8] sm:$0xff]   ;;  %v11822_v51 = vld [vmem:[%s14259_s22 + $0x10] sm:$0xff]  }
  0x13   : > { %10179 = vmatprep.subr.bf16.mxu0 %v1302_v5  ;;  %s9195_s27 = sshll.u32 %s14263_s26, 2  ;;  %v11797_v24 = vld [vmem:[%s14260_s25] sm:$0xff]   ;;  %v11800_v27 = vld [vmem:[%s14260_s25 + $0x8] sm:$0xff]   ;;  %v11801_v28 = vld [vmem:[%s14260_s25 + $0x10] sm:$0xff]   ;;  %s9197_s24 = sshll.u32 %s14263_s26, 3 }
  0x14   : > { %s12087_s30 = scalar_lea.vmem %s14258_s29, %s9195_s27  ;;  %10309 = vmatprep.subr.bf16.mxu1 %v11797_v24  ;;  %v11804_v31 = vld [vmem:[%s14260_s25 + $0x18] sm:$0xff]   ;;  %v11805_v32 = vld [vmem:[%s14260_s25 + $0x20] sm:$0xff]   ;;  %v11808_v35 = vld [vmem:[%s14260_s25 + $0x28] sm:$0xff]   ;;  %s13831_s0 = scalar_lea.vmem %s14247_s20, %s9197_s24 }
  0x15   : > { %v11748_v6 = vld [vmem:[%s12087_s30] sm:$0xff]   ;;  %v11749_v7 = vld [vmem:[%s12087_s30 + $0x8] sm:$0xff]   ;;  %v11750_v8 = vld [vmem:[%s12087_s30 + $0x10] sm:$0xff]   ;;  %10310 = vmatpush3.bf16.msra.mxu1 %v11797_v24 }
  0x16   : > { %10180 = vmatpush3.bf16.msra.mxu0 %v1302_v5  ;;  %10181 = vmatprep.mubr.msk.bf16.mxu0 %vm1104_vm2, %v11748_v6  ;;  %v11751_v9 = vld [vmem:[%s12087_s30 + $0x18] sm:$0xff]   ;;  %v11752_v10 = vld [vmem:[%s12087_s30 + $0x20] sm:$0xff]   ;;  %v11753_v11 = vld [vmem:[%s12087_s30 + $0x28] sm:$0xff]  }
  0x17   : > { %v11754_v12 = vld [vmem:[%s12087_s30 + $0x30] sm:$0xff]   ;;  %v11755_v13 = vld [vmem:[%s12087_s30 + $0x38] sm:$0xff]   ;;  %v11756_v14 = vld [vmem:[%s12087_s30 + $0x40] sm:$0xff]   ;;  %10453 = vmatprep.subr.bf16.mxu0 %v11796_v23  ;;  %10311 = vmatprep.subr.bf16.mxu1 %v11800_v27 }
  0x18   : > { %v11757_v15 = vld [vmem:[%s12087_s30 + $0x48] sm:$0xff]   ;;  %v11758_v16 = vld [vmem:[%s12087_s30 + $0x50] sm:$0xff]   ;;  %v11759_v17 = vld [vmem:[%s12087_s30 + $0x58] sm:$0xff]  }
  0x19   : > { %10182 = vmatmul.mubr.msk.bf16.vlgmr.msra.gmra.mrb[0].mxu0 %vm1104_vm2, %v11749_v7  ;;  %v11760_v18 = vld [vmem:[%s12087_s30 + $0x60] sm:$0xff]   ;;  %v11761_v19 = vld [vmem:[%s12087_s30 + $0x68] sm:$0xff]   ;;  %v11762_v20 = vld [vmem:[%s12087_s30 + $0x70] sm:$0xff]   ;;  %10312 = vmatpush3.bf16.msra.mxu1 %v11800_v27 }
  0x1a   : > { %10185 = vmatprep.mubr.msk.bf16.mxu0 %vm1104_vm2, %v11750_v8  ;;  %v11763_v21 = vld [vmem:[%s12087_s30 + $0x78] sm:$0xff]   ;;  %v11764_v22 = vld [vmem:[%s12087_s30 + $0x80] sm:$0xff]   ;;  %v11765_v25 = vld [vmem:[%s12087_s30 + $0x88] sm:$0xff]   ;;  %10454 = vmatpush3.bf16.msra.mxu0 %v11796_v23 }
  0x1b   : > { %v11766_v26 = vld [vmem:[%s12087_s30 + $0x90] sm:$0xff]   ;;  %v11767_v29 = vld [vmem:[%s12087_s30 + $0x98] sm:$0xff]   ;;  %v11768_v30 = vld [vmem:[%s12087_s30 + $0xa0] sm:$0xff]   ;;  %10313 = vmatprep.subr.bf16.mxu1 %v11801_v28  ;;  %10455 = vmatprep.subr.bf16.mxu0 %v11813_v42 }
  0x1c   : > { %v11769_v33 = vld [vmem:[%s12087_s30 + $0xa8] sm:$0xff]   ;;  %v11770_v34 = vld [vmem:[%s12087_s30 + $0xb0] sm:$0xff]   ;;  %v11771_v36 = vld [vmem:[%s12087_s30 + $0xb8] sm:$0xff]  }
  0x1d   : > { %10314 = vmatpush3.bf16.msra.mxu1 %v11801_v28  ;;  %v11809_v37 = vld [vmem:[%s14260_s25 + $0x30] sm:$0xff]   ;;  %v11772_v38 = vld [vmem:[%s12087_s30 + $0xc0] sm:$0xff]   ;;  %v11812_v39 = vld [vmem:[%s14260_s25 + $0x38] sm:$0xff]  }
  0x1e   : > { %10315 = vmatprep.subr.bf16.mxu1 %v11804_v31  ;;  %v11773_v40 = vld [vmem:[%s12087_s30 + $0xc8] sm:$0xff]   ;;  %v11774_v41 = vld [vmem:[%s12087_s30 + $0xd0] sm:$0xff]   ;;  %10456 = vmatpush3.bf16.msra.mxu0 %v11813_v42  ;;  %v11775_v43 = vld [vmem:[%s12087_s30 + $0xd8] sm:$0xff]  }
  0x1f   : > { %v11776_v44 = vld [vmem:[%s12087_s30 + $0xe0] sm:$0xff]   ;;  %v11777_v45 = vld [vmem:[%s12087_s30 + $0xe8] sm:$0xff]   ;;  %v11778_v46 = vld [vmem:[%s12087_s30 + $0xf0] sm:$0xff]   ;;  %10457 = vmatprep.subr.bf16.mxu0 %v11822_v51 }
  0x20   : > { %v11779_v47 = vld [vmem:[%s12087_s30 + $0xf8] sm:$0xff]   ;;  %v11780_v48 = vld [vmem:[%s12087_s30 + $0x100] sm:$0xff]   ;;  %v11781_v49 = vld [vmem:[%s12087_s30 + $0x108] sm:$0xff]  }
  0x21   : > { %10186 = vmatmul.mubr.msk.bf16.gmra.mrb[4].mxu0 %vm1104_vm2, %v11751_v9  ;;  %10316 = vmatpush3.bf16.msra.mxu1 %v11804_v31  ;;  %v11782_v50 = vld [vmem:[%s12087_s30 + $0x110] sm:$0xff]   ;;  %v11783_v52 = vld [vmem:[%s12087_s30 + $0x118] sm:$0xff]   ;;  %v11784_v53 = vld [vmem:[%s12087_s30 + $0x120] sm:$0xff]  }
  0x22   : > { %10189 = vmatprep.mubr.msk.bf16.mxu0 %vm1104_vm2, %v11752_v10  ;;  %10317 = vmatprep.subr.bf16.mxu1 %v11805_v32  ;;  %v11785_v54 = vld [vmem:[%s12087_s30 + $0x128] sm:$0xff]   ;;  %v11786_v55 = vld [vmem:[%s12087_s30 + $0x130] sm:$0xff]   ;;  %v11787_v56 = vld [vmem:[%s12087_s30 + $0x138] sm:$0xff]  }
  0x23   : > { %10458 = vmatpush3.bf16.msra.mxu0 %v11822_v51  ;;  %v11788_v57 = vld [vmem:[%s12087_s30 + $0x140] sm:$0xff]   ;;  %v11789_v58 = vld [vmem:[%s12087_s30 + $0x148] sm:$0xff]   ;;  %v11790_v59 = vld [vmem:[%s12087_s30 + $0x150] sm:$0xff]  }
  0x24   : > { %v11823_v60 = vld [vmem:[%s14259_s22 + $0x18] sm:$0xff]   ;;  %v11792_v62 = vld [vmem:[%s12087_s30 + $0x160] sm:$0xff]   ;;  %v11793_v63 = vld [vmem:[%s12087_s30 + $0x168] sm:$0xff]  }
  0x25   : > { %10318 = vmatpush3.bf16.msra.mxu1 %v11805_v32  ;;  %10459 = vmatprep.subr.bf16.mxu0 %v11823_v60  ;;  %v11791_v61 = vld [vmem:[%s12087_s30 + $0x158] sm:$0xff]   ;;  %v11794_v0 = vld [vmem:[%s12087_s30 + $0x170] sm:$0xff]   ;;  %v11798_v2 = vld [vmem:[%s12087_s30 + $0x180] sm:$0xff]  }
  0x26   : > { %10319 = vmatprep.subr.bf16.mxu1 %v11808_v35  ;;  %v11795_v1 = vld [vmem:[%s12087_s30 + $0x178] sm:$0xff]   ;;  %v11799_v3 = vld [vmem:[%s12087_s30 + $0x188] sm:$0xff]   ;;  %v11802_v5 = vld [vmem:[%s12087_s30 + $0x190] sm:$0xff]  }
  0x27   : > { %10460 = vmatpush3.bf16.msra.mxu0 %v11823_v60  ;;  %v11824_v6 = vld [vmem:[%s14259_s22 + $0x20] sm:$0xff]   ;;  %v11803_v7 = vld [vmem:[%s12087_s30 + $0x198] sm:$0xff]   ;;  %v11807_v9 = vld [vmem:[%s12087_s30 + $0x1a8] sm:$0xff]  }
  0x28   : > { %10461 = vmatprep.subr.bf16.mxu0 %v11824_v6  ;;  %v11806_v8 = vld [vmem:[%s12087_s30 + $0x1a0] sm:$0xff]   ;;  %v11810_v10 = vld [vmem:[%s12087_s30 + $0x1b0] sm:$0xff]   ;;  %v11815_v31 = vld [vmem:[%s12087_s30 + $0x1c8] sm:$0xff]  }
  0x29   : > { %10190 = vmatmul.mubr.msk.bf16.gmra.mrb[8].mxu0 %vm1104_vm2, %v11753_v11  ;;  %10320 = vmatpush3.bf16.msra.mxu1 %v11808_v35  ;;  %v12240_v11 = vld [vmem:[%s14238_s11] ss:$0 sm:$0xff] }
  0x2a   : > { %10193 = vmatprep.mubr.msk.bf16.mxu0 %vm1104_vm2, %v11754_v12  ;;  %10321 = vmatprep.subr.bf16.mxu1 %v11809_v37  ;;  %v11818_v51 = vld [vmem:[%s12087_s30 + $0x1e0] sm:$0xff]  }
  0x2b   : > { %10462 = vmatpush3.bf16.msra.mxu0 %v11824_v6 }
  0x2d   : > { %10322 = vmatpush3.bf16.msra.mxu1 %v11809_v37  ;;  %v11825_v37 = vld [vmem:[%s14259_s22 + $0x28] sm:$0xff]  }
  0x2e   : > { %10323 = vmatprep.subr.bf16.mxu1 %v11812_v39  ;;  %10463 = vmatprep.subr.bf16.mxu0 %v11825_v37 }
  0x2f   : > { %10464 = vmatpush3.bf16.msra.mxu0 %v11825_v37  ;;  %v11826_v37 = vld [vmem:[%s14259_s22 + $0x30] sm:$0xff]  }
  0x30   : > { %10465 = vmatprep.subr.bf16.mxu0 %v11826_v37 }
  0x31   : > { %10194 = vmatmul.mubr.msk.bf16.gmra.mrb[12].mxu0 %vm1104_vm2, %v11755_v13  ;;  %10324 = vmatpush3.bf16.msra.mxu1 %v11812_v39 }
  0x32   : > { %10197 = vmatprep.mubr.msk.bf16.mxu0 %vm1104_vm2, %v11756_v14 }
  0x33   : > { %10466 = vmatpush3.bf16.msra.mxu0 %v11826_v37 }
  0x39   : > { %10198 = vmatmul.mubr.msk.bf16.gmra.mrb[16].mxu0 %vm1104_vm2, %v11757_v15  ;;  %v11811_v15 = vld [vmem:[%s12087_s30 + $0x1b8] sm:$0xff]  }
  0x3a   : > { %10201 = vmatprep.mubr.msk.bf16.mxu0 %vm1104_vm2, %v11758_v16 }
  0x41   : > { %10202 = vmatmul.mubr.msk.bf16.gmra.mrb[20].mxu0 %vm1104_vm2, %v11759_v17 }
  0x42   : > { %10205 = vmatprep.mubr.msk.bf16.mxu0 %vm1104_vm2, %v11760_v18  ;;  %v11814_v18 = vld [vmem:[%s12087_s30 + $0x1c0] sm:$0xff]  }
  0x49   : > { %10206 = vmatmul.mubr.msk.bf16.gmra.mrb[24].mxu0 %vm1104_vm2, %v11761_v19 }
  0x4a   : > { %10209 = vmatprep.mubr.msk.bf16.mxu0 %vm1104_vm2, %v11762_v20 }
  0x51   : > { %10210 = vmatmul.mubr.msk.bf16.gmra.mrb[28].mxu0 %vm1104_vm2, %v11763_v21 }
  0x52   : > { %10213 = vmatprep.mubr.msk.bf16.mxu0 %vm1104_vm2, %v11764_v22 }
  0x59   : > { %10214 = vmatmul.mubr.msk.bf16.gmra.mrb[32].mxu0 %vm1104_vm2, %v11765_v25 }
  0x5a   : > { %10217 = vmatprep.mubr.msk.bf16.mxu0 %vm1104_vm2, %v11766_v26 }
  0x61   : > { %10218 = vmatmul.mubr.msk.bf16.gmra.mrb[36].mxu0 %vm1104_vm2, %v11767_v29 }
  0x62   : > { %10221 = vmatprep.mubr.msk.bf16.mxu0 %vm1104_vm2, %v11768_v30 }
  0x69   : > { %10222 = vmatmul.mubr.msk.bf16.gmra.mrb[40].mxu0 %vm1104_vm2, %v11769_v33 }
  0x6a   : > { %10225 = vmatprep.mubr.msk.bf16.mxu0 %vm1104_vm2, %v11770_v34  ;;  %v11816_v34 = vld [vmem:[%s12087_s30 + $0x1d0] sm:$0xff]  }
  0x71   : > { %10226 = vmatmul.mubr.msk.bf16.gmra.mrb[44].mxu0 %vm1104_vm2, %v11771_v36 }
  0x72   : > { %10229 = vmatprep.mubr.msk.bf16.mxu0 %vm1104_vm2, %v11772_v38 }
  0x79   : > { %10230 = vmatmul.mubr.msk.bf16.gmra.mrb[48].mxu0 %vm1104_vm2, %v11773_v40 }
  0x7a   : > { %10233 = vmatprep.mubr.msk.bf16.mxu0 %vm1104_vm2, %v11774_v41 }
  0x81   : > { %10234 = vmatmul.mubr.msk.bf16.gmra.mrb[52].mxu0 %vm1104_vm2, %v11775_v43 }
  0x82   : > { %10237 = vmatprep.mubr.msk.bf16.mxu0 %vm1104_vm2, %v11776_v44 }
  0x89   : > { %10238 = vmatmul.mubr.msk.bf16.gmra.mrb[56].mxu0 %vm1104_vm2, %v11777_v45 }
  0x8a   : > { %10241 = vmatprep.mubr.msk.bf16.mxu0 %vm1104_vm2, %v11778_v46 }
  0x91   : > { %10242 = vmatmul.mubr.msk.bf16.gmra.mrb[60].mxu0 %vm1104_vm2, %v11779_v47 }
  0x92   : > { %10245 = vmatprep.mubr.msk.bf16.mxu0 %vm1104_vm2, %v11780_v48  ;;  %v11817_v48 = vld [vmem:[%s12087_s30 + $0x1d8] sm:$0xff]  }
  0x99   : > { %10246 = vmatmul.mubr.msk.bf16.gmra.mrb[64].mxu0 %vm1104_vm2, %v11781_v49 }
  0x9a   : > { %10249 = vmatprep.mubr.msk.bf16.mxu0 %vm1104_vm2, %v11782_v50 }
  0xa1   : > { %10250 = vmatmul.mubr.msk.bf16.gmra.mrb[68].mxu0 %vm1104_vm2, %v11783_v52 }
  0xa2   : > { %10253 = vmatprep.mubr.msk.bf16.mxu0 %vm1104_vm2, %v11784_v53 }
  0xa9   : > { %10254 = vmatmul.mubr.msk.bf16.gmra.mrb[72].mxu0 %vm1104_vm2, %v11785_v54 }
  0xaa   : > { %10257 = vmatprep.mubr.msk.bf16.mxu0 %vm1104_vm2, %v11786_v55 }
  0xb1   : > { %10258 = vmatmul.mubr.msk.bf16.gmra.mrb[76].mxu0 %vm1104_vm2, %v11787_v56 }
  0xb2   : > { %10261 = vmatprep.mubr.msk.bf16.mxu0 %vm1104_vm2, %v11788_v57 }
  0xb9   : > { %10262 = vmatmul.mubr.msk.bf16.gmra.mrb[80].mxu0 %vm1104_vm2, %v11789_v58 }
  0xba   : > { %10265 = vmatprep.mubr.msk.bf16.mxu0 %vm1104_vm2, %v11790_v59 }
  0xc1   : > { %10266 = vmatmul.mubr.msk.bf16.gmra.mrb[84].mxu0 %vm1104_vm2, %v11791_v61 }
  0xc2   : > { %10269 = vmatprep.mubr.msk.bf16.mxu0 %vm1104_vm2, %v11792_v62 }
  0xc9   : > { %10270 = vmatmul.mubr.msk.bf16.gmra.mrb[88].mxu0 %vm1104_vm2, %v11793_v63 }
  0xca   : > { %10273 = vmatprep.mubr.msk.bf16.mxu0 %vm1104_vm2, %v11794_v0  ;;  %v11819_v0 = vld [vmem:[%s12087_s30 + $0x1e8] sm:$0xff]  }
  0xd1   : > { %10274 = vmatmul.mubr.msk.bf16.gmra.mrb[92].mxu0 %vm1104_vm2, %v11795_v1 }
  0xd2   : > { %10277 = vmatprep.mubr.msk.bf16.mxu0 %vm1104_vm2, %v11798_v2 }
  0xd9   : > { %10278 = vmatmul.mubr.msk.bf16.gmra.mrb[96].mxu0 %vm1104_vm2, %v11799_v3  ;;  %v11820_v3 = vld [vmem:[%s12087_s30 + $0x1f0] sm:$0xff]  }
  0xda   : > { %10281 = vmatprep.mubr.msk.bf16.mxu0 %vm1104_vm2, %v11802_v5 }
  0xe1   : > { %10282 = vmatmul.mubr.msk.bf16.gmra.mrb[100].mxu0 %vm1104_vm2, %v11803_v7 }
  0xe2   : > { %10285 = vmatprep.mubr.msk.bf16.mxu0 %vm1104_vm2, %v11806_v8 }
  0xe9   : > { %10286 = vmatmul.mubr.msk.bf16.gmra.mrb[104].mxu0 %vm1104_vm2, %v11807_v9 }
  0xea   : > { %10289 = vmatprep.mubr.msk.bf16.mxu0 %vm1104_vm2, %v11810_v10 }
  0xec   : > { %v10183_v12 = vpop.f32.mrb[0].mxu0 }
  0xed   : > { %v1347_v13 = vadd.f32 %v10183_v12, %v12240_v11  ;;  %v1338_v14 = vpop.f32.mrb[1].mxu0 }
  0xee   : > { %v10184_v16 = vpop.f32.mrb[2].mxu0  ;;  %v1339_v17 = vadd.f32 %v12240_v11, %v1338_v14 }
  0xef   : > { %v1350_v19 = vadd.f32 %v10184_v16, %v12240_v11  ;;  %v1341_v20 = vpop.f32.mrb[3].mxu0  ;;  %v1851_v22 = vmax.f32 %v1347_v13, 0.0 }
  0xf0   : > { %v1342_v21 = vadd.f32 %v12240_v11, %v1341_v20  ;;  %v1849_v24 = vmax.f32 %v1339_v17, 0.0 }
  0xf1   : > { %v1852_v23 = vmax.f32 %v1350_v19, 0.0  ;;  %10290 = vmatmul.mubr.msk.bf16.gmra.mrb[108].mxu0 %vm1104_vm2, %v11811_v15 }
  0xf2   : > { %v1850_v25 = vmax.f32 %v1342_v21, 0.0  ;;  %10293 = vmatprep.mubr.msk.bf16.mxu0 %vm1104_vm2, %v11814_v18  ;;  %v11821_v18 = vld [vmem:[%s12087_s30 + $0x1f8] sm:$0xff]  }
  0xf3   : > { %v1978_v26 = vpack.c.bf16 %v1852_v23, %v1851_v22 }
  0xf4   : > { %v10187_v27 = vpop.f32.mrb[4].mxu0  ;;  %v1977_v28 = vpack.c.bf16 %v1850_v25, %v1849_v24 }
  0xf5   : > { %v1363_v29 = vadd.f32 %v10187_v27, %v12240_v11  ;;  %v1354_v30 = vpop.f32.mrb[5].mxu0 }
  0xf6   : > { %v1355_v32 = vadd.f32 %v12240_v11, %v1354_v30  ;;  %v10188_v33 = vpop.f32.mrb[6].mxu0  ;;  %10325 = vmatprep.mubr.bf16.mxu1 %v1977_v28 }
  0xf7   : > { %v1366_v35 = vadd.f32 %v10188_v33, %v12240_v11  ;;  %v1357_v36 = vpop.f32.mrb[7].mxu0  ;;  %10326 = vmatmul.mubr.bf16.vlgmr.msra.gmra.mrb[0].mxu1 %v1978_v26  ;;  %v1855_v39 = vmax.f32 %v1363_v29, 0.0 }
  0xf8   : > { %v1358_v38 = vadd.f32 %v12240_v11, %v1357_v36  ;;  %v1853_v41 = vmax.f32 %v1355_v32, 0.0 }
  0xf9   : > { %v1856_v40 = vmax.f32 %v1366_v35, 0.0  ;;  %10294 = vmatmul.mubr.msk.bf16.gmra.mrb[112].mxu0 %vm1104_vm2, %v11815_v31 }
  0xfa   : > { %v1854_v42 = vmax.f32 %v1358_v38, 0.0  ;;  %10297 = vmatprep.mubr.msk.bf16.mxu0 %vm1104_vm2, %v11816_v34 }
  0xfb   : > { %v1980_v43 = vpack.c.bf16 %v1856_v40, %v1855_v39 }
  0xfc   : > { %v10191_v44 = vpop.f32.mrb[8].mxu0  ;;  %v1979_v45 = vpack.c.bf16 %v1854_v42, %v1853_v41 }
  0xfd   : > { %v1379_v46 = vadd.f32 %v10191_v44, %v12240_v11  ;;  %v1370_v47 = vpop.f32.mrb[9].mxu0 }
  0xfe   : > { %v1371_v49 = vadd.f32 %v12240_v11, %v1370_v47  ;;  %v10192_v50 = vpop.f32.mrb[10].mxu0  ;;  %10329 = vmatprep.mubr.bf16.mxu1 %v1979_v45 }
  0xff   : > { %v1382_v52 = vadd.f32 %v10192_v50, %v12240_v11  ;;  %v1373_v53 = vpop.f32.mrb[11].mxu0  ;;  %10330 = vmatmul.mubr.bf16.gmra.mrb[4].mxu1 %v1980_v43  ;;  %v1859_v55 = vmax.f32 %v1379_v46, 0.0 }
 0x100   : > { %v1374_v54 = vadd.f32 %v12240_v11, %v1373_v53  ;;  %v1857_v57 = vmax.f32 %v1371_v49, 0.0 }
 0x101   : > { %v1860_v56 = vmax.f32 %v1382_v52, 0.0  ;;  %10298 = vmatmul.mubr.msk.bf16.gmra.mrb[116].mxu0 %vm1104_vm2, %v11817_v48 }
 0x102   : > { %v1858_v58 = vmax.f32 %v1374_v54, 0.0  ;;  %10301 = vmatprep.mubr.msk.bf16.mxu0 %vm1104_vm2, %v11818_v51 }
 0x103   : > { %v1982_v59 = vpack.c.bf16 %v1860_v56, %v1859_v55 }
 0x104   : > { %v10195_v60 = vpop.f32.mrb[12].mxu0  ;;  %v1981_v61 = vpack.c.bf16 %v1858_v58, %v1857_v57 }
 0x105   : > { %v1395_v62 = vadd.f32 %v10195_v60, %v12240_v11  ;;  %v1386_v63 = vpop.f32.mrb[13].mxu0 }
 0x106   : > { %v1387_v1 = vadd.f32 %v12240_v11, %v1386_v63  ;;  %v10196_v2 = vpop.f32.mrb[14].mxu0  ;;  %10333 = vmatprep.mubr.bf16.mxu1 %v1981_v61 }
 0x107   : > { %v1398_v5 = vadd.f32 %v10196_v2, %v12240_v11  ;;  %v1389_v6 = vpop.f32.mrb[15].mxu0  ;;  %10334 = vmatmul.mubr.bf16.gmra.mrb[8].mxu1 %v1982_v59  ;;  %v1863_v8 = vmax.f32 %v1395_v62, 0.0 }
 0x108   : > { %v1390_v7 = vadd.f32 %v12240_v11, %v1389_v6  ;;  %v1861_v10 = vmax.f32 %v1387_v1, 0.0 }
 0x109   : > { %v1864_v9 = vmax.f32 %v1398_v5, 0.0  ;;  %10302 = vmatmul.mubr.msk.bf16.gmra.mrb[120].mxu0 %vm1104_vm2, %v11819_v0 }
 0x10a   : > { %v1862_v12 = vmax.f32 %v1390_v7, 0.0  ;;  %10305 = vmatprep.mubr.msk.bf16.mxu0 %vm1104_vm2, %v11820_v3 }
 0x10b   : > { %v1984_v13 = vpack.c.bf16 %v1864_v9, %v1863_v8 }
 0x10c   : > { %v10199_v14 = vpop.f32.mrb[16].mxu0  ;;  %v1983_v15 = vpack.c.bf16 %v1862_v12, %v1861_v10 }
 0x10d   : > { %v1411_v16 = vadd.f32 %v10199_v14, %v12240_v11  ;;  %v1402_v17 = vpop.f32.mrb[17].mxu0 }
 0x10e   : > { %v1403_v19 = vadd.f32 %v12240_v11, %v1402_v17  ;;  %v10200_v20 = vpop.f32.mrb[18].mxu0  ;;  %10337 = vmatprep.mubr.bf16.mxu1 %v1983_v15 }
 0x10f   : > { %v1414_v21 = vadd.f32 %v10200_v20, %v12240_v11  ;;  %v1405_v22 = vpop.f32.mrb[19].mxu0  ;;  %10338 = vmatmul.mubr.bf16.gmra.mrb[12].mxu1 %v1984_v13  ;;  %v1867_v24 = vmax.f32 %v1411_v16, 0.0 }
 0x110   : > { %v1406_v23 = vadd.f32 %v12240_v11, %v1405_v22  ;;  %v1865_v26 = vmax.f32 %v1403_v19, 0.0 }
 0x111   : > { %v1868_v25 = vmax.f32 %v1414_v21, 0.0  ;;  %10306 = vmatmul.mubr.msk.bf16.gmra.mrb[124].mxu0 %vm1104_vm2, %v11821_v18 }
 0x112   : > { %v1866_v27 = vmax.f32 %v1406_v23, 0.0  ;;  %v11827_v23 = vld [vmem:[%s14261_s4] sm:$0xff]  }
 0x113   : > { %v1986_v28 = vpack.c.bf16 %v1868_v25, %v1867_v24  ;;  %10597 = vmatprep.subr.bf16.mxu1 %v11827_v23 }
 0x114   : > { %v10203_v29 = vpop.f32.mrb[20].mxu0  ;;  %v1985_v30 = vpack.c.bf16 %v1866_v27, %v1865_v26  ;;  %10598 = vmatpush3.bf16.msra.mxu1 %v11827_v23 }
 0x115   : > { %v1427_v31 = vadd.f32 %v10203_v29, %v12240_v11  ;;  %v1418_v32 = vpop.f32.mrb[21].mxu0 }
 0x116   : > { %v1419_v33 = vadd.f32 %v12240_v11, %v1418_v32  ;;  %v10204_v34 = vpop.f32.mrb[22].mxu0  ;;  %10341 = vmatprep.mubr.bf16.mxu1 %v1985_v30 }
 0x117   : > { %v1430_v35 = vadd.f32 %v10204_v34, %v12240_v11  ;;  %v1421_v36 = vpop.f32.mrb[23].mxu0  ;;  %10342 = vmatmul.mubr.bf16.gmra.mrb[16].mxu1 %v1986_v28  ;;  %v1871_v39 = vmax.f32 %v1427_v31, 0.0 }
 0x118   : > { %v1422_v38 = vadd.f32 %v12240_v11, %v1421_v36  ;;  %v1869_v41 = vmax.f32 %v1419_v33, 0.0  ;;  %v11828_v33 = vld [vmem:[%s14259_s22 + $0x38] sm:$0xff]  }
 0x119   : > { %v1872_v40 = vmax.f32 %v1430_v35, 0.0  ;;  %10467 = vmatprep.subr.bf16.mxu0 %v11828_v33 }
 0x11a   : > { %v1870_v42 = vmax.f32 %v1422_v38, 0.0  ;;  %10468 = vmatpush3.bf16.msra.mxu0 %v11828_v33 }
 0x11b   : > { %v1988_v43 = vpack.c.bf16 %v1872_v40, %v1871_v39 }
 0x11c   : > { %v10207_v44 = vpop.f32.mrb[24].mxu0  ;;  %v1987_v45 = vpack.c.bf16 %v1870_v42, %v1869_v41 }
 0x11d   : > { %v1443_v46 = vadd.f32 %v10207_v44, %v12240_v11  ;;  %v1434_v47 = vpop.f32.mrb[25].mxu0 }
 0x11e   : > { %v1435_v48 = vadd.f32 %v12240_v11, %v1434_v47  ;;  %v10208_v49 = vpop.f32.mrb[26].mxu0  ;;  %10345 = vmatprep.mubr.bf16.mxu1 %v1987_v45 }
 0x11f   : > { %v1446_v50 = vadd.f32 %v10208_v49, %v12240_v11  ;;  %v1437_v51 = vpop.f32.mrb[27].mxu0  ;;  %10346 = vmatmul.mubr.bf16.gmra.mrb[20].mxu1 %v1988_v43  ;;  %v1875_v53 = vmax.f32 %v1443_v46, 0.0 }
 0x120   : > { %v1438_v52 = vadd.f32 %v12240_v11, %v1437_v51  ;;  %v1873_v55 = vmax.f32 %v1435_v48, 0.0 }
 0x121   : > { %v1876_v54 = vmax.f32 %v1446_v50, 0.0 }
 0x122   : > { %v1874_v56 = vmax.f32 %v1438_v52, 0.0 }
 0x123   : > { %v1990_v57 = vpack.c.bf16 %v1876_v54, %v1875_v53 }
 0x124   : > { %v10211_v58 = vpop.f32.mrb[28].mxu0  ;;  %v1989_v59 = vpack.c.bf16 %v1874_v56, %v1873_v55 }
 0x125   : > { %v1459_v60 = vadd.f32 %v10211_v58, %v12240_v11  ;;  %v1450_v61 = vpop.f32.mrb[29].mxu0 }
 0x126   : > { %v1451_v62 = vadd.f32 %v12240_v11, %v1450_v61  ;;  %v10212_v63 = vpop.f32.mrb[30].mxu0  ;;  %10349 = vmatprep.mubr.bf16.mxu1 %v1989_v59 }
 0x127   : > { %v1462_v0 = vadd.f32 %v10212_v63, %v12240_v11  ;;  %v1453_v1 = vpop.f32.mrb[31].mxu0  ;;  %10350 = vmatmul.mubr.bf16.gmra.mrb[24].mxu1 %v1990_v57  ;;  %v1879_v3 = vmax.f32 %v1459_v60, 0.0 }
 0x128   : > { %v1454_v2 = vadd.f32 %v12240_v11, %v1453_v1  ;;  %v1877_v6 = vmax.f32 %v1451_v62, 0.0 }
 0x129   : > { %v1880_v5 = vmax.f32 %v1462_v0, 0.0 }
 0x12a   : > { %v1878_v7 = vmax.f32 %v1454_v2, 0.0 }
 0x12b   : > { %v1992_v8 = vpack.c.bf16 %v1880_v5, %v1879_v3 }
 0x12c   : > { %v10215_v9 = vpop.f32.mrb[32].mxu0  ;;  %v1991_v10 = vpack.c.bf16 %v1878_v7, %v1877_v6 }
 0x12d   : > { %v1475_v12 = vadd.f32 %v10215_v9, %v12240_v11  ;;  %v1466_v13 = vpop.f32.mrb[33].mxu0 }
 0x12e   : > { %v1467_v14 = vadd.f32 %v12240_v11, %v1466_v13  ;;  %v10216_v15 = vpop.f32.mrb[34].mxu0  ;;  %10353 = vmatprep.mubr.bf16.mxu1 %v1991_v10 }
 0x12f   : > { %v1478_v16 = vadd.f32 %v10216_v15, %v12240_v11  ;;  %v1469_v17 = vpop.f32.mrb[35].mxu0  ;;  %10354 = vmatmul.mubr.bf16.gmra.mrb[28].mxu1 %v1992_v8  ;;  %v1883_v19 = vmax.f32 %v1475_v12, 0.0 }
 0x130   : > { %v1470_v18 = vadd.f32 %v12240_v11, %v1469_v17  ;;  %v1881_v21 = vmax.f32 %v1467_v14, 0.0 }
 0x131   : > { %v1884_v20 = vmax.f32 %v1478_v16, 0.0 }
 0x132   : > { %v1882_v22 = vmax.f32 %v1470_v18, 0.0 }
 0x133   : > { %v1994_v24 = vpack.c.bf16 %v1884_v20, %v1883_v19  ;;  %v11829_v20 = vld [vmem:[%s14261_s4 + $0x8] sm:$0xff]  }
 0x134   : > { %v10219_v25 = vpop.f32.mrb[36].mxu0  ;;  %v1993_v26 = vpack.c.bf16 %v1882_v22, %v1881_v21  ;;  %10599 = vmatprep.subr.bf16.mxu1 %v11829_v20 }
 0x135   : > { %v1491_v27 = vadd.f32 %v10219_v25, %v12240_v11  ;;  %v1482_v28 = vpop.f32.mrb[37].mxu0  ;;  %10600 = vmatpush3.bf16.msra.mxu1 %v11829_v20 }
 0x136   : > { %v1483_v29 = vadd.f32 %v12240_v11, %v1482_v28  ;;  %v10220_v30 = vpop.f32.mrb[38].mxu0  ;;  %10357 = vmatprep.mubr.bf16.mxu1 %v1993_v26 }
 0x137   : > { %v1494_v31 = vadd.f32 %v10220_v30, %v12240_v11  ;;  %v1485_v32 = vpop.f32.mrb[39].mxu0  ;;  %10358 = vmatmul.mubr.bf16.gmra.mrb[32].mxu1 %v1994_v24  ;;  %v1887_v35 = vmax.f32 %v1491_v27, 0.0 }
 0x138   : > { %v1486_v34 = vadd.f32 %v12240_v11, %v1485_v32  ;;  %v1885_v37 = vmax.f32 %v1483_v29, 0.0 }
 0x139   : > { %v1888_v36 = vmax.f32 %v1494_v31, 0.0 }
 0x13a   : > { %v1886_v38 = vmax.f32 %v1486_v34, 0.0 }
 0x13b   : > { %v1996_v39 = vpack.c.bf16 %v1888_v36, %v1887_v35 }
 0x13c   : > { %v10223_v40 = vpop.f32.mrb[40].mxu0  ;;  %v1995_v41 = vpack.c.bf16 %v1886_v38, %v1885_v37 }
 0x13d   : > { %v1507_v42 = vadd.f32 %v10223_v40, %v12240_v11  ;;  %v1498_v43 = vpop.f32.mrb[41].mxu0 }
 0x13e   : > { %v1499_v44 = vadd.f32 %v12240_v11, %v1498_v43  ;;  %v10224_v45 = vpop.f32.mrb[42].mxu0  ;;  %10361 = vmatprep.mubr.bf16.mxu1 %v1995_v41 }
 0x13f   : > { %v1510_v46 = vadd.f32 %v10224_v45, %v12240_v11  ;;  %v1501_v47 = vpop.f32.mrb[43].mxu0  ;;  %10362 = vmatmul.mubr.bf16.gmra.mrb[36].mxu1 %v1996_v39  ;;  %v1891_v49 = vmax.f32 %v1507_v42, 0.0 }
 0x140   : > { %v1502_v48 = vadd.f32 %v12240_v11, %v1501_v47  ;;  %v1889_v51 = vmax.f32 %v1499_v44, 0.0 }
 0x141   : > { %v1892_v50 = vmax.f32 %v1510_v46, 0.0 }
 0x142   : > { %v1890_v52 = vmax.f32 %v1502_v48, 0.0 }
 0x143   : > { %v1998_v53 = vpack.c.bf16 %v1892_v50, %v1891_v49 }
 0x144   : > { %v10227_v54 = vpop.f32.mrb[44].mxu0  ;;  %v1997_v55 = vpack.c.bf16 %v1890_v52, %v1889_v51 }
 0x145   : > { %v1523_v56 = vadd.f32 %v10227_v54, %v12240_v11  ;;  %v1514_v57 = vpop.f32.mrb[45].mxu0 }
 0x146   : > { %v1515_v58 = vadd.f32 %v12240_v11, %v1514_v57  ;;  %v10228_v59 = vpop.f32.mrb[46].mxu0  ;;  %10365 = vmatprep.mubr.bf16.mxu1 %v1997_v55 }
 0x147   : > { %v1526_v60 = vadd.f32 %v10228_v59, %v12240_v11  ;;  %v1517_v61 = vpop.f32.mrb[47].mxu0  ;;  %10366 = vmatmul.mubr.bf16.gmra.mrb[40].mxu1 %v1998_v53  ;;  %v1895_v63 = vmax.f32 %v1523_v56, 0.0 }
 0x148   : > { %v1518_v62 = vadd.f32 %v12240_v11, %v1517_v61  ;;  %v1893_v1 = vmax.f32 %v1515_v58, 0.0 }
 0x149   : > { %v1896_v0 = vmax.f32 %v1526_v60, 0.0 }
 0x14a   : > { %v1894_v2 = vmax.f32 %v1518_v62, 0.0 }
 0x14b   : > { %v2000_v3 = vpack.c.bf16 %v1896_v0, %v1895_v63 }
 0x14c   : > { %v10231_v5 = vpop.f32.mrb[48].mxu0  ;;  %v1999_v6 = vpack.c.bf16 %v1894_v2, %v1893_v1 }
 0x14d   : > { %v1539_v7 = vadd.f32 %v10231_v5, %v12240_v11  ;;  %v1530_v8 = vpop.f32.mrb[49].mxu0 }
 0x14e   : > { %v1531_v9 = vadd.f32 %v12240_v11, %v1530_v8  ;;  %v10232_v10 = vpop.f32.mrb[50].mxu0  ;;  %10369 = vmatprep.mubr.bf16.mxu1 %v1999_v6 }
 0x14f   : > { %v1542_v12 = vadd.f32 %v10232_v10, %v12240_v11  ;;  %v1533_v13 = vpop.f32.mrb[51].mxu0  ;;  %10370 = vmatmul.mubr.bf16.gmra.mrb[44].mxu1 %v2000_v3  ;;  %v1899_v15 = vmax.f32 %v1539_v7, 0.0 }
 0x150   : > { %v1534_v14 = vadd.f32 %v12240_v11, %v1533_v13  ;;  %v1897_v17 = vmax.f32 %v1531_v9, 0.0 }
 0x151   : > { %v1900_v16 = vmax.f32 %v1542_v12, 0.0 }
 0x152   : > { %v1898_v18 = vmax.f32 %v1534_v14, 0.0 }
 0x153   : > { %v2002_v19 = vpack.c.bf16 %v1900_v16, %v1899_v15  ;;  %v11830_v15 = vld [vmem:[%s14261_s4 + $0x10] sm:$0xff]  }
 0x154   : > { %v10235_v21 = vpop.f32.mrb[52].mxu0  ;;  %v2001_v22 = vpack.c.bf16 %v1898_v18, %v1897_v17  ;;  %10601 = vmatprep.subr.bf16.mxu1 %v11830_v15 }
 0x155   : > { %v1555_v23 = vadd.f32 %v10235_v21, %v12240_v11  ;;  %v1546_v24 = vpop.f32.mrb[53].mxu0  ;;  %10602 = vmatpush3.bf16.msra.mxu1 %v11830_v15 }
 0x156   : > { %v1547_v25 = vadd.f32 %v12240_v11, %v1546_v24  ;;  %v10236_v26 = vpop.f32.mrb[54].mxu0  ;;  %10373 = vmatprep.mubr.bf16.mxu1 %v2001_v22 }
 0x157   : > { %v1558_v27 = vadd.f32 %v10236_v26, %v12240_v11  ;;  %v1549_v28 = vpop.f32.mrb[55].mxu0  ;;  %10374 = vmatmul.mubr.bf16.gmra.mrb[48].mxu1 %v2002_v19  ;;  %v1903_v30 = vmax.f32 %v1555_v23, 0.0 }
 0x158   : > { %v1550_v29 = vadd.f32 %v12240_v11, %v1549_v28  ;;  %v1901_v32 = vmax.f32 %v1547_v25, 0.0 }
 0x159   : > { %v1904_v31 = vmax.f32 %v1558_v27, 0.0 }
 0x15a   : > { %v1902_v33 = vmax.f32 %v1550_v29, 0.0 }
 0x15b   : > { %v2004_v34 = vpack.c.bf16 %v1904_v31, %v1903_v30 }
 0x15c   : > { %v10239_v35 = vpop.f32.mrb[56].mxu0  ;;  %v2003_v36 = vpack.c.bf16 %v1902_v33, %v1901_v32 }
 0x15d   : > { %v1571_v37 = vadd.f32 %v10239_v35, %v12240_v11  ;;  %v1562_v38 = vpop.f32.mrb[57].mxu0 }
 0x15e   : > { %v1563_v39 = vadd.f32 %v12240_v11, %v1562_v38  ;;  %v10240_v40 = vpop.f32.mrb[58].mxu0  ;;  %10377 = vmatprep.mubr.bf16.mxu1 %v2003_v36 }
 0x15f   : > { %v1574_v41 = vadd.f32 %v10240_v40, %v12240_v11  ;;  %v1565_v42 = vpop.f32.mrb[59].mxu0  ;;  %10378 = vmatmul.mubr.bf16.gmra.mrb[52].mxu1 %v2004_v34  ;;  %v1907_v44 = vmax.f32 %v1571_v37, 0.0 }
 0x160   : > { %v1566_v43 = vadd.f32 %v12240_v11, %v1565_v42  ;;  %v1905_v46 = vmax.f32 %v1563_v39, 0.0 }
 0x161   : > { %v1908_v45 = vmax.f32 %v1574_v41, 0.0 }
 0x162   : > { %v1906_v47 = vmax.f32 %v1566_v43, 0.0 }
 0x163   : > { %v2006_v48 = vpack.c.bf16 %v1908_v45, %v1907_v44 }
 0x164   : > { %v10243_v49 = vpop.f32.mrb[60].mxu0  ;;  %v2005_v50 = vpack.c.bf16 %v1906_v47, %v1905_v46 }
 0x165   : > { %v1587_v51 = vadd.f32 %v10243_v49, %v12240_v11  ;;  %v1578_v52 = vpop.f32.mrb[61].mxu0 }
 0x166   : > { %v1579_v53 = vadd.f32 %v12240_v11, %v1578_v52  ;;  %v10244_v54 = vpop.f32.mrb[62].mxu0  ;;  %10381 = vmatprep.mubr.bf16.mxu1 %v2005_v50 }
 0x167   : > { %v1590_v55 = vadd.f32 %v10244_v54, %v12240_v11  ;;  %v1581_v56 = vpop.f32.mrb[63].mxu0  ;;  %10382 = vmatmul.mubr.bf16.gmra.mrb[56].mxu1 %v2006_v48  ;;  %v1911_v58 = vmax.f32 %v1587_v51, 0.0 }
 0x168   : > { %v1582_v57 = vadd.f32 %v12240_v11, %v1581_v56  ;;  %v1909_v60 = vmax.f32 %v1579_v53, 0.0 }
 0x169   : > { %v1912_v59 = vmax.f32 %v1590_v55, 0.0 }
 0x16a   : > { %v1910_v61 = vmax.f32 %v1582_v57, 0.0 }
 0x16b   : > { %v2008_v62 = vpack.c.bf16 %v1912_v59, %v1911_v58 }
 0x16c   : > { %v10247_v63 = vpop.f32.mrb[64].mxu0  ;;  %v2007_v0 = vpack.c.bf16 %v1910_v61, %v1909_v60 }
 0x16d   : > { %v1603_v1 = vadd.f32 %v10247_v63, %v12240_v11  ;;  %v1594_v2 = vpop.f32.mrb[65].mxu0 }
 0x16e   : > { %v1595_v3 = vadd.f32 %v12240_v11, %v1594_v2  ;;  %v10248_v5 = vpop.f32.mrb[66].mxu0  ;;  %10385 = vmatprep.mubr.bf16.mxu1 %v2007_v0 }
 0x16f   : > { %v1606_v6 = vadd.f32 %v10248_v5, %v12240_v11  ;;  %v1597_v7 = vpop.f32.mrb[67].mxu0  ;;  %10386 = vmatmul.mubr.bf16.gmra.mrb[60].mxu1 %v2008_v62  ;;  %v1915_v9 = vmax.f32 %v1603_v1, 0.0 }
 0x170   : > { %v1598_v8 = vadd.f32 %v12240_v11, %v1597_v7  ;;  %v1913_v12 = vmax.f32 %v1595_v3, 0.0 }
 0x171   : > { %v1916_v10 = vmax.f32 %v1606_v6, 0.0 }
 0x172   : > { %v1914_v13 = vmax.f32 %v1598_v8, 0.0 }
 0x173   : > { %v2010_v14 = vpack.c.bf16 %v1916_v10, %v1915_v9  ;;  %v11831_v9 = vld [vmem:[%s14261_s4 + $0x18] sm:$0xff]  }
 0x174   : > { %v10251_v16 = vpop.f32.mrb[68].mxu0  ;;  %v2009_v17 = vpack.c.bf16 %v1914_v13, %v1913_v12  ;;  %10603 = vmatprep.subr.bf16.mxu1 %v11831_v9 }
 0x175   : > { %v1619_v18 = vadd.f32 %v10251_v16, %v12240_v11  ;;  %v1610_v19 = vpop.f32.mrb[69].mxu0  ;;  %10604 = vmatpush3.bf16.msra.mxu1 %v11831_v9 }
 0x176   : > { %v1611_v20 = vadd.f32 %v12240_v11, %v1610_v19  ;;  %v10252_v21 = vpop.f32.mrb[70].mxu0  ;;  %10389 = vmatprep.mubr.bf16.mxu1 %v2009_v17 }
 0x177   : > { %v1622_v22 = vadd.f32 %v10252_v21, %v12240_v11  ;;  %v1613_v23 = vpop.f32.mrb[71].mxu0  ;;  %10390 = vmatmul.mubr.bf16.gmra.mrb[64].mxu1 %v2010_v14  ;;  %v1919_v25 = vmax.f32 %v1619_v18, 0.0 }
 0x178   : > { %v1614_v24 = vadd.f32 %v12240_v11, %v1613_v23  ;;  %v1917_v27 = vmax.f32 %v1611_v20, 0.0 }
 0x179   : > { %v1920_v26 = vmax.f32 %v1622_v22, 0.0 }
 0x17a   : > { %v1918_v28 = vmax.f32 %v1614_v24, 0.0 }
 0x17b   : > { %v2012_v29 = vpack.c.bf16 %v1920_v26, %v1919_v25 }
 0x17c   : > { %v10255_v30 = vpop.f32.mrb[72].mxu0  ;;  %v2011_v31 = vpack.c.bf16 %v1918_v28, %v1917_v27 }
 0x17d   : > { %v1635_v32 = vadd.f32 %v10255_v30, %v12240_v11  ;;  %v1626_v33 = vpop.f32.mrb[73].mxu0 }
 0x17e   : > { %v1627_v34 = vadd.f32 %v12240_v11, %v1626_v33  ;;  %v10256_v35 = vpop.f32.mrb[74].mxu0  ;;  %10393 = vmatprep.mubr.bf16.mxu1 %v2011_v31 }
 0x17f   : > { %v1638_v36 = vadd.f32 %v10256_v35, %v12240_v11  ;;  %v1629_v37 = vpop.f32.mrb[75].mxu0  ;;  %10394 = vmatmul.mubr.bf16.gmra.mrb[68].mxu1 %v2012_v29  ;;  %v1923_v39 = vmax.f32 %v1635_v32, 0.0 }
 0x180   : > { %v1630_v38 = vadd.f32 %v12240_v11, %v1629_v37  ;;  %v1921_v41 = vmax.f32 %v1627_v34, 0.0 }
 0x181   : > { %v1924_v40 = vmax.f32 %v1638_v36, 0.0 }
 0x182   : > { %v1922_v42 = vmax.f32 %v1630_v38, 0.0 }
 0x183   : > { %v2014_v43 = vpack.c.bf16 %v1924_v40, %v1923_v39 }
 0x184   : > { %v10259_v44 = vpop.f32.mrb[76].mxu0  ;;  %v2013_v45 = vpack.c.bf16 %v1922_v42, %v1921_v41 }
 0x185   : > { %v1651_v46 = vadd.f32 %v10259_v44, %v12240_v11  ;;  %v1642_v47 = vpop.f32.mrb[77].mxu0 }
 0x186   : > { %v1643_v48 = vadd.f32 %v12240_v11, %v1642_v47  ;;  %v10260_v49 = vpop.f32.mrb[78].mxu0  ;;  %10397 = vmatprep.mubr.bf16.mxu1 %v2013_v45 }
 0x187   : > { %v1654_v50 = vadd.f32 %v10260_v49, %v12240_v11  ;;  %v1645_v51 = vpop.f32.mrb[79].mxu0  ;;  %10398 = vmatmul.mubr.bf16.gmra.mrb[72].mxu1 %v2014_v43  ;;  %v1927_v53 = vmax.f32 %v1651_v46, 0.0 }
 0x188   : > { %v1646_v52 = vadd.f32 %v12240_v11, %v1645_v51  ;;  %v1925_v55 = vmax.f32 %v1643_v48, 0.0 }
 0x189   : > { %v1928_v54 = vmax.f32 %v1654_v50, 0.0 }
 0x18a   : > { %v1926_v56 = vmax.f32 %v1646_v52, 0.0 }
 0x18b   : > { %v2016_v57 = vpack.c.bf16 %v1928_v54, %v1927_v53 }
 0x18c   : > { %v10263_v58 = vpop.f32.mrb[80].mxu0  ;;  %v2015_v59 = vpack.c.bf16 %v1926_v56, %v1925_v55 }
 0x18d   : > { %v1667_v60 = vadd.f32 %v10263_v58, %v12240_v11  ;;  %v1658_v61 = vpop.f32.mrb[81].mxu0 }
 0x18e   : > { %v1659_v62 = vadd.f32 %v12240_v11, %v1658_v61  ;;  %v10264_v63 = vpop.f32.mrb[82].mxu0  ;;  %10401 = vmatprep.mubr.bf16.mxu1 %v2015_v59 }
 0x18f   : > { %v1670_v0 = vadd.f32 %v10264_v63, %v12240_v11  ;;  %v1661_v1 = vpop.f32.mrb[83].mxu0  ;;  %10402 = vmatmul.mubr.bf16.gmra.mrb[76].mxu1 %v2016_v57  ;;  %v1931_v3 = vmax.f32 %v1667_v60, 0.0 }
 0x190   : > { %v1662_v2 = vadd.f32 %v12240_v11, %v1661_v1  ;;  %v1929_v6 = vmax.f32 %v1659_v62, 0.0 }
 0x191   : > { %v1932_v5 = vmax.f32 %v1670_v0, 0.0 }
 0x192   : > { %v1930_v7 = vmax.f32 %v1662_v2, 0.0 }
 0x193   : > { %v2018_v8 = vpack.c.bf16 %v1932_v5, %v1931_v3  ;;  %v11832_v3 = vld [vmem:[%s14261_s4 + $0x20] sm:$0xff]  }
 0x194   : > { %v10267_v10 = vpop.f32.mrb[84].mxu0  ;;  %v2017_v12 = vpack.c.bf16 %v1930_v7, %v1929_v6  ;;  %10605 = vmatprep.subr.bf16.mxu1 %v11832_v3 }
 0x195   : > { %v1683_v13 = vadd.f32 %v10267_v10, %v12240_v11  ;;  %v1674_v14 = vpop.f32.mrb[85].mxu0  ;;  %10606 = vmatpush3.bf16.msra.mxu1 %v11832_v3 }
 0x196   : > { %v1675_v15 = vadd.f32 %v12240_v11, %v1674_v14  ;;  %v10268_v16 = vpop.f32.mrb[86].mxu0  ;;  %10405 = vmatprep.mubr.bf16.mxu1 %v2017_v12 }
 0x197   : > { %v1686_v17 = vadd.f32 %v10268_v16, %v12240_v11  ;;  %v1677_v18 = vpop.f32.mrb[87].mxu0  ;;  %10406 = vmatmul.mubr.bf16.gmra.mrb[80].mxu1 %v2018_v8  ;;  %v1935_v20 = vmax.f32 %v1683_v13, 0.0 }
 0x198   : > { %v1678_v19 = vadd.f32 %v12240_v11, %v1677_v18  ;;  %v1933_v22 = vmax.f32 %v1675_v15, 0.0 }
 0x199   : > { %v1936_v21 = vmax.f32 %v1686_v17, 0.0 }
 0x19a   : > { %v1934_v23 = vmax.f32 %v1678_v19, 0.0 }
 0x19b   : > { %v2020_v24 = vpack.c.bf16 %v1936_v21, %v1935_v20 }
 0x19c   : > { %v10271_v25 = vpop.f32.mrb[88].mxu0  ;;  %v2019_v26 = vpack.c.bf16 %v1934_v23, %v1933_v22 }
 0x19d   : > { %v1699_v27 = vadd.f32 %v10271_v25, %v12240_v11  ;;  %v1690_v28 = vpop.f32.mrb[89].mxu0 }
 0x19e   : > { %v1691_v29 = vadd.f32 %v12240_v11, %v1690_v28  ;;  %v10272_v30 = vpop.f32.mrb[90].mxu0  ;;  %10409 = vmatprep.mubr.bf16.mxu1 %v2019_v26 }
 0x19f   : > { %v1702_v31 = vadd.f32 %v10272_v30, %v12240_v11  ;;  %v1693_v32 = vpop.f32.mrb[91].mxu0  ;;  %10410 = vmatmul.mubr.bf16.gmra.mrb[84].mxu1 %v2020_v24  ;;  %v1939_v34 = vmax.f32 %v1699_v27, 0.0 }
 0x1a0   : > { %v1694_v33 = vadd.f32 %v12240_v11, %v1693_v32  ;;  %v1937_v36 = vmax.f32 %v1691_v29, 0.0 }
 0x1a1   : > { %v1940_v35 = vmax.f32 %v1702_v31, 0.0 }
 0x1a2   : > { %v1938_v37 = vmax.f32 %v1694_v33, 0.0 }
 0x1a3   : > { %v2022_v38 = vpack.c.bf16 %v1940_v35, %v1939_v34 }
 0x1a4   : > { %v10275_v39 = vpop.f32.mrb[92].mxu0  ;;  %v2021_v40 = vpack.c.bf16 %v1938_v37, %v1937_v36 }
 0x1a5   : > { %v1715_v41 = vadd.f32 %v10275_v39, %v12240_v11  ;;  %v1706_v42 = vpop.f32.mrb[93].mxu0 }
 0x1a6   : > { %v1707_v43 = vadd.f32 %v12240_v11, %v1706_v42  ;;  %v10276_v44 = vpop.f32.mrb[94].mxu0  ;;  %10413 = vmatprep.mubr.bf16.mxu1 %v2021_v40 }
 0x1a7   : > { %v1718_v45 = vadd.f32 %v10276_v44, %v12240_v11  ;;  %v1709_v46 = vpop.f32.mrb[95].mxu0  ;;  %10414 = vmatmul.mubr.bf16.gmra.mrb[88].mxu1 %v2022_v38  ;;  %v1943_v48 = vmax.f32 %v1715_v41, 0.0 }
 0x1a8   : > { %v1710_v47 = vadd.f32 %v12240_v11, %v1709_v46  ;;  %v1941_v50 = vmax.f32 %v1707_v43, 0.0  ;;  %v12400_v43 = vld [vmem:[%s14239_s12] ss:$0 sm:$0xff] }
 0x1a9   : > { %v1944_v49 = vmax.f32 %v1718_v45, 0.0 }
 0x1aa   : > { %v1942_v51 = vmax.f32 %v1710_v47, 0.0 }
 0x1ab   : > { %v2024_v52 = vpack.c.bf16 %v1944_v49, %v1943_v48 }
 0x1ac   : > { %v10279_v53 = vpop.f32.mrb[96].mxu0  ;;  %v2023_v54 = vpack.c.bf16 %v1942_v51, %v1941_v50 }
 0x1ad   : > { %v1731_v55 = vadd.f32 %v10279_v53, %v12240_v11  ;;  %v1722_v56 = vpop.f32.mrb[97].mxu0 }
 0x1ae   : > { %v1723_v57 = vadd.f32 %v12240_v11, %v1722_v56  ;;  %v10280_v58 = vpop.f32.mrb[98].mxu0  ;;  %10417 = vmatprep.mubr.bf16.mxu1 %v2023_v54 }
 0x1af   : > { %v1734_v59 = vadd.f32 %v10280_v58, %v12240_v11  ;;  %v1725_v60 = vpop.f32.mrb[99].mxu0  ;;  %10418 = vmatmul.mubr.bf16.gmra.mrb[92].mxu1 %v2024_v52  ;;  %v1947_v62 = vmax.f32 %v1731_v55, 0.0 }
 0x1b0   : > { %v1726_v61 = vadd.f32 %v12240_v11, %v1725_v60  ;;  %v1945_v0 = vmax.f32 %v1723_v57, 0.0 }
 0x1b1   : > { %v1948_v63 = vmax.f32 %v1734_v59, 0.0 }
 0x1b2   : > { %v1946_v1 = vmax.f32 %v1726_v61, 0.0 }
 0x1b3   : > { %v2026_v2 = vpack.c.bf16 %v1948_v63, %v1947_v62 }
 0x1b4   : > { %v10283_v5 = vpop.f32.mrb[100].mxu0  ;;  %v2025_v6 = vpack.c.bf16 %v1946_v1, %v1945_v0 }
 0x1b5   : > { %v1747_v7 = vadd.f32 %v10283_v5, %v12240_v11  ;;  %v1738_v8 = vpop.f32.mrb[101].mxu0 }
 0x1b6   : > { %v1739_v9 = vadd.f32 %v12240_v11, %v1738_v8  ;;  %v10284_v10 = vpop.f32.mrb[102].mxu0  ;;  %10421 = vmatprep.mubr.bf16.mxu1 %v2025_v6 }
 0x1b7   : > { %v1750_v12 = vadd.f32 %v10284_v10, %v12240_v11  ;;  %v1741_v13 = vpop.f32.mrb[103].mxu0  ;;  %10422 = vmatmul.mubr.bf16.gmra.mrb[96].mxu1 %v2026_v2  ;;  %v1951_v15 = vmax.f32 %v1747_v7, 0.0 }
 0x1b8   : > { %v1742_v14 = vadd.f32 %v12240_v11, %v1741_v13  ;;  %v1949_v17 = vmax.f32 %v1739_v9, 0.0 }
 0x1b9   : > { %v1952_v16 = vmax.f32 %v1750_v12, 0.0 }
 0x1ba   : > { %v1950_v18 = vmax.f32 %v1742_v14, 0.0 }
 0x1bb   : > { %v2028_v19 = vpack.c.bf16 %v1952_v16, %v1951_v15 }
 0x1bc   : > { %v10287_v20 = vpop.f32.mrb[104].mxu0  ;;  %v2027_v21 = vpack.c.bf16 %v1950_v18, %v1949_v17  ;;  %v11833_v18 = vld [vmem:[%s14261_s4 + $0x28] sm:$0xff]  }
 0x1bd   : > { %v1763_v22 = vadd.f32 %v10287_v20, %v12240_v11  ;;  %v1754_v23 = vpop.f32.mrb[105].mxu0  ;;  %10607 = vmatprep.subr.bf16.mxu1 %v11833_v18 }
 0x1be   : > { %v1755_v24 = vadd.f32 %v12240_v11, %v1754_v23  ;;  %v10288_v25 = vpop.f32.mrb[106].mxu0  ;;  %10425 = vmatprep.mubr.bf16.mxu1 %v2027_v21  ;;  %10608 = vmatpush3.bf16.msra.mxu1 %v11833_v18 }
 0x1bf   : > { %v1766_v26 = vadd.f32 %v10288_v25, %v12240_v11  ;;  %v1757_v27 = vpop.f32.mrb[107].mxu0  ;;  %10426 = vmatmul.mubr.bf16.gmra.mrb[100].mxu1 %v2028_v19  ;;  %v1955_v29 = vmax.f32 %v1763_v22, 0.0  ;;  %v12418_v22 = vld [vmem:[%s14238_s11] ss:$0 sm:$0xff] }
 0x1c0   : > { %v1758_v28 = vadd.f32 %v12240_v11, %v1757_v27  ;;  %v1953_v31 = vmax.f32 %v1755_v24, 0.0 }
 0x1c1   : > { %v1956_v30 = vmax.f32 %v1766_v26, 0.0 }
 0x1c2   : > { %v1954_v32 = vmax.f32 %v1758_v28, 0.0 }
 0x1c3   : > { %v2030_v33 = vpack.c.bf16 %v1956_v30, %v1955_v29 }
 0x1c4   : > { %v10291_v34 = vpop.f32.mrb[108].mxu0  ;;  %v2029_v35 = vpack.c.bf16 %v1954_v32, %v1953_v31 }
 0x1c5   : > { %v1779_v36 = vadd.f32 %v10291_v34, %v12240_v11  ;;  %v1770_v37 = vpop.f32.mrb[109].mxu0 }
 0x1c6   : > { %v1771_v38 = vadd.f32 %v12240_v11, %v1770_v37  ;;  %v10292_v39 = vpop.f32.mrb[110].mxu0  ;;  %10429 = vmatprep.mubr.bf16.mxu1 %v2029_v35 }
 0x1c7   : > { %v1782_v40 = vadd.f32 %v10292_v39, %v12240_v11  ;;  %v1773_v41 = vpop.f32.mrb[111].mxu0  ;;  %10430 = vmatmul.mubr.bf16.gmra.mrb[104].mxu1 %v2030_v33  ;;  %v1959_v44 = vmax.f32 %v1779_v36, 0.0 }
 0x1c8   : > { %v1774_v42 = vadd.f32 %v12240_v11, %v1773_v41  ;;  %v1957_v46 = vmax.f32 %v1771_v38, 0.0 }
 0x1c9   : > { %v1960_v45 = vmax.f32 %v1782_v40, 0.0 }
 0x1ca   : > { %v1958_v47 = vmax.f32 %v1774_v42, 0.0  ;;  %v10327_v48 = vpop.f32.mrb[0].mxu1 }
 0x1cb   : > { %v2155_v49 = vadd.f32 %v10327_v48, %v12400_v43  ;;  %v2146_v50 = vpop.f32.mrb[1].mxu1  ;;  %v2032_v51 = vpack.c.bf16 %v1960_v45, %v1959_v44 }
 0x1cc   : > { %v2147_v52 = vadd.f32 %v12400_v43, %v2146_v50  ;;  %v10295_v53 = vpop.f32.mrb[112].mxu0  ;;  %v10328_v54 = vpop.f32.mrb[2].mxu1  ;;  %v2031_v55 = vpack.c.bf16 %v1958_v47, %v1957_v46 }
 0x1cd   : > { %v1795_v56 = vadd.f32 %v10295_v53, %v12240_v11  ;;  %v2158_v57 = vadd.f32 %v10328_v54, %v12400_v43  ;;  %v1786_v58 = vpop.f32.mrb[113].mxu0  ;;  %v2149_v59 = vpop.f32.mrb[3].mxu1  ;;  %v2659_v63 = vmax.f32 %v2155_v49, 0.0 }
 0x1ce   : > { %v1787_v60 = vadd.f32 %v12240_v11, %v1786_v58  ;;  %v2150_v61 = vadd.f32 %v12400_v43, %v2149_v59  ;;  %v10296_v62 = vpop.f32.mrb[114].mxu0  ;;  %10433 = vmatprep.mubr.bf16.mxu1 %v2031_v55  ;;  %v2657_v5 = vmax.f32 %v2147_v52, 0.0 }
 0x1cf   : > { %v2660_v0 = vmax.f32 %v2158_v57, 0.0  ;;  %v1798_v1 = vadd.f32 %v10296_v62, %v12240_v11  ;;  %v1789_v2 = vpop.f32.mrb[115].mxu0  ;;  %10434 = vmatmul.mubr.bf16.gmra.mrb[108].mxu1 %v2032_v51  ;;  %v1963_v7 = vmax.f32 %v1795_v56, 0.0 }
 0x1d0   : > { %v1790_v3 = vadd.f32 %v12240_v11, %v1789_v2  ;;  %v2658_v6 = vmax.f32 %v2150_v61, 0.0  ;;  %v1961_v10 = vmax.f32 %v1787_v60, 0.0 }
 0x1d1   : > { %v2786_v8 = vpack.c.bf16 %v2660_v0, %v2659_v63  ;;  %v1964_v9 = vmax.f32 %v1798_v1, 0.0 }
 0x1d2   : > { %v1962_v12 = vmax.f32 %v1790_v3, 0.0  ;;  %v10331_v13 = vpop.f32.mrb[4].mxu1  ;;  %v2785_v14 = vpack.c.bf16 %v2658_v6, %v2657_v5 }
 0x1d3   : > { %v2171_v15 = vadd.f32 %v10331_v13, %v12400_v43  ;;  %v2162_v16 = vpop.f32.mrb[5].mxu1  ;;  %v2034_v17 = vpack.c.bf16 %v1964_v9, %v1963_v7 }
 0x1d4   : > { %v2163_v19 = vadd.f32 %v12400_v43, %v2162_v16  ;;  %v10299_v11 = vpop.f32.mrb[116].mxu0  ;;  %v10332_v20 = vpop.f32.mrb[6].mxu1  ;;  %10469 = vmatprep.mubr.bf16.mxu0 %v2785_v14  ;;  %v2033_v21 = vpack.c.bf16 %v1962_v12, %v1961_v10 }
 0x1d5   : > { %v1811_v23 = vadd.f32 %v12418_v22, %v10299_v11  ;;  %v2174_v24 = vadd.f32 %v10332_v20, %v12400_v43  ;;  %v1802_v25 = vpop.f32.mrb[117].mxu0  ;;  %v2165_v26 = vpop.f32.mrb[7].mxu1  ;;  %10470 = vmatmul.mubr.bf16.vlgmr.msra.gmra.mrb[128].mxu0 %v2786_v8  ;;  %v2663_v32 = vmax.f32 %v2171_v15, 0.0 }
 0x1d6   : > { %v1803_v27 = vadd.f32 %v12418_v22, %v1802_v25  ;;  %v2166_v28 = vadd.f32 %v12400_v43, %v2165_v26  ;;  %v10300_v29 = vpop.f32.mrb[118].mxu0  ;;  %10437 = vmatprep.mubr.bf16.mxu1 %v2033_v21  ;;  %v2661_v35 = vmax.f32 %v2163_v19, 0.0 }
 0x1d7   : > { %v1814_v30 = vadd.f32 %v12418_v22, %v10300_v29  ;;  %v1805_v31 = vpop.f32.mrb[119].mxu0  ;;  %10438 = vmatmul.mubr.bf16.gmra.mrb[112].mxu1 %v2034_v17  ;;  %v2664_v33 = vmax.f32 %v2174_v24, 0.0  ;;  %v1967_v37 = vmax.f32 %v1811_v23, 0.0 }
 0x1d8   : > { %v1806_v34 = vadd.f32 %v12418_v22, %v1805_v31  ;;  %v2662_v36 = vmax.f32 %v2166_v28, 0.0  ;;  %v1965_v40 = vmax.f32 %v1803_v27, 0.0 }
 0x1d9   : > { %v1968_v38 = vmax.f32 %v1814_v30, 0.0  ;;  %v2788_v39 = vpack.c.bf16 %v2664_v33, %v2663_v32 }
 0x1da   : > { %v1966_v41 = vmax.f32 %v1806_v34, 0.0  ;;  %v10335_v42 = vpop.f32.mrb[8].mxu1  ;;  %v2787_v44 = vpack.c.bf16 %v2662_v36, %v2661_v35 }
 0x1db   : > { %v2187_v45 = vadd.f32 %v10335_v42, %v12400_v43  ;;  %v2178_v46 = vpop.f32.mrb[9].mxu1  ;;  %v2036_v47 = vpack.c.bf16 %v1968_v38, %v1967_v37 }
 0x1dc   : > { %v2179_v48 = vadd.f32 %v12400_v43, %v2178_v46  ;;  %v10303_v49 = vpop.f32.mrb[120].mxu0  ;;  %v10336_v50 = vpop.f32.mrb[10].mxu1  ;;  %10473 = vmatprep.mubr.bf16.mxu0 %v2787_v44  ;;  %v2035_v51 = vpack.c.bf16 %v1966_v41, %v1965_v40 }
 0x1dd   : > { %v1827_v52 = vadd.f32 %v12418_v22, %v10303_v49  ;;  %v2190_v53 = vadd.f32 %v10336_v50, %v12400_v43  ;;  %v1818_v54 = vpop.f32.mrb[121].mxu0  ;;  %v2181_v55 = vpop.f32.mrb[11].mxu1  ;;  %10474 = vmatmul.mubr.bf16.gmra.mrb[132].mxu0 %v2788_v39  ;;  %v2667_v61 = vmax.f32 %v2187_v45, 0.0 }
 0x1de   : > { %v1819_v56 = vadd.f32 %v12418_v22, %v1818_v54  ;;  %v2182_v57 = vadd.f32 %v12400_v43, %v2181_v55  ;;  %v10304_v58 = vpop.f32.mrb[122].mxu0  ;;  %10441 = vmatprep.mubr.bf16.mxu1 %v2035_v51  ;;  %v2665_v0 = vmax.f32 %v2179_v48, 0.0 }
 0x1df   : > { %v1830_v59 = vadd.f32 %v12418_v22, %v10304_v58  ;;  %v1821_v60 = vpop.f32.mrb[123].mxu0  ;;  %10442 = vmatmul.mubr.bf16.gmra.mrb[116].mxu1 %v2036_v47  ;;  %v2668_v62 = vmax.f32 %v2190_v53, 0.0  ;;  %v1971_v2 = vmax.f32 %v1827_v52, 0.0 }
 0x1e0   : > { %v1822_v63 = vadd.f32 %v12418_v22, %v1821_v60  ;;  %v2666_v1 = vmax.f32 %v2182_v57, 0.0  ;;  %v1969_v6 = vmax.f32 %v1819_v56, 0.0  ;;  %v11834_v57 = vld [vmem:[%s14261_s4 + $0x30] sm:$0xff]  }
 0x1e1   : > { %v1972_v3 = vmax.f32 %v1830_v59, 0.0  ;;  %v2790_v5 = vpack.c.bf16 %v2668_v62, %v2667_v61  ;;  %10609 = vmatprep.subr.bf16.mxu1 %v11834_v57 }
 0x1e2   : > { %v1970_v7 = vmax.f32 %v1822_v63, 0.0  ;;  %v10339_v8 = vpop.f32.mrb[12].mxu1  ;;  %v2789_v9 = vpack.c.bf16 %v2666_v1, %v2665_v0  ;;  %10610 = vmatpush3.bf16.msra.mxu1 %v11834_v57 }
 0x1e3   : > { %v2203_v10 = vadd.f32 %v10339_v8, %v12400_v43  ;;  %v2194_v12 = vpop.f32.mrb[13].mxu1  ;;  %v2038_v13 = vpack.c.bf16 %v1972_v3, %v1971_v2 }
 0x1e4   : > { %v2195_v14 = vadd.f32 %v12400_v43, %v2194_v12  ;;  %v10307_v15 = vpop.f32.mrb[124].mxu0  ;;  %v10340_v16 = vpop.f32.mrb[14].mxu1  ;;  %10477 = vmatprep.mubr.bf16.mxu0 %v2789_v9  ;;  %v2037_v17 = vpack.c.bf16 %v1970_v7, %v1969_v6 }
 0x1e5   : > { %v1843_v18 = vadd.f32 %v12418_v22, %v10307_v15  ;;  %v2206_v19 = vadd.f32 %v10340_v16, %v12400_v43  ;;  %v1834_v11 = vpop.f32.mrb[125].mxu0  ;;  %v2197_v20 = vpop.f32.mrb[15].mxu1  ;;  %10478 = vmatmul.mubr.bf16.gmra.mrb[136].mxu0 %v2790_v5  ;;  %v2671_v27 = vmax.f32 %v2203_v10, 0.0 }
 0x1e6   : > { %v1835_v21 = vadd.f32 %v12418_v22, %v1834_v11  ;;  %v2198_v23 = vadd.f32 %v12400_v43, %v2197_v20  ;;  %v10308_v24 = vpop.f32.mrb[126].mxu0  ;;  %10445 = vmatprep.mubr.bf16.mxu1 %v2037_v17  ;;  %v2669_v30 = vmax.f32 %v2195_v14, 0.0 }
 0x1e7   : > { %v1846_v25 = vadd.f32 %v12418_v22, %v10308_v24  ;;  %v1837_v26 = vpop.f32.mrb[127].mxu0  ;;  %10446 = vmatmul.mubr.bf16.gmra.mrb[120].mxu1 %v2038_v13  ;;  %v2672_v28 = vmax.f32 %v2206_v19, 0.0  ;;  %v1975_v32 = vmax.f32 %v1843_v18, 0.0 }
 0x1e8   : > { %v1838_v29 = vadd.f32 %v12418_v22, %v1837_v26  ;;  %v2670_v31 = vmax.f32 %v2198_v23, 0.0  ;;  %v1973_v35 = vmax.f32 %v1835_v21, 0.0 }
 0x1e9   : > { %v1976_v33 = vmax.f32 %v1846_v25, 0.0  ;;  %v2792_v34 = vpack.c.bf16 %v2672_v28, %v2671_v27 }
 0x1ea   : > { %v1974_v36 = vmax.f32 %v1838_v29, 0.0  ;;  %v10343_v37 = vpop.f32.mrb[16].mxu1  ;;  %v2791_v38 = vpack.c.bf16 %v2670_v31, %v2669_v30 }
 0x1eb   : > { %v2219_v39 = vadd.f32 %v10343_v37, %v12400_v43  ;;  %v2210_v40 = vpop.f32.mrb[17].mxu1  ;;  %v2040_v41 = vpack.c.bf16 %v1976_v33, %v1975_v32 }
 0x1ec   : > { %v2211_v42 = vadd.f32 %v12400_v43, %v2210_v40  ;;  %v10344_v44 = vpop.f32.mrb[18].mxu1  ;;  %10481 = vmatprep.mubr.bf16.mxu0 %v2791_v38  ;;  %v2039_v45 = vpack.c.bf16 %v1974_v36, %v1973_v35 }
 0x1ed   : > { %v2222_v22 = vadd.f32 %v10344_v44, %v12400_v43  ;;  %v2213_v46 = vpop.f32.mrb[19].mxu1  ;;  %10482 = vmatmul.mubr.bf16.gmra.mrb[140].mxu0 %v2792_v34  ;;  %v2675_v48 = vmax.f32 %v2219_v39, 0.0  ;;  %v11835_v44 = vld [vmem:[%s14232_s5] sm:$0xff]  }
 0x1ee   : > { %v2214_v47 = vadd.f32 %v12400_v43, %v2213_v46  ;;  %10449 = vmatprep.mubr.bf16.mxu1 %v2039_v45  ;;  %v2673_v50 = vmax.f32 %v2211_v42, 0.0  ;;  %10741 = vmatprep.subr.bf16.mxu0 %v11835_v44 }
 0x1ef   : > { %10450 = vmatmul.mubr.bf16.gmra.mrb[124].mxu1 %v2040_v41  ;;  %v2676_v49 = vmax.f32 %v2222_v22, 0.0  ;;  %10742 = vmatpush3.bf16.msra.mxu0 %v11835_v44 }
 0x1f0   : > { %v2674_v51 = vmax.f32 %v2214_v47, 0.0 }
 0x1f1   : > { %v2794_v52 = vpack.c.bf16 %v2676_v49, %v2675_v48 }
 0x1f2   : > { %v10347_v53 = vpop.f32.mrb[20].mxu1  ;;  %v2793_v54 = vpack.c.bf16 %v2674_v51, %v2673_v50 }
 0x1f3   : > { %v2235_v55 = vadd.f32 %v10347_v53, %v12400_v43  ;;  %v2226_v56 = vpop.f32.mrb[21].mxu1  ;;  %v11836_v53 = vld [vmem:[%s14261_s4 + $0x38] sm:$0xff]  }
 0x1f4   : > { %v2227_v58 = vadd.f32 %v12400_v43, %v2226_v56  ;;  %v10348_v59 = vpop.f32.mrb[22].mxu1  ;;  %10485 = vmatprep.mubr.bf16.mxu0 %v2793_v54  ;;  %10611 = vmatprep.subr.bf16.mxu1 %v11836_v53 }
 0x1f5   : > { %v2238_v60 = vadd.f32 %v10348_v59, %v12400_v43  ;;  %v2229_v61 = vpop.f32.mrb[23].mxu1  ;;  %10486 = vmatmul.mubr.bf16.gmra.mrb[144].mxu0 %v2794_v52  ;;  %v2679_v63 = vmax.f32 %v2235_v55, 0.0  ;;  %10612 = vmatpush3.bf16.msra.mxu1 %v11836_v53 }
 0x1f6   : > { %v2230_v62 = vadd.f32 %v12400_v43, %v2229_v61  ;;  %v2677_v1 = vmax.f32 %v2227_v58, 0.0 }
 0x1f7   : > { %v2680_v0 = vmax.f32 %v2238_v60, 0.0 }
 0x1f8   : > { %v2678_v2 = vmax.f32 %v2230_v62, 0.0 }
 0x1f9   : > { %v2796_v3 = vpack.c.bf16 %v2680_v0, %v2679_v63 }
 0x1fa   : > { %v10351_v5 = vpop.f32.mrb[24].mxu1  ;;  %v2795_v6 = vpack.c.bf16 %v2678_v2, %v2677_v1 }
 0x1fb   : > { %v2251_v7 = vadd.f32 %v10351_v5, %v12400_v43  ;;  %v2242_v8 = vpop.f32.mrb[25].mxu1 }
 0x1fc   : > { %v2243_v9 = vadd.f32 %v12400_v43, %v2242_v8  ;;  %v10352_v10 = vpop.f32.mrb[26].mxu1  ;;  %10489 = vmatprep.mubr.bf16.mxu0 %v2795_v6 }
 0x1fd   : > { %v2254_v12 = vadd.f32 %v10352_v10, %v12400_v43  ;;  %v2245_v13 = vpop.f32.mrb[27].mxu1  ;;  %10490 = vmatmul.mubr.bf16.gmra.mrb[148].mxu0 %v2796_v3  ;;  %v2683_v15 = vmax.f32 %v2251_v7, 0.0 }
 0x1fe   : > { %v2246_v14 = vadd.f32 %v12400_v43, %v2245_v13  ;;  %v2681_v17 = vmax.f32 %v2243_v9, 0.0 }
 0x1ff   : > { %v2684_v16 = vmax.f32 %v2254_v12, 0.0 }
 0x200   : > { %v2682_v18 = vmax.f32 %v2246_v14, 0.0 }
 0x201   : > { %v2798_v19 = vpack.c.bf16 %v2684_v16, %v2683_v15 }
 0x202   : > { %v10355_v11 = vpop.f32.mrb[28].mxu1  ;;  %v2797_v20 = vpack.c.bf16 %v2682_v18, %v2681_v17 }
 0x203   : > { %v2267_v21 = vadd.f32 %v10355_v11, %v12400_v43  ;;  %v2258_v23 = vpop.f32.mrb[29].mxu1 }
 0x204   : > { %v2259_v24 = vadd.f32 %v12400_v43, %v2258_v23  ;;  %v10356_v25 = vpop.f32.mrb[30].mxu1  ;;  %10493 = vmatprep.mubr.bf16.mxu0 %v2797_v20 }
 0x205   : > { %v2270_v26 = vadd.f32 %v10356_v25, %v12400_v43  ;;  %v2261_v27 = vpop.f32.mrb[31].mxu1  ;;  %10494 = vmatmul.mubr.bf16.gmra.mrb[152].mxu0 %v2798_v19  ;;  %v2687_v29 = vmax.f32 %v2267_v21, 0.0 }
 0x206   : > { %v2262_v28 = vadd.f32 %v12400_v43, %v2261_v27  ;;  %v2685_v31 = vmax.f32 %v2259_v24, 0.0 }
 0x207   : > { %v2688_v30 = vmax.f32 %v2270_v26, 0.0 }
 0x208   : > { %v2686_v32 = vmax.f32 %v2262_v28, 0.0 }
 0x209   : > { %v2800_v33 = vpack.c.bf16 %v2688_v30, %v2687_v29 }
 0x20a   : > { %v10359_v34 = vpop.f32.mrb[32].mxu1  ;;  %v2799_v35 = vpack.c.bf16 %v2686_v32, %v2685_v31 }
 0x20b   : > { %v2283_v36 = vadd.f32 %v10359_v34, %v12400_v43  ;;  %v2274_v37 = vpop.f32.mrb[33].mxu1 }
 0x20c   : > { %v2275_v38 = vadd.f32 %v12400_v43, %v2274_v37  ;;  %v10360_v39 = vpop.f32.mrb[34].mxu1  ;;  %10497 = vmatprep.mubr.bf16.mxu0 %v2799_v35 }
 0x20d   : > { %v2286_v40 = vadd.f32 %v10360_v39, %v12400_v43  ;;  %v2277_v41 = vpop.f32.mrb[35].mxu1  ;;  %10498 = vmatmul.mubr.bf16.gmra.mrb[156].mxu0 %v2800_v33  ;;  %v2691_v45 = vmax.f32 %v2283_v36, 0.0 }
 0x20e   : > { %v2278_v42 = vadd.f32 %v12400_v43, %v2277_v41  ;;  %v2689_v46 = vmax.f32 %v2275_v38, 0.0 }
 0x20f   : > { %v2692_v22 = vmax.f32 %v2286_v40, 0.0 }
 0x210   : > { %v2690_v47 = vmax.f32 %v2278_v42, 0.0 }
 0x211   : > { %v2802_v48 = vpack.c.bf16 %v2692_v22, %v2691_v45 }
 0x212   : > { %v10363_v49 = vpop.f32.mrb[36].mxu1  ;;  %v2801_v50 = vpack.c.bf16 %v2690_v47, %v2689_v46 }
 0x213   : > { %v2299_v51 = vadd.f32 %v10363_v49, %v12400_v43  ;;  %v2290_v52 = vpop.f32.mrb[37].mxu1 }
 0x214   : > { %v2291_v54 = vadd.f32 %v12400_v43, %v2290_v52  ;;  %v10364_v55 = vpop.f32.mrb[38].mxu1  ;;  %10501 = vmatprep.mubr.bf16.mxu0 %v2801_v50 }
 0x215   : > { %v2302_v56 = vadd.f32 %v10364_v55, %v12400_v43  ;;  %v2293_v57 = vpop.f32.mrb[39].mxu1  ;;  %10502 = vmatmul.mubr.bf16.gmra.mrb[160].mxu0 %v2802_v48  ;;  %v2695_v59 = vmax.f32 %v2299_v51, 0.0  ;;  %v11837_v48 = vld [vmem:[%s14232_s5 + $0x8] sm:$0xff]  }
 0x216   : > { %v2294_v58 = vadd.f32 %v12400_v43, %v2293_v57  ;;  %v2693_v61 = vmax.f32 %v2291_v54, 0.0  ;;  %10743 = vmatprep.subr.bf16.mxu0 %v11837_v48 }
 0x217   : > { %v2696_v60 = vmax.f32 %v2302_v56, 0.0  ;;  %10744 = vmatpush3.bf16.msra.mxu0 %v11837_v48 }
 0x218   : > { %v2694_v62 = vmax.f32 %v2294_v58, 0.0 }
 0x219   : > { %v2804_v63 = vpack.c.bf16 %v2696_v60, %v2695_v59 }
 0x21a   : > { %v10367_v0 = vpop.f32.mrb[40].mxu1  ;;  %v2803_v1 = vpack.c.bf16 %v2694_v62, %v2693_v61 }
 0x21b   : > { %v2315_v2 = vadd.f32 %v10367_v0, %v12400_v43  ;;  %v2306_v3 = vpop.f32.mrb[41].mxu1 }
 0x21c   : > { %v2307_v5 = vadd.f32 %v12400_v43, %v2306_v3  ;;  %v10368_v6 = vpop.f32.mrb[42].mxu1  ;;  %10505 = vmatprep.mubr.bf16.mxu0 %v2803_v1 }
 0x21d   : > { %v2318_v7 = vadd.f32 %v10368_v6, %v12400_v43  ;;  %v2309_v8 = vpop.f32.mrb[43].mxu1  ;;  %10506 = vmatmul.mubr.bf16.gmra.mrb[164].mxu0 %v2804_v63  ;;  %v2699_v10 = vmax.f32 %v2315_v2, 0.0 }
 0x21e   : > { %v2310_v9 = vadd.f32 %v12400_v43, %v2309_v8  ;;  %v2697_v13 = vmax.f32 %v2307_v5, 0.0 }
 0x21f   : > { %v2700_v12 = vmax.f32 %v2318_v7, 0.0 }
 0x220   : > { %v2698_v14 = vmax.f32 %v2310_v9, 0.0 }
 0x221   : > { %v2806_v15 = vpack.c.bf16 %v2700_v12, %v2699_v10 }
 0x222   : > { %v10371_v16 = vpop.f32.mrb[44].mxu1  ;;  %v2805_v17 = vpack.c.bf16 %v2698_v14, %v2697_v13 }
 0x223   : > { %v2331_v18 = vadd.f32 %v10371_v16, %v12400_v43  ;;  %v2322_v19 = vpop.f32.mrb[45].mxu1 }
 0x224   : > { %v2323_v11 = vadd.f32 %v12400_v43, %v2322_v19  ;;  %v10372_v20 = vpop.f32.mrb[46].mxu1  ;;  %10509 = vmatprep.mubr.bf16.mxu0 %v2805_v17 }
 0x225   : > { %v2334_v21 = vadd.f32 %v10372_v20, %v12400_v43  ;;  %v2325_v23 = vpop.f32.mrb[47].mxu1  ;;  %10510 = vmatmul.mubr.bf16.gmra.mrb[168].mxu0 %v2806_v15  ;;  %v2703_v25 = vmax.f32 %v2331_v18, 0.0 }
 0x226   : > { %v2326_v24 = vadd.f32 %v12400_v43, %v2325_v23  ;;  %v2701_v27 = vmax.f32 %v2323_v11, 0.0 }
 0x227   : > { %v2704_v26 = vmax.f32 %v2334_v21, 0.0 }
 0x228   : > { %v2702_v28 = vmax.f32 %v2326_v24, 0.0 }
 0x229   : > { %v2808_v29 = vpack.c.bf16 %v2704_v26, %v2703_v25 }
 0x22a   : > { %v10375_v30 = vpop.f32.mrb[48].mxu1  ;;  %v2807_v31 = vpack.c.bf16 %v2702_v28, %v2701_v27 }
 0x22b   : > { %v2347_v32 = vadd.f32 %v10375_v30, %v12400_v43  ;;  %v2338_v33 = vpop.f32.mrb[49].mxu1 }
 0x22c   : > { %v2339_v34 = vadd.f32 %v12400_v43, %v2338_v33  ;;  %v10376_v35 = vpop.f32.mrb[50].mxu1  ;;  %10513 = vmatprep.mubr.bf16.mxu0 %v2807_v31 }
 0x22d   : > { %v2350_v36 = vadd.f32 %v10376_v35, %v12400_v43  ;;  %v2341_v37 = vpop.f32.mrb[51].mxu1  ;;  %10514 = vmatmul.mubr.bf16.gmra.mrb[172].mxu0 %v2808_v29  ;;  %v2707_v39 = vmax.f32 %v2347_v32, 0.0 }
 0x22e   : > { %v2342_v38 = vadd.f32 %v12400_v43, %v2341_v37  ;;  %v2705_v41 = vmax.f32 %v2339_v34, 0.0 }
 0x22f   : > { %v2708_v40 = vmax.f32 %v2350_v36, 0.0 }
 0x230   : > { %v2706_v42 = vmax.f32 %v2342_v38, 0.0 }
 0x231   : > { %v2810_v44 = vpack.c.bf16 %v2708_v40, %v2707_v39 }
 0x232   : > { %v10379_v45 = vpop.f32.mrb[52].mxu1  ;;  %v2809_v22 = vpack.c.bf16 %v2706_v42, %v2705_v41 }
 0x233   : > { %v2363_v46 = vadd.f32 %v10379_v45, %v12400_v43  ;;  %v2354_v47 = vpop.f32.mrb[53].mxu1 }
 0x234   : > { %v2355_v49 = vadd.f32 %v12400_v43, %v2354_v47  ;;  %v10380_v50 = vpop.f32.mrb[54].mxu1  ;;  %10517 = vmatprep.mubr.bf16.mxu0 %v2809_v22 }
 0x235   : > { %v2366_v51 = vadd.f32 %v10380_v50, %v12400_v43  ;;  %v2357_v52 = vpop.f32.mrb[55].mxu1  ;;  %10518 = vmatmul.mubr.bf16.gmra.mrb[176].mxu0 %v2810_v44  ;;  %v2711_v54 = vmax.f32 %v2363_v46, 0.0  ;;  %v11838_v44 = vld [vmem:[%s14232_s5 + $0x10] sm:$0xff]  }
 0x236   : > { %v2358_v53 = vadd.f32 %v12400_v43, %v2357_v52  ;;  %v2709_v56 = vmax.f32 %v2355_v49, 0.0  ;;  %10745 = vmatprep.subr.bf16.mxu0 %v11838_v44 }
 0x237   : > { %v2712_v55 = vmax.f32 %v2366_v51, 0.0  ;;  %10746 = vmatpush3.bf16.msra.mxu0 %v11838_v44 }
 0x238   : > { %v2710_v57 = vmax.f32 %v2358_v53, 0.0 }
 0x239   : > { %v2812_v58 = vpack.c.bf16 %v2712_v55, %v2711_v54 }
 0x23a   : > { %v10383_v59 = vpop.f32.mrb[56].mxu1  ;;  %v2811_v60 = vpack.c.bf16 %v2710_v57, %v2709_v56 }
 0x23b   : > { %v2379_v61 = vadd.f32 %v10383_v59, %v12400_v43  ;;  %v2370_v62 = vpop.f32.mrb[57].mxu1 }
 0x23c   : > { %v2371_v63 = vadd.f32 %v12400_v43, %v2370_v62  ;;  %v10384_v0 = vpop.f32.mrb[58].mxu1  ;;  %10521 = vmatprep.mubr.bf16.mxu0 %v2811_v60 }
 0x23d   : > { %v2382_v1 = vadd.f32 %v10384_v0, %v12400_v43  ;;  %v2373_v2 = vpop.f32.mrb[59].mxu1  ;;  %10522 = vmatmul.mubr.bf16.gmra.mrb[180].mxu0 %v2812_v58  ;;  %v2715_v5 = vmax.f32 %v2379_v61, 0.0 }
 0x23e   : > { %v2374_v3 = vadd.f32 %v12400_v43, %v2373_v2  ;;  %v2713_v7 = vmax.f32 %v2371_v63, 0.0 }
 0x23f   : > { %v2716_v6 = vmax.f32 %v2382_v1, 0.0 }
 0x240   : > { %v2714_v8 = vmax.f32 %v2374_v3, 0.0 }
 0x241   : > { %v2814_v9 = vpack.c.bf16 %v2716_v6, %v2715_v5 }
 0x242   : > { %v10387_v10 = vpop.f32.mrb[60].mxu1  ;;  %v2813_v12 = vpack.c.bf16 %v2714_v8, %v2713_v7 }
 0x243   : > { %v2395_v13 = vadd.f32 %v10387_v10, %v12400_v43  ;;  %v2386_v14 = vpop.f32.mrb[61].mxu1 }
 0x244   : > { %v2387_v15 = vadd.f32 %v12400_v43, %v2386_v14  ;;  %v10388_v16 = vpop.f32.mrb[62].mxu1  ;;  %10525 = vmatprep.mubr.bf16.mxu0 %v2813_v12 }
 0x245   : > { %v2398_v17 = vadd.f32 %v10388_v16, %v12400_v43  ;;  %v2389_v18 = vpop.f32.mrb[63].mxu1  ;;  %10526 = vmatmul.mubr.bf16.gmra.mrb[184].mxu0 %v2814_v9  ;;  %v2719_v11 = vmax.f32 %v2395_v13, 0.0 }
 0x246   : > { %v2390_v19 = vadd.f32 %v12400_v43, %v2389_v18  ;;  %v2717_v21 = vmax.f32 %v2387_v15, 0.0 }
 0x247   : > { %v2720_v20 = vmax.f32 %v2398_v17, 0.0 }
 0x248   : > { %v2718_v23 = vmax.f32 %v2390_v19, 0.0 }
 0x249   : > { %v2816_v24 = vpack.c.bf16 %v2720_v20, %v2719_v11 }
 0x24a   : > { %v10391_v25 = vpop.f32.mrb[64].mxu1  ;;  %v2815_v26 = vpack.c.bf16 %v2718_v23, %v2717_v21 }
 0x24b   : > { %v2411_v27 = vadd.f32 %v10391_v25, %v12400_v43  ;;  %v2402_v28 = vpop.f32.mrb[65].mxu1 }
 0x24c   : > { %v2403_v29 = vadd.f32 %v12400_v43, %v2402_v28  ;;  %v10392_v30 = vpop.f32.mrb[66].mxu1  ;;  %10529 = vmatprep.mubr.bf16.mxu0 %v2815_v26 }
 0x24d   : > { %v2414_v31 = vadd.f32 %v10392_v30, %v12400_v43  ;;  %v2405_v32 = vpop.f32.mrb[67].mxu1  ;;  %10530 = vmatmul.mubr.bf16.gmra.mrb[188].mxu0 %v2816_v24  ;;  %v2723_v34 = vmax.f32 %v2411_v27, 0.0 }
 0x24e   : > { %v2406_v33 = vadd.f32 %v12400_v43, %v2405_v32  ;;  %v2721_v36 = vmax.f32 %v2403_v29, 0.0 }
 0x24f   : > { %v2724_v35 = vmax.f32 %v2414_v31, 0.0 }
 0x250   : > { %v2722_v37 = vmax.f32 %v2406_v33, 0.0 }
 0x251   : > { %v2818_v38 = vpack.c.bf16 %v2724_v35, %v2723_v34 }
 0x252   : > { %v10395_v39 = vpop.f32.mrb[68].mxu1  ;;  %v2817_v40 = vpack.c.bf16 %v2722_v37, %v2721_v36 }
 0x253   : > { %v2427_v41 = vadd.f32 %v10395_v39, %v12400_v43  ;;  %v2418_v42 = vpop.f32.mrb[69].mxu1 }
 0x254   : > { %v2419_v45 = vadd.f32 %v12400_v43, %v2418_v42  ;;  %v10396_v22 = vpop.f32.mrb[70].mxu1  ;;  %10533 = vmatprep.mubr.bf16.mxu0 %v2817_v40 }
 0x255   : > { %v2430_v46 = vadd.f32 %v10396_v22, %v12400_v43  ;;  %v2421_v47 = vpop.f32.mrb[71].mxu1  ;;  %10534 = vmatmul.mubr.bf16.gmra.mrb[192].mxu0 %v2818_v38  ;;  %v2727_v49 = vmax.f32 %v2427_v41, 0.0  ;;  %v11839_v38 = vld [vmem:[%s14232_s5 + $0x18] sm:$0xff]  }
 0x256   : > { %v2422_v48 = vadd.f32 %v12400_v43, %v2421_v47  ;;  %v2725_v51 = vmax.f32 %v2419_v45, 0.0  ;;  %10747 = vmatprep.subr.bf16.mxu0 %v11839_v38 }
 0x257   : > { %v2728_v50 = vmax.f32 %v2430_v46, 0.0  ;;  %10748 = vmatpush3.bf16.msra.mxu0 %v11839_v38 }
 0x258   : > { %v2726_v52 = vmax.f32 %v2422_v48, 0.0 }
 0x259   : > { %v2820_v53 = vpack.c.bf16 %v2728_v50, %v2727_v49 }
 0x25a   : > { %v10399_v54 = vpop.f32.mrb[72].mxu1  ;;  %v2819_v55 = vpack.c.bf16 %v2726_v52, %v2725_v51 }
 0x25b   : > { %v2443_v56 = vadd.f32 %v10399_v54, %v12400_v43  ;;  %v2434_v57 = vpop.f32.mrb[73].mxu1 }
 0x25c   : > { %v2435_v58 = vadd.f32 %v12400_v43, %v2434_v57  ;;  %v10400_v59 = vpop.f32.mrb[74].mxu1  ;;  %10537 = vmatprep.mubr.bf16.mxu0 %v2819_v55 }
 0x25d   : > { %v2446_v60 = vadd.f32 %v10400_v59, %v12400_v43  ;;  %v2437_v61 = vpop.f32.mrb[75].mxu1  ;;  %10538 = vmatmul.mubr.bf16.gmra.mrb[196].mxu0 %v2820_v53  ;;  %v2731_v63 = vmax.f32 %v2443_v56, 0.0 }
 0x25e   : > { %v2438_v62 = vadd.f32 %v12400_v43, %v2437_v61  ;;  %v2729_v1 = vmax.f32 %v2435_v58, 0.0 }
 0x25f   : > { %v2732_v0 = vmax.f32 %v2446_v60, 0.0 }
 0x260   : > { %v2730_v2 = vmax.f32 %v2438_v62, 0.0 }
 0x261   : > { %v2822_v3 = vpack.c.bf16 %v2732_v0, %v2731_v63 }
 0x262   : > { %v10403_v5 = vpop.f32.mrb[76].mxu1  ;;  %v2821_v6 = vpack.c.bf16 %v2730_v2, %v2729_v1 }
 0x263   : > { %v2459_v7 = vadd.f32 %v10403_v5, %v12400_v43  ;;  %v2450_v8 = vpop.f32.mrb[77].mxu1 }
 0x264   : > { %v2451_v9 = vadd.f32 %v12400_v43, %v2450_v8  ;;  %v10404_v10 = vpop.f32.mrb[78].mxu1  ;;  %10541 = vmatprep.mubr.bf16.mxu0 %v2821_v6 }
 0x265   : > { %v2462_v12 = vadd.f32 %v10404_v10, %v12400_v43  ;;  %v2453_v13 = vpop.f32.mrb[79].mxu1  ;;  %10542 = vmatmul.mubr.bf16.gmra.mrb[200].mxu0 %v2822_v3  ;;  %v2735_v15 = vmax.f32 %v2459_v7, 0.0 }
 0x266   : > { %v2454_v14 = vadd.f32 %v12400_v43, %v2453_v13  ;;  %v2733_v17 = vmax.f32 %v2451_v9, 0.0 }
 0x267   : > { %v2736_v16 = vmax.f32 %v2462_v12, 0.0 }
 0x268   : > { %v2734_v18 = vmax.f32 %v2454_v14, 0.0 }
 0x269   : > { %v2824_v19 = vpack.c.bf16 %v2736_v16, %v2735_v15 }
 0x26a   : > { %v10407_v11 = vpop.f32.mrb[80].mxu1  ;;  %v2823_v20 = vpack.c.bf16 %v2734_v18, %v2733_v17 }
 0x26b   : > { %v2475_v21 = vadd.f32 %v10407_v11, %v12400_v43  ;;  %v2466_v23 = vpop.f32.mrb[81].mxu1 }
 0x26c   : > { %v2467_v24 = vadd.f32 %v12400_v43, %v2466_v23  ;;  %v10408_v25 = vpop.f32.mrb[82].mxu1  ;;  %10545 = vmatprep.mubr.bf16.mxu0 %v2823_v20 }
 0x26d   : > { %v2478_v26 = vadd.f32 %v10408_v25, %v12400_v43  ;;  %v2469_v27 = vpop.f32.mrb[83].mxu1  ;;  %10546 = vmatmul.mubr.bf16.gmra.mrb[204].mxu0 %v2824_v19  ;;  %v2739_v29 = vmax.f32 %v2475_v21, 0.0 }
 0x26e   : > { %v2470_v28 = vadd.f32 %v12400_v43, %v2469_v27  ;;  %v2737_v31 = vmax.f32 %v2467_v24, 0.0 }
 0x26f   : > { %v2740_v30 = vmax.f32 %v2478_v26, 0.0 }
 0x270   : > { %v2738_v32 = vmax.f32 %v2470_v28, 0.0 }
 0x271   : > { %v2826_v33 = vpack.c.bf16 %v2740_v30, %v2739_v29 }
 0x272   : > { %v10411_v34 = vpop.f32.mrb[84].mxu1  ;;  %v2825_v35 = vpack.c.bf16 %v2738_v32, %v2737_v31 }
 0x273   : > { %v2491_v36 = vadd.f32 %v10411_v34, %v12400_v43  ;;  %v2482_v37 = vpop.f32.mrb[85].mxu1 }
 0x274   : > { %v2483_v39 = vadd.f32 %v12400_v43, %v2482_v37  ;;  %v10412_v40 = vpop.f32.mrb[86].mxu1  ;;  %10549 = vmatprep.mubr.bf16.mxu0 %v2825_v35 }
 0x275   : > { %v2494_v41 = vadd.f32 %v10412_v40, %v12400_v43  ;;  %v2485_v42 = vpop.f32.mrb[87].mxu1  ;;  %10550 = vmatmul.mubr.bf16.gmra.mrb[208].mxu0 %v2826_v33  ;;  %v2743_v45 = vmax.f32 %v2491_v36, 0.0  ;;  %v11840_v33 = vld [vmem:[%s14232_s5 + $0x20] sm:$0xff]  }
 0x276   : > { %v2486_v44 = vadd.f32 %v12400_v43, %v2485_v42  ;;  %v2741_v46 = vmax.f32 %v2483_v39, 0.0  ;;  %10749 = vmatprep.subr.bf16.mxu0 %v11840_v33 }
 0x277   : > { %v2744_v22 = vmax.f32 %v2494_v41, 0.0  ;;  %10750 = vmatpush3.bf16.msra.mxu0 %v11840_v33 }
 0x278   : > { %v2742_v47 = vmax.f32 %v2486_v44, 0.0 }
 0x279   : > { %v2828_v48 = vpack.c.bf16 %v2744_v22, %v2743_v45 }
 0x27a   : > { %v10415_v49 = vpop.f32.mrb[88].mxu1  ;;  %v2827_v50 = vpack.c.bf16 %v2742_v47, %v2741_v46  ;;  %v12554_v46 = vld [vmem:[%s14239_s12] ss:$0 sm:$0xff] }
 0x27b   : > { %v2507_v51 = vadd.f32 %v10415_v49, %v12400_v43  ;;  %v2498_v52 = vpop.f32.mrb[89].mxu1 }
 0x27c   : > { %v2499_v53 = vadd.f32 %v12400_v43, %v2498_v52  ;;  %v10416_v54 = vpop.f32.mrb[90].mxu1  ;;  %10553 = vmatprep.mubr.bf16.mxu0 %v2827_v50 }
 0x27d   : > { %v2510_v55 = vadd.f32 %v10416_v54, %v12400_v43  ;;  %v2501_v56 = vpop.f32.mrb[91].mxu1  ;;  %10554 = vmatmul.mubr.bf16.gmra.mrb[212].mxu0 %v2828_v48  ;;  %v2747_v58 = vmax.f32 %v2507_v51, 0.0 }
 0x27e   : > { %v2502_v57 = vadd.f32 %v12400_v43, %v2501_v56  ;;  %v2745_v60 = vmax.f32 %v2499_v53, 0.0 }
 0x27f   : > { %v2748_v59 = vmax.f32 %v2510_v55, 0.0 }
 0x280   : > { %v2746_v61 = vmax.f32 %v2502_v57, 0.0 }
 0x281   : > { %v2830_v62 = vpack.c.bf16 %v2748_v59, %v2747_v58 }
 0x282   : > { %v10419_v63 = vpop.f32.mrb[92].mxu1  ;;  %v2829_v0 = vpack.c.bf16 %v2746_v61, %v2745_v60 }
 0x283   : > { %v2523_v1 = vadd.f32 %v10419_v63, %v12400_v43  ;;  %v2514_v2 = vpop.f32.mrb[93].mxu1 }
 0x284   : > { %v2515_v3 = vadd.f32 %v12400_v43, %v2514_v2  ;;  %v10420_v5 = vpop.f32.mrb[94].mxu1  ;;  %10557 = vmatprep.mubr.bf16.mxu0 %v2829_v0 }
 0x285   : > { %v2526_v6 = vadd.f32 %v10420_v5, %v12400_v43  ;;  %v2517_v7 = vpop.f32.mrb[95].mxu1  ;;  %10558 = vmatmul.mubr.bf16.gmra.mrb[216].mxu0 %v2830_v62  ;;  %v2751_v9 = vmax.f32 %v2523_v1, 0.0 }
 0x286   : > { %v2518_v8 = vadd.f32 %v12400_v43, %v2517_v7  ;;  %v2749_v12 = vmax.f32 %v2515_v3, 0.0  ;;  %v12567_v3 = vld [vmem:[%s14240_s13] ss:$0 sm:$0xff] }
 0x287   : > { %v2752_v10 = vmax.f32 %v2526_v6, 0.0 }
 0x288   : > { %v2750_v13 = vmax.f32 %v2518_v8, 0.0 }
 0x289   : > { %v2832_v14 = vpack.c.bf16 %v2752_v10, %v2751_v9 }
 0x28a   : > { %v10423_v15 = vpop.f32.mrb[96].mxu1  ;;  %v2831_v16 = vpack.c.bf16 %v2750_v13, %v2749_v12 }
 0x28b   : > { %v2539_v17 = vadd.f32 %v10423_v15, %v12400_v43  ;;  %v2530_v18 = vpop.f32.mrb[97].mxu1 }
 0x28c   : > { %v2531_v19 = vadd.f32 %v12400_v43, %v2530_v18  ;;  %v10424_v11 = vpop.f32.mrb[98].mxu1  ;;  %10561 = vmatprep.mubr.bf16.mxu0 %v2831_v16 }
 0x28d   : > { %v2542_v20 = vadd.f32 %v10424_v11, %v12400_v43  ;;  %v2533_v21 = vpop.f32.mrb[99].mxu1  ;;  %10562 = vmatmul.mubr.bf16.gmra.mrb[220].mxu0 %v2832_v14  ;;  %v2755_v24 = vmax.f32 %v2539_v17, 0.0 }
 0x28e   : > { %v2534_v23 = vadd.f32 %v12400_v43, %v2533_v21  ;;  %v2753_v26 = vmax.f32 %v2531_v19, 0.0 }
 0x28f   : > { %v2756_v25 = vmax.f32 %v2542_v20, 0.0 }
 0x290   : > { %v2754_v27 = vmax.f32 %v2534_v23, 0.0 }
 0x291   : > { %v2834_v28 = vpack.c.bf16 %v2756_v25, %v2755_v24 }
 0x292   : > { %v10427_v29 = vpop.f32.mrb[100].mxu1  ;;  %v2833_v30 = vpack.c.bf16 %v2754_v27, %v2753_v26 }
 0x293   : > { %v2555_v31 = vadd.f32 %v10427_v29, %v12400_v43  ;;  %v2546_v32 = vpop.f32.mrb[101].mxu1 }
 0x294   : > { %v2547_v34 = vadd.f32 %v12400_v43, %v2546_v32  ;;  %v10428_v35 = vpop.f32.mrb[102].mxu1  ;;  %10565 = vmatprep.mubr.bf16.mxu0 %v2833_v30 }
 0x295   : > { %v2558_v36 = vadd.f32 %v10428_v35, %v12400_v43  ;;  %v2549_v37 = vpop.f32.mrb[103].mxu1  ;;  %10566 = vmatmul.mubr.bf16.gmra.mrb[224].mxu0 %v2834_v28  ;;  %v2759_v39 = vmax.f32 %v2555_v31, 0.0 }
 0x296   : > { %v2550_v38 = vadd.f32 %v12400_v43, %v2549_v37  ;;  %v2757_v41 = vmax.f32 %v2547_v34, 0.0 }
 0x297   : > { %v2760_v40 = vmax.f32 %v2558_v36, 0.0 }
 0x298   : > { %v2758_v42 = vmax.f32 %v2550_v38, 0.0 }
 0x299   : > { %v2836_v44 = vpack.c.bf16 %v2760_v40, %v2759_v39 }
 0x29a   : > { %v10431_v45 = vpop.f32.mrb[104].mxu1  ;;  %v2835_v22 = vpack.c.bf16 %v2758_v42, %v2757_v41 }
 0x29b   : > { %v2571_v47 = vadd.f32 %v12554_v46, %v10431_v45  ;;  %v2562_v48 = vpop.f32.mrb[105].mxu1 }
 0x29c   : > { %v2563_v49 = vadd.f32 %v12554_v46, %v2562_v48  ;;  %v10432_v50 = vpop.f32.mrb[106].mxu1  ;;  %10569 = vmatprep.mubr.bf16.mxu0 %v2835_v22 }
 0x29d   : > { %v2574_v43 = vadd.f32 %v12554_v46, %v10432_v50  ;;  %v2565_v51 = vpop.f32.mrb[107].mxu1  ;;  %10570 = vmatmul.mubr.bf16.gmra.mrb[228].mxu0 %v2836_v44  ;;  %v2763_v53 = vmax.f32 %v2571_v47, 0.0 }
 0x29e   : > { %v2566_v52 = vadd.f32 %v12554_v46, %v2565_v51  ;;  %v2761_v55 = vmax.f32 %v2563_v49, 0.0 }
 0x29f   : > { %v2764_v54 = vmax.f32 %v2574_v43, 0.0  ;;  %v11841_v43 = vld [vmem:[%s14232_s5 + $0x28] sm:$0xff]  }
 0x2a0   : > { %v2762_v56 = vmax.f32 %v2566_v52, 0.0  ;;  %10751 = vmatprep.subr.bf16.mxu0 %v11841_v43 }
 0x2a1   : > { %v2838_v57 = vpack.c.bf16 %v2764_v54, %v2763_v53  ;;  %10752 = vmatpush3.bf16.msra.mxu0 %v11841_v43 }
 0x2a2   : > { %v10435_v58 = vpop.f32.mrb[108].mxu1  ;;  %v2837_v59 = vpack.c.bf16 %v2762_v56, %v2761_v55 }
 0x2a3   : > { %v2587_v60 = vadd.f32 %v12554_v46, %v10435_v58  ;;  %v2578_v61 = vpop.f32.mrb[109].mxu1 }
 0x2a4   : > { %v2579_v62 = vadd.f32 %v12554_v46, %v2578_v61  ;;  %v10436_v63 = vpop.f32.mrb[110].mxu1  ;;  %10573 = vmatprep.mubr.bf16.mxu0 %v2837_v59 }
 0x2a5   : > { %v2590_v0 = vadd.f32 %v12554_v46, %v10436_v63  ;;  %v2581_v1 = vpop.f32.mrb[111].mxu1  ;;  %10574 = vmatmul.mubr.bf16.gmra.mrb[232].mxu0 %v2838_v57  ;;  %v2767_v5 = vmax.f32 %v2587_v60, 0.0 }
 0x2a6   : > { %v2582_v2 = vadd.f32 %v12554_v46, %v2581_v1  ;;  %v2765_v8 = vmax.f32 %v2579_v62, 0.0 }
 0x2a7   : > { %v2768_v6 = vmax.f32 %v2590_v0, 0.0 }
 0x2a8   : > { %v10471_v7 = vpop.f32.mrb[128].mxu0  ;;  %v2766_v9 = vmax.f32 %v2582_v2, 0.0 }
 0x2a9   : > { %v2963_v10 = vadd.f32 %v10471_v7, %v12567_v3  ;;  %v2954_v12 = vpop.f32.mrb[129].mxu0  ;;  %v2840_v13 = vpack.c.bf16 %v2768_v6, %v2767_v5 }
 0x2aa   : > { %v2955_v14 = vadd.f32 %v12567_v3, %v2954_v12  ;;  %v10439_v15 = vpop.f32.mrb[112].mxu1  ;;  %v10472_v16 = vpop.f32.mrb[130].mxu0  ;;  %v2839_v17 = vpack.c.bf16 %v2766_v9, %v2765_v8 }
 0x2ab   : > { %v2603_v18 = vadd.f32 %v12554_v46, %v10439_v15  ;;  %v2966_v19 = vadd.f32 %v10472_v16, %v12567_v3  ;;  %v2594_v11 = vpop.f32.mrb[113].mxu1  ;;  %v2957_v20 = vpop.f32.mrb[131].mxu0  ;;  %v3467_v25 = vmax.f32 %v2963_v10, 0.0 }
 0x2ac   : > { %v2595_v21 = vadd.f32 %v12554_v46, %v2594_v11  ;;  %v2958_v23 = vadd.f32 %v12567_v3, %v2957_v20  ;;  %v10440_v24 = vpop.f32.mrb[114].mxu1  ;;  %10577 = vmatprep.mubr.bf16.mxu0 %v2839_v17  ;;  %v3465_v29 = vmax.f32 %v2955_v14, 0.0 }
 0x2ad   : > { %v3468_v26 = vmax.f32 %v2966_v19, 0.0  ;;  %v2606_v27 = vadd.f32 %v12554_v46, %v10440_v24  ;;  %v2597_v28 = vpop.f32.mrb[115].mxu1  ;;  %10578 = vmatmul.mubr.bf16.gmra.mrb[236].mxu0 %v2840_v13  ;;  %v2771_v33 = vmax.f32 %v2603_v18, 0.0 }
 0x2ae   : > { %v3466_v30 = vmax.f32 %v2958_v23, 0.0  ;;  %v2598_v31 = vadd.f32 %v12554_v46, %v2597_v28  ;;  %v2769_v37 = vmax.f32 %v2595_v21, 0.0 }
 0x2af   : > { %v3594_v32 = vpack.c.bf16 %v3468_v26, %v3467_v25  ;;  %v2772_v34 = vmax.f32 %v2606_v27, 0.0 }
 0x2b0   : > { %v10475_v35 = vpop.f32.mrb[132].mxu0  ;;  %v3593_v36 = vpack.c.bf16 %v3466_v30, %v3465_v29  ;;  %v2770_v38 = vmax.f32 %v2598_v31, 0.0 }
 0x2b1   : > { %v2979_v39 = vadd.f32 %v10475_v35, %v12567_v3  ;;  %v2970_v40 = vpop.f32.mrb[133].mxu0  ;;  %v2842_v41 = vpack.c.bf16 %v2772_v34, %v2771_v33 }
 0x2b2   : > { %v2971_v42 = vadd.f32 %v12567_v3, %v2970_v40  ;;  %v10443_v44 = vpop.f32.mrb[116].mxu1  ;;  %v10476_v45 = vpop.f32.mrb[134].mxu0  ;;  %10613 = vmatprep.mubr.bf16.mxu1 %v3593_v36  ;;  %v2841_v22 = vpack.c.bf16 %v2770_v38, %v2769_v37 }
 0x2b3   : > { %v2619_v47 = vadd.f32 %v12554_v46, %v10443_v44  ;;  %v2982_v48 = vadd.f32 %v10476_v45, %v12567_v3  ;;  %v2610_v49 = vpop.f32.mrb[117].mxu1  ;;  %v2973_v50 = vpop.f32.mrb[135].mxu0  ;;  %10614 = vmatmul.mubr.bf16.vlgmr.msra.gmra.mrb[128].mxu1 %v3594_v32  ;;  %v3471_v54 = vmax.f32 %v2979_v39, 0.0 }
 0x2b4   : > { %v2611_v51 = vadd.f32 %v12554_v46, %v2610_v49  ;;  %v2974_v52 = vadd.f32 %v12567_v3, %v2973_v50  ;;  %v10444_v53 = vpop.f32.mrb[118].mxu1  ;;  %10581 = vmatprep.mubr.bf16.mxu0 %v2841_v22  ;;  %v3469_v58 = vmax.f32 %v2971_v42, 0.0 }
 0x2b5   : > { %v3472_v55 = vmax.f32 %v2982_v48, 0.0  ;;  %v2622_v56 = vadd.f32 %v12554_v46, %v10444_v53  ;;  %v2613_v57 = vpop.f32.mrb[119].mxu1  ;;  %10582 = vmatmul.mubr.bf16.gmra.mrb[240].mxu0 %v2842_v41  ;;  %v2775_v62 = vmax.f32 %v2619_v47, 0.0 }
 0x2b6   : > { %v3470_v59 = vmax.f32 %v2974_v52, 0.0  ;;  %v2614_v60 = vadd.f32 %v12554_v46, %v2613_v57  ;;  %v2773_v2 = vmax.f32 %v2611_v51, 0.0 }
 0x2b7   : > { %v3596_v61 = vpack.c.bf16 %v3472_v55, %v3471_v54  ;;  %v2776_v63 = vmax.f32 %v2622_v56, 0.0 }
 0x2b8   : > { %v10479_v0 = vpop.f32.mrb[136].mxu0  ;;  %v3595_v1 = vpack.c.bf16 %v3470_v59, %v3469_v58  ;;  %v2774_v5 = vmax.f32 %v2614_v60, 0.0 }
 0x2b9   : > { %v2995_v6 = vadd.f32 %v10479_v0, %v12567_v3  ;;  %v2986_v7 = vpop.f32.mrb[137].mxu0  ;;  %v2844_v8 = vpack.c.bf16 %v2776_v63, %v2775_v62 }
 0x2ba   : > { %v2987_v9 = vadd.f32 %v12567_v3, %v2986_v7  ;;  %v10447_v10 = vpop.f32.mrb[120].mxu1  ;;  %v10480_v12 = vpop.f32.mrb[138].mxu0  ;;  %10617 = vmatprep.mubr.bf16.mxu1 %v3595_v1  ;;  %v2843_v13 = vpack.c.bf16 %v2774_v5, %v2773_v2 }
 0x2bb   : > { %v2635_v14 = vadd.f32 %v12554_v46, %v10447_v10  ;;  %v2998_v15 = vadd.f32 %v10480_v12, %v12567_v3  ;;  %v2626_v16 = vpop.f32.mrb[121].mxu1  ;;  %v2989_v17 = vpop.f32.mrb[139].mxu0  ;;  %10618 = vmatmul.mubr.bf16.gmra.mrb[132].mxu1 %v3596_v61  ;;  %v3475_v20 = vmax.f32 %v2995_v6, 0.0 }
 0x2bc   : > { %v2627_v18 = vadd.f32 %v12554_v46, %v2626_v16  ;;  %v2990_v19 = vadd.f32 %v12567_v3, %v2989_v17  ;;  %v10448_v11 = vpop.f32.mrb[122].mxu1  ;;  %10585 = vmatprep.mubr.bf16.mxu0 %v2843_v13  ;;  %v3473_v25 = vmax.f32 %v2987_v9, 0.0 }
 0x2bd   : > { %v3476_v21 = vmax.f32 %v2998_v15, 0.0  ;;  %v2638_v23 = vadd.f32 %v12554_v46, %v10448_v11  ;;  %v2629_v24 = vpop.f32.mrb[123].mxu1  ;;  %10586 = vmatmul.mubr.bf16.gmra.mrb[244].mxu0 %v2844_v8  ;;  %v2779_v29 = vmax.f32 %v2635_v14, 0.0 }
 0x2be   : > { %v3474_v26 = vmax.f32 %v2990_v19, 0.0  ;;  %v2630_v27 = vadd.f32 %v12554_v46, %v2629_v24  ;;  %v2777_v33 = vmax.f32 %v2627_v18, 0.0 }
 0x2bf   : > { %v3598_v28 = vpack.c.bf16 %v3476_v21, %v3475_v20  ;;  %v2780_v30 = vmax.f32 %v2638_v23, 0.0  ;;  %v11842_v23 = vld [vmem:[%s14232_s5 + $0x30] sm:$0xff]  }
 0x2c0   : > { %v10483_v31 = vpop.f32.mrb[140].mxu0  ;;  %v3597_v32 = vpack.c.bf16 %v3474_v26, %v3473_v25  ;;  %v2778_v34 = vmax.f32 %v2630_v27, 0.0  ;;  %10753 = vmatprep.subr.bf16.mxu0 %v11842_v23 }
 0x2c1   : > { %v3011_v35 = vadd.f32 %v10483_v31, %v12567_v3  ;;  %v3002_v36 = vpop.f32.mrb[141].mxu0  ;;  %v2846_v37 = vpack.c.bf16 %v2780_v30, %v2779_v29  ;;  %10754 = vmatpush3.bf16.msra.mxu0 %v11842_v23 }
 0x2c2   : > { %v3003_v38 = vadd.f32 %v12567_v3, %v3002_v36  ;;  %v10451_v39 = vpop.f32.mrb[124].mxu1  ;;  %v10484_v40 = vpop.f32.mrb[142].mxu0  ;;  %10621 = vmatprep.mubr.bf16.mxu1 %v3597_v32  ;;  %v2845_v41 = vpack.c.bf16 %v2778_v34, %v2777_v33 }
 0x2c3   : > { %v2651_v42 = vadd.f32 %v12554_v46, %v10451_v39  ;;  %v3014_v44 = vadd.f32 %v10484_v40, %v12567_v3  ;;  %v2642_v45 = vpop.f32.mrb[125].mxu1  ;;  %v3005_v22 = vpop.f32.mrb[143].mxu0  ;;  %10622 = vmatmul.mubr.bf16.gmra.mrb[136].mxu1 %v3598_v28  ;;  %v3479_v50 = vmax.f32 %v3011_v35, 0.0 }
 0x2c4   : > { %v2643_v47 = vadd.f32 %v12554_v46, %v2642_v45  ;;  %v3006_v48 = vadd.f32 %v12567_v3, %v3005_v22  ;;  %v10452_v49 = vpop.f32.mrb[126].mxu1  ;;  %10589 = vmatprep.mubr.bf16.mxu0 %v2845_v41  ;;  %v3477_v53 = vmax.f32 %v3003_v38, 0.0 }
 0x2c5   : > { %v3480_v43 = vmax.f32 %v3014_v44, 0.0  ;;  %v2654_v51 = vadd.f32 %v12554_v46, %v10452_v49  ;;  %v2645_v52 = vpop.f32.mrb[127].mxu1  ;;  %10590 = vmatmul.mubr.bf16.gmra.mrb[248].mxu0 %v2846_v37  ;;  %v2783_v57 = vmax.f32 %v2651_v42, 0.0 }
 0x2c6   : > { %v3478_v54 = vmax.f32 %v3006_v48, 0.0  ;;  %v2646_v55 = vadd.f32 %v12554_v46, %v2645_v52  ;;  %v2781_v61 = vmax.f32 %v2643_v47, 0.0 }
 0x2c7   : > { %v3600_v56 = vpack.c.bf16 %v3480_v43, %v3479_v50  ;;  %v2784_v58 = vmax.f32 %v2654_v51, 0.0 }
 0x2c8   : > { %v10487_v59 = vpop.f32.mrb[144].mxu0  ;;  %v3599_v60 = vpack.c.bf16 %v3478_v54, %v3477_v53  ;;  %v2782_v62 = vmax.f32 %v2646_v55, 0.0 }
 0x2c9   : > { %v3027_v63 = vadd.f32 %v10487_v59, %v12567_v3  ;;  %v3018_v0 = vpop.f32.mrb[145].mxu0  ;;  %v2848_v1 = vpack.c.bf16 %v2784_v58, %v2783_v57 }
 0x2ca   : > { %v3019_v2 = vadd.f32 %v12567_v3, %v3018_v0  ;;  %v10488_v5 = vpop.f32.mrb[146].mxu0  ;;  %10625 = vmatprep.mubr.bf16.mxu1 %v3599_v60  ;;  %v2847_v6 = vpack.c.bf16 %v2782_v62, %v2781_v61 }
 0x2cb   : > { %v3030_v7 = vadd.f32 %v10488_v5, %v12567_v3  ;;  %v3021_v8 = vpop.f32.mrb[147].mxu0  ;;  %10626 = vmatmul.mubr.bf16.gmra.mrb[140].mxu1 %v3600_v56  ;;  %v3483_v9 = vmax.f32 %v3027_v63, 0.0 }
 0x2cc   : > { %v3022_v46 = vadd.f32 %v12567_v3, %v3021_v8  ;;  %10593 = vmatprep.mubr.bf16.mxu0 %v2847_v6  ;;  %v3481_v12 = vmax.f32 %v3019_v2, 0.0 }
 0x2cd   : > { %v3484_v10 = vmax.f32 %v3030_v7, 0.0  ;;  %10594 = vmatmul.mubr.bf16.gmra.mrb[252].mxu0 %v2848_v1 }
 0x2ce   : > { %v3482_v13 = vmax.f32 %v3022_v46, 0.0  ;;  %v11843_v46 = vld [vmem:[%s14234_s7] sm:$0xff]  }
 0x2cf   : > { %v3602_v14 = vpack.c.bf16 %v3484_v10, %v3483_v9  ;;  %10885 = vmatprep.subr.bf16.mxu1 %v11843_v46 }
 0x2d0   : > { %v10491_v15 = vpop.f32.mrb[148].mxu0  ;;  %v3601_v16 = vpack.c.bf16 %v3482_v13, %v3481_v12  ;;  %10886 = vmatpush3.bf16.msra.mxu1 %v11843_v46 }
 0x2d1   : > { %v3043_v17 = vadd.f32 %v10491_v15, %v12567_v3  ;;  %v3034_v18 = vpop.f32.mrb[149].mxu0 }
 0x2d2   : > { %v3035_v19 = vadd.f32 %v12567_v3, %v3034_v18  ;;  %v10492_v11 = vpop.f32.mrb[150].mxu0  ;;  %10629 = vmatprep.mubr.bf16.mxu1 %v3601_v16 }
 0x2d3   : > { %v3046_v20 = vadd.f32 %v10492_v11, %v12567_v3  ;;  %v3037_v21 = vpop.f32.mrb[151].mxu0  ;;  %10630 = vmatmul.mubr.bf16.gmra.mrb[144].mxu1 %v3602_v14  ;;  %v3487_v25 = vmax.f32 %v3043_v17, 0.0 }
 0x2d4   : > { %v3038_v24 = vadd.f32 %v12567_v3, %v3037_v21  ;;  %v3485_v27 = vmax.f32 %v3035_v19, 0.0  ;;  %v11844_v19 = vld [vmem:[%s14232_s5 + $0x38] sm:$0xff]  }
 0x2d5   : > { %v3488_v26 = vmax.f32 %v3046_v20, 0.0  ;;  %10755 = vmatprep.subr.bf16.mxu0 %v11844_v19 }
 0x2d6   : > { %v3486_v28 = vmax.f32 %v3038_v24, 0.0  ;;  %10756 = vmatpush3.bf16.msra.mxu0 %v11844_v19 }
 0x2d7   : > { %v3604_v29 = vpack.c.bf16 %v3488_v26, %v3487_v25 }
 0x2d8   : > { %v10495_v30 = vpop.f32.mrb[152].mxu0  ;;  %v3603_v31 = vpack.c.bf16 %v3486_v28, %v3485_v27 }
 0x2d9   : > { %v3059_v32 = vadd.f32 %v10495_v30, %v12567_v3  ;;  %v3050_v33 = vpop.f32.mrb[153].mxu0 }
 0x2da   : > { %v3051_v34 = vadd.f32 %v12567_v3, %v3050_v33  ;;  %v10496_v35 = vpop.f32.mrb[154].mxu0  ;;  %10633 = vmatprep.mubr.bf16.mxu1 %v3603_v31 }
 0x2db   : > { %v3062_v36 = vadd.f32 %v10496_v35, %v12567_v3  ;;  %v3053_v37 = vpop.f32.mrb[155].mxu0  ;;  %10634 = vmatmul.mubr.bf16.gmra.mrb[148].mxu1 %v3604_v29  ;;  %v3491_v39 = vmax.f32 %v3059_v32, 0.0 }
 0x2dc   : > { %v3054_v38 = vadd.f32 %v12567_v3, %v3053_v37  ;;  %v3489_v41 = vmax.f32 %v3051_v34, 0.0 }
 0x2dd   : > { %v3492_v40 = vmax.f32 %v3062_v36, 0.0 }
 0x2de   : > { %v3490_v42 = vmax.f32 %v3054_v38, 0.0 }
 0x2df   : > { %v3606_v44 = vpack.c.bf16 %v3492_v40, %v3491_v39 }
 0x2e0   : > { %v10499_v45 = vpop.f32.mrb[156].mxu0  ;;  %v3605_v22 = vpack.c.bf16 %v3490_v42, %v3489_v41 }
 0x2e1   : > { %v3075_v47 = vadd.f32 %v10499_v45, %v12567_v3  ;;  %v3066_v48 = vpop.f32.mrb[157].mxu0 }
 0x2e2   : > { %v3067_v49 = vadd.f32 %v12567_v3, %v3066_v48  ;;  %v10500_v50 = vpop.f32.mrb[158].mxu0  ;;  %10637 = vmatprep.mubr.bf16.mxu1 %v3605_v22 }
 0x2e3   : > { %v3078_v43 = vadd.f32 %v10500_v50, %v12567_v3  ;;  %v3069_v51 = vpop.f32.mrb[159].mxu0  ;;  %10638 = vmatmul.mubr.bf16.gmra.mrb[152].mxu1 %v3606_v44  ;;  %v3495_v53 = vmax.f32 %v3075_v47, 0.0 }
 0x2e4   : > { %v3070_v52 = vadd.f32 %v12567_v3, %v3069_v51  ;;  %v3493_v55 = vmax.f32 %v3067_v49, 0.0 }
 0x2e5   : > { %v3496_v54 = vmax.f32 %v3078_v43, 0.0 }
 0x2e6   : > { %v3494_v56 = vmax.f32 %v3070_v52, 0.0 }
 0x2e7   : > { %v3608_v57 = vpack.c.bf16 %v3496_v54, %v3495_v53 }
 0x2e8   : > { %v10503_v58 = vpop.f32.mrb[160].mxu0  ;;  %v3607_v59 = vpack.c.bf16 %v3494_v56, %v3493_v55 }
 0x2e9   : > { %v3091_v60 = vadd.f32 %v10503_v58, %v12567_v3  ;;  %v3082_v61 = vpop.f32.mrb[161].mxu0 }
 0x2ea   : > { %v3083_v62 = vadd.f32 %v12567_v3, %v3082_v61  ;;  %v10504_v63 = vpop.f32.mrb[162].mxu0  ;;  %10641 = vmatprep.mubr.bf16.mxu1 %v3607_v59 }
 0x2eb   : > { %v3094_v0 = vadd.f32 %v10504_v63, %v12567_v3  ;;  %v3085_v1 = vpop.f32.mrb[163].mxu0  ;;  %10642 = vmatmul.mubr.bf16.gmra.mrb[156].mxu1 %v3608_v57  ;;  %v3499_v5 = vmax.f32 %v3091_v60, 0.0 }
 0x2ec   : > { %v3086_v2 = vadd.f32 %v12567_v3, %v3085_v1  ;;  %v3497_v7 = vmax.f32 %v3083_v62, 0.0 }
 0x2ed   : > { %v3500_v6 = vmax.f32 %v3094_v0, 0.0 }
 0x2ee   : > { %v3498_v8 = vmax.f32 %v3086_v2, 0.0 }
 0x2ef   : > { %v3610_v9 = vpack.c.bf16 %v3500_v6, %v3499_v5 }
 0x2f0   : > { %v10507_v10 = vpop.f32.mrb[164].mxu0  ;;  %v3609_v12 = vpack.c.bf16 %v3498_v8, %v3497_v7 }
 0x2f1   : > { %v3107_v13 = vadd.f32 %v10507_v10, %v12567_v3  ;;  %v3098_v14 = vpop.f32.mrb[165].mxu0 }
 0x2f2   : > { %v3099_v15 = vadd.f32 %v12567_v3, %v3098_v14  ;;  %v10508_v16 = vpop.f32.mrb[166].mxu0  ;;  %10645 = vmatprep.mubr.bf16.mxu1 %v3609_v12 }
 0x2f3   : > { %v3110_v17 = vadd.f32 %v10508_v16, %v12567_v3  ;;  %v3101_v18 = vpop.f32.mrb[167].mxu0  ;;  %10646 = vmatmul.mubr.bf16.gmra.mrb[160].mxu1 %v3610_v9  ;;  %v3503_v20 = vmax.f32 %v3107_v13, 0.0  ;;  %v11845_v9 = vld [vmem:[%s14234_s7 + $0x8] sm:$0xff]  }
 0x2f4   : > { %v3102_v11 = vadd.f32 %v12567_v3, %v3101_v18  ;;  %v3501_v23 = vmax.f32 %v3099_v15, 0.0  ;;  %10887 = vmatprep.subr.bf16.mxu1 %v11845_v9 }
 0x2f5   : > { %v3504_v21 = vmax.f32 %v3110_v17, 0.0  ;;  %10888 = vmatpush3.bf16.msra.mxu1 %v11845_v9 }
 0x2f6   : > { %v3502_v24 = vmax.f32 %v3102_v11, 0.0 }
 0x2f7   : > { %v3612_v25 = vpack.c.bf16 %v3504_v21, %v3503_v20 }
 0x2f8   : > { %v10511_v26 = vpop.f32.mrb[168].mxu0  ;;  %v3611_v27 = vpack.c.bf16 %v3502_v24, %v3501_v23 }
 0x2f9   : > { %v3123_v28 = vadd.f32 %v10511_v26, %v12567_v3  ;;  %v3114_v29 = vpop.f32.mrb[169].mxu0 }
 0x2fa   : > { %v3115_v30 = vadd.f32 %v12567_v3, %v3114_v29  ;;  %v10512_v31 = vpop.f32.mrb[170].mxu0  ;;  %10649 = vmatprep.mubr.bf16.mxu1 %v3611_v27 }
 0x2fb   : > { %v3126_v32 = vadd.f32 %v10512_v31, %v12567_v3  ;;  %v3117_v33 = vpop.f32.mrb[171].mxu0  ;;  %10650 = vmatmul.mubr.bf16.gmra.mrb[164].mxu1 %v3612_v25  ;;  %v3507_v35 = vmax.f32 %v3123_v28, 0.0 }
 0x2fc   : > { %v3118_v34 = vadd.f32 %v12567_v3, %v3117_v33  ;;  %v3505_v37 = vmax.f32 %v3115_v30, 0.0 }
 0x2fd   : > { %v3508_v36 = vmax.f32 %v3126_v32, 0.0 }
 0x2fe   : > { %v3506_v38 = vmax.f32 %v3118_v34, 0.0 }
 0x2ff   : > { %v3614_v39 = vpack.c.bf16 %v3508_v36, %v3507_v35 }
 0x300   : > { %v10515_v40 = vpop.f32.mrb[172].mxu0  ;;  %v3613_v41 = vpack.c.bf16 %v3506_v38, %v3505_v37 }
 0x301   : > { %v3139_v42 = vadd.f32 %v10515_v40, %v12567_v3  ;;  %v3130_v44 = vpop.f32.mrb[173].mxu0 }
 0x302   : > { %v3131_v45 = vadd.f32 %v12567_v3, %v3130_v44  ;;  %v10516_v22 = vpop.f32.mrb[174].mxu0  ;;  %10653 = vmatprep.mubr.bf16.mxu1 %v3613_v41 }
 0x303   : > { %v3142_v47 = vadd.f32 %v10516_v22, %v12567_v3  ;;  %v3133_v48 = vpop.f32.mrb[175].mxu0  ;;  %10654 = vmatmul.mubr.bf16.gmra.mrb[168].mxu1 %v3614_v39  ;;  %v3511_v50 = vmax.f32 %v3139_v42, 0.0 }
 0x304   : > { %v3134_v49 = vadd.f32 %v12567_v3, %v3133_v48  ;;  %v3509_v51 = vmax.f32 %v3131_v45, 0.0 }
 0x305   : > { %v3512_v43 = vmax.f32 %v3142_v47, 0.0 }
 0x306   : > { %v3510_v52 = vmax.f32 %v3134_v49, 0.0 }
 0x307   : > { %v3616_v53 = vpack.c.bf16 %v3512_v43, %v3511_v50 }
 0x308   : > { %v10519_v54 = vpop.f32.mrb[176].mxu0  ;;  %v3615_v55 = vpack.c.bf16 %v3510_v52, %v3509_v51 }
 0x309   : > { %v3155_v56 = vadd.f32 %v10519_v54, %v12567_v3  ;;  %v3146_v57 = vpop.f32.mrb[177].mxu0 }
 0x30a   : > { %v3147_v58 = vadd.f32 %v12567_v3, %v3146_v57  ;;  %v10520_v59 = vpop.f32.mrb[178].mxu0  ;;  %10657 = vmatprep.mubr.bf16.mxu1 %v3615_v55 }
 0x30b   : > { %v3158_v60 = vadd.f32 %v10520_v59, %v12567_v3  ;;  %v3149_v61 = vpop.f32.mrb[179].mxu0  ;;  %10658 = vmatmul.mubr.bf16.gmra.mrb[172].mxu1 %v3616_v53  ;;  %v3515_v63 = vmax.f32 %v3155_v56, 0.0 }
 0x30c   : > { %v3150_v62 = vadd.f32 %v12567_v3, %v3149_v61  ;;  %v3513_v1 = vmax.f32 %v3147_v58, 0.0 }
 0x30d   : > { %v3516_v0 = vmax.f32 %v3158_v60, 0.0 }
 0x30e   : > { %v3514_v2 = vmax.f32 %v3150_v62, 0.0 }
 0x30f   : > { %v3618_v5 = vpack.c.bf16 %v3516_v0, %v3515_v63 }
 0x310   : > { %v10523_v6 = vpop.f32.mrb[180].mxu0  ;;  %v3617_v7 = vpack.c.bf16 %v3514_v2, %v3513_v1 }
 0x311   : > { %v3171_v8 = vadd.f32 %v10523_v6, %v12567_v3  ;;  %v3162_v46 = vpop.f32.mrb[181].mxu0 }
 0x312   : > { %v3163_v10 = vadd.f32 %v12567_v3, %v3162_v46  ;;  %v10524_v12 = vpop.f32.mrb[182].mxu0  ;;  %10661 = vmatprep.mubr.bf16.mxu1 %v3617_v7 }
 0x313   : > { %v3174_v13 = vadd.f32 %v10524_v12, %v12567_v3  ;;  %v3165_v14 = vpop.f32.mrb[183].mxu0  ;;  %10662 = vmatmul.mubr.bf16.gmra.mrb[176].mxu1 %v3618_v5  ;;  %v3519_v16 = vmax.f32 %v3171_v8, 0.0  ;;  %v11846_v5 = vld [vmem:[%s14234_s7 + $0x10] sm:$0xff]  }
 0x314   : > { %v3166_v15 = vadd.f32 %v12567_v3, %v3165_v14  ;;  %v3517_v18 = vmax.f32 %v3163_v10, 0.0  ;;  %10889 = vmatprep.subr.bf16.mxu1 %v11846_v5 }
 0x315   : > { %v3520_v17 = vmax.f32 %v3174_v13, 0.0  ;;  %10890 = vmatpush3.bf16.msra.mxu1 %v11846_v5 }
 0x316   : > { %v3518_v19 = vmax.f32 %v3166_v15, 0.0 }
 0x317   : > { %v3620_v11 = vpack.c.bf16 %v3520_v17, %v3519_v16 }
 0x318   : > { %v10527_v20 = vpop.f32.mrb[184].mxu0  ;;  %v3619_v21 = vpack.c.bf16 %v3518_v19, %v3517_v18 }
 0x319   : > { %v3187_v23 = vadd.f32 %v10527_v20, %v12567_v3  ;;  %v3178_v24 = vpop.f32.mrb[185].mxu0 }
 0x31a   : > { %v3179_v25 = vadd.f32 %v12567_v3, %v3178_v24  ;;  %v10528_v26 = vpop.f32.mrb[186].mxu0  ;;  %10665 = vmatprep.mubr.bf16.mxu1 %v3619_v21 }
 0x31b   : > { %v3190_v27 = vadd.f32 %v10528_v26, %v12567_v3  ;;  %v3181_v28 = vpop.f32.mrb[187].mxu0  ;;  %10666 = vmatmul.mubr.bf16.gmra.mrb[180].mxu1 %v3620_v11  ;;  %v3523_v30 = vmax.f32 %v3187_v23, 0.0 }
 0x31c   : > { %v3182_v29 = vadd.f32 %v12567_v3, %v3181_v28  ;;  %v3521_v32 = vmax.f32 %v3179_v25, 0.0 }
 0x31d   : > { %v3524_v31 = vmax.f32 %v3190_v27, 0.0 }
 0x31e   : > { %v3522_v33 = vmax.f32 %v3182_v29, 0.0 }
 0x31f   : > { %v3622_v34 = vpack.c.bf16 %v3524_v31, %v3523_v30 }
 0x320   : > { %v10531_v35 = vpop.f32.mrb[188].mxu0  ;;  %v3621_v36 = vpack.c.bf16 %v3522_v33, %v3521_v32 }
 0x321   : > { %v3203_v37 = vadd.f32 %v10531_v35, %v12567_v3  ;;  %v3194_v38 = vpop.f32.mrb[189].mxu0 }
 0x322   : > { %v3195_v39 = vadd.f32 %v12567_v3, %v3194_v38  ;;  %v10532_v40 = vpop.f32.mrb[190].mxu0  ;;  %10669 = vmatprep.mubr.bf16.mxu1 %v3621_v36 }
 0x323   : > { %v3206_v41 = vadd.f32 %v10532_v40, %v12567_v3  ;;  %v3197_v42 = vpop.f32.mrb[191].mxu0  ;;  %10670 = vmatmul.mubr.bf16.gmra.mrb[184].mxu1 %v3622_v34  ;;  %v3527_v45 = vmax.f32 %v3203_v37, 0.0 }
 0x324   : > { %v3198_v44 = vadd.f32 %v12567_v3, %v3197_v42  ;;  %v3525_v47 = vmax.f32 %v3195_v39, 0.0 }
 0x325   : > { %v3528_v22 = vmax.f32 %v3206_v41, 0.0 }
 0x326   : > { %v3526_v48 = vmax.f32 %v3198_v44, 0.0 }
 0x327   : > { %v3624_v49 = vpack.c.bf16 %v3528_v22, %v3527_v45 }
 0x328   : > { %v10535_v50 = vpop.f32.mrb[192].mxu0  ;;  %v3623_v43 = vpack.c.bf16 %v3526_v48, %v3525_v47 }
 0x329   : > { %v3219_v51 = vadd.f32 %v10535_v50, %v12567_v3  ;;  %v3210_v52 = vpop.f32.mrb[193].mxu0 }
 0x32a   : > { %v3211_v53 = vadd.f32 %v12567_v3, %v3210_v52  ;;  %v10536_v54 = vpop.f32.mrb[194].mxu0  ;;  %10673 = vmatprep.mubr.bf16.mxu1 %v3623_v43 }
 0x32b   : > { %v3222_v55 = vadd.f32 %v10536_v54, %v12567_v3  ;;  %v3213_v56 = vpop.f32.mrb[195].mxu0  ;;  %10674 = vmatmul.mubr.bf16.gmra.mrb[188].mxu1 %v3624_v49  ;;  %v3531_v58 = vmax.f32 %v3219_v51, 0.0 }
 0x32c   : > { %v3214_v57 = vadd.f32 %v12567_v3, %v3213_v56  ;;  %v3529_v60 = vmax.f32 %v3211_v53, 0.0 }
 0x32d   : > { %v3532_v59 = vmax.f32 %v3222_v55, 0.0 }
 0x32e   : > { %v3530_v61 = vmax.f32 %v3214_v57, 0.0 }
 0x32f   : > { %v3626_v62 = vpack.c.bf16 %v3532_v59, %v3531_v58 }
 0x330   : > { %v10539_v63 = vpop.f32.mrb[196].mxu0  ;;  %v3625_v0 = vpack.c.bf16 %v3530_v61, %v3529_v60 }
 0x331   : > { %v3235_v1 = vadd.f32 %v10539_v63, %v12567_v3  ;;  %v3226_v2 = vpop.f32.mrb[197].mxu0 }
 0x332   : > { %v3227_v6 = vadd.f32 %v12567_v3, %v3226_v2  ;;  %v10540_v7 = vpop.f32.mrb[198].mxu0  ;;  %10677 = vmatprep.mubr.bf16.mxu1 %v3625_v0 }
 0x333   : > { %v3238_v8 = vadd.f32 %v10540_v7, %v12567_v3  ;;  %v3229_v46 = vpop.f32.mrb[199].mxu0  ;;  %10678 = vmatmul.mubr.bf16.gmra.mrb[192].mxu1 %v3626_v62  ;;  %v3535_v10 = vmax.f32 %v3235_v1, 0.0  ;;  %v11847_v62 = vld [vmem:[%s14234_s7 + $0x18] sm:$0xff]  }
 0x334   : > { %v3230_v9 = vadd.f32 %v12567_v3, %v3229_v46  ;;  %v3533_v13 = vmax.f32 %v3227_v6, 0.0  ;;  %10891 = vmatprep.subr.bf16.mxu1 %v11847_v62 }
 0x335   : > { %v3536_v12 = vmax.f32 %v3238_v8, 0.0  ;;  %10892 = vmatpush3.bf16.msra.mxu1 %v11847_v62 }
 0x336   : > { %v3534_v14 = vmax.f32 %v3230_v9, 0.0 }
 0x337   : > { %v3628_v15 = vpack.c.bf16 %v3536_v12, %v3535_v10 }
 0x338   : > { %v10543_v16 = vpop.f32.mrb[200].mxu0  ;;  %v3627_v17 = vpack.c.bf16 %v3534_v14, %v3533_v13 }
 0x339   : > { %v3251_v18 = vadd.f32 %v10543_v16, %v12567_v3  ;;  %v3242_v19 = vpop.f32.mrb[201].mxu0 }
 0x33a   : > { %v3243_v11 = vadd.f32 %v12567_v3, %v3242_v19  ;;  %v10544_v20 = vpop.f32.mrb[202].mxu0  ;;  %10681 = vmatprep.mubr.bf16.mxu1 %v3627_v17 }
 0x33b   : > { %v3254_v21 = vadd.f32 %v10544_v20, %v12567_v3  ;;  %v3245_v23 = vpop.f32.mrb[203].mxu0  ;;  %10682 = vmatmul.mubr.bf16.gmra.mrb[196].mxu1 %v3628_v15  ;;  %v3539_v25 = vmax.f32 %v3251_v18, 0.0 }
 0x33c   : > { %v3246_v24 = vadd.f32 %v12567_v3, %v3245_v23  ;;  %v3537_v27 = vmax.f32 %v3243_v11, 0.0 }
 0x33d   : > { %v3540_v26 = vmax.f32 %v3254_v21, 0.0 }
 0x33e   : > { %v3538_v28 = vmax.f32 %v3246_v24, 0.0 }
 0x33f   : > { %v3630_v29 = vpack.c.bf16 %v3540_v26, %v3539_v25 }
 0x340   : > { %v10547_v30 = vpop.f32.mrb[204].mxu0  ;;  %v3629_v31 = vpack.c.bf16 %v3538_v28, %v3537_v27 }
 0x341   : > { %v3267_v32 = vadd.f32 %v10547_v30, %v12567_v3  ;;  %v3258_v33 = vpop.f32.mrb[205].mxu0 }
 0x342   : > { %v3259_v34 = vadd.f32 %v12567_v3, %v3258_v33  ;;  %v10548_v35 = vpop.f32.mrb[206].mxu0  ;;  %10685 = vmatprep.mubr.bf16.mxu1 %v3629_v31 }
 0x343   : > { %v3270_v36 = vadd.f32 %v10548_v35, %v12567_v3  ;;  %v3261_v37 = vpop.f32.mrb[207].mxu0  ;;  %10686 = vmatmul.mubr.bf16.gmra.mrb[200].mxu1 %v3630_v29  ;;  %v3543_v39 = vmax.f32 %v3267_v32, 0.0 }
 0x344   : > { %v3262_v38 = vadd.f32 %v12567_v3, %v3261_v37  ;;  %v3541_v41 = vmax.f32 %v3259_v34, 0.0 }
 0x345   : > { %v3544_v40 = vmax.f32 %v3270_v36, 0.0 }
 0x346   : > { %v3542_v42 = vmax.f32 %v3262_v38, 0.0 }
 0x347   : > { %v3632_v44 = vpack.c.bf16 %v3544_v40, %v3543_v39 }
 0x348   : > { %v10551_v45 = vpop.f32.mrb[208].mxu0  ;;  %v3631_v22 = vpack.c.bf16 %v3542_v42, %v3541_v41 }
 0x349   : > { %v3283_v47 = vadd.f32 %v10551_v45, %v12567_v3  ;;  %v3274_v48 = vpop.f32.mrb[209].mxu0 }
 0x34a   : > { %v3275_v49 = vadd.f32 %v12567_v3, %v3274_v48  ;;  %v10552_v50 = vpop.f32.mrb[210].mxu0  ;;  %10689 = vmatprep.mubr.bf16.mxu1 %v3631_v22 }
 0x34b   : > { %v3286_v43 = vadd.f32 %v10552_v50, %v12567_v3  ;;  %v3277_v51 = vpop.f32.mrb[211].mxu0  ;;  %10690 = vmatmul.mubr.bf16.gmra.mrb[204].mxu1 %v3632_v44  ;;  %v3547_v53 = vmax.f32 %v3283_v47, 0.0 }
 0x34c   : > { %v3278_v52 = vadd.f32 %v12567_v3, %v3277_v51  ;;  %v3545_v55 = vmax.f32 %v3275_v49, 0.0 }
 0x34d   : > { %v3548_v54 = vmax.f32 %v3286_v43, 0.0 }
 0x34e   : > { %v3546_v56 = vmax.f32 %v3278_v52, 0.0 }
 0x34f   : > { %v3634_v57 = vpack.c.bf16 %v3548_v54, %v3547_v53 }
 0x350   : > { %v10555_v58 = vpop.f32.mrb[212].mxu0  ;;  %v3633_v59 = vpack.c.bf16 %v3546_v56, %v3545_v55 }
 0x351   : > { %v3299_v60 = vadd.f32 %v10555_v58, %v12567_v3  ;;  %v3290_v61 = vpop.f32.mrb[213].mxu0 }
 0x352   : > { %v3291_v63 = vadd.f32 %v12567_v3, %v3290_v61  ;;  %v10556_v0 = vpop.f32.mrb[214].mxu0  ;;  %10693 = vmatprep.mubr.bf16.mxu1 %v3633_v59 }
 0x353   : > { %v3302_v1 = vadd.f32 %v10556_v0, %v12567_v3  ;;  %v3293_v2 = vpop.f32.mrb[215].mxu0  ;;  %10694 = vmatmul.mubr.bf16.gmra.mrb[208].mxu1 %v3634_v57  ;;  %v3551_v6 = vmax.f32 %v3299_v60, 0.0  ;;  %v11848_v57 = vld [vmem:[%s14234_s7 + $0x20] sm:$0xff]  }
 0x354   : > { %v3294_v5 = vadd.f32 %v12567_v3, %v3293_v2  ;;  %v3549_v8 = vmax.f32 %v3291_v63, 0.0  ;;  %10893 = vmatprep.subr.bf16.mxu1 %v11848_v57 }
 0x355   : > { %v3552_v7 = vmax.f32 %v3302_v1, 0.0  ;;  %10894 = vmatpush3.bf16.msra.mxu1 %v11848_v57 }
 0x356   : > { %v3550_v46 = vmax.f32 %v3294_v5, 0.0 }
 0x357   : > { %v3636_v9 = vpack.c.bf16 %v3552_v7, %v3551_v6 }
 0x358   : > { %v10559_v10 = vpop.f32.mrb[216].mxu0  ;;  %v3635_v12 = vpack.c.bf16 %v3550_v46, %v3549_v8  ;;  %v12716_v8 = vld [vmem:[%s14240_s13] ss:$0 sm:$0xff] }
 0x359   : > { %v3315_v13 = vadd.f32 %v10559_v10, %v12567_v3  ;;  %v3306_v14 = vpop.f32.mrb[217].mxu0 }
 0x35a   : > { %v3307_v15 = vadd.f32 %v12567_v3, %v3306_v14  ;;  %v10560_v16 = vpop.f32.mrb[218].mxu0  ;;  %10697 = vmatprep.mubr.bf16.mxu1 %v3635_v12 }
 0x35b   : > { %v3318_v17 = vadd.f32 %v10560_v16, %v12567_v3  ;;  %v3309_v18 = vpop.f32.mrb[219].mxu0  ;;  %10698 = vmatmul.mubr.bf16.gmra.mrb[212].mxu1 %v3636_v9  ;;  %v3555_v11 = vmax.f32 %v3315_v13, 0.0 }
 0x35c   : > { %v3310_v19 = vadd.f32 %v12567_v3, %v3309_v18  ;;  %v3553_v21 = vmax.f32 %v3307_v15, 0.0 }
 0x35d   : > { %v3556_v20 = vmax.f32 %v3318_v17, 0.0 }
 0x35e   : > { %v3554_v23 = vmax.f32 %v3310_v19, 0.0 }
 0x35f   : > { %v3638_v24 = vpack.c.bf16 %v3556_v20, %v3555_v11 }
 0x360   : > { %v10563_v25 = vpop.f32.mrb[220].mxu0  ;;  %v3637_v26 = vpack.c.bf16 %v3554_v23, %v3553_v21 }
 0x361   : > { %v3331_v27 = vadd.f32 %v10563_v25, %v12567_v3  ;;  %v3322_v28 = vpop.f32.mrb[221].mxu0 }
 0x362   : > { %v3323_v29 = vadd.f32 %v12567_v3, %v3322_v28  ;;  %v10564_v30 = vpop.f32.mrb[222].mxu0  ;;  %10701 = vmatprep.mubr.bf16.mxu1 %v3637_v26 }
 0x363   : > { %v3334_v31 = vadd.f32 %v10564_v30, %v12567_v3  ;;  %v3325_v32 = vpop.f32.mrb[223].mxu0  ;;  %10702 = vmatmul.mubr.bf16.gmra.mrb[216].mxu1 %v3638_v24  ;;  %v3559_v34 = vmax.f32 %v3331_v27, 0.0 }
 0x364   : > { %v3326_v33 = vadd.f32 %v12567_v3, %v3325_v32  ;;  %v3557_v36 = vmax.f32 %v3323_v29, 0.0  ;;  %v12729_v29 = vld [vmem:[%s14241_s14] ss:$0 sm:$0xff] }
 0x365   : > { %v3560_v35 = vmax.f32 %v3334_v31, 0.0 }
 0x366   : > { %v3558_v37 = vmax.f32 %v3326_v33, 0.0 }
 0x367   : > { %v3640_v38 = vpack.c.bf16 %v3560_v35, %v3559_v34 }
 0x368   : > { %v10567_v39 = vpop.f32.mrb[224].mxu0  ;;  %v3639_v40 = vpack.c.bf16 %v3558_v37, %v3557_v36 }
 0x369   : > { %v3347_v41 = vadd.f32 %v10567_v39, %v12567_v3  ;;  %v3338_v42 = vpop.f32.mrb[225].mxu0 }
 0x36a   : > { %v3339_v44 = vadd.f32 %v12567_v3, %v3338_v42  ;;  %v10568_v45 = vpop.f32.mrb[226].mxu0  ;;  %10705 = vmatprep.mubr.bf16.mxu1 %v3639_v40 }
 0x36b   : > { %v3350_v22 = vadd.f32 %v10568_v45, %v12567_v3  ;;  %v3341_v47 = vpop.f32.mrb[227].mxu0  ;;  %10706 = vmatmul.mubr.bf16.gmra.mrb[220].mxu1 %v3640_v38  ;;  %v3563_v49 = vmax.f32 %v3347_v41, 0.0 }
 0x36c   : > { %v3342_v48 = vadd.f32 %v12567_v3, %v3341_v47  ;;  %v3561_v43 = vmax.f32 %v3339_v44, 0.0 }
 0x36d   : > { %v3564_v50 = vmax.f32 %v3350_v22, 0.0 }
 0x36e   : > { %v3562_v51 = vmax.f32 %v3342_v48, 0.0 }
 0x36f   : > { %v3642_v52 = vpack.c.bf16 %v3564_v50, %v3563_v49 }
 0x370   : > { %v10571_v53 = vpop.f32.mrb[228].mxu0  ;;  %v3641_v54 = vpack.c.bf16 %v3562_v51, %v3561_v43 }
 0x371   : > { %v3363_v55 = vadd.f32 %v10571_v53, %v12567_v3  ;;  %v3354_v56 = vpop.f32.mrb[229].mxu0 }
 0x372   : > { %v3355_v58 = vadd.f32 %v12567_v3, %v3354_v56  ;;  %v10572_v59 = vpop.f32.mrb[230].mxu0  ;;  %10709 = vmatprep.mubr.bf16.mxu1 %v3641_v54 }
 0x373   : > { %v3366_v60 = vadd.f32 %v10572_v59, %v12567_v3  ;;  %v3357_v61 = vpop.f32.mrb[231].mxu0  ;;  %10710 = vmatmul.mubr.bf16.gmra.mrb[224].mxu1 %v3642_v52  ;;  %v3567_v63 = vmax.f32 %v3363_v55, 0.0 }
 0x374   : > { %v3358_v62 = vadd.f32 %v12567_v3, %v3357_v61  ;;  %v3565_v1 = vmax.f32 %v3355_v58, 0.0 }
 0x375   : > { %v3568_v0 = vmax.f32 %v3366_v60, 0.0 }
 0x376   : > { %v3566_v2 = vmax.f32 %v3358_v62, 0.0 }
 0x377   : > { %v3644_v5 = vpack.c.bf16 %v3568_v0, %v3567_v63 }
 0x378   : > { %v10575_v6 = vpop.f32.mrb[232].mxu0  ;;  %v3643_v7 = vpack.c.bf16 %v3566_v2, %v3565_v1 }
 0x379   : > { %v3379_v46 = vadd.f32 %v12716_v8, %v10575_v6  ;;  %v3370_v9 = vpop.f32.mrb[233].mxu0 }
 0x37a   : > { %v3371_v10 = vadd.f32 %v12716_v8, %v3370_v9  ;;  %v10576_v12 = vpop.f32.mrb[234].mxu0  ;;  %10713 = vmatprep.mubr.bf16.mxu1 %v3643_v7 }
 0x37b   : > { %v3382_v3 = vadd.f32 %v12716_v8, %v10576_v12  ;;  %v3373_v13 = vpop.f32.mrb[235].mxu0  ;;  %10714 = vmatmul.mubr.bf16.gmra.mrb[228].mxu1 %v3644_v5  ;;  %v3571_v15 = vmax.f32 %v3379_v46, 0.0 }
 0x37c   : > { %v3374_v14 = vadd.f32 %v12716_v8, %v3373_v13  ;;  %v3569_v17 = vmax.f32 %v3371_v10, 0.0 }
 0x37d   : > { %v3572_v16 = vmax.f32 %v3382_v3, 0.0  ;;  %v11849_v3 = vld [vmem:[%s14234_s7 + $0x28] sm:$0xff]  }
 0x37e   : > { %v3570_v18 = vmax.f32 %v3374_v14, 0.0  ;;  %10895 = vmatprep.subr.bf16.mxu1 %v11849_v3 }
 0x37f   : > { %v3646_v19 = vpack.c.bf16 %v3572_v16, %v3571_v15  ;;  %10896 = vmatpush3.bf16.msra.mxu1 %v11849_v3 }
 0x380   : > { %v10579_v11 = vpop.f32.mrb[236].mxu0  ;;  %v3645_v20 = vpack.c.bf16 %v3570_v18, %v3569_v17 }
 0x381   : > { %v3395_v21 = vadd.f32 %v12716_v8, %v10579_v11  ;;  %v3386_v23 = vpop.f32.mrb[237].mxu0 }
 0x382   : > { %v3387_v24 = vadd.f32 %v12716_v8, %v3386_v23  ;;  %v10580_v25 = vpop.f32.mrb[238].mxu0  ;;  %10717 = vmatprep.mubr.bf16.mxu1 %v3645_v20 }
 0x383   : > { %v3398_v26 = vadd.f32 %v12716_v8, %v10580_v25  ;;  %v3389_v27 = vpop.f32.mrb[239].mxu0  ;;  %10718 = vmatmul.mubr.bf16.gmra.mrb[232].mxu1 %v3646_v19  ;;  %v3575_v30 = vmax.f32 %v3395_v21, 0.0 }
 0x384   : > { %v3390_v28 = vadd.f32 %v12716_v8, %v3389_v27  ;;  %v3573_v32 = vmax.f32 %v3387_v24, 0.0 }
 0x385   : > { %v3576_v31 = vmax.f32 %v3398_v26, 0.0 }
 0x386   : > { %v3574_v33 = vmax.f32 %v3390_v28, 0.0  ;;  %v10615_v34 = vpop.f32.mrb[128].mxu1 }
 0x387   : > { %v3771_v35 = vadd.f32 %v10615_v34, %v12729_v29  ;;  %v3762_v36 = vpop.f32.mrb[129].mxu1  ;;  %v3648_v37 = vpack.c.bf16 %v3576_v31, %v3575_v30 }
 0x388   : > { %v3763_v38 = vadd.f32 %v12729_v29, %v3762_v36  ;;  %v10583_v39 = vpop.f32.mrb[240].mxu0  ;;  %v10616_v40 = vpop.f32.mrb[130].mxu1  ;;  %v3647_v41 = vpack.c.bf16 %v3574_v33, %v3573_v32 }
 0x389   : > { %v3411_v42 = vadd.f32 %v12716_v8, %v10583_v39  ;;  %v3774_v44 = vadd.f32 %v10616_v40, %v12729_v29  ;;  %v3402_v45 = vpop.f32.mrb[241].mxu0  ;;  %v3765_v22 = vpop.f32.mrb[131].mxu1  ;;  %v4275_v50 = vmax.f32 %v3771_v35, 0.0 }
 0x38a   : > { %v3403_v47 = vadd.f32 %v12716_v8, %v3402_v45  ;;  %v3766_v48 = vadd.f32 %v12729_v29, %v3765_v22  ;;  %v10584_v49 = vpop.f32.mrb[242].mxu0  ;;  %10721 = vmatprep.mubr.bf16.mxu1 %v3647_v41  ;;  %v4273_v53 = vmax.f32 %v3763_v38, 0.0 }
 0x38b   : > { %v4276_v43 = vmax.f32 %v3774_v44, 0.0  ;;  %v3414_v51 = vadd.f32 %v12716_v8, %v10584_v49  ;;  %v3405_v52 = vpop.f32.mrb[243].mxu0  ;;  %10722 = vmatmul.mubr.bf16.gmra.mrb[236].mxu1 %v3648_v37  ;;  %v3579_v56 = vmax.f32 %v3411_v42, 0.0 }
 0x38c   : > { %v4274_v54 = vmax.f32 %v3766_v48, 0.0  ;;  %v3406_v55 = vadd.f32 %v12716_v8, %v3405_v52  ;;  %v3577_v59 = vmax.f32 %v3403_v47, 0.0 }
 0x38d   : > { %v4402_v57 = vpack.c.bf16 %v4276_v43, %v4275_v50  ;;  %v3580_v58 = vmax.f32 %v3414_v51, 0.0 }
 0x38e   : > { %v3578_v60 = vmax.f32 %v3406_v55, 0.0  ;;  %v10619_v61 = vpop.f32.mrb[132].mxu1  ;;  %v4401_v62 = vpack.c.bf16 %v4274_v54, %v4273_v53 }
 0x38f   : > { %v3787_v63 = vadd.f32 %v10619_v61, %v12729_v29  ;;  %v3778_v0 = vpop.f32.mrb[133].mxu1  ;;  %v3650_v1 = vpack.c.bf16 %v3580_v58, %v3579_v56 }
 0x390   : > { %v3779_v2 = vadd.f32 %v12729_v29, %v3778_v0  ;;  %v10587_v5 = vpop.f32.mrb[244].mxu0  ;;  %v10620_v6 = vpop.f32.mrb[134].mxu1  ;;  %10757 = vmatprep.mubr.bf16.mxu0 %v4401_v62  ;;  %v3649_v7 = vpack.c.bf16 %v3578_v60, %v3577_v59 }
 0x391   : > { %v3427_v46 = vadd.f32 %v12716_v8, %v10587_v5  ;;  %v3790_v9 = vadd.f32 %v10620_v6, %v12729_v29  ;;  %v3418_v10 = vpop.f32.mrb[245].mxu0  ;;  %v3781_v12 = vpop.f32.mrb[135].mxu1  ;;  %10758 = vmatmul.mubr.bf16.vlgmr.msra.gmra.mrb[0].mxu0 %v4402_v57  ;;  %v4279_v16 = vmax.f32 %v3787_v63, 0.0 }
 0x392   : > { %v3419_v13 = vadd.f32 %v12716_v8, %v3418_v10  ;;  %v3782_v14 = vadd.f32 %v12729_v29, %v3781_v12  ;;  %v10588_v15 = vpop.f32.mrb[246].mxu0  ;;  %10725 = vmatprep.mubr.bf16.mxu1 %v3649_v7  ;;  %v4277_v11 = vmax.f32 %v3779_v2, 0.0 }
 0x393   : > { %v4280_v17 = vmax.f32 %v3790_v9, 0.0  ;;  %v3430_v18 = vadd.f32 %v12716_v8, %v10588_v15  ;;  %v3421_v19 = vpop.f32.mrb[247].mxu0  ;;  %10726 = vmatmul.mubr.bf16.gmra.mrb[240].mxu1 %v3650_v1  ;;  %v3583_v23 = vmax.f32 %v3427_v46, 0.0 }
 0x394   : > { %v4278_v20 = vmax.f32 %v3782_v14, 0.0  ;;  %v3422_v21 = vadd.f32 %v12716_v8, %v3421_v19  ;;  %v3581_v26 = vmax.f32 %v3419_v13, 0.0 }
 0x395   : > { %v4404_v24 = vpack.c.bf16 %v4280_v17, %v4279_v16  ;;  %v3584_v25 = vmax.f32 %v3430_v18, 0.0 }
 0x396   : > { %v3582_v27 = vmax.f32 %v3422_v21, 0.0  ;;  %v10623_v28 = vpop.f32.mrb[136].mxu1  ;;  %v4403_v30 = vpack.c.bf16 %v4278_v20, %v4277_v11 }
 0x397   : > { %v3803_v31 = vadd.f32 %v10623_v28, %v12729_v29  ;;  %v3794_v32 = vpop.f32.mrb[137].mxu1  ;;  %v3652_v33 = vpack.c.bf16 %v3584_v25, %v3583_v23 }
 0x398   : > { %v3795_v34 = vadd.f32 %v12729_v29, %v3794_v32  ;;  %v10591_v35 = vpop.f32.mrb[248].mxu0  ;;  %v10624_v36 = vpop.f32.mrb[138].mxu1  ;;  %10761 = vmatprep.mubr.bf16.mxu0 %v4403_v30  ;;  %v3651_v37 = vpack.c.bf16 %v3582_v27, %v3581_v26 }
 0x399   : > { %v3443_v38 = vadd.f32 %v12716_v8, %v10591_v35  ;;  %v3806_v39 = vadd.f32 %v10624_v36, %v12729_v29  ;;  %v3434_v40 = vpop.f32.mrb[249].mxu0  ;;  %v3797_v41 = vpop.f32.mrb[139].mxu1  ;;  %10762 = vmatmul.mubr.bf16.gmra.mrb[4].mxu0 %v4404_v24  ;;  %v4283_v22 = vmax.f32 %v3803_v31, 0.0 }
 0x39a   : > { %v3435_v42 = vadd.f32 %v12716_v8, %v3434_v40  ;;  %v3798_v44 = vadd.f32 %v12729_v29, %v3797_v41  ;;  %v10592_v45 = vpop.f32.mrb[250].mxu0  ;;  %10729 = vmatprep.mubr.bf16.mxu1 %v3651_v37  ;;  %v4281_v50 = vmax.f32 %v3795_v34, 0.0 }
 0x39b   : > { %v4284_v47 = vmax.f32 %v3806_v39, 0.0  ;;  %v3446_v48 = vadd.f32 %v12716_v8, %v10592_v45  ;;  %v3437_v49 = vpop.f32.mrb[251].mxu0  ;;  %10730 = vmatmul.mubr.bf16.gmra.mrb[244].mxu1 %v3652_v33  ;;  %v3587_v52 = vmax.f32 %v3443_v38, 0.0 }
 0x39c   : > { %v4282_v43 = vmax.f32 %v3798_v44, 0.0  ;;  %v3438_v51 = vadd.f32 %v12716_v8, %v3437_v49  ;;  %v3585_v55 = vmax.f32 %v3435_v42, 0.0 }
 0x39d   : > { %v4406_v53 = vpack.c.bf16 %v4284_v47, %v4283_v22  ;;  %v3588_v54 = vmax.f32 %v3446_v48, 0.0  ;;  %v11850_v48 = vld [vmem:[%s14234_s7 + $0x30] sm:$0xff]  }
 0x39e   : > { %v3586_v56 = vmax.f32 %v3438_v51, 0.0  ;;  %v10627_v57 = vpop.f32.mrb[140].mxu1  ;;  %v4405_v58 = vpack.c.bf16 %v4282_v43, %v4281_v50  ;;  %10897 = vmatprep.subr.bf16.mxu1 %v11850_v48 }
 0x39f   : > { %v3819_v59 = vadd.f32 %v10627_v57, %v12729_v29  ;;  %v3810_v60 = vpop.f32.mrb[141].mxu1  ;;  %v3654_v61 = vpack.c.bf16 %v3588_v54, %v3587_v52  ;;  %10898 = vmatpush3.bf16.msra.mxu1 %v11850_v48 }
 0x3a0   : > { %v3811_v62 = vadd.f32 %v12729_v29, %v3810_v60  ;;  %v10595_v63 = vpop.f32.mrb[252].mxu0  ;;  %v10628_v0 = vpop.f32.mrb[142].mxu1  ;;  %10765 = vmatprep.mubr.bf16.mxu0 %v4405_v58  ;;  %v3653_v1 = vpack.c.bf16 %v3586_v56, %v3585_v55 }
 0x3a1   : > { %v3459_v2 = vadd.f32 %v12716_v8, %v10595_v63  ;;  %v3822_v5 = vadd.f32 %v10628_v0, %v12729_v29  ;;  %v3450_v6 = vpop.f32.mrb[253].mxu0  ;;  %v3813_v7 = vpop.f32.mrb[143].mxu1  ;;  %10766 = vmatmul.mubr.bf16.gmra.mrb[8].mxu0 %v4406_v53  ;;  %v4287_v12 = vmax.f32 %v3819_v59, 0.0 }
 0x3a2   : > { %v3451_v46 = vadd.f32 %v12716_v8, %v3450_v6  ;;  %v3814_v9 = vadd.f32 %v12729_v29, %v3813_v7  ;;  %v10596_v10 = vpop.f32.mrb[254].mxu0  ;;  %10733 = vmatprep.mubr.bf16.mxu1 %v3653_v1  ;;  %v4285_v15 = vmax.f32 %v3811_v62, 0.0 }
 0x3a3   : > { %v4288_v3 = vmax.f32 %v3822_v5, 0.0  ;;  %v3462_v13 = vadd.f32 %v12716_v8, %v10596_v10  ;;  %v3453_v14 = vpop.f32.mrb[255].mxu0  ;;  %10734 = vmatmul.mubr.bf16.gmra.mrb[248].mxu1 %v3654_v61  ;;  %v3591_v18 = vmax.f32 %v3459_v2, 0.0 }
 0x3a4   : > { %v4286_v16 = vmax.f32 %v3814_v9, 0.0  ;;  %v3454_v17 = vadd.f32 %v12716_v8, %v3453_v14  ;;  %v3589_v20 = vmax.f32 %v3451_v46, 0.0 }
 0x3a5   : > { %v4408_v19 = vpack.c.bf16 %v4288_v3, %v4287_v12  ;;  %v3592_v11 = vmax.f32 %v3462_v13, 0.0 }
 0x3a6   : > { %v3590_v21 = vmax.f32 %v3454_v17, 0.0  ;;  %v10631_v23 = vpop.f32.mrb[144].mxu1  ;;  %v4407_v24 = vpack.c.bf16 %v4286_v16, %v4285_v15 }
 0x3a7   : > { %v3835_v25 = vadd.f32 %v10631_v23, %v12729_v29  ;;  %v3826_v26 = vpop.f32.mrb[145].mxu1  ;;  %v3656_v27 = vpack.c.bf16 %v3592_v11, %v3591_v18 }
 0x3a8   : > { %v3827_v28 = vadd.f32 %v12729_v29, %v3826_v26  ;;  %v10632_v30 = vpop.f32.mrb[146].mxu1  ;;  %10769 = vmatprep.mubr.bf16.mxu0 %v4407_v24  ;;  %v3655_v31 = vpack.c.bf16 %v3590_v21, %v3589_v20 }
 0x3a9   : > { %v3838_v32 = vadd.f32 %v10632_v30, %v12729_v29  ;;  %v3829_v33 = vpop.f32.mrb[147].mxu1  ;;  %10770 = vmatmul.mubr.bf16.gmra.mrb[12].mxu0 %v4408_v19  ;;  %v4291_v34 = vmax.f32 %v3835_v25, 0.0 }
 0x3aa   : > { %v3830_v8 = vadd.f32 %v12729_v29, %v3829_v33  ;;  %10737 = vmatprep.mubr.bf16.mxu1 %v3655_v31  ;;  %v4289_v36 = vmax.f32 %v3827_v28, 0.0 }
 0x3ab   : > { %v4292_v35 = vmax.f32 %v3838_v32, 0.0  ;;  %10738 = vmatmul.mubr.bf16.gmra.mrb[252].mxu1 %v3656_v27 }
 0x3ac   : > { %v4290_v37 = vmax.f32 %v3830_v8, 0.0 }
 0x3ad   : > { %v4410_v38 = vpack.c.bf16 %v4292_v35, %v4291_v34 }
 0x3ae   : > { %v10635_v39 = vpop.f32.mrb[148].mxu1  ;;  %v4409_v40 = vpack.c.bf16 %v4290_v37, %v4289_v36 }
 0x3af   : > { %v3851_v41 = vadd.f32 %v10635_v39, %v12729_v29  ;;  %v3842_v42 = vpop.f32.mrb[149].mxu1 }
 0x3b0   : > { %v3843_v44 = vadd.f32 %v12729_v29, %v3842_v42  ;;  %v10636_v45 = vpop.f32.mrb[150].mxu1  ;;  %10773 = vmatprep.mubr.bf16.mxu0 %v4409_v40  ;;  %v11851_v42 = vld [vmem:[%s14234_s7 + $0x38] sm:$0xff]  }
 0x3b1   : > { %v3854_v22 = vadd.f32 %v10636_v45, %v12729_v29  ;;  %v3845_v47 = vpop.f32.mrb[151].mxu1  ;;  %10774 = vmatmul.mubr.bf16.gmra.mrb[16].mxu0 %v4410_v38  ;;  %v4295_v50 = vmax.f32 %v3851_v41, 0.0  ;;  %10899 = vmatprep.subr.bf16.mxu1 %v11851_v42 }
 0x3b2   : > { %v3846_v49 = vadd.f32 %v12729_v29, %v3845_v47  ;;  %v4293_v51 = vmax.f32 %v3843_v44, 0.0  ;;  %10900 = vmatpush3.bf16.msra.mxu1 %v11851_v42 }
 0x3b3   : > { %v4296_v43 = vmax.f32 %v3854_v22, 0.0 }
 0x3b4   : > { %v4294_v52 = vmax.f32 %v3846_v49, 0.0 }
 0x3b5   : > { %v4412_v53 = vpack.c.bf16 %v4296_v43, %v4295_v50 }
 0x3b6   : > { %v10639_v54 = vpop.f32.mrb[152].mxu1  ;;  %v4411_v55 = vpack.c.bf16 %v4294_v52, %v4293_v51 }
 0x3b7   : > { %v3867_v56 = vadd.f32 %v10639_v54, %v12729_v29  ;;  %v3858_v57 = vpop.f32.mrb[153].mxu1 }
 0x3b8   : > { %v3859_v58 = vadd.f32 %v12729_v29, %v3858_v57  ;;  %v10640_v59 = vpop.f32.mrb[154].mxu1  ;;  %10777 = vmatprep.mubr.bf16.mxu0 %v4411_v55 }
 0x3b9   : > { %v3870_v60 = vadd.f32 %v10640_v59, %v12729_v29  ;;  %v3861_v61 = vpop.f32.mrb[155].mxu1  ;;  %10778 = vmatmul.mubr.bf16.gmra.mrb[20].mxu0 %v4412_v53  ;;  %v4299_v63 = vmax.f32 %v3867_v56, 0.0 }
 0x3ba   : > { %v3862_v62 = vadd.f32 %v12729_v29, %v3861_v61  ;;  %v4297_v1 = vmax.f32 %v3859_v58, 0.0 }
 0x3bb   : > { %v4300_v0 = vmax.f32 %v3870_v60, 0.0 }
 0x3bc   : > { %v4298_v2 = vmax.f32 %v3862_v62, 0.0 }
 0x3bd   : > { %v4414_v5 = vpack.c.bf16 %v4300_v0, %v4299_v63 }
 0x3be   : > { %v10643_v6 = vpop.f32.mrb[156].mxu1  ;;  %v4413_v7 = vpack.c.bf16 %v4298_v2, %v4297_v1 }
 0x3bf   : > { %v3883_v46 = vadd.f32 %v10643_v6, %v12729_v29  ;;  %v3874_v9 = vpop.f32.mrb[157].mxu1 }
 0x3c0   : > { %v3875_v10 = vadd.f32 %v12729_v29, %v3874_v9  ;;  %v10644_v12 = vpop.f32.mrb[158].mxu1  ;;  %10781 = vmatprep.mubr.bf16.mxu0 %v4413_v7 }
 0x3c1   : > { %v3886_v3 = vadd.f32 %v10644_v12, %v12729_v29  ;;  %v3877_v13 = vpop.f32.mrb[159].mxu1  ;;  %10782 = vmatmul.mubr.bf16.gmra.mrb[24].mxu0 %v4414_v5  ;;  %v4303_v15 = vmax.f32 %v3883_v46, 0.0 }
 0x3c2   : > { %v3878_v14 = vadd.f32 %v12729_v29, %v3877_v13  ;;  %v4301_v17 = vmax.f32 %v3875_v10, 0.0 }
 0x3c3   : > { %v4304_v16 = vmax.f32 %v3886_v3, 0.0 }
 0x3c4   : > { %v4302_v18 = vmax.f32 %v3878_v14, 0.0 }
 0x3c5   : > { %v4416_v19 = vpack.c.bf16 %v4304_v16, %v4303_v15 }
 0x3c6   : > { %v10647_v11 = vpop.f32.mrb[160].mxu1  ;;  %v4415_v20 = vpack.c.bf16 %v4302_v18, %v4301_v17 }
 0x3c7   : > { %v3899_v21 = vadd.f32 %v10647_v11, %v12729_v29  ;;  %v3890_v23 = vpop.f32.mrb[161].mxu1 }
 0x3c8   : > { %v3891_v24 = vadd.f32 %v12729_v29, %v3890_v23  ;;  %v10648_v25 = vpop.f32.mrb[162].mxu1  ;;  %10785 = vmatprep.mubr.bf16.mxu0 %v4415_v20 }
 0x3c9   : > { %v3902_v26 = vadd.f32 %v10648_v25, %v12729_v29  ;;  %v3893_v27 = vpop.f32.mrb[163].mxu1  ;;  %10786 = vmatmul.mubr.bf16.gmra.mrb[28].mxu0 %v4416_v19  ;;  %v4307_v30 = vmax.f32 %v3899_v21, 0.0 }
 0x3ca   : > { %v3894_v28 = vadd.f32 %v12729_v29, %v3893_v27  ;;  %v4305_v32 = vmax.f32 %v3891_v24, 0.0 }
 0x3cb   : > { %v4308_v31 = vmax.f32 %v3902_v26, 0.0 }
 0x3cc   : > { %v4306_v33 = vmax.f32 %v3894_v28, 0.0 }
 0x3cd   : > { %v4418_v8 = vpack.c.bf16 %v4308_v31, %v4307_v30 }
 0x3ce   : > { %v10651_v34 = vpop.f32.mrb[164].mxu1  ;;  %v4417_v35 = vpack.c.bf16 %v4306_v33, %v4305_v32 }
 0x3cf   : > { %v3915_v36 = vadd.f32 %v10651_v34, %v12729_v29  ;;  %v3906_v37 = vpop.f32.mrb[165].mxu1 }
 0x3d0   : > { %v3907_v38 = vadd.f32 %v12729_v29, %v3906_v37  ;;  %v10652_v39 = vpop.f32.mrb[166].mxu1  ;;  %10789 = vmatprep.mubr.bf16.mxu0 %v4417_v35 }
 0x3d1   : > { %v3918_v40 = vadd.f32 %v10652_v39, %v12729_v29  ;;  %v3909_v41 = vpop.f32.mrb[167].mxu1  ;;  %10790 = vmatmul.mubr.bf16.gmra.mrb[32].mxu0 %v4418_v8  ;;  %v4311_v45 = vmax.f32 %v3915_v36, 0.0 }
 0x3d2   : > { %v3910_v44 = vadd.f32 %v12729_v29, %v3909_v41  ;;  %v4309_v47 = vmax.f32 %v3907_v38, 0.0 }
 0x3d3   : > { %v4312_v22 = vmax.f32 %v3918_v40, 0.0  ;;  %v12815_v40 = vld [vmem:[%s14233_s6] sm:$0xff]  }
 0x3d4   : > { %v4310_v48 = vmax.f32 %v3910_v44, 0.0  ;;  %11029 = vmatprep.subr.bf16.mxu1 %v12815_v40 }
 0x3d5   : > { %v4420_v49 = vpack.c.bf16 %v4312_v22, %v4311_v45 }
 0x3d6   : > { %v10655_v50 = vpop.f32.mrb[168].mxu1  ;;  %v4419_v43 = vpack.c.bf16 %v4310_v48, %v4309_v47 }
 0x3d7   : > { %v3931_v51 = vadd.f32 %v10655_v50, %v12729_v29  ;;  %v3922_v52 = vpop.f32.mrb[169].mxu1 }
 0x3d8   : > { %v3923_v53 = vadd.f32 %v12729_v29, %v3922_v52  ;;  %v10656_v54 = vpop.f32.mrb[170].mxu1  ;;  %10793 = vmatprep.mubr.bf16.mxu0 %v4419_v43 }
 0x3d9   : > { %v3934_v55 = vadd.f32 %v10656_v54, %v12729_v29  ;;  %v3925_v56 = vpop.f32.mrb[171].mxu1  ;;  %10794 = vmatmul.mubr.bf16.gmra.mrb[36].mxu0 %v4420_v49  ;;  %v4315_v58 = vmax.f32 %v3931_v51, 0.0 }
 0x3da   : > { %v3926_v57 = vadd.f32 %v12729_v29, %v3925_v56  ;;  %v4313_v60 = vmax.f32 %v3923_v53, 0.0 }
 0x3db   : > { %v4316_v59 = vmax.f32 %v3934_v55, 0.0 }
 0x3dc   : > { %v4314_v61 = vmax.f32 %v3926_v57, 0.0 }
 0x3dd   : > { %v4422_v62 = vpack.c.bf16 %v4316_v59, %v4315_v58 }
 0x3de   : > { %v10659_v63 = vpop.f32.mrb[172].mxu1  ;;  %v4421_v0 = vpack.c.bf16 %v4314_v61, %v4313_v60 }
 0x3df   : > { %v3947_v1 = vadd.f32 %v10659_v63, %v12729_v29  ;;  %v3938_v2 = vpop.f32.mrb[173].mxu1 }
 0x3e0   : > { %v3939_v5 = vadd.f32 %v12729_v29, %v3938_v2  ;;  %v10660_v6 = vpop.f32.mrb[174].mxu1  ;;  %10797 = vmatprep.mubr.bf16.mxu0 %v4421_v0 }
 0x3e1   : > { %v3950_v7 = vadd.f32 %v10660_v6, %v12729_v29  ;;  %v3941_v46 = vpop.f32.mrb[175].mxu1  ;;  %10798 = vmatmul.mubr.bf16.gmra.mrb[40].mxu0 %v4422_v62  ;;  %v4319_v10 = vmax.f32 %v3947_v1, 0.0 }
 0x3e2   : > { %v3942_v9 = vadd.f32 %v12729_v29, %v3941_v46  ;;  %v4317_v3 = vmax.f32 %v3939_v5, 0.0 }
 0x3e3   : > { %v4320_v12 = vmax.f32 %v3950_v7, 0.0 }
 0x3e4   : > { %v4318_v13 = vmax.f32 %v3942_v9, 0.0 }
 0x3e5   : > { %v4424_v14 = vpack.c.bf16 %v4320_v12, %v4319_v10 }
 0x3e6   : > { %v10663_v15 = vpop.f32.mrb[176].mxu1  ;;  %v4423_v16 = vpack.c.bf16 %v4318_v13, %v4317_v3 }
 0x3e7   : > { %v3963_v17 = vadd.f32 %v10663_v15, %v12729_v29  ;;  %v3954_v18 = vpop.f32.mrb[177].mxu1 }
 0x3e8   : > { %v3955_v19 = vadd.f32 %v12729_v29, %v3954_v18  ;;  %v10664_v11 = vpop.f32.mrb[178].mxu1  ;;  %10801 = vmatprep.mubr.bf16.mxu0 %v4423_v16 }
 0x3e9   : > { %v3966_v20 = vadd.f32 %v10664_v11, %v12729_v29  ;;  %v3957_v21 = vpop.f32.mrb[179].mxu1  ;;  %10802 = vmatmul.mubr.bf16.gmra.mrb[44].mxu0 %v4424_v14  ;;  %v4323_v24 = vmax.f32 %v3963_v17, 0.0 }
 0x3ea   : > { %v3958_v23 = vadd.f32 %v12729_v29, %v3957_v21  ;;  %v4321_v26 = vmax.f32 %v3955_v19, 0.0 }
 0x3eb   : > { %v4324_v25 = vmax.f32 %v3966_v20, 0.0 }
 0x3ec   : > { %v4322_v27 = vmax.f32 %v3958_v23, 0.0 }
 0x3ed   : > { %v4426_v28 = vpack.c.bf16 %v4324_v25, %v4323_v24 }
 0x3ee   : > { %v10667_v30 = vpop.f32.mrb[180].mxu1  ;;  %v4425_v31 = vpack.c.bf16 %v4322_v27, %v4321_v26 }
 0x3ef   : > { %v3979_v32 = vadd.f32 %v10667_v30, %v12729_v29  ;;  %v3970_v33 = vpop.f32.mrb[181].mxu1 }
 0x3f0   : > { %v3971_v8 = vadd.f32 %v12729_v29, %v3970_v33  ;;  %v10668_v34 = vpop.f32.mrb[182].mxu1  ;;  %10805 = vmatprep.mubr.bf16.mxu0 %v4425_v31 }
 0x3f1   : > { %v3982_v35 = vadd.f32 %v10668_v34, %v12729_v29  ;;  %v3973_v36 = vpop.f32.mrb[183].mxu1  ;;  %10806 = vmatmul.mubr.bf16.gmra.mrb[48].mxu0 %v4426_v28  ;;  %v4327_v38 = vmax.f32 %v3979_v32, 0.0 }
 0x3f2   : > { %v3974_v37 = vadd.f32 %v12729_v29, %v3973_v36  ;;  %v4325_v41 = vmax.f32 %v3971_v8, 0.0 }
 0x3f3   : > { %v4328_v39 = vmax.f32 %v3982_v35, 0.0 }
 0x3f4   : > { %v4326_v42 = vmax.f32 %v3974_v37, 0.0 }
 0x3f5   : > { %v4428_v44 = vpack.c.bf16 %v4328_v39, %v4327_v38 }
 0x3f6   : > { %v10671_v45 = vpop.f32.mrb[184].mxu1  ;;  %v4427_v22 = vpack.c.bf16 %v4326_v42, %v4325_v41 }
 0x3f7   : > { %v3995_v47 = vadd.f32 %v10671_v45, %v12729_v29  ;;  %v3986_v48 = vpop.f32.mrb[185].mxu1 }
 0x3f8   : > { %v3987_v49 = vadd.f32 %v12729_v29, %v3986_v48  ;;  %v10672_v50 = vpop.f32.mrb[186].mxu1  ;;  %10809 = vmatprep.mubr.bf16.mxu0 %v4427_v22 }
 0x3f9   : > { %v3998_v43 = vadd.f32 %v10672_v50, %v12729_v29  ;;  %v3989_v51 = vpop.f32.mrb[187].mxu1  ;;  %10810 = vmatmul.mubr.bf16.gmra.mrb[52].mxu0 %v4428_v44  ;;  %v4331_v53 = vmax.f32 %v3995_v47, 0.0 }
 0x3fa   : > { %v3990_v52 = vadd.f32 %v12729_v29, %v3989_v51  ;;  %v4329_v55 = vmax.f32 %v3987_v49, 0.0 }
 0x3fb   : > { %v4332_v54 = vmax.f32 %v3998_v43, 0.0 }
 0x3fc   : > { %v4330_v56 = vmax.f32 %v3990_v52, 0.0 }
 0x3fd   : > { %v4430_v57 = vpack.c.bf16 %v4332_v54, %v4331_v53 }
 0x3fe   : > { %v10675_v58 = vpop.f32.mrb[188].mxu1  ;;  %v4429_v59 = vpack.c.bf16 %v4330_v56, %v4329_v55 }
 0x3ff   : > { %v4011_v60 = vadd.f32 %v10675_v58, %v12729_v29  ;;  %v4002_v61 = vpop.f32.mrb[189].mxu1 }
 0x400   : > { %v4003_v62 = vadd.f32 %v12729_v29, %v4002_v61  ;;  %v10676_v63 = vpop.f32.mrb[190].mxu1  ;;  %10813 = vmatprep.mubr.bf16.mxu0 %v4429_v59 }
 0x401   : > { %v4014_v0 = vadd.f32 %v10676_v63, %v12729_v29  ;;  %v4005_v1 = vpop.f32.mrb[191].mxu1  ;;  %10814 = vmatmul.mubr.bf16.gmra.mrb[56].mxu0 %v4430_v57  ;;  %v4335_v5 = vmax.f32 %v4011_v60, 0.0 }
 0x402   : > { %v4006_v2 = vadd.f32 %v12729_v29, %v4005_v1  ;;  %v4333_v7 = vmax.f32 %v4003_v62, 0.0 }
 0x403   : > { %v4336_v6 = vmax.f32 %v4014_v0, 0.0 }
 0x404   : > { %v4334_v46 = vmax.f32 %v4006_v2, 0.0 }
 0x405   : > { %v4432_v9 = vpack.c.bf16 %v4336_v6, %v4335_v5 }
 0x406   : > { %v10679_v10 = vpop.f32.mrb[192].mxu1  ;;  %v4431_v12 = vpack.c.bf16 %v4334_v46, %v4333_v7 }
 0x407   : > { %v4027_v3 = vadd.f32 %v10679_v10, %v12729_v29  ;;  %v4018_v13 = vpop.f32.mrb[193].mxu1 }
 0x408   : > { %v4019_v14 = vadd.f32 %v12729_v29, %v4018_v13  ;;  %v10680_v15 = vpop.f32.mrb[194].mxu1  ;;  %10817 = vmatprep.mubr.bf16.mxu0 %v4431_v12 }
 0x409   : > { %v4030_v16 = vadd.f32 %v10680_v15, %v12729_v29  ;;  %v4021_v17 = vpop.f32.mrb[195].mxu1  ;;  %10818 = vmatmul.mubr.bf16.gmra.mrb[60].mxu0 %v4432_v9  ;;  %v4339_v19 = vmax.f32 %v4027_v3, 0.0 }
 0x40a   : > { %v4022_v18 = vadd.f32 %v12729_v29, %v4021_v17  ;;  %v4337_v20 = vmax.f32 %v4019_v14, 0.0 }
 0x40b   : > { %v4340_v11 = vmax.f32 %v4030_v16, 0.0 }
 0x40c   : > { %v4338_v21 = vmax.f32 %v4022_v18, 0.0 }
 0x40d   : > { %v4434_v23 = vpack.c.bf16 %v4340_v11, %v4339_v19 }
 0x40e   : > { %v10683_v24 = vpop.f32.mrb[196].mxu1  ;;  %v4433_v25 = vpack.c.bf16 %v4338_v21, %v4337_v20 }
 0x40f   : > { %v4043_v26 = vadd.f32 %v10683_v24, %v12729_v29  ;;  %v4034_v27 = vpop.f32.mrb[197].mxu1 }
 0x410   : > { %v4035_v28 = vadd.f32 %v12729_v29, %v4034_v27  ;;  %v10684_v30 = vpop.f32.mrb[198].mxu1  ;;  %10821 = vmatprep.mubr.bf16.mxu0 %v4433_v25 }
 0x411   : > { %v4046_v31 = vadd.f32 %v10684_v30, %v12729_v29  ;;  %v4037_v32 = vpop.f32.mrb[199].mxu1  ;;  %10822 = vmatmul.mubr.bf16.gmra.mrb[64].mxu0 %v4434_v23  ;;  %v4343_v8 = vmax.f32 %v4043_v26, 0.0 }
 0x412   : > { %v4038_v33 = vadd.f32 %v12729_v29, %v4037_v32  ;;  %v4341_v35 = vmax.f32 %v4035_v28, 0.0 }
 0x413   : > { %v4344_v34 = vmax.f32 %v4046_v31, 0.0 }
 0x414   : > { %v4342_v36 = vmax.f32 %v4038_v33, 0.0 }
 0x415   : > { %v4436_v37 = vpack.c.bf16 %v4344_v34, %v4343_v8 }
 0x416   : > { %v10687_v38 = vpop.f32.mrb[200].mxu1  ;;  %v4435_v39 = vpack.c.bf16 %v4342_v36, %v4341_v35 }
 0x417   : > { %v4059_v41 = vadd.f32 %v10687_v38, %v12729_v29  ;;  %v4050_v42 = vpop.f32.mrb[201].mxu1 }
 0x418   : > { %v4051_v44 = vadd.f32 %v12729_v29, %v4050_v42  ;;  %v10688_v45 = vpop.f32.mrb[202].mxu1  ;;  %10825 = vmatprep.mubr.bf16.mxu0 %v4435_v39 }
 0x419   : > { %v4062_v22 = vadd.f32 %v10688_v45, %v12729_v29  ;;  %v4053_v47 = vpop.f32.mrb[203].mxu1  ;;  %10826 = vmatmul.mubr.bf16.gmra.mrb[68].mxu0 %v4436_v37  ;;  %v4347_v49 = vmax.f32 %v4059_v41, 0.0 }
 0x41a   : > { %v4054_v48 = vadd.f32 %v12729_v29, %v4053_v47  ;;  %v4345_v43 = vmax.f32 %v4051_v44, 0.0 }
 0x41b   : > { %v4348_v50 = vmax.f32 %v4062_v22, 0.0 }
 0x41c   : > { %v4346_v51 = vmax.f32 %v4054_v48, 0.0 }
 0x41d   : > { %v4438_v52 = vpack.c.bf16 %v4348_v50, %v4347_v49 }
 0x41e   : > { %v10691_v53 = vpop.f32.mrb[204].mxu1  ;;  %v4437_v54 = vpack.c.bf16 %v4346_v51, %v4345_v43 }
 0x41f   : > { %v4075_v55 = vadd.f32 %v10691_v53, %v12729_v29  ;;  %v4066_v56 = vpop.f32.mrb[205].mxu1 }
 0x420   : > { %v4067_v57 = vadd.f32 %v12729_v29, %v4066_v56  ;;  %v10692_v58 = vpop.f32.mrb[206].mxu1  ;;  %10829 = vmatprep.mubr.bf16.mxu0 %v4437_v54 }
 0x421   : > { %v4078_v59 = vadd.f32 %v10692_v58, %v12729_v29  ;;  %v4069_v60 = vpop.f32.mrb[207].mxu1  ;;  %10830 = vmatmul.mubr.bf16.gmra.mrb[72].mxu0 %v4438_v52  ;;  %v4351_v62 = vmax.f32 %v4075_v55, 0.0 }
 0x422   : > { %v4070_v61 = vadd.f32 %v12729_v29, %v4069_v60  ;;  %v4349_v0 = vmax.f32 %v4067_v57, 0.0 }
 0x423   : > { %v4352_v63 = vmax.f32 %v4078_v59, 0.0 }
 0x424   : > { %v4350_v1 = vmax.f32 %v4070_v61, 0.0 }
 0x425   : > { %v4440_v2 = vpack.c.bf16 %v4352_v63, %v4351_v62 }
 0x426   : > { %v10695_v5 = vpop.f32.mrb[208].mxu1  ;;  %v4439_v6 = vpack.c.bf16 %v4350_v1, %v4349_v0 }
 0x427   : > { %v4091_v7 = vadd.f32 %v10695_v5, %v12729_v29  ;;  %v4082_v46 = vpop.f32.mrb[209].mxu1 }
 0x428   : > { %v4083_v9 = vadd.f32 %v12729_v29, %v4082_v46  ;;  %v10696_v10 = vpop.f32.mrb[210].mxu1  ;;  %10833 = vmatprep.mubr.bf16.mxu0 %v4439_v6 }
 0x429   : > { %v4094_v12 = vadd.f32 %v10696_v10, %v12729_v29  ;;  %v4085_v3 = vpop.f32.mrb[211].mxu1  ;;  %10834 = vmatmul.mubr.bf16.gmra.mrb[76].mxu0 %v4440_v2  ;;  %v4355_v14 = vmax.f32 %v4091_v7, 0.0 }
 0x42a   : > { %v4086_v13 = vadd.f32 %v12729_v29, %v4085_v3  ;;  %v4353_v16 = vmax.f32 %v4083_v9, 0.0 }
 0x42b   : > { %v4356_v15 = vmax.f32 %v4094_v12, 0.0 }
 0x42c   : > { %v4354_v17 = vmax.f32 %v4086_v13, 0.0 }
 0x42d   : > { %v4442_v18 = vpack.c.bf16 %v4356_v15, %v4355_v14 }
 0x42e   : > { %v10699_v19 = vpop.f32.mrb[212].mxu1  ;;  %v4441_v11 = vpack.c.bf16 %v4354_v17, %v4353_v16 }
 0x42f   : > { %v4107_v20 = vadd.f32 %v10699_v19, %v12729_v29  ;;  %v4098_v21 = vpop.f32.mrb[213].mxu1 }
 0x430   : > { %v4099_v23 = vadd.f32 %v12729_v29, %v4098_v21  ;;  %v10700_v24 = vpop.f32.mrb[214].mxu1  ;;  %10837 = vmatprep.mubr.bf16.mxu0 %v4441_v11 }
 0x431   : > { %v4110_v25 = vadd.f32 %v10700_v24, %v12729_v29  ;;  %v4101_v26 = vpop.f32.mrb[215].mxu1  ;;  %10838 = vmatmul.mubr.bf16.gmra.mrb[80].mxu0 %v4442_v18  ;;  %v4359_v28 = vmax.f32 %v4107_v20, 0.0 }
 0x432   : > { %v4102_v27 = vadd.f32 %v12729_v29, %v4101_v26  ;;  %v4357_v31 = vmax.f32 %v4099_v23, 0.0 }
 0x433   : > { %v4360_v30 = vmax.f32 %v4110_v25, 0.0 }
 0x434   : > { %v4358_v32 = vmax.f32 %v4102_v27, 0.0 }
 0x435   : > { %v4444_v33 = vpack.c.bf16 %v4360_v30, %v4359_v28 }
 0x436   : > { %v10703_v8 = vpop.f32.mrb[216].mxu1  ;;  %v4443_v34 = vpack.c.bf16 %v4358_v32, %v4357_v31 }
 0x437   : > { %v4123_v35 = vadd.f32 %v10703_v8, %v12729_v29  ;;  %v4114_v36 = vpop.f32.mrb[217].mxu1 }
 0x438   : > { %v4115_v37 = vadd.f32 %v12729_v29, %v4114_v36  ;;  %v10704_v38 = vpop.f32.mrb[218].mxu1  ;;  %10841 = vmatprep.mubr.bf16.mxu0 %v4443_v34 }
 0x439   : > { %v4126_v39 = vadd.f32 %v10704_v38, %v12729_v29  ;;  %v4117_v41 = vpop.f32.mrb[219].mxu1  ;;  %10842 = vmatmul.mubr.bf16.gmra.mrb[84].mxu0 %v4444_v33  ;;  %v4363_v44 = vmax.f32 %v4123_v35, 0.0 }
 0x43a   : > { %v4118_v42 = vadd.f32 %v12729_v29, %v4117_v41  ;;  %v4361_v22 = vmax.f32 %v4115_v37, 0.0 }
 0x43b   : > { %v4364_v45 = vmax.f32 %v4126_v39, 0.0 }
 0x43c   : > { %v4362_v47 = vmax.f32 %v4118_v42, 0.0 }
 0x43d   : > { %v4446_v48 = vpack.c.bf16 %v4364_v45, %v4363_v44 }
 0x43e   : > { %v10707_v49 = vpop.f32.mrb[220].mxu1  ;;  %v4445_v50 = vpack.c.bf16 %v4362_v47, %v4361_v22  ;;  %v12873_v22 = vld [vmem:[%s14241_s14] ss:$0 sm:$0xff] }
 0x43f   : > { %v4139_v43 = vadd.f32 %v10707_v49, %v12729_v29  ;;  %v4130_v51 = vpop.f32.mrb[221].mxu1 }
 0x440   : > { %v4131_v52 = vadd.f32 %v12729_v29, %v4130_v51  ;;  %v10708_v53 = vpop.f32.mrb[222].mxu1  ;;  %10845 = vmatprep.mubr.bf16.mxu0 %v4445_v50 }
 0x441   : > { %v4142_v54 = vadd.f32 %v10708_v53, %v12729_v29  ;;  %v4133_v55 = vpop.f32.mrb[223].mxu1  ;;  %10846 = vmatmul.mubr.bf16.gmra.mrb[88].mxu0 %v4446_v48  ;;  %v4367_v57 = vmax.f32 %v4139_v43, 0.0 }
 0x442   : > { %v4134_v56 = vadd.f32 %v12729_v29, %v4133_v55  ;;  %v4365_v59 = vmax.f32 %v4131_v52, 0.0  ;;  %v12882_v52 = vld [vmem:[%s14242_s15] ss:$0 sm:$0xff] }
 0x443   : > { %v4368_v58 = vmax.f32 %v4142_v54, 0.0 }
 0x444   : > { %v4366_v60 = vmax.f32 %v4134_v56, 0.0 }
 0x445   : > { %v4448_v61 = vpack.c.bf16 %v4368_v58, %v4367_v57 }
 0x446   : > { %v10711_v62 = vpop.f32.mrb[224].mxu1  ;;  %v4447_v63 = vpack.c.bf16 %v4366_v60, %v4365_v59 }
 0x447   : > { %v4155_v0 = vadd.f32 %v10711_v62, %v12729_v29  ;;  %v4146_v1 = vpop.f32.mrb[225].mxu1 }
 0x448   : > { %v4147_v2 = vadd.f32 %v12729_v29, %v4146_v1  ;;  %v10712_v5 = vpop.f32.mrb[226].mxu1  ;;  %10849 = vmatprep.mubr.bf16.mxu0 %v4447_v63 }
 0x449   : > { %v4158_v6 = vadd.f32 %v10712_v5, %v12729_v29  ;;  %v4149_v7 = vpop.f32.mrb[227].mxu1  ;;  %10850 = vmatmul.mubr.bf16.gmra.mrb[92].mxu0 %v4448_v61  ;;  %v4371_v9 = vmax.f32 %v4155_v0, 0.0 }
 0x44a   : > { %v4150_v46 = vadd.f32 %v12729_v29, %v4149_v7  ;;  %v4369_v12 = vmax.f32 %v4147_v2, 0.0 }
 0x44b   : > { %v4372_v10 = vmax.f32 %v4158_v6, 0.0 }
 0x44c   : > { %v4370_v3 = vmax.f32 %v4150_v46, 0.0 }
 0x44d   : > { %v4450_v13 = vpack.c.bf16 %v4372_v10, %v4371_v9 }
 0x44e   : > { %v10715_v14 = vpop.f32.mrb[228].mxu1  ;;  %v4449_v15 = vpack.c.bf16 %v4370_v3, %v4369_v12 }
 0x44f   : > { %v4171_v16 = vadd.f32 %v10715_v14, %v12729_v29  ;;  %v4162_v17 = vpop.f32.mrb[229].mxu1 }
 0x450   : > { %v4163_v18 = vadd.f32 %v12729_v29, %v4162_v17  ;;  %v10716_v19 = vpop.f32.mrb[230].mxu1  ;;  %10853 = vmatprep.mubr.bf16.mxu0 %v4449_v15 }
 0x451   : > { %v4174_v11 = vadd.f32 %v10716_v19, %v12729_v29  ;;  %v4165_v20 = vpop.f32.mrb[231].mxu1  ;;  %10854 = vmatmul.mubr.bf16.gmra.mrb[96].mxu0 %v4450_v13  ;;  %v4375_v23 = vmax.f32 %v4171_v16, 0.0 }
 0x452   : > { %v4166_v21 = vadd.f32 %v12729_v29, %v4165_v20  ;;  %v4373_v25 = vmax.f32 %v4163_v18, 0.0 }
 0x453   : > { %v4376_v24 = vmax.f32 %v4174_v11, 0.0 }
 0x454   : > { %v4374_v26 = vmax.f32 %v4166_v21, 0.0 }
 0x455   : > { %v4452_v27 = vpack.c.bf16 %v4376_v24, %v4375_v23 }
 0x456   : > { %v10719_v28 = vpop.f32.mrb[232].mxu1  ;;  %v4451_v30 = vpack.c.bf16 %v4374_v26, %v4373_v25 }
 0x457   : > { %v4187_v31 = vadd.f32 %v10719_v28, %v12729_v29  ;;  %v4178_v32 = vpop.f32.mrb[233].mxu1 }
 0x458   : > { %v4179_v33 = vadd.f32 %v12729_v29, %v4178_v32  ;;  %v10720_v8 = vpop.f32.mrb[234].mxu1  ;;  %10857 = vmatprep.mubr.bf16.mxu0 %v4451_v30 }
 0x459   : > { %v4190_v34 = vadd.f32 %v10720_v8, %v12729_v29  ;;  %v4181_v35 = vpop.f32.mrb[235].mxu1  ;;  %10858 = vmatmul.mubr.bf16.gmra.mrb[100].mxu0 %v4452_v27  ;;  %v4379_v37 = vmax.f32 %v4187_v31, 0.0 }
 0x45a   : > { %v4182_v36 = vadd.f32 %v12729_v29, %v4181_v35  ;;  %v4377_v39 = vmax.f32 %v4179_v33, 0.0 }
 0x45b   : > { %v4380_v38 = vmax.f32 %v4190_v34, 0.0 }
 0x45c   : > { %v4378_v41 = vmax.f32 %v4182_v36, 0.0 }
 0x45d   : > { %v4454_v42 = vpack.c.bf16 %v4380_v38, %v4379_v37 }
 0x45e   : > { %v10723_v44 = vpop.f32.mrb[236].mxu1  ;;  %v4453_v45 = vpack.c.bf16 %v4378_v41, %v4377_v39 }
 0x45f   : > { %v4203_v47 = vadd.f32 %v12873_v22, %v10723_v44  ;;  %v4194_v48 = vpop.f32.mrb[237].mxu1 }
 0x460   : > { %v4195_v49 = vadd.f32 %v12873_v22, %v4194_v48  ;;  %v10724_v50 = vpop.f32.mrb[238].mxu1  ;;  %10861 = vmatprep.mubr.bf16.mxu0 %v4453_v45 }
 0x461   : > { %v4206_v29 = vadd.f32 %v12873_v22, %v10724_v50  ;;  %v4197_v43 = vpop.f32.mrb[239].mxu1  ;;  %10862 = vmatmul.mubr.bf16.gmra.mrb[104].mxu0 %v4454_v42  ;;  %v4383_v53 = vmax.f32 %v4203_v47, 0.0 }
 0x462   : > { %v4198_v51 = vadd.f32 %v12873_v22, %v4197_v43  ;;  %v4381_v55 = vmax.f32 %v4195_v49, 0.0 }
 0x463   : > { %v4384_v54 = vmax.f32 %v4206_v29, 0.0  ;;  %v11853_v29 = vld [vmem:[%s14233_s6 + $0x8] sm:$0x3f]  }
 0x464   : > { %v4382_v56 = vmax.f32 %v4198_v51, 0.0  ;;  %v10759_v57 = vpop.f32.mrb[0].mxu0 }
 0x465   : > { %v4456_v58 = vpack.c.bf16 %v4384_v54, %v4383_v53  ;;  %v4579_v59 = vadd.f32 %v10759_v57, %v12882_v52  ;;  %v4570_v60 = vpop.f32.mrb[1].mxu0  ;;  %v5898_v57 = vand.u32 %v11853_v29, %v12078_v4 }
 0x466   : > { %v4571_v61 = vadd.f32 %v12882_v52, %v4570_v60  ;;  %v10727_v62 = vpop.f32.mrb[240].mxu1  ;;  %v10760_v63 = vpop.f32.mrb[2].mxu0  ;;  %v4455_v0 = vpack.c.bf16 %v4382_v56, %v4381_v55 }
 0x467   : > { %v4219_v1 = vadd.f32 %v12873_v22, %v10727_v62  ;;  %v4582_v2 = vadd.f32 %v10760_v63, %v12882_v52  ;;  %v4210_v5 = vpop.f32.mrb[241].mxu1  ;;  %v4573_v6 = vpop.f32.mrb[3].mxu0  ;;  %v5083_v10 = vmax.f32 %v4579_v59, 0.0 }
 0x468   : > { %v4211_v7 = vadd.f32 %v12873_v22, %v4210_v5  ;;  %v4574_v46 = vadd.f32 %v12882_v52, %v4573_v6  ;;  %v10728_v9 = vpop.f32.mrb[242].mxu1  ;;  %10865 = vmatprep.mubr.bf16.mxu0 %v4455_v0  ;;  %v5081_v14 = vmax.f32 %v4571_v61, 0.0 }
 0x469   : > { %v5084_v12 = vmax.f32 %v4582_v2, 0.0  ;;  %v4222_v3 = vadd.f32 %v12873_v22, %v10728_v9  ;;  %v4213_v13 = vpop.f32.mrb[243].mxu1  ;;  %10866 = vmatmul.mubr.bf16.gmra.mrb[108].mxu0 %v4456_v58  ;;  %v4387_v17 = vmax.f32 %v4219_v1, 0.0 }
 0x46a   : > { %v5082_v15 = vmax.f32 %v4574_v46, 0.0  ;;  %v4214_v16 = vadd.f32 %v12873_v22, %v4213_v13  ;;  %v4385_v11 = vmax.f32 %v4211_v7, 0.0 }
 0x46b   : > { %v5210_v18 = vpack.c.bf16 %v5084_v12, %v5083_v10  ;;  %v4388_v19 = vmax.f32 %v4222_v3, 0.0 }
 0x46c   : > { %v4386_v20 = vmax.f32 %v4214_v16, 0.0  ;;  %v10763_v21 = vpop.f32.mrb[4].mxu0  ;;  %v5209_v23 = vpack.c.bf16 %v5082_v15, %v5081_v14 }
 0x46d   : > { %v4458_v24 = vpack.c.bf16 %v4388_v19, %v4387_v17  ;;  %v4595_v25 = vadd.f32 %v10763_v21, %v12882_v52  ;;  %v4586_v26 = vpop.f32.mrb[5].mxu0 }
 0x46e   : > { %v4587_v27 = vadd.f32 %v12882_v52, %v4586_v26  ;;  %v10731_v28 = vpop.f32.mrb[244].mxu1  ;;  %v10764_v30 = vpop.f32.mrb[6].mxu0  ;;  %10901 = vmatprep.mubr.bf16.mxu1 %v5209_v23  ;;  %v4457_v31 = vpack.c.bf16 %v4386_v20, %v4385_v11 }
 0x46f   : > { %v4235_v32 = vadd.f32 %v12873_v22, %v10731_v28  ;;  %v4598_v33 = vadd.f32 %v10764_v30, %v12882_v52  ;;  %v4226_v8 = vpop.f32.mrb[245].mxu1  ;;  %v4589_v34 = vpop.f32.mrb[7].mxu0  ;;  %10902 = vmatmul.mubr.bf16.vlgmr.msra.gmra.mrb[0].mxu1 %v5210_v18  ;;  %v5087_v38 = vmax.f32 %v4595_v25, 0.0 }
 0x470   : > { %v4227_v35 = vadd.f32 %v12873_v22, %v4226_v8  ;;  %v4590_v36 = vadd.f32 %v12882_v52, %v4589_v34  ;;  %11030 = vmatpush3.bf16.msra.mxu1 %v12815_v40  ;;  %v10732_v37 = vpop.f32.mrb[246].mxu1  ;;  %10869 = vmatprep.mubr.bf16.mxu0 %v4457_v31  ;;  %v5085_v44 = vmax.f32 %v4587_v27, 0.0 }
 0x471   : > { %v5088_v39 = vmax.f32 %v4598_v33, 0.0  ;;  %v4238_v41 = vadd.f32 %v12873_v22, %v10732_v37  ;;  %v4229_v42 = vpop.f32.mrb[247].mxu1  ;;  %10870 = vmatmul.mubr.bf16.gmra.mrb[112].mxu0 %v4458_v24  ;;  %v4391_v48 = vmax.f32 %v4235_v32, 0.0  ;;  %11031 = vmatprep.subr.bf16.mxu1 %v5898_v57 }
 0x472   : > { %v5086_v45 = vmax.f32 %v4590_v36, 0.0  ;;  %v4230_v47 = vadd.f32 %v12873_v22, %v4229_v42  ;;  %v4389_v40 = vmax.f32 %v4227_v35, 0.0 }
 0x473   : > { %v5212_v49 = vpack.c.bf16 %v5088_v39, %v5087_v38  ;;  %v4392_v50 = vmax.f32 %v4238_v41, 0.0 }
 0x474   : > { %v4390_v43 = vmax.f32 %v4230_v47, 0.0  ;;  %v10767_v51 = vpop.f32.mrb[8].mxu0  ;;  %v5211_v53 = vpack.c.bf16 %v5086_v45, %v5085_v44  ;;  %11032 = vmatpush3.bf16.msra.mxu1 %v5898_v57 }
 0x475   : > { %v4460_v54 = vpack.c.bf16 %v4392_v50, %v4391_v48  ;;  %v4611_v55 = vadd.f32 %v10767_v51, %v12882_v52  ;;  %v4602_v56 = vpop.f32.mrb[9].mxu0 }
 0x476   : > { %v4603_v58 = vadd.f32 %v12882_v52, %v4602_v56  ;;  %v10735_v59 = vpop.f32.mrb[248].mxu1  ;;  %v10768_v60 = vpop.f32.mrb[10].mxu0  ;;  %10905 = vmatprep.mubr.bf16.mxu1 %v5211_v53  ;;  %v4459_v61 = vpack.c.bf16 %v4390_v43, %v4389_v40 }
 0x477   : > { %v4251_v62 = vadd.f32 %v12873_v22, %v10735_v59  ;;  %v4614_v63 = vadd.f32 %v10768_v60, %v12882_v52  ;;  %v4242_v0 = vpop.f32.mrb[249].mxu1  ;;  %v4605_v1 = vpop.f32.mrb[11].mxu0  ;;  %10906 = vmatmul.mubr.bf16.gmra.mrb[4].mxu1 %v5212_v49  ;;  %v5091_v4 = vmax.f32 %v4611_v55, 0.0 }
 0x478   : > { %v4243_v2 = vadd.f32 %v12873_v22, %v4242_v0  ;;  %v4606_v5 = vadd.f32 %v12882_v52, %v4605_v1  ;;  %v10736_v6 = vpop.f32.mrb[250].mxu1  ;;  %10873 = vmatprep.mubr.bf16.mxu0 %v4459_v61  ;;  %v5089_v10 = vmax.f32 %v4603_v58, 0.0 }
 0x479   : > { %v5092_v7 = vmax.f32 %v4614_v63, 0.0  ;;  %v4254_v46 = vadd.f32 %v12873_v22, %v10736_v6  ;;  %v4245_v9 = vpop.f32.mrb[251].mxu1  ;;  %10874 = vmatmul.mubr.bf16.gmra.mrb[116].mxu0 %v4460_v54  ;;  %v4395_v13 = vmax.f32 %v4251_v62, 0.0 }
 0x47a   : > { %v5090_v12 = vmax.f32 %v4606_v5, 0.0  ;;  %v4246_v3 = vadd.f32 %v12873_v22, %v4245_v9  ;;  %v4393_v16 = vmax.f32 %v4243_v2, 0.0 }
 0x47b   : > { %v5214_v14 = vpack.c.bf16 %v5092_v7, %v5091_v4  ;;  %v4396_v15 = vmax.f32 %v4254_v46, 0.0 }
 0x47c   : > { %v4394_v17 = vmax.f32 %v4246_v3, 0.0  ;;  %v10771_v18 = vpop.f32.mrb[12].mxu0  ;;  %v5213_v19 = vpack.c.bf16 %v5090_v12, %v5089_v10 }
 0x47d   : > { %v4462_v11 = vpack.c.bf16 %v4396_v15, %v4395_v13  ;;  %v4627_v20 = vadd.f32 %v10771_v18, %v12882_v52  ;;  %v4618_v21 = vpop.f32.mrb[13].mxu0 }
 0x47e   : > { %v4619_v23 = vadd.f32 %v12882_v52, %v4618_v21  ;;  %v10739_v24 = vpop.f32.mrb[252].mxu1  ;;  %v10772_v25 = vpop.f32.mrb[14].mxu0  ;;  %10909 = vmatprep.mubr.bf16.mxu1 %v5213_v19  ;;  %v4461_v26 = vpack.c.bf16 %v4394_v17, %v4393_v16 }
 0x47f   : > { %v4267_v27 = vadd.f32 %v12873_v22, %v10739_v24  ;;  %v4630_v28 = vadd.f32 %v10772_v25, %v12882_v52  ;;  %v4258_v30 = vpop.f32.mrb[253].mxu1  ;;  %v4621_v31 = vpop.f32.mrb[15].mxu0  ;;  %10910 = vmatmul.mubr.bf16.gmra.mrb[8].mxu1 %v5214_v14  ;;  %v5095_v34 = vmax.f32 %v4627_v20, 0.0 }
 0x480   : > { %v4259_v32 = vadd.f32 %v12873_v22, %v4258_v30  ;;  %v4622_v33 = vadd.f32 %v12882_v52, %v4621_v31  ;;  %v10740_v8 = vpop.f32.mrb[254].mxu1  ;;  %10877 = vmatprep.mubr.bf16.mxu0 %v4461_v26  ;;  %v5093_v38 = vmax.f32 %v4619_v23, 0.0 }
 0x481   : > { %v5096_v35 = vmax.f32 %v4630_v28, 0.0  ;;  %v4270_v36 = vadd.f32 %v12873_v22, %v10740_v8  ;;  %v4261_v37 = vpop.f32.mrb[255].mxu1  ;;  %10878 = vmatmul.mubr.bf16.gmra.mrb[120].mxu0 %v4462_v11  ;;  %v4399_v42 = vmax.f32 %v4267_v27, 0.0 }
 0x482   : > { %v5094_v39 = vmax.f32 %v4622_v33, 0.0  ;;  %v4262_v41 = vadd.f32 %v12873_v22, %v4261_v37  ;;  %v4397_v47 = vmax.f32 %v4259_v32, 0.0 }
 0x483   : > { %v5216_v44 = vpack.c.bf16 %v5096_v35, %v5095_v34  ;;  %v4400_v45 = vmax.f32 %v4270_v36, 0.0 }
 0x484   : > { %v4398_v48 = vmax.f32 %v4262_v41, 0.0  ;;  %v10775_v49 = vpop.f32.mrb[16].mxu0  ;;  %v5215_v50 = vpack.c.bf16 %v5094_v39, %v5093_v38 }
 0x485   : > { %v4464_v29 = vpack.c.bf16 %v4400_v45, %v4399_v42  ;;  %v4643_v40 = vadd.f32 %v10775_v49, %v12882_v52  ;;  %v4634_v43 = vpop.f32.mrb[17].mxu0 }
 0x486   : > { %v4463_v51 = vpack.c.bf16 %v4398_v48, %v4397_v47  ;;  %v4635_v53 = vadd.f32 %v12882_v52, %v4634_v43  ;;  %v10776_v54 = vpop.f32.mrb[18].mxu0  ;;  %10913 = vmatprep.mubr.bf16.mxu1 %v5215_v50 }
 0x487   : > { %v4646_v55 = vadd.f32 %v10776_v54, %v12882_v52  ;;  %v4637_v56 = vpop.f32.mrb[19].mxu0  ;;  %10914 = vmatmul.mubr.bf16.gmra.mrb[12].mxu1 %v5216_v44  ;;  %v5099_v57 = vmax.f32 %v4643_v40, 0.0 }
 0x488   : > { %v4638_v22 = vadd.f32 %v12882_v52, %v4637_v56  ;;  %10881 = vmatprep.mubr.bf16.mxu0 %v4463_v51  ;;  %v5097_v59 = vmax.f32 %v4635_v53, 0.0 }
 0x489   : > { %v5100_v58 = vmax.f32 %v4646_v55, 0.0  ;;  %10882 = vmatmul.mubr.bf16.gmra.mrb[124].mxu0 %v4464_v29 }
 0x48a   : > { %v5098_v60 = vmax.f32 %v4638_v22, 0.0 }
 0x48b   : > { %v5218_v61 = vpack.c.bf16 %v5100_v58, %v5099_v57 }
 0x48c   : > { %v10779_v62 = vpop.f32.mrb[20].mxu0  ;;  %v5217_v63 = vpack.c.bf16 %v5098_v60, %v5097_v59 }
 0x48d   : > { %v4659_v0 = vadd.f32 %v10779_v62, %v12882_v52  ;;  %v4650_v1 = vpop.f32.mrb[21].mxu0 }
 0x48e   : > { %v4651_v2 = vadd.f32 %v12882_v52, %v4650_v1  ;;  %v10780_v5 = vpop.f32.mrb[22].mxu0  ;;  %10917 = vmatprep.mubr.bf16.mxu1 %v5217_v63 }
 0x48f   : > { %v4662_v6 = vadd.f32 %v10780_v5, %v12882_v52  ;;  %v4653_v4 = vpop.f32.mrb[23].mxu0  ;;  %10918 = vmatmul.mubr.bf16.gmra.mrb[16].mxu1 %v5218_v61  ;;  %v5103_v46 = vmax.f32 %v4659_v0, 0.0 }
 0x490   : > { %v4654_v7 = vadd.f32 %v12882_v52, %v4653_v4  ;;  %v5101_v10 = vmax.f32 %v4651_v2, 0.0 }
 0x491   : > { %v5104_v9 = vmax.f32 %v4662_v6, 0.0 }
 0x492   : > { %v5102_v12 = vmax.f32 %v4654_v7, 0.0 }
 0x493   : > { %v5220_v3 = vpack.c.bf16 %v5104_v9, %v5103_v46 }
 0x494   : > { %v10783_v13 = vpop.f32.mrb[24].mxu0  ;;  %v5219_v14 = vpack.c.bf16 %v5102_v12, %v5101_v10 }
 0x495   : > { %v4675_v15 = vadd.f32 %v10783_v13, %v12882_v52  ;;  %v4666_v16 = vpop.f32.mrb[25].mxu0 }
 0x496   : > { %v4667_v17 = vadd.f32 %v12882_v52, %v4666_v16  ;;  %v10784_v18 = vpop.f32.mrb[26].mxu0  ;;  %10921 = vmatprep.mubr.bf16.mxu1 %v5219_v14 }
 0x497   : > { %v4678_v19 = vadd.f32 %v10784_v18, %v12882_v52  ;;  %v4669_v11 = vpop.f32.mrb[27].mxu0  ;;  %10922 = vmatmul.mubr.bf16.gmra.mrb[20].mxu1 %v5220_v3  ;;  %v5107_v21 = vmax.f32 %v4675_v15, 0.0 }
 0x498   : > { %v4670_v20 = vadd.f32 %v12882_v52, %v4669_v11  ;;  %v5105_v24 = vmax.f32 %v4667_v17, 0.0 }
 0x499   : > { %v5108_v23 = vmax.f32 %v4678_v19, 0.0 }
 0x49a   : > { %v5106_v25 = vmax.f32 %v4670_v20, 0.0 }
 0x49b   : > { %v5222_v26 = vpack.c.bf16 %v5108_v23, %v5107_v21 }
 0x49c   : > { %v10787_v27 = vpop.f32.mrb[28].mxu0  ;;  %v5221_v28 = vpack.c.bf16 %v5106_v25, %v5105_v24 }
 0x49d   : > { %v4691_v30 = vadd.f32 %v10787_v27, %v12882_v52  ;;  %v4682_v31 = vpop.f32.mrb[29].mxu0 }
 0x49e   : > { %v4683_v32 = vadd.f32 %v12882_v52, %v4682_v31  ;;  %v10788_v33 = vpop.f32.mrb[30].mxu0  ;;  %10925 = vmatprep.mubr.bf16.mxu1 %v5221_v28 }
 0x49f   : > { %v4694_v8 = vadd.f32 %v10788_v33, %v12882_v52  ;;  %v4685_v34 = vpop.f32.mrb[31].mxu0  ;;  %10926 = vmatmul.mubr.bf16.gmra.mrb[24].mxu1 %v5222_v26  ;;  %v5111_v36 = vmax.f32 %v4691_v30, 0.0 }
 0x4a0   : > { %v4686_v35 = vadd.f32 %v12882_v52, %v4685_v34  ;;  %v5109_v38 = vmax.f32 %v4683_v32, 0.0 }
 0x4a1   : > { %v5112_v37 = vmax.f32 %v4694_v8, 0.0 }
 0x4a2   : > { %v5110_v39 = vmax.f32 %v4686_v35, 0.0 }
 0x4a3   : > { %v5224_v41 = vpack.c.bf16 %v5112_v37, %v5111_v36 }
 0x4a4   : > { %v10791_v42 = vpop.f32.mrb[32].mxu0  ;;  %v5223_v44 = vpack.c.bf16 %v5110_v39, %v5109_v38 }
 0x4a5   : > { %v4707_v45 = vadd.f32 %v10791_v42, %v12882_v52  ;;  %v4698_v47 = vpop.f32.mrb[33].mxu0 }
 0x4a6   : > { %v4699_v48 = vadd.f32 %v12882_v52, %v4698_v47  ;;  %v10792_v49 = vpop.f32.mrb[34].mxu0  ;;  %10929 = vmatprep.mubr.bf16.mxu1 %v5223_v44 }
 0x4a7   : > { %v4710_v50 = vadd.f32 %v10792_v49, %v12882_v52  ;;  %v4701_v29 = vpop.f32.mrb[35].mxu0  ;;  %10930 = vmatmul.mubr.bf16.gmra.mrb[28].mxu1 %v5224_v41  ;;  %v5115_v43 = vmax.f32 %v4707_v45, 0.0 }
 0x4a8   : > { %v4702_v40 = vadd.f32 %v12882_v52, %v4701_v29  ;;  %v5113_v53 = vmax.f32 %v4699_v48, 0.0 }
 0x4a9   : > { %v5116_v51 = vmax.f32 %v4710_v50, 0.0 }
 0x4aa   : > { %v5114_v54 = vmax.f32 %v4702_v40, 0.0 }
 0x4ab   : > { %v5226_v55 = vpack.c.bf16 %v5116_v51, %v5115_v43 }
 0x4ac   : > { %v10795_v56 = vpop.f32.mrb[36].mxu0  ;;  %v5225_v22 = vpack.c.bf16 %v5114_v54, %v5113_v53 }
 0x4ad   : > { %v4723_v57 = vadd.f32 %v10795_v56, %v12882_v52  ;;  %v4714_v58 = vpop.f32.mrb[37].mxu0 }
 0x4ae   : > { %v4715_v59 = vadd.f32 %v12882_v52, %v4714_v58  ;;  %v10796_v60 = vpop.f32.mrb[38].mxu0  ;;  %10933 = vmatprep.mubr.bf16.mxu1 %v5225_v22  ;;  %v11854_v22 = vld [vmem:[%s14235_s8] sm:$0xff]  }
 0x4af   : > { %v4726_v61 = vadd.f32 %v10796_v60, %v12882_v52  ;;  %v4717_v62 = vpop.f32.mrb[39].mxu0  ;;  %10934 = vmatmul.mubr.bf16.gmra.mrb[32].mxu1 %v5226_v55  ;;  %v5119_v0 = vmax.f32 %v4723_v57, 0.0  ;;  %11161 = vmatprep.subr.bf16.mxu0 %v11854_v22 }
 0x4b0   : > { %v4718_v63 = vadd.f32 %v12882_v52, %v4717_v62  ;;  %v5117_v2 = vmax.f32 %v4715_v59, 0.0  ;;  %11162 = vmatpush3.bf16.msra.mxu0 %v11854_v22 }
 0x4b1   : > { %v5120_v1 = vmax.f32 %v4726_v61, 0.0 }
 0x4b2   : > { %v5118_v5 = vmax.f32 %v4718_v63, 0.0 }
 0x4b3   : > { %v5228_v6 = vpack.c.bf16 %v5120_v1, %v5119_v0 }
 0x4b4   : > { %v10799_v4 = vpop.f32.mrb[40].mxu0  ;;  %v5227_v7 = vpack.c.bf16 %v5118_v5, %v5117_v2 }
 0x4b5   : > { %v4739_v46 = vadd.f32 %v10799_v4, %v12882_v52  ;;  %v4730_v9 = vpop.f32.mrb[41].mxu0 }
 0x4b6   : > { %v4731_v10 = vadd.f32 %v12882_v52, %v4730_v9  ;;  %v10800_v12 = vpop.f32.mrb[42].mxu0  ;;  %10937 = vmatprep.mubr.bf16.mxu1 %v5227_v7 }
 0x4b7   : > { %v4742_v3 = vadd.f32 %v10800_v12, %v12882_v52  ;;  %v4733_v13 = vpop.f32.mrb[43].mxu0  ;;  %10938 = vmatmul.mubr.bf16.gmra.mrb[36].mxu1 %v5228_v6  ;;  %v5123_v15 = vmax.f32 %v4739_v46, 0.0 }
 0x4b8   : > { %v4734_v14 = vadd.f32 %v12882_v52, %v4733_v13  ;;  %v5121_v17 = vmax.f32 %v4731_v10, 0.0 }
 0x4b9   : > { %v5124_v16 = vmax.f32 %v4742_v3, 0.0 }
 0x4ba   : > { %v5122_v18 = vmax.f32 %v4734_v14, 0.0 }
 0x4bb   : > { %v5230_v19 = vpack.c.bf16 %v5124_v16, %v5123_v15 }
 0x4bc   : > { %v10803_v11 = vpop.f32.mrb[44].mxu0  ;;  %v5229_v20 = vpack.c.bf16 %v5122_v18, %v5121_v17 }
 0x4bd   : > { %v4755_v21 = vadd.f32 %v10803_v11, %v12882_v52  ;;  %v4746_v23 = vpop.f32.mrb[45].mxu0 }
 0x4be   : > { %v4747_v24 = vadd.f32 %v12882_v52, %v4746_v23  ;;  %v10804_v25 = vpop.f32.mrb[46].mxu0  ;;  %10941 = vmatprep.mubr.bf16.mxu1 %v5229_v20 }
 0x4bf   : > { %v4758_v26 = vadd.f32 %v10804_v25, %v12882_v52  ;;  %v4749_v27 = vpop.f32.mrb[47].mxu0  ;;  %10942 = vmatmul.mubr.bf16.gmra.mrb[40].mxu1 %v5230_v19  ;;  %v5127_v30 = vmax.f32 %v4755_v21, 0.0 }
 0x4c0   : > { %v4750_v28 = vadd.f32 %v12882_v52, %v4749_v27  ;;  %v5125_v32 = vmax.f32 %v4747_v24, 0.0 }
 0x4c1   : > { %v5128_v31 = vmax.f32 %v4758_v26, 0.0 }
 0x4c2   : > { %v5126_v33 = vmax.f32 %v4750_v28, 0.0 }
 0x4c3   : > { %v5232_v8 = vpack.c.bf16 %v5128_v31, %v5127_v30 }
 0x4c4   : > { %v10807_v34 = vpop.f32.mrb[48].mxu0  ;;  %v5231_v35 = vpack.c.bf16 %v5126_v33, %v5125_v32 }
 0x4c5   : > { %v4771_v36 = vadd.f32 %v10807_v34, %v12882_v52  ;;  %v4762_v37 = vpop.f32.mrb[49].mxu0 }
 0x4c6   : > { %v4763_v38 = vadd.f32 %v12882_v52, %v4762_v37  ;;  %v10808_v39 = vpop.f32.mrb[50].mxu0  ;;  %10945 = vmatprep.mubr.bf16.mxu1 %v5231_v35 }
 0x4c7   : > { %v4774_v41 = vadd.f32 %v10808_v39, %v12882_v52  ;;  %v4765_v42 = vpop.f32.mrb[51].mxu0  ;;  %10946 = vmatmul.mubr.bf16.gmra.mrb[44].mxu1 %v5232_v8  ;;  %v5131_v45 = vmax.f32 %v4771_v36, 0.0  ;;  %v11855_v36 = vld [vmem:[%s14235_s8 + $0x8] sm:$0xff]  }
 0x4c8   : > { %v4766_v44 = vadd.f32 %v12882_v52, %v4765_v42  ;;  %v5129_v48 = vmax.f32 %v4763_v38, 0.0  ;;  %11163 = vmatprep.subr.bf16.mxu0 %v11855_v36 }
 0x4c9   : > { %v5132_v47 = vmax.f32 %v4774_v41, 0.0  ;;  %11164 = vmatpush3.bf16.msra.mxu0 %v11855_v36 }
 0x4ca   : > { %v5130_v49 = vmax.f32 %v4766_v44, 0.0 }
 0x4cb   : > { %v5234_v50 = vpack.c.bf16 %v5132_v47, %v5131_v45 }
 0x4cc   : > { %v10811_v29 = vpop.f32.mrb[52].mxu0  ;;  %v5233_v40 = vpack.c.bf16 %v5130_v49, %v5129_v48 }
 0x4cd   : > { %v4787_v43 = vadd.f32 %v10811_v29, %v12882_v52  ;;  %v4778_v51 = vpop.f32.mrb[53].mxu0 }
 0x4ce   : > { %v4779_v53 = vadd.f32 %v12882_v52, %v4778_v51  ;;  %v10812_v54 = vpop.f32.mrb[54].mxu0  ;;  %10949 = vmatprep.mubr.bf16.mxu1 %v5233_v40 }
 0x4cf   : > { %v4790_v55 = vadd.f32 %v10812_v54, %v12882_v52  ;;  %v4781_v56 = vpop.f32.mrb[55].mxu0  ;;  %10950 = vmatmul.mubr.bf16.gmra.mrb[48].mxu1 %v5234_v50  ;;  %v5135_v58 = vmax.f32 %v4787_v43, 0.0 }
 0x4d0   : > { %v4782_v57 = vadd.f32 %v12882_v52, %v4781_v56  ;;  %v5133_v60 = vmax.f32 %v4779_v53, 0.0 }
 0x4d1   : > { %v5136_v59 = vmax.f32 %v4790_v55, 0.0 }
 0x4d2   : > { %v5134_v61 = vmax.f32 %v4782_v57, 0.0 }
 0x4d3   : > { %v5236_v62 = vpack.c.bf16 %v5136_v59, %v5135_v58 }
 0x4d4   : > { %v10815_v63 = vpop.f32.mrb[56].mxu0  ;;  %v5235_v0 = vpack.c.bf16 %v5134_v61, %v5133_v60 }
 0x4d5   : > { %v4803_v1 = vadd.f32 %v10815_v63, %v12882_v52  ;;  %v4794_v2 = vpop.f32.mrb[57].mxu0 }
 0x4d6   : > { %v4795_v5 = vadd.f32 %v12882_v52, %v4794_v2  ;;  %v10816_v6 = vpop.f32.mrb[58].mxu0  ;;  %10953 = vmatprep.mubr.bf16.mxu1 %v5235_v0 }
 0x4d7   : > { %v4806_v4 = vadd.f32 %v10816_v6, %v12882_v52  ;;  %v4797_v7 = vpop.f32.mrb[59].mxu0  ;;  %10954 = vmatmul.mubr.bf16.gmra.mrb[52].mxu1 %v5236_v62  ;;  %v5139_v9 = vmax.f32 %v4803_v1, 0.0 }
 0x4d8   : > { %v4798_v46 = vadd.f32 %v12882_v52, %v4797_v7  ;;  %v5137_v12 = vmax.f32 %v4795_v5, 0.0 }
 0x4d9   : > { %v5140_v10 = vmax.f32 %v4806_v4, 0.0 }
 0x4da   : > { %v5138_v3 = vmax.f32 %v4798_v46, 0.0 }
 0x4db   : > { %v5238_v13 = vpack.c.bf16 %v5140_v10, %v5139_v9 }
 0x4dc   : > { %v10819_v14 = vpop.f32.mrb[60].mxu0  ;;  %v5237_v15 = vpack.c.bf16 %v5138_v3, %v5137_v12 }
 0x4dd   : > { %v4819_v16 = vadd.f32 %v10819_v14, %v12882_v52  ;;  %v4810_v17 = vpop.f32.mrb[61].mxu0 }
 0x4de   : > { %v4811_v18 = vadd.f32 %v12882_v52, %v4810_v17  ;;  %v10820_v19 = vpop.f32.mrb[62].mxu0  ;;  %10957 = vmatprep.mubr.bf16.mxu1 %v5237_v15 }
 0x4df   : > { %v4822_v11 = vadd.f32 %v10820_v19, %v12882_v52  ;;  %v4813_v20 = vpop.f32.mrb[63].mxu0  ;;  %10958 = vmatmul.mubr.bf16.gmra.mrb[56].mxu1 %v5238_v13  ;;  %v5143_v23 = vmax.f32 %v4819_v16, 0.0 }
 0x4e0   : > { %v4814_v21 = vadd.f32 %v12882_v52, %v4813_v20  ;;  %v5141_v25 = vmax.f32 %v4811_v18, 0.0 }
 0x4e1   : > { %v5144_v24 = vmax.f32 %v4822_v11, 0.0 }
 0x4e2   : > { %v5142_v26 = vmax.f32 %v4814_v21, 0.0 }
 0x4e3   : > { %v5240_v27 = vpack.c.bf16 %v5144_v24, %v5143_v23 }
 0x4e4   : > { %v10823_v28 = vpop.f32.mrb[64].mxu0  ;;  %v5239_v30 = vpack.c.bf16 %v5142_v26, %v5141_v25 }
 0x4e5   : > { %v4835_v31 = vadd.f32 %v10823_v28, %v12882_v52  ;;  %v4826_v32 = vpop.f32.mrb[65].mxu0 }
 0x4e6   : > { %v4827_v33 = vadd.f32 %v12882_v52, %v4826_v32  ;;  %v10824_v8 = vpop.f32.mrb[66].mxu0  ;;  %10961 = vmatprep.mubr.bf16.mxu1 %v5239_v30 }
 0x4e7   : > { %v4838_v34 = vadd.f32 %v10824_v8, %v12882_v52  ;;  %v4829_v35 = vpop.f32.mrb[67].mxu0  ;;  %10962 = vmatmul.mubr.bf16.gmra.mrb[60].mxu1 %v5240_v27  ;;  %v5147_v38 = vmax.f32 %v4835_v31, 0.0  ;;  %v11856_v31 = vld [vmem:[%s14235_s8 + $0x10] sm:$0xff]  }
 0x4e8   : > { %v4830_v37 = vadd.f32 %v12882_v52, %v4829_v35  ;;  %v5145_v41 = vmax.f32 %v4827_v33, 0.0  ;;  %11165 = vmatprep.subr.bf16.mxu0 %v11856_v31 }
 0x4e9   : > { %v5148_v39 = vmax.f32 %v4838_v34, 0.0  ;;  %11166 = vmatpush3.bf16.msra.mxu0 %v11856_v31 }
 0x4ea   : > { %v5146_v42 = vmax.f32 %v4830_v37, 0.0 }
 0x4eb   : > { %v5242_v44 = vpack.c.bf16 %v5148_v39, %v5147_v38 }
 0x4ec   : > { %v10827_v45 = vpop.f32.mrb[68].mxu0  ;;  %v5241_v47 = vpack.c.bf16 %v5146_v42, %v5145_v41 }
 0x4ed   : > { %v4851_v48 = vadd.f32 %v10827_v45, %v12882_v52  ;;  %v4842_v49 = vpop.f32.mrb[69].mxu0 }
 0x4ee   : > { %v4843_v50 = vadd.f32 %v12882_v52, %v4842_v49  ;;  %v10828_v29 = vpop.f32.mrb[70].mxu0  ;;  %10965 = vmatprep.mubr.bf16.mxu1 %v5241_v47 }
 0x4ef   : > { %v4854_v40 = vadd.f32 %v10828_v29, %v12882_v52  ;;  %v4845_v43 = vpop.f32.mrb[71].mxu0  ;;  %10966 = vmatmul.mubr.bf16.gmra.mrb[64].mxu1 %v5242_v44  ;;  %v5151_v53 = vmax.f32 %v4851_v48, 0.0 }
 0x4f0   : > { %v4846_v51 = vadd.f32 %v12882_v52, %v4845_v43  ;;  %v5149_v55 = vmax.f32 %v4843_v50, 0.0 }
 0x4f1   : > { %v5152_v54 = vmax.f32 %v4854_v40, 0.0 }
 0x4f2   : > { %v5150_v56 = vmax.f32 %v4846_v51, 0.0 }
 0x4f3   : > { %v5244_v22 = vpack.c.bf16 %v5152_v54, %v5151_v53 }
 0x4f4   : > { %v10831_v57 = vpop.f32.mrb[72].mxu0  ;;  %v5243_v58 = vpack.c.bf16 %v5150_v56, %v5149_v55 }
 0x4f5   : > { %v4867_v59 = vadd.f32 %v10831_v57, %v12882_v52  ;;  %v4858_v60 = vpop.f32.mrb[73].mxu0 }
 0x4f6   : > { %v4859_v61 = vadd.f32 %v12882_v52, %v4858_v60  ;;  %v10832_v62 = vpop.f32.mrb[74].mxu0  ;;  %10969 = vmatprep.mubr.bf16.mxu1 %v5243_v58 }
 0x4f7   : > { %v4870_v63 = vadd.f32 %v10832_v62, %v12882_v52  ;;  %v4861_v0 = vpop.f32.mrb[75].mxu0  ;;  %10970 = vmatmul.mubr.bf16.gmra.mrb[68].mxu1 %v5244_v22  ;;  %v5155_v2 = vmax.f32 %v4867_v59, 0.0 }
 0x4f8   : > { %v4862_v1 = vadd.f32 %v12882_v52, %v4861_v0  ;;  %v5153_v6 = vmax.f32 %v4859_v61, 0.0 }
 0x4f9   : > { %v5156_v5 = vmax.f32 %v4870_v63, 0.0 }
 0x4fa   : > { %v5154_v4 = vmax.f32 %v4862_v1, 0.0 }
 0x4fb   : > { %v5246_v7 = vpack.c.bf16 %v5156_v5, %v5155_v2 }
 0x4fc   : > { %v10835_v46 = vpop.f32.mrb[76].mxu0  ;;  %v5245_v9 = vpack.c.bf16 %v5154_v4, %v5153_v6 }
 0x4fd   : > { %v4883_v10 = vadd.f32 %v10835_v46, %v12882_v52  ;;  %v4874_v12 = vpop.f32.mrb[77].mxu0 }
 0x4fe   : > { %v4875_v3 = vadd.f32 %v12882_v52, %v4874_v12  ;;  %v10836_v13 = vpop.f32.mrb[78].mxu0  ;;  %10973 = vmatprep.mubr.bf16.mxu1 %v5245_v9 }
 0x4ff   : > { %v4886_v14 = vadd.f32 %v10836_v13, %v12882_v52  ;;  %v4877_v15 = vpop.f32.mrb[79].mxu0  ;;  %10974 = vmatmul.mubr.bf16.gmra.mrb[72].mxu1 %v5246_v7  ;;  %v5159_v17 = vmax.f32 %v4883_v10, 0.0 }
 0x500   : > { %v4878_v16 = vadd.f32 %v12882_v52, %v4877_v15  ;;  %v5157_v19 = vmax.f32 %v4875_v3, 0.0 }
 0x501   : > { %v5160_v18 = vmax.f32 %v4886_v14, 0.0 }
 0x502   : > { %v5158_v11 = vmax.f32 %v4878_v16, 0.0 }
 0x503   : > { %v5248_v20 = vpack.c.bf16 %v5160_v18, %v5159_v17 }
 0x504   : > { %v10839_v21 = vpop.f32.mrb[80].mxu0  ;;  %v5247_v23 = vpack.c.bf16 %v5158_v11, %v5157_v19 }
 0x505   : > { %v4899_v24 = vadd.f32 %v10839_v21, %v12882_v52  ;;  %v4890_v25 = vpop.f32.mrb[81].mxu0 }
 0x506   : > { %v4891_v26 = vadd.f32 %v12882_v52, %v4890_v25  ;;  %v10840_v27 = vpop.f32.mrb[82].mxu0  ;;  %10977 = vmatprep.mubr.bf16.mxu1 %v5247_v23 }
 0x507   : > { %v4902_v28 = vadd.f32 %v10840_v27, %v12882_v52  ;;  %v4893_v30 = vpop.f32.mrb[83].mxu0  ;;  %10978 = vmatmul.mubr.bf16.gmra.mrb[76].mxu1 %v5248_v20  ;;  %v5163_v33 = vmax.f32 %v4899_v24, 0.0  ;;  %v11857_v24 = vld [vmem:[%s14235_s8 + $0x18] sm:$0xff]  }
 0x508   : > { %v4894_v32 = vadd.f32 %v12882_v52, %v4893_v30  ;;  %v5161_v34 = vmax.f32 %v4891_v26, 0.0  ;;  %11167 = vmatprep.subr.bf16.mxu0 %v11857_v24 }
 0x509   : > { %v5164_v8 = vmax.f32 %v4902_v28, 0.0  ;;  %11168 = vmatpush3.bf16.msra.mxu0 %v11857_v24 }
 0x50a   : > { %v5162_v35 = vmax.f32 %v4894_v32, 0.0 }
 0x50b   : > { %v5250_v36 = vpack.c.bf16 %v5164_v8, %v5163_v33 }
 0x50c   : > { %v10843_v37 = vpop.f32.mrb[84].mxu0  ;;  %v5249_v38 = vpack.c.bf16 %v5162_v35, %v5161_v34 }
 0x50d   : > { %v4915_v39 = vadd.f32 %v10843_v37, %v12882_v52  ;;  %v4906_v41 = vpop.f32.mrb[85].mxu0 }
 0x50e   : > { %v4907_v42 = vadd.f32 %v12882_v52, %v4906_v41  ;;  %v10844_v44 = vpop.f32.mrb[86].mxu0  ;;  %10981 = vmatprep.mubr.bf16.mxu1 %v5249_v38 }
 0x50f   : > { %v4918_v45 = vadd.f32 %v10844_v44, %v12882_v52  ;;  %v4909_v47 = vpop.f32.mrb[87].mxu0  ;;  %10982 = vmatmul.mubr.bf16.gmra.mrb[80].mxu1 %v5250_v36  ;;  %v5167_v49 = vmax.f32 %v4915_v39, 0.0 }
 0x510   : > { %v4910_v48 = vadd.f32 %v12882_v52, %v4909_v47  ;;  %v5165_v29 = vmax.f32 %v4907_v42, 0.0 }
 0x511   : > { %v5168_v50 = vmax.f32 %v4918_v45, 0.0 }
 0x512   : > { %v5166_v40 = vmax.f32 %v4910_v48, 0.0 }
 0x513   : > { %v5252_v43 = vpack.c.bf16 %v5168_v50, %v5167_v49 }
 0x514   : > { %v10847_v51 = vpop.f32.mrb[88].mxu0  ;;  %v5251_v53 = vpack.c.bf16 %v5166_v40, %v5165_v29 }
 0x515   : > { %v4931_v54 = vadd.f32 %v10847_v51, %v12882_v52  ;;  %v4922_v55 = vpop.f32.mrb[89].mxu0 }
 0x516   : > { %v4923_v56 = vadd.f32 %v12882_v52, %v4922_v55  ;;  %v10848_v22 = vpop.f32.mrb[90].mxu0  ;;  %10985 = vmatprep.mubr.bf16.mxu1 %v5251_v53 }
 0x517   : > { %v4934_v57 = vadd.f32 %v10848_v22, %v12882_v52  ;;  %v4925_v58 = vpop.f32.mrb[91].mxu0  ;;  %10986 = vmatmul.mubr.bf16.gmra.mrb[84].mxu1 %v5252_v43  ;;  %v5171_v60 = vmax.f32 %v4931_v54, 0.0  ;;  %v13027_v54 = vld [vmem:[%s14242_s15] ss:$0 sm:$0xff] }
 0x518   : > { %v4926_v59 = vadd.f32 %v12882_v52, %v4925_v58  ;;  %v5169_v62 = vmax.f32 %v4923_v56, 0.0 }
 0x519   : > { %v5172_v61 = vmax.f32 %v4934_v57, 0.0 }
 0x51a   : > { %v5170_v63 = vmax.f32 %v4926_v59, 0.0 }
 0x51b   : > { %v5254_v0 = vpack.c.bf16 %v5172_v61, %v5171_v60 }
 0x51c   : > { %v10851_v1 = vpop.f32.mrb[92].mxu0  ;;  %v5253_v2 = vpack.c.bf16 %v5170_v63, %v5169_v62 }
 0x51d   : > { %v4947_v5 = vadd.f32 %v10851_v1, %v12882_v52  ;;  %v4938_v6 = vpop.f32.mrb[93].mxu0 }
 0x51e   : > { %v4939_v4 = vadd.f32 %v12882_v52, %v4938_v6  ;;  %v10852_v7 = vpop.f32.mrb[94].mxu0  ;;  %10989 = vmatprep.mubr.bf16.mxu1 %v5253_v2 }
 0x51f   : > { %v4950_v46 = vadd.f32 %v10852_v7, %v12882_v52  ;;  %v4941_v9 = vpop.f32.mrb[95].mxu0  ;;  %10990 = vmatmul.mubr.bf16.gmra.mrb[88].mxu1 %v5254_v0  ;;  %v5175_v12 = vmax.f32 %v4947_v5, 0.0 }
 0x520   : > { %v4942_v10 = vadd.f32 %v12882_v52, %v4941_v9  ;;  %v5173_v13 = vmax.f32 %v4939_v4, 0.0 }
 0x521   : > { %v5176_v3 = vmax.f32 %v4950_v46, 0.0 }
 0x522   : > { %v5174_v14 = vmax.f32 %v4942_v10, 0.0 }
 0x523   : > { %v5256_v15 = vpack.c.bf16 %v5176_v3, %v5175_v12 }
 0x524   : > { %v10855_v16 = vpop.f32.mrb[96].mxu0  ;;  %v5255_v17 = vpack.c.bf16 %v5174_v14, %v5173_v13 }
 0x525   : > { %v4963_v18 = vadd.f32 %v10855_v16, %v12882_v52  ;;  %v4954_v19 = vpop.f32.mrb[97].mxu0 }
 0x526   : > { %v4955_v11 = vadd.f32 %v12882_v52, %v4954_v19  ;;  %v10856_v20 = vpop.f32.mrb[98].mxu0  ;;  %10993 = vmatprep.mubr.bf16.mxu1 %v5255_v17 }
 0x527   : > { %v4966_v21 = vadd.f32 %v10856_v20, %v12882_v52  ;;  %v4957_v23 = vpop.f32.mrb[99].mxu0  ;;  %10994 = vmatmul.mubr.bf16.gmra.mrb[92].mxu1 %v5256_v15  ;;  %v5179_v26 = vmax.f32 %v4963_v18, 0.0  ;;  %v11858_v18 = vld [vmem:[%s14235_s8 + $0x20] sm:$0xff]  }
 0x528   : > { %v4958_v25 = vadd.f32 %v12882_v52, %v4957_v23  ;;  %v5177_v28 = vmax.f32 %v4955_v11, 0.0  ;;  %11169 = vmatprep.subr.bf16.mxu0 %v11858_v18 }
 0x529   : > { %v5180_v27 = vmax.f32 %v4966_v21, 0.0  ;;  %11170 = vmatpush3.bf16.msra.mxu0 %v11858_v18  ;;  %v11895_v18 = vld [vmem:[%s12087_s30 + $0x60] sm:$0xff]  }
 0x52a   : > { %v5178_v30 = vmax.f32 %v4958_v25, 0.0 }
 0x52b   : > { %v5258_v31 = vpack.c.bf16 %v5180_v27, %v5179_v26 }
 0x52c   : > { %v10859_v32 = vpop.f32.mrb[100].mxu0  ;;  %v5257_v33 = vpack.c.bf16 %v5178_v30, %v5177_v28 }
 0x52d   : > { %v4979_v8 = vadd.f32 %v10859_v32, %v12882_v52  ;;  %v4970_v34 = vpop.f32.mrb[101].mxu0 }
 0x52e   : > { %v4971_v35 = vadd.f32 %v12882_v52, %v4970_v34  ;;  %v10860_v36 = vpop.f32.mrb[102].mxu0  ;;  %10997 = vmatprep.mubr.bf16.mxu1 %v5257_v33 }
 0x52f   : > { %v4982_v37 = vadd.f32 %v10860_v36, %v12882_v52  ;;  %v4973_v38 = vpop.f32.mrb[103].mxu0  ;;  %10998 = vmatmul.mubr.bf16.gmra.mrb[96].mxu1 %v5258_v31  ;;  %v5183_v41 = vmax.f32 %v4979_v8, 0.0 }
 0x530   : > { %v4974_v39 = vadd.f32 %v12882_v52, %v4973_v38  ;;  %v5181_v44 = vmax.f32 %v4971_v35, 0.0 }
 0x531   : > { %v5184_v42 = vmax.f32 %v4982_v37, 0.0 }
 0x532   : > { %v5182_v45 = vmax.f32 %v4974_v39, 0.0 }
 0x533   : > { %v5260_v47 = vpack.c.bf16 %v5184_v42, %v5183_v41 }
 0x534   : > { %v10863_v48 = vpop.f32.mrb[104].mxu0  ;;  %v5259_v49 = vpack.c.bf16 %v5182_v45, %v5181_v44 }
 0x535   : > { %v4995_v50 = vadd.f32 %v10863_v48, %v12882_v52  ;;  %v4986_v29 = vpop.f32.mrb[105].mxu0 }
 0x536   : > { %v4987_v40 = vadd.f32 %v12882_v52, %v4986_v29  ;;  %v10864_v43 = vpop.f32.mrb[106].mxu0  ;;  %11001 = vmatprep.mubr.bf16.mxu1 %v5259_v49 }
 0x537   : > { %v4998_v51 = vadd.f32 %v10864_v43, %v12882_v52  ;;  %v4989_v53 = vpop.f32.mrb[107].mxu0  ;;  %11002 = vmatmul.mubr.bf16.gmra.mrb[100].mxu1 %v5260_v47  ;;  %v5187_v56 = vmax.f32 %v4995_v50, 0.0 }
 0x538   : > { %v4990_v55 = vadd.f32 %v13027_v54, %v4989_v53  ;;  %v5185_v57 = vmax.f32 %v4987_v40, 0.0 }
 0x539   : > { %v5188_v22 = vmax.f32 %v4998_v51, 0.0 }
 0x53a   : > { %v5186_v58 = vmax.f32 %v4990_v55, 0.0 }
 0x53b   : > { %v5262_v59 = vpack.c.bf16 %v5188_v22, %v5187_v56 }
 0x53c   : > { %v10867_v60 = vpop.f32.mrb[108].mxu0  ;;  %v5261_v61 = vpack.c.bf16 %v5186_v58, %v5185_v57 }
 0x53d   : > { %v5011_v62 = vadd.f32 %v13027_v54, %v10867_v60  ;;  %v5002_v63 = vpop.f32.mrb[109].mxu0 }
 0x53e   : > { %v5003_v52 = vadd.f32 %v13027_v54, %v5002_v63  ;;  %v10868_v0 = vpop.f32.mrb[110].mxu0  ;;  %11005 = vmatprep.mubr.bf16.mxu1 %v5261_v61 }
 0x53f   : > { %v5014_v1 = vadd.f32 %v13027_v54, %v10868_v0  ;;  %v5005_v2 = vpop.f32.mrb[111].mxu0  ;;  %11006 = vmatmul.mubr.bf16.gmra.mrb[104].mxu1 %v5262_v59  ;;  %v5191_v6 = vmax.f32 %v5011_v62, 0.0 }
 0x540   : > { %v5006_v5 = vadd.f32 %v13027_v54, %v5005_v2  ;;  %v5189_v7 = vmax.f32 %v5003_v52, 0.0 }
 0x541   : > { %v5192_v4 = vmax.f32 %v5014_v1, 0.0 }
 0x542   : > { %v5190_v46 = vmax.f32 %v5006_v5, 0.0 }
 0x543   : > { %v5264_v9 = vpack.c.bf16 %v5192_v4, %v5191_v6  ;;  %v11859_v6 = vld [vmem:[%s14235_s8 + $0x28] sm:$0xff]   ;;  %v11883_v4 = vld [vmem:[%s12087_s30] sm:$0xff]  }
 0x544   : > { %v10871_v10 = vpop.f32.mrb[112].mxu0  ;;  %v5263_v12 = vpack.c.bf16 %v5190_v46, %v5189_v7  ;;  %11171 = vmatprep.subr.bf16.mxu0 %v11859_v6  ;;  %v11885_v7 = vld [vmem:[%s12087_s30 + $0x10] sm:$0xff]   ;;  %v11886_v46 = vld [vmem:[%s12087_s30 + $0x18] sm:$0xff]  }
 0x545   : > { %v5027_v3 = vadd.f32 %v13027_v54, %v10871_v10  ;;  %v5018_v13 = vpop.f32.mrb[113].mxu0  ;;  %11172 = vmatpush3.bf16.msra.mxu0 %v11859_v6  ;;  %v11888_v10 = vld [vmem:[%s12087_s30 + $0x28] sm:$0xff]  }
 0x546   : > { %v5019_v14 = vadd.f32 %v13027_v54, %v5018_v13  ;;  %v10872_v15 = vpop.f32.mrb[114].mxu0  ;;  %11009 = vmatprep.mubr.bf16.mxu1 %v5263_v12  ;;  %v11889_v12 = vld [vmem:[%s12087_s30 + $0x30] sm:$0xff]  }
 0x547   : > { %v5030_v16 = vadd.f32 %v13027_v54, %v10872_v15  ;;  %v5021_v17 = vpop.f32.mrb[115].mxu0  ;;  %11010 = vmatmul.mubr.bf16.gmra.mrb[108].mxu1 %v5264_v9  ;;  %v5195_v11 = vmax.f32 %v5027_v3, 0.0  ;;  %v11887_v9 = vld [vmem:[%s12087_s30 + $0x20] sm:$0xff]   ;;  %v11890_v3 = vld [vmem:[%s12087_s30 + $0x38] sm:$0xff]   ;;  %v11860_v13 = vld [vmem:[%s14235_s8 + $0x30] sm:$0xff]  }
 0x548   : > { %v5022_v19 = vadd.f32 %v13027_v54, %v5021_v17  ;;  %v5193_v21 = vmax.f32 %v5019_v14, 0.0  ;;  %v11891_v14 = vld [vmem:[%s12087_s30 + $0x40] sm:$0xff]   ;;  %11173 = vmatprep.subr.bf16.mxu0 %v11860_v13  ;;  %v11892_v15 = vld [vmem:[%s12087_s30 + $0x48] sm:$0xff]   ;;  %v11894_v17 = vld [vmem:[%s12087_s30 + $0x58] sm:$0xff]  }
 0x549   : > { %v5196_v20 = vmax.f32 %v5030_v16, 0.0  ;;  %11174 = vmatpush3.bf16.msra.mxu0 %v11860_v13  ;;  %v11893_v16 = vld [vmem:[%s12087_s30 + $0x50] sm:$0xff]   ;;  %v11939_v13 = vld [vmem:[%s12087_s30 + $0x1c0] sm:$0xff]  }
 0x54a   : > { %v5194_v23 = vmax.f32 %v5022_v19, 0.0  ;;  %v11896_v19 = vld [vmem:[%s12087_s30 + $0x68] sm:$0xff]  }
 0x54b   : > { %v5266_v24 = vpack.c.bf16 %v5196_v20, %v5195_v11  ;;  %v11897_v11 = vld [vmem:[%s12087_s30 + $0x70] sm:$0xff]   ;;  %v11898_v20 = vld [vmem:[%s12087_s30 + $0x78] sm:$0xff]  }
 0x54c   : > { %v10875_v25 = vpop.f32.mrb[116].mxu0  ;;  %v5265_v26 = vpack.c.bf16 %v5194_v23, %v5193_v21  ;;  %v11861_v21 = vld [vmem:[%s14235_s8 + $0x38] sm:$0xff]   ;;  %v11899_v23 = vld [vmem:[%s12087_s30 + $0x80] sm:$0xff]  }
 0x54d   : > { %v5043_v27 = vadd.f32 %v13027_v54, %v10875_v25  ;;  %v5034_v28 = vpop.f32.mrb[117].mxu0  ;;  %11175 = vmatprep.subr.bf16.mxu0 %v11861_v21  ;;  %v11901_v25 = vld [vmem:[%s12087_s30 + $0x90] sm:$0xff]  }
 0x54e   : > { %v5035_v30 = vadd.f32 %v13027_v54, %v5034_v28  ;;  %v10876_v31 = vpop.f32.mrb[118].mxu0  ;;  %11013 = vmatprep.mubr.bf16.mxu1 %v5265_v26  ;;  %11176 = vmatpush3.bf16.msra.mxu0 %v11861_v21  ;;  %v11902_v26 = vld [vmem:[%s12087_s30 + $0x98] sm:$0xff]   ;;  %v11904_v28 = vld [vmem:[%s12087_s30 + $0xa8] sm:$0xff]  }
 0x54f   : > { %v5046_v32 = vadd.f32 %v13027_v54, %v10876_v31  ;;  %v5037_v33 = vpop.f32.mrb[119].mxu0  ;;  %11014 = vmatmul.mubr.bf16.gmra.mrb[112].mxu1 %v5266_v24  ;;  %v5199_v34 = vmax.f32 %v5043_v27, 0.0  ;;  %v11900_v24 = vld [vmem:[%s12087_s30 + $0x88] sm:$0xff]   ;;  %v11903_v27 = vld [vmem:[%s12087_s30 + $0xa0] sm:$0xff]   ;;  %v11906_v31 = vld [vmem:[%s12087_s30 + $0xb8] sm:$0xff]  }
 0x550   : > { %v5038_v8 = vadd.f32 %v13027_v54, %v5037_v33  ;;  %v5197_v36 = vmax.f32 %v5035_v30, 0.0  ;;  %v11905_v30 = vld [vmem:[%s12087_s30 + $0xb0] sm:$0xff]   ;;  %v11908_v33 = vld [vmem:[%s12087_s30 + $0xc8] sm:$0xff]  }
 0x551   : > { %v5200_v35 = vmax.f32 %v5046_v32, 0.0  ;;  %v11907_v32 = vld [vmem:[%s12087_s30 + $0xc0] sm:$0xff]  }
 0x552   : > { %v5198_v37 = vmax.f32 %v5038_v8, 0.0  ;;  %v11909_v8 = vld [vmem:[%s12087_s30 + $0xd0] sm:$0xff]  }
 0x553   : > { %v5268_v38 = vpack.c.bf16 %v5200_v35, %v5199_v34  ;;  %v13119_v34 = vld [vmem:[%s14236_s9] sm:$0xff]   ;;  %v11910_v35 = vld [vmem:[%s12087_s30 + $0xd8] sm:$0xff]  }
 0x554   : > { %v10879_v39 = vpop.f32.mrb[120].mxu0  ;;  %v5267_v41 = vpack.c.bf16 %v5198_v37, %v5197_v36  ;;  %11305 = vmatprep.subr.bf16.mxu0 %v13119_v34  ;;  %v11911_v36 = vld [vmem:[%s12087_s30 + $0xe0] sm:$0xff]   ;;  %v11912_v37 = vld [vmem:[%s12087_s30 + $0xe8] sm:$0xff]  }
 0x555   : > { %v5059_v42 = vadd.f32 %v13027_v54, %v10879_v39  ;;  %v5050_v44 = vpop.f32.mrb[121].mxu0  ;;  %v11914_v39 = vld [vmem:[%s12087_s30 + $0xf8] sm:$0xff]  }
 0x556   : > { %v5051_v45 = vadd.f32 %v13027_v54, %v5050_v44  ;;  %v10880_v47 = vpop.f32.mrb[122].mxu0  ;;  %11017 = vmatprep.mubr.bf16.mxu1 %v5267_v41  ;;  %v11915_v41 = vld [vmem:[%s12087_s30 + $0x100] sm:$0xff]   ;;  %v11917_v44 = vld [vmem:[%s12087_s30 + $0x110] sm:$0xff]  }
 0x557   : > { %v5062_v48 = vadd.f32 %v13027_v54, %v10880_v47  ;;  %v5053_v49 = vpop.f32.mrb[123].mxu0  ;;  %11018 = vmatmul.mubr.bf16.gmra.mrb[116].mxu1 %v5268_v38  ;;  %v5203_v29 = vmax.f32 %v5059_v42, 0.0  ;;  %v11913_v38 = vld [vmem:[%s12087_s30 + $0xf0] sm:$0xff]   ;;  %v11916_v42 = vld [vmem:[%s12087_s30 + $0x108] sm:$0xff]   ;;  %v11919_v47 = vld [vmem:[%s12087_s30 + $0x120] sm:$0xff]  }
 0x558   : > { %v5054_v50 = vadd.f32 %v13027_v54, %v5053_v49  ;;  %v5201_v43 = vmax.f32 %v5051_v45, 0.0  ;;  %v11918_v45 = vld [vmem:[%s12087_s30 + $0x118] sm:$0xff]   ;;  %v11921_v49 = vld [vmem:[%s12087_s30 + $0x130] sm:$0xff]  }
 0x559   : > { %v5204_v40 = vmax.f32 %v5062_v48, 0.0  ;;  %v11920_v48 = vld [vmem:[%s12087_s30 + $0x128] sm:$0xff]  }
 0x55a   : > { %v5202_v51 = vmax.f32 %v5054_v50, 0.0  ;;  %v11922_v50 = vld [vmem:[%s12087_s30 + $0x138] sm:$0xff]  }
 0x55b   : > { %v5270_v53 = vpack.c.bf16 %v5204_v40, %v5203_v29  ;;  %v11923_v29 = vld [vmem:[%s12087_s30 + $0x140] sm:$0xff]   ;;  %v11924_v40 = vld [vmem:[%s12087_s30 + $0x148] sm:$0xff]  }
 0x55c   : > { %v10883_v55 = vpop.f32.mrb[124].mxu0  ;;  %v5269_v56 = vpack.c.bf16 %v5202_v51, %v5201_v43  ;;  %v11925_v43 = vld [vmem:[%s12087_s30 + $0x150] sm:$0xff]   ;;  %v11926_v51 = vld [vmem:[%s12087_s30 + $0x158] sm:$0xff]  }
 0x55d   : > { %v5075_v22 = vadd.f32 %v13027_v54, %v10883_v55  ;;  %v5066_v57 = vpop.f32.mrb[125].mxu0  ;;  %v11928_v55 = vld [vmem:[%s12087_s30 + $0x168] sm:$0xff]  }
 0x55e   : > { %v5067_v58 = vadd.f32 %v13027_v54, %v5066_v57  ;;  %v10884_v59 = vpop.f32.mrb[126].mxu0  ;;  %11021 = vmatprep.mubr.bf16.mxu1 %v5269_v56  ;;  %v11929_v56 = vld [vmem:[%s12087_s30 + $0x170] sm:$0xff]   ;;  %v11931_v57 = vld [vmem:[%s12087_s30 + $0x180] sm:$0xff]  }
 0x55f   : > { %v5078_v60 = vadd.f32 %v13027_v54, %v10884_v59  ;;  %v5069_v61 = vpop.f32.mrb[127].mxu0  ;;  %11022 = vmatmul.mubr.bf16.gmra.mrb[120].mxu1 %v5270_v53  ;;  %v5207_v63 = vmax.f32 %v5075_v22, 0.0  ;;  %v11927_v53 = vld [vmem:[%s12087_s30 + $0x160] sm:$0xff]   ;;  %v11930_v22 = vld [vmem:[%s12087_s30 + $0x178] sm:$0xff]   ;;  %v11933_v59 = vld [vmem:[%s12087_s30 + $0x190] sm:$0xff]  }
 0x560   : > { %v5070_v62 = vadd.f32 %v13027_v54, %v5069_v61  ;;  %v5205_v0 = vmax.f32 %v5067_v58, 0.0  ;;  %v11884_v54 = vld [vmem:[%s12087_s30 + $0x8] sm:$0xff]   ;;  %v11935_v61 = vld [vmem:[%s12087_s30 + $0x1a0] sm:$0xff]  }
 0x561   : > { %v5208_v52 = vmax.f32 %v5078_v60, 0.0  ;;  %v11932_v58 = vld [vmem:[%s12087_s30 + $0x188] sm:$0xff]   ;;  %v11934_v60 = vld [vmem:[%s12087_s30 + $0x198] sm:$0xff]  }
 0x562   : > { %v5206_v1 = vmax.f32 %v5070_v62, 0.0  ;;  %v11936_v62 = vld [vmem:[%s12087_s30 + $0x1a8] sm:$0xff]  }
 0x563   : > { %v5272_v2 = vpack.c.bf16 %v5208_v52, %v5207_v63  ;;  %v13179_v63 = vld [vmem:[%s14243_s16] ss:$0 sm:$0xff]  ;;  %v11937_v52 = vld [vmem:[%s12087_s30 + $0x1b0] sm:$0xff]  }
 0x564   : > { %v5271_v5 = vpack.c.bf16 %v5206_v1, %v5205_v0 }
 0x566   : > { %11025 = vmatprep.mubr.bf16.mxu1 %v5271_v5 }
 0x567   : > { %11026 = vmatmul.mubr.bf16.gmra.mrb[124].mxu1 %v5272_v2 }
 0x568   : > { %11033 = vmatprep.mubr.msk.bf16.mxu1 %vm1104_vm2, %v11883_v4 }
 0x56f   : > { %11034 = vmatmul.mubr.msk.bf16.vlgmr.msra.gmra.mrb[0].mxu1 %vm1104_vm2, %v11884_v54 }
 0x570   : > { %11037 = vmatprep.mubr.msk.bf16.mxu1 %vm1104_vm2, %v11885_v7 }
 0x577   : > { %11038 = vmatmul.mubr.msk.bf16.gmra.mrb[4].mxu1 %vm1104_vm2, %v11886_v46 }
 0x578   : > { %11041 = vmatprep.mubr.msk.bf16.mxu1 %vm1104_vm2, %v11887_v9 }
 0x57f   : > { %11042 = vmatmul.mubr.msk.bf16.gmra.mrb[8].mxu1 %vm1104_vm2, %v11888_v10  ;;  %v11938_v10 = vld [vmem:[%s12087_s30 + $0x1b8] sm:$0xff]  }
 0x580   : > { %11045 = vmatprep.mubr.msk.bf16.mxu1 %vm1104_vm2, %v11889_v12 }
 0x587   : > { %11046 = vmatmul.mubr.msk.bf16.gmra.mrb[12].mxu1 %vm1104_vm2, %v11890_v3 }
 0x588   : > { %11049 = vmatprep.mubr.msk.bf16.mxu1 %vm1104_vm2, %v11891_v14 }
 0x58f   : > { %11050 = vmatmul.mubr.msk.bf16.gmra.mrb[16].mxu1 %vm1104_vm2, %v11892_v15 }
 0x590   : > { %11053 = vmatprep.mubr.msk.bf16.mxu1 %vm1104_vm2, %v11893_v16 }
 0x597   : > { %11054 = vmatmul.mubr.msk.bf16.gmra.mrb[20].mxu1 %vm1104_vm2, %v11894_v17 }
 0x598   : > { %11057 = vmatprep.mubr.msk.bf16.mxu1 %vm1104_vm2, %v11895_v18 }
 0x59f   : > { %11058 = vmatmul.mubr.msk.bf16.gmra.mrb[24].mxu1 %vm1104_vm2, %v11896_v19  ;;  %v11863_v19 = vld [vmem:[%s14236_s9 + $0x8] sm:$0xff]  }
 0x5a0   : > { %11061 = vmatprep.mubr.msk.bf16.mxu1 %vm1104_vm2, %v11897_v11 }
 0x5a7   : > { %11062 = vmatmul.mubr.msk.bf16.gmra.mrb[28].mxu1 %vm1104_vm2, %v11898_v20 }
 0x5a8   : > { %11065 = vmatprep.mubr.msk.bf16.mxu1 %vm1104_vm2, %v11899_v23 }
 0x5af   : > { %11066 = vmatmul.mubr.msk.bf16.gmra.mrb[32].mxu1 %vm1104_vm2, %v11900_v24 }
 0x5b0   : > { %11069 = vmatprep.mubr.msk.bf16.mxu1 %vm1104_vm2, %v11901_v25 }
 0x5b7   : > { %11070 = vmatmul.mubr.msk.bf16.gmra.mrb[36].mxu1 %vm1104_vm2, %v11902_v26 }
 0x5b8   : > { %11073 = vmatprep.mubr.msk.bf16.mxu1 %vm1104_vm2, %v11903_v27  ;;  %v11940_v27 = vld [vmem:[%s12087_s30 + $0x1c8] sm:$0xff]  }
 0x5bf   : > { %11074 = vmatmul.mubr.msk.bf16.gmra.mrb[40].mxu1 %vm1104_vm2, %v11904_v28  ;;  %v11864_v28 = vld [vmem:[%s14236_s9 + $0x10] sm:$0xff]  }
 0x5c0   : > { %11077 = vmatprep.mubr.msk.bf16.mxu1 %vm1104_vm2, %v11905_v30 }
 0x5c7   : > { %11078 = vmatmul.mubr.msk.bf16.gmra.mrb[44].mxu1 %vm1104_vm2, %v11906_v31 }
 0x5c8   : > { %11081 = vmatprep.mubr.msk.bf16.mxu1 %vm1104_vm2, %v11907_v32  ;;  %v11941_v32 = vld [vmem:[%s12087_s30 + $0x1d0] sm:$0xff]  }
 0x5cf   : > { %11082 = vmatmul.mubr.msk.bf16.gmra.mrb[48].mxu1 %vm1104_vm2, %v11908_v33 }
 0x5d0   : > { %11085 = vmatprep.mubr.msk.bf16.mxu1 %vm1104_vm2, %v11909_v8 }
 0x5d7   : > { %11086 = vmatmul.mubr.msk.bf16.gmra.mrb[52].mxu1 %vm1104_vm2, %v11910_v35 }
 0x5d8   : > { %11089 = vmatprep.mubr.msk.bf16.mxu1 %vm1104_vm2, %v11911_v36 }
 0x5df   : > { %11090 = vmatmul.mubr.msk.bf16.gmra.mrb[56].mxu1 %vm1104_vm2, %v11912_v37  ;;  %v11865_v37 = vld [vmem:[%s14236_s9 + $0x18] sm:$0xff]  }
 0x5e0   : > { %11093 = vmatprep.mubr.msk.bf16.mxu1 %vm1104_vm2, %v11913_v38 }
 0x5e7   : > { %11094 = vmatmul.mubr.msk.bf16.gmra.mrb[60].mxu1 %vm1104_vm2, %v11914_v39 }
 0x5e8   : > { %11097 = vmatprep.mubr.msk.bf16.mxu1 %vm1104_vm2, %v11915_v41 }
 0x5ef   : > { %11098 = vmatmul.mubr.msk.bf16.gmra.mrb[64].mxu1 %vm1104_vm2, %v11916_v42 }
 0x5f0   : > { %11101 = vmatprep.mubr.msk.bf16.mxu1 %vm1104_vm2, %v11917_v44 }
 0x5f7   : > { %11102 = vmatmul.mubr.msk.bf16.gmra.mrb[68].mxu1 %vm1104_vm2, %v11918_v45 }
 0x5f8   : > { %11105 = vmatprep.mubr.msk.bf16.mxu1 %vm1104_vm2, %v11919_v47 }
 0x5ff   : > { %11106 = vmatmul.mubr.msk.bf16.gmra.mrb[72].mxu1 %vm1104_vm2, %v11920_v48  ;;  %v11942_v48 = vld [vmem:[%s12087_s30 + $0x1d8] sm:$0xff]  }
 0x600   : > { %11109 = vmatprep.mubr.msk.bf16.mxu1 %vm1104_vm2, %v11921_v49  ;;  %v11866_v49 = vld [vmem:[%s14236_s9 + $0x20] sm:$0xff]  }
 0x607   : > { %11110 = vmatmul.mubr.msk.bf16.gmra.mrb[76].mxu1 %vm1104_vm2, %v11922_v50 }
 0x608   : > { %11113 = vmatprep.mubr.msk.bf16.mxu1 %vm1104_vm2, %v11923_v29 }
 0x60f   : > { %11114 = vmatmul.mubr.msk.bf16.gmra.mrb[80].mxu1 %vm1104_vm2, %v11924_v40  ;;  %v11943_v40 = vld [vmem:[%s12087_s30 + $0x1e0] sm:$0xff]  }
 0x610   : > { %11117 = vmatprep.mubr.msk.bf16.mxu1 %vm1104_vm2, %v11925_v43 }
 0x617   : > { %11118 = vmatmul.mubr.msk.bf16.gmra.mrb[84].mxu1 %vm1104_vm2, %v11926_v51 }
 0x618   : > { %11121 = vmatprep.mubr.msk.bf16.mxu1 %vm1104_vm2, %v11927_v53 }
 0x61f   : > { %11122 = vmatmul.mubr.msk.bf16.gmra.mrb[88].mxu1 %vm1104_vm2, %v11928_v55 }
 0x620   : > { %11125 = vmatprep.mubr.msk.bf16.mxu1 %vm1104_vm2, %v11929_v56 }
 0x627   : > { %11126 = vmatmul.mubr.msk.bf16.gmra.mrb[92].mxu1 %vm1104_vm2, %v11930_v22 }
 0x628   : > { %11129 = vmatprep.mubr.msk.bf16.mxu1 %vm1104_vm2, %v11931_v57 }
 0x62f   : > { %11130 = vmatmul.mubr.msk.bf16.gmra.mrb[96].mxu1 %vm1104_vm2, %v11932_v58 }
 0x630   : > { %11133 = vmatprep.mubr.msk.bf16.mxu1 %vm1104_vm2, %v11933_v59 }
 0x637   : > { %11134 = vmatmul.mubr.msk.bf16.gmra.mrb[100].mxu1 %vm1104_vm2, %v11934_v60 }
 0x638   : > { %11137 = vmatprep.mubr.msk.bf16.mxu1 %vm1104_vm2, %v11935_v61 }
 0x63f   : > { %11138 = vmatmul.mubr.msk.bf16.gmra.mrb[104].mxu1 %vm1104_vm2, %v11936_v62 }
 0x640   : > { %11141 = vmatprep.mubr.msk.bf16.mxu1 %vm1104_vm2, %v11937_v52  ;;  %v11944_v52 = vld [vmem:[%s12087_s30 + $0x1e8] sm:$0xff]  }
 0x642   : > { %v11035_v0 = vpop.f32.mrb[0].mxu1 }
 0x643   : > { %v6454_v1 = vadd.f32 %v11035_v0, %v13179_v63  ;;  %v5934_v2 = vpop.f32.mrb[1].mxu1 }
 0x644   : > { %v6452_v5 = vadd.f32 %v13179_v63, %v5934_v2  ;;  %v11036_v6 = vpop.f32.mrb[2].mxu1  ;;  %v11945_v2 = vld [vmem:[%s12087_s30 + $0x1f0] sm:$0xff]  }
 0x645   : > { %v6455_v4 = vadd.f32 %v11036_v6, %v13179_v63  ;;  %v5937_v54 = vpop.f32.mrb[3].mxu1  ;;  %v6582_v46 = vmax.f32 %v6454_v1, 0.0 }
 0x646   : > { %v6453_v7 = vadd.f32 %v13179_v63, %v5937_v54  ;;  %v6580_v12 = vmax.f32 %v6452_v5, 0.0 }
 0x647   : > { %v6583_v9 = vmax.f32 %v6455_v4, 0.0  ;;  %11142 = vmatmul.mubr.msk.bf16.gmra.mrb[108].mxu1 %vm1104_vm2, %v11938_v10 }
 0x648   : > { %v6581_v3 = vmax.f32 %v6453_v7, 0.0  ;;  %11145 = vmatprep.mubr.msk.bf16.mxu1 %vm1104_vm2, %v11939_v13 }
 0x649   : > { %v6709_v14 = vpack.c.bf16 %v6583_v9, %v6582_v46 }
 0x64a   : > { %v6708_v15 = vpack.c.bf16 %v6581_v3, %v6580_v12  ;;  %v11039_v16 = vpop.f32.mrb[4].mxu1 }
 0x64b   : > { %v6458_v17 = vadd.f32 %v11039_v16, %v13179_v63  ;;  %v5950_v18 = vpop.f32.mrb[5].mxu1 }
 0x64c   : > { %v6456_v11 = vadd.f32 %v13179_v63, %v5950_v18  ;;  %v11040_v20 = vpop.f32.mrb[6].mxu1  ;;  %11177 = vmatprep.mubr.bf16.mxu0 %v6708_v15  ;;  %v11946_v15 = vld [vmem:[%s12087_s30 + $0x1f8] sm:$0xff]  }
 0x64d   : > { %v6459_v21 = vadd.f32 %v11040_v20, %v13179_v63  ;;  %v5953_v23 = vpop.f32.mrb[7].mxu1  ;;  %11178 = vmatmul.mubr.bf16.vlgmr.msra.gmra.mrb[128].mxu0 %v6709_v14  ;;  %v6586_v25 = vmax.f32 %v6458_v17, 0.0 }
 0x64e   : > { %v6457_v24 = vadd.f32 %v13179_v63, %v5953_v23  ;;  %11306 = vmatpush3.bf16.msra.mxu0 %v13119_v34  ;;  %v6584_v30 = vmax.f32 %v6456_v11, 0.0 }
 0x64f   : > { %v6587_v26 = vmax.f32 %v6459_v21, 0.0  ;;  %11146 = vmatmul.mubr.msk.bf16.gmra.mrb[112].mxu1 %vm1104_vm2, %v11940_v27  ;;  %11307 = vmatprep.subr.bf16.mxu0 %v11863_v19 }
 0x650   : > { %v6585_v31 = vmax.f32 %v6457_v24, 0.0  ;;  %11149 = vmatprep.mubr.msk.bf16.mxu1 %vm1104_vm2, %v11941_v32 }
 0x651   : > { %v6711_v33 = vpack.c.bf16 %v6587_v26, %v6586_v25 }
 0x652   : > { %v6710_v8 = vpack.c.bf16 %v6585_v31, %v6584_v30  ;;  %v11043_v35 = vpop.f32.mrb[8].mxu1  ;;  %11308 = vmatpush3.bf16.msra.mxu0 %v11863_v19 }
 0x653   : > { %v6462_v34 = vadd.f32 %v11043_v35, %v13179_v63  ;;  %v5966_v36 = vpop.f32.mrb[9].mxu1  ;;  %11309 = vmatprep.subr.bf16.mxu0 %v11864_v28 }
 0x654   : > { %v6460_v38 = vadd.f32 %v13179_v63, %v5966_v36  ;;  %v11044_v39 = vpop.f32.mrb[10].mxu1  ;;  %11181 = vmatprep.mubr.bf16.mxu0 %v6710_v8  ;;  %v11867_v8 = vld [vmem:[%s14236_s9 + $0x28] sm:$0xff]  }
 0x655   : > { %v6463_v41 = vadd.f32 %v11044_v39, %v13179_v63  ;;  %v5969_v42 = vpop.f32.mrb[11].mxu1  ;;  %11182 = vmatmul.mubr.bf16.gmra.mrb[132].mxu0 %v6711_v33  ;;  %v6590_v45 = vmax.f32 %v6462_v34, 0.0 }
 0x656   : > { %v6461_v44 = vadd.f32 %v13179_v63, %v5969_v42  ;;  %11310 = vmatpush3.bf16.msra.mxu0 %v11864_v28  ;;  %v6588_v50 = vmax.f32 %v6460_v38, 0.0 }
 0x657   : > { %v6591_v47 = vmax.f32 %v6463_v41, 0.0  ;;  %11150 = vmatmul.mubr.msk.bf16.gmra.mrb[116].mxu1 %vm1104_vm2, %v11942_v48  ;;  %11311 = vmatprep.subr.bf16.mxu0 %v11865_v37 }
 0x658   : > { %v6589_v29 = vmax.f32 %v6461_v44, 0.0  ;;  %11153 = vmatprep.mubr.msk.bf16.mxu1 %vm1104_vm2, %v11943_v40 }
 0x659   : > { %v6713_v43 = vpack.c.bf16 %v6591_v47, %v6590_v45 }
 0x65a   : > { %v6712_v51 = vpack.c.bf16 %v6589_v29, %v6588_v50  ;;  %v11047_v53 = vpop.f32.mrb[12].mxu1  ;;  %11312 = vmatpush3.bf16.msra.mxu0 %v11865_v37 }
 0x65b   : > { %v6466_v55 = vadd.f32 %v11047_v53, %v13179_v63  ;;  %v5982_v56 = vpop.f32.mrb[13].mxu1  ;;  %11313 = vmatprep.subr.bf16.mxu0 %v11866_v49 }
 0x65c   : > { %v6464_v22 = vadd.f32 %v13179_v63, %v5982_v56  ;;  %v11048_v57 = vpop.f32.mrb[14].mxu1  ;;  %11185 = vmatprep.mubr.bf16.mxu0 %v6712_v51 }
 0x65d   : > { %v6467_v58 = vadd.f32 %v11048_v57, %v13179_v63  ;;  %v5985_v59 = vpop.f32.mrb[15].mxu1  ;;  %11186 = vmatmul.mubr.bf16.gmra.mrb[136].mxu0 %v6713_v43  ;;  %v6594_v61 = vmax.f32 %v6466_v55, 0.0 }
 0x65e   : > { %v6465_v60 = vadd.f32 %v13179_v63, %v5985_v59  ;;  %11314 = vmatpush3.bf16.msra.mxu0 %v11866_v49  ;;  %v6592_v0 = vmax.f32 %v6464_v22, 0.0 }
 0x65f   : > { %v6595_v62 = vmax.f32 %v6467_v58, 0.0  ;;  %11154 = vmatmul.mubr.msk.bf16.gmra.mrb[120].mxu1 %vm1104_vm2, %v11944_v52  ;;  %11315 = vmatprep.subr.bf16.mxu0 %v11867_v8 }
 0x660   : > { %v6593_v1 = vmax.f32 %v6465_v60, 0.0  ;;  %11157 = vmatprep.mubr.msk.bf16.mxu1 %vm1104_vm2, %v11945_v2 }
 0x661   : > { %v6715_v5 = vpack.c.bf16 %v6595_v62, %v6594_v61 }
 0x662   : > { %v6714_v6 = vpack.c.bf16 %v6593_v1, %v6592_v0  ;;  %v11051_v4 = vpop.f32.mrb[16].mxu1  ;;  %11316 = vmatpush3.bf16.msra.mxu0 %v11867_v8 }
 0x663   : > { %v6470_v54 = vadd.f32 %v11051_v4, %v13179_v63  ;;  %v5998_v7 = vpop.f32.mrb[17].mxu1 }
 0x664   : > { %v6468_v46 = vadd.f32 %v13179_v63, %v5998_v7  ;;  %v11052_v9 = vpop.f32.mrb[18].mxu1  ;;  %11189 = vmatprep.mubr.bf16.mxu0 %v6714_v6 }
 0x665   : > { %v6471_v10 = vadd.f32 %v11052_v9, %v13179_v63  ;;  %v6001_v12 = vpop.f32.mrb[19].mxu1  ;;  %11190 = vmatmul.mubr.bf16.gmra.mrb[140].mxu0 %v6715_v5  ;;  %v6598_v13 = vmax.f32 %v6470_v54, 0.0 }
 0x666   : > { %v6469_v3 = vadd.f32 %v13179_v63, %v6001_v12  ;;  %v6596_v16 = vmax.f32 %v6468_v46, 0.0 }
 0x667   : > { %v6599_v14 = vmax.f32 %v6471_v10, 0.0  ;;  %11158 = vmatmul.mubr.msk.bf16.gmra.mrb[124].mxu1 %vm1104_vm2, %v11946_v15 }
 0x668   : > { %v6597_v17 = vmax.f32 %v6469_v3, 0.0 }
 0x669   : > { %v6717_v18 = vpack.c.bf16 %v6599_v14, %v6598_v13 }
 0x66a   : > { %v6716_v19 = vpack.c.bf16 %v6597_v17, %v6596_v16  ;;  %v11055_v11 = vpop.f32.mrb[20].mxu1 }
 0x66b   : > { %v6474_v20 = vadd.f32 %v11055_v11, %v13179_v63  ;;  %v6014_v21 = vpop.f32.mrb[21].mxu1 }
 0x66c   : > { %v6472_v23 = vadd.f32 %v13179_v63, %v6014_v21  ;;  %v11056_v24 = vpop.f32.mrb[22].mxu1  ;;  %11193 = vmatprep.mubr.bf16.mxu0 %v6716_v19 }
 0x66d   : > { %v6475_v25 = vadd.f32 %v11056_v24, %v13179_v63  ;;  %v6017_v26 = vpop.f32.mrb[23].mxu1  ;;  %11194 = vmatmul.mubr.bf16.gmra.mrb[144].mxu0 %v6717_v18  ;;  %v6602_v28 = vmax.f32 %v6474_v20, 0.0 }
 0x66e   : > { %v6473_v27 = vadd.f32 %v13179_v63, %v6017_v26  ;;  %v6600_v31 = vmax.f32 %v6472_v23, 0.0 }
 0x66f   : > { %v6603_v30 = vmax.f32 %v6475_v25, 0.0 }
 0x670   : > { %v6601_v32 = vmax.f32 %v6473_v27, 0.0  ;;  %v11868_v27 = vld [vmem:[%s14236_s9 + $0x30] sm:$0xff]  }
 0x671   : > { %v6719_v33 = vpack.c.bf16 %v6603_v30, %v6602_v28  ;;  %11317 = vmatprep.subr.bf16.mxu0 %v11868_v27 }
 0x672   : > { %v6718_v35 = vpack.c.bf16 %v6601_v32, %v6600_v31  ;;  %v11059_v34 = vpop.f32.mrb[24].mxu1  ;;  %11318 = vmatpush3.bf16.msra.mxu0 %v11868_v27 }
 0x673   : > { %v6478_v36 = vadd.f32 %v11059_v34, %v13179_v63  ;;  %v6030_v37 = vpop.f32.mrb[25].mxu1 }
 0x674   : > { %v6476_v38 = vadd.f32 %v13179_v63, %v6030_v37  ;;  %v11060_v39 = vpop.f32.mrb[26].mxu1  ;;  %11197 = vmatprep.mubr.bf16.mxu0 %v6718_v35 }
 0x675   : > { %v6479_v41 = vadd.f32 %v11060_v39, %v13179_v63  ;;  %v6033_v42 = vpop.f32.mrb[27].mxu1  ;;  %11198 = vmatmul.mubr.bf16.gmra.mrb[148].mxu0 %v6719_v33  ;;  %v6606_v45 = vmax.f32 %v6478_v36, 0.0 }
 0x676   : > { %v6477_v44 = vadd.f32 %v13179_v63, %v6033_v42  ;;  %v6604_v48 = vmax.f32 %v6476_v38, 0.0 }
 0x677   : > { %v6607_v47 = vmax.f32 %v6479_v41, 0.0 }
 0x678   : > { %v6605_v49 = vmax.f32 %v6477_v44, 0.0 }
 0x679   : > { %v6721_v50 = vpack.c.bf16 %v6607_v47, %v6606_v45 }
 0x67a   : > { %v6720_v29 = vpack.c.bf16 %v6605_v49, %v6604_v48  ;;  %v11063_v40 = vpop.f32.mrb[28].mxu1 }
 0x67b   : > { %v6482_v43 = vadd.f32 %v11063_v40, %v13179_v63  ;;  %v6046_v51 = vpop.f32.mrb[29].mxu1 }
 0x67c   : > { %v6480_v53 = vadd.f32 %v13179_v63, %v6046_v51  ;;  %v11064_v55 = vpop.f32.mrb[30].mxu1  ;;  %11201 = vmatprep.mubr.bf16.mxu0 %v6720_v29 }
 0x67d   : > { %v6483_v56 = vadd.f32 %v11064_v55, %v13179_v63  ;;  %v6049_v22 = vpop.f32.mrb[31].mxu1  ;;  %11202 = vmatmul.mubr.bf16.gmra.mrb[152].mxu0 %v6721_v50  ;;  %v6610_v58 = vmax.f32 %v6482_v43, 0.0 }
 0x67e   : > { %v6481_v57 = vadd.f32 %v13179_v63, %v6049_v22  ;;  %v6608_v60 = vmax.f32 %v6480_v53, 0.0 }
 0x67f   : > { %v6611_v59 = vmax.f32 %v6483_v56, 0.0 }
 0x680   : > { %v6609_v61 = vmax.f32 %v6481_v57, 0.0 }
 0x681   : > { %v6723_v62 = vpack.c.bf16 %v6611_v59, %v6610_v58 }
 0x682   : > { %v6722_v52 = vpack.c.bf16 %v6609_v61, %v6608_v60  ;;  %v11067_v0 = vpop.f32.mrb[32].mxu1 }
 0x683   : > { %v6486_v1 = vadd.f32 %v11067_v0, %v13179_v63  ;;  %v6062_v2 = vpop.f32.mrb[33].mxu1 }
 0x684   : > { %v6484_v5 = vadd.f32 %v13179_v63, %v6062_v2  ;;  %v11068_v6 = vpop.f32.mrb[34].mxu1  ;;  %11205 = vmatprep.mubr.bf16.mxu0 %v6722_v52 }
 0x685   : > { %v6487_v4 = vadd.f32 %v11068_v6, %v13179_v63  ;;  %v6065_v54 = vpop.f32.mrb[35].mxu1  ;;  %11206 = vmatmul.mubr.bf16.gmra.mrb[156].mxu0 %v6723_v62  ;;  %v6614_v46 = vmax.f32 %v6486_v1, 0.0 }
 0x686   : > { %v6485_v7 = vadd.f32 %v13179_v63, %v6065_v54  ;;  %v6612_v10 = vmax.f32 %v6484_v5, 0.0 }
 0x687   : > { %v6615_v9 = vmax.f32 %v6487_v4, 0.0 }
 0x688   : > { %v6613_v12 = vmax.f32 %v6485_v7, 0.0 }
 0x689   : > { %v6725_v3 = vpack.c.bf16 %v6615_v9, %v6614_v46 }
 0x68a   : > { %v6724_v13 = vpack.c.bf16 %v6613_v12, %v6612_v10  ;;  %v11071_v14 = vpop.f32.mrb[36].mxu1 }
 0x68b   : > { %v6490_v15 = vadd.f32 %v11071_v14, %v13179_v63  ;;  %v6078_v16 = vpop.f32.mrb[37].mxu1 }
 0x68c   : > { %v6488_v17 = vadd.f32 %v13179_v63, %v6078_v16  ;;  %v11072_v18 = vpop.f32.mrb[38].mxu1  ;;  %11209 = vmatprep.mubr.bf16.mxu0 %v6724_v13 }
 0x68d   : > { %v6491_v19 = vadd.f32 %v11072_v18, %v13179_v63  ;;  %v6081_v11 = vpop.f32.mrb[39].mxu1  ;;  %11210 = vmatmul.mubr.bf16.gmra.mrb[160].mxu0 %v6725_v3  ;;  %v6618_v21 = vmax.f32 %v6490_v15, 0.0 }
 0x68e   : > { %v6489_v20 = vadd.f32 %v13179_v63, %v6081_v11  ;;  %v6616_v24 = vmax.f32 %v6488_v17, 0.0 }
 0x68f   : > { %v6619_v23 = vmax.f32 %v6491_v19, 0.0 }
 0x690   : > { %v6617_v25 = vmax.f32 %v6489_v20, 0.0  ;;  %v11869_v20 = vld [vmem:[%s14236_s9 + $0x38] sm:$0xff]  }
 0x691   : > { %v6727_v26 = vpack.c.bf16 %v6619_v23, %v6618_v21  ;;  %11319 = vmatprep.subr.bf16.mxu0 %v11869_v20 }
 0x692   : > { %v6726_v28 = vpack.c.bf16 %v6617_v25, %v6616_v24  ;;  %v11075_v30 = vpop.f32.mrb[40].mxu1  ;;  %11320 = vmatpush3.bf16.msra.mxu0 %v11869_v20 }
 0x693   : > { %v6494_v31 = vadd.f32 %v11075_v30, %v13179_v63  ;;  %v6094_v32 = vpop.f32.mrb[41].mxu1 }
 0x694   : > { %v6492_v33 = vadd.f32 %v13179_v63, %v6094_v32  ;;  %v11076_v8 = vpop.f32.mrb[42].mxu1  ;;  %11213 = vmatprep.mubr.bf16.mxu0 %v6726_v28 }
 0x695   : > { %v6495_v35 = vadd.f32 %v11076_v8, %v13179_v63  ;;  %v6097_v34 = vpop.f32.mrb[43].mxu1  ;;  %11214 = vmatmul.mubr.bf16.gmra.mrb[164].mxu0 %v6727_v26  ;;  %v6622_v37 = vmax.f32 %v6494_v31, 0.0  ;;  %v13286_v8 = vld [vmem:[%s14237_s10] sm:$0xff]  }
 0x696   : > { %v6493_v36 = vadd.f32 %v13179_v63, %v6097_v34  ;;  %v6620_v39 = vmax.f32 %v6492_v33, 0.0  ;;  %11593 = vmatprep.subr.bf16.mxu1 %v13286_v8  ;;  %11449 = vmatprep.subr.bf16.mxu0 %v13286_v8 }
 0x697   : > { %v6623_v38 = vmax.f32 %v6495_v35, 0.0  ;;  %11601 = vmatpush3.bf16.msra.mxu1 %v13286_v8 }
 0x698   : > { %v6621_v41 = vmax.f32 %v6493_v36, 0.0 }
 0x699   : > { %v6729_v42 = vpack.c.bf16 %v6623_v38, %v6622_v37 }
 0x69a   : > { %v6728_v44 = vpack.c.bf16 %v6621_v41, %v6620_v39  ;;  %v11079_v45 = vpop.f32.mrb[44].mxu1 }
 0x69b   : > { %v6498_v47 = vadd.f32 %v11079_v45, %v13179_v63  ;;  %v6110_v48 = vpop.f32.mrb[45].mxu1 }
 0x69c   : > { %v6496_v49 = vadd.f32 %v13179_v63, %v6110_v48  ;;  %v11080_v50 = vpop.f32.mrb[46].mxu1  ;;  %11217 = vmatprep.mubr.bf16.mxu0 %v6728_v44 }
 0x69d   : > { %v6499_v29 = vadd.f32 %v11080_v50, %v13179_v63  ;;  %v6113_v40 = vpop.f32.mrb[47].mxu1  ;;  %11218 = vmatmul.mubr.bf16.gmra.mrb[168].mxu0 %v6729_v42  ;;  %v6626_v51 = vmax.f32 %v6498_v47, 0.0 }
 0x69e   : > { %v6497_v43 = vadd.f32 %v13179_v63, %v6113_v40  ;;  %v6624_v55 = vmax.f32 %v6496_v49, 0.0 }
 0x69f   : > { %v6627_v53 = vmax.f32 %v6499_v29, 0.0 }
 0x6a0   : > { %v6625_v56 = vmax.f32 %v6497_v43, 0.0 }
 0x6a1   : > { %v6731_v22 = vpack.c.bf16 %v6627_v53, %v6626_v51 }
 0x6a2   : > { %v6730_v57 = vpack.c.bf16 %v6625_v56, %v6624_v55  ;;  %v11083_v58 = vpop.f32.mrb[48].mxu1 }
 0x6a3   : > { %v6502_v59 = vadd.f32 %v11083_v58, %v13179_v63  ;;  %v6126_v60 = vpop.f32.mrb[49].mxu1 }
 0x6a4   : > { %v6500_v61 = vadd.f32 %v13179_v63, %v6126_v60  ;;  %v11084_v62 = vpop.f32.mrb[50].mxu1  ;;  %11221 = vmatprep.mubr.bf16.mxu0 %v6730_v57 }
 0x6a5   : > { %v6503_v52 = vadd.f32 %v11084_v62, %v13179_v63  ;;  %v6129_v0 = vpop.f32.mrb[51].mxu1  ;;  %11222 = vmatmul.mubr.bf16.gmra.mrb[172].mxu0 %v6731_v22  ;;  %v6630_v2 = vmax.f32 %v6502_v59, 0.0 }
 0x6a6   : > { %v6501_v1 = vadd.f32 %v13179_v63, %v6129_v0  ;;  %v6628_v6 = vmax.f32 %v6500_v61, 0.0 }
 0x6a7   : > { %v6631_v5 = vmax.f32 %v6503_v52, 0.0 }
 0x6a8   : > { %v6629_v4 = vmax.f32 %v6501_v1, 0.0 }
 0x6a9   : > { %v6733_v54 = vpack.c.bf16 %v6631_v5, %v6630_v2 }
 0x6aa   : > { %v6732_v7 = vpack.c.bf16 %v6629_v4, %v6628_v6  ;;  %v11087_v46 = vpop.f32.mrb[52].mxu1 }
 0x6ab   : > { %v6506_v9 = vadd.f32 %v11087_v46, %v13179_v63  ;;  %v6142_v10 = vpop.f32.mrb[53].mxu1 }
 0x6ac   : > { %v6504_v12 = vadd.f32 %v13179_v63, %v6142_v10  ;;  %v11088_v3 = vpop.f32.mrb[54].mxu1  ;;  %11225 = vmatprep.mubr.bf16.mxu0 %v6732_v7 }
 0x6ad   : > { %v6507_v13 = vadd.f32 %v11088_v3, %v13179_v63  ;;  %v6145_v14 = vpop.f32.mrb[55].mxu1  ;;  %11226 = vmatmul.mubr.bf16.gmra.mrb[176].mxu0 %v6733_v54  ;;  %v6634_v16 = vmax.f32 %v6506_v9, 0.0 }
 0x6ae   : > { %v6505_v15 = vadd.f32 %v13179_v63, %v6145_v14  ;;  %v6632_v18 = vmax.f32 %v6504_v12, 0.0 }
 0x6af   : > { %v6635_v17 = vmax.f32 %v6507_v13, 0.0 }
 0x6b0   : > { %v6633_v19 = vmax.f32 %v6505_v15, 0.0 }
 0x6b1   : > { %v6735_v11 = vpack.c.bf16 %v6635_v17, %v6634_v16 }
 0x6b2   : > { %v6734_v21 = vpack.c.bf16 %v6633_v19, %v6632_v18  ;;  %v11091_v23 = vpop.f32.mrb[56].mxu1 }
 0x6b3   : > { %v6510_v24 = vadd.f32 %v11091_v23, %v13179_v63  ;;  %v6158_v25 = vpop.f32.mrb[57].mxu1 }
 0x6b4   : > { %v6508_v26 = vadd.f32 %v13179_v63, %v6158_v25  ;;  %v11092_v27 = vpop.f32.mrb[58].mxu1  ;;  %11229 = vmatprep.mubr.bf16.mxu0 %v6734_v21 }
 0x6b5   : > { %v6511_v28 = vadd.f32 %v11092_v27, %v13179_v63  ;;  %v6161_v30 = vpop.f32.mrb[59].mxu1  ;;  %11230 = vmatmul.mubr.bf16.gmra.mrb[180].mxu0 %v6735_v11  ;;  %v6638_v32 = vmax.f32 %v6510_v24, 0.0  ;;  %v13310_v27 = vld [vmem:[%s14237_s10 + $0x8] sm:$0xff]  }
 0x6b6   : > { %v6509_v31 = vadd.f32 %v13179_v63, %v6161_v30  ;;  %v6636_v35 = vmax.f32 %v6508_v26, 0.0  ;;  %11594 = vmatprep.subr.bf16.mxu1 %v13310_v27 }
 0x6b7   : > { %v6639_v33 = vmax.f32 %v6511_v28, 0.0  ;;  %11602 = vmatpush3.bf16.msra.mxu1 %v13310_v27 }
 0x6b8   : > { %v6637_v34 = vmax.f32 %v6509_v31, 0.0 }
 0x6b9   : > { %v6737_v36 = vpack.c.bf16 %v6639_v33, %v6638_v32 }
 0x6ba   : > { %v6736_v37 = vpack.c.bf16 %v6637_v34, %v6636_v35  ;;  %v11095_v38 = vpop.f32.mrb[60].mxu1 }
 0x6bb   : > { %v6514_v39 = vadd.f32 %v11095_v38, %v13179_v63  ;;  %v6174_v41 = vpop.f32.mrb[61].mxu1 }
 0x6bc   : > { %v6512_v42 = vadd.f32 %v13179_v63, %v6174_v41  ;;  %v11096_v44 = vpop.f32.mrb[62].mxu1  ;;  %11233 = vmatprep.mubr.bf16.mxu0 %v6736_v37 }
 0x6bd   : > { %v6515_v45 = vadd.f32 %v11096_v44, %v13179_v63  ;;  %v6177_v47 = vpop.f32.mrb[63].mxu1  ;;  %11234 = vmatmul.mubr.bf16.gmra.mrb[184].mxu0 %v6737_v36  ;;  %v6642_v49 = vmax.f32 %v6514_v39, 0.0 }
 0x6be   : > { %v6513_v48 = vadd.f32 %v13179_v63, %v6177_v47  ;;  %v6640_v29 = vmax.f32 %v6512_v42, 0.0 }
 0x6bf   : > { %v6643_v50 = vmax.f32 %v6515_v45, 0.0 }
 0x6c0   : > { %v6641_v40 = vmax.f32 %v6513_v48, 0.0 }
 0x6c1   : > { %v6739_v43 = vpack.c.bf16 %v6643_v50, %v6642_v49 }
 0x6c2   : > { %v6738_v51 = vpack.c.bf16 %v6641_v40, %v6640_v29  ;;  %v11099_v53 = vpop.f32.mrb[64].mxu1 }
 0x6c3   : > { %v6518_v55 = vadd.f32 %v11099_v53, %v13179_v63  ;;  %v6190_v56 = vpop.f32.mrb[65].mxu1 }
 0x6c4   : > { %v6516_v22 = vadd.f32 %v13179_v63, %v6190_v56  ;;  %v11100_v57 = vpop.f32.mrb[66].mxu1  ;;  %11237 = vmatprep.mubr.bf16.mxu0 %v6738_v51 }
 0x6c5   : > { %v6519_v58 = vadd.f32 %v11100_v57, %v13179_v63  ;;  %v6193_v59 = vpop.f32.mrb[67].mxu1  ;;  %11238 = vmatmul.mubr.bf16.gmra.mrb[188].mxu0 %v6739_v43  ;;  %v6646_v61 = vmax.f32 %v6518_v55, 0.0 }
 0x6c6   : > { %v6517_v60 = vadd.f32 %v13179_v63, %v6193_v59  ;;  %v6644_v52 = vmax.f32 %v6516_v22, 0.0 }
 0x6c7   : > { %v6647_v62 = vmax.f32 %v6519_v58, 0.0 }
 0x6c8   : > { %v6645_v0 = vmax.f32 %v6517_v60, 0.0 }
 0x6c9   : > { %v6741_v1 = vpack.c.bf16 %v6647_v62, %v6646_v61 }
 0x6ca   : > { %v6740_v2 = vpack.c.bf16 %v6645_v0, %v6644_v52  ;;  %v11103_v5 = vpop.f32.mrb[68].mxu1 }
 0x6cb   : > { %v6522_v6 = vadd.f32 %v11103_v5, %v13179_v63  ;;  %v6206_v4 = vpop.f32.mrb[69].mxu1 }
 0x6cc   : > { %v6520_v54 = vadd.f32 %v13179_v63, %v6206_v4  ;;  %v11104_v7 = vpop.f32.mrb[70].mxu1  ;;  %11241 = vmatprep.mubr.bf16.mxu0 %v6740_v2 }
 0x6cd   : > { %v6523_v46 = vadd.f32 %v11104_v7, %v13179_v63  ;;  %v6209_v9 = vpop.f32.mrb[71].mxu1  ;;  %11242 = vmatmul.mubr.bf16.gmra.mrb[192].mxu0 %v6741_v1  ;;  %v6650_v12 = vmax.f32 %v6522_v6, 0.0 }
 0x6ce   : > { %v6521_v10 = vadd.f32 %v13179_v63, %v6209_v9  ;;  %v6648_v13 = vmax.f32 %v6520_v54, 0.0 }
 0x6cf   : > { %v6651_v3 = vmax.f32 %v6523_v46, 0.0 }
 0x6d0   : > { %v6649_v14 = vmax.f32 %v6521_v10, 0.0 }
 0x6d1   : > { %v6743_v15 = vpack.c.bf16 %v6651_v3, %v6650_v12 }
 0x6d2   : > { %v6742_v16 = vpack.c.bf16 %v6649_v14, %v6648_v13  ;;  %v11107_v17 = vpop.f32.mrb[72].mxu1 }
 0x6d3   : > { %v6526_v18 = vadd.f32 %v11107_v17, %v13179_v63  ;;  %v6222_v19 = vpop.f32.mrb[73].mxu1 }
 0x6d4   : > { %v6524_v11 = vadd.f32 %v13179_v63, %v6222_v19  ;;  %v11108_v20 = vpop.f32.mrb[74].mxu1  ;;  %11245 = vmatprep.mubr.bf16.mxu0 %v6742_v16 }
 0x6d5   : > { %v6527_v21 = vadd.f32 %v11108_v20, %v13179_v63  ;;  %v6225_v23 = vpop.f32.mrb[75].mxu1  ;;  %11246 = vmatmul.mubr.bf16.gmra.mrb[196].mxu0 %v6743_v15  ;;  %v6654_v25 = vmax.f32 %v6526_v18, 0.0 }
 0x6d6   : > { %v6525_v24 = vadd.f32 %v13179_v63, %v6225_v23  ;;  %v6652_v28 = vmax.f32 %v6524_v11, 0.0 }
 0x6d7   : > { %v6655_v26 = vmax.f32 %v6527_v21, 0.0  ;;  %v13333_v21 = vld [vmem:[%s14237_s10 + $0x10] sm:$0xff]  }
 0x6d8   : > { %v6653_v30 = vmax.f32 %v6525_v24, 0.0  ;;  %11595 = vmatprep.subr.bf16.mxu1 %v13333_v21 }
 0x6d9   : > { %v6745_v31 = vpack.c.bf16 %v6655_v26, %v6654_v25  ;;  %11603 = vmatpush3.bf16.msra.mxu1 %v13333_v21 }
 0x6da   : > { %v6744_v32 = vpack.c.bf16 %v6653_v30, %v6652_v28  ;;  %v11111_v33 = vpop.f32.mrb[76].mxu1 }
 0x6db   : > { %v6530_v35 = vadd.f32 %v11111_v33, %v13179_v63  ;;  %v6238_v34 = vpop.f32.mrb[77].mxu1 }
 0x6dc   : > { %v6528_v36 = vadd.f32 %v13179_v63, %v6238_v34  ;;  %v11112_v37 = vpop.f32.mrb[78].mxu1  ;;  %11249 = vmatprep.mubr.bf16.mxu0 %v6744_v32 }
 0x6dd   : > { %v6531_v38 = vadd.f32 %v11112_v37, %v13179_v63  ;;  %v6241_v39 = vpop.f32.mrb[79].mxu1  ;;  %11250 = vmatmul.mubr.bf16.gmra.mrb[200].mxu0 %v6745_v31  ;;  %v6658_v42 = vmax.f32 %v6530_v35, 0.0 }
 0x6de   : > { %v6529_v41 = vadd.f32 %v13179_v63, %v6241_v39  ;;  %v6656_v45 = vmax.f32 %v6528_v36, 0.0 }
 0x6df   : > { %v6659_v44 = vmax.f32 %v6531_v38, 0.0 }
 0x6e0   : > { %v6657_v47 = vmax.f32 %v6529_v41, 0.0 }
 0x6e1   : > { %v6747_v48 = vpack.c.bf16 %v6659_v44, %v6658_v42 }
 0x6e2   : > { %v6746_v49 = vpack.c.bf16 %v6657_v47, %v6656_v45  ;;  %v11115_v50 = vpop.f32.mrb[80].mxu1 }
 0x6e3   : > { %v6534_v29 = vadd.f32 %v11115_v50, %v13179_v63  ;;  %v6254_v40 = vpop.f32.mrb[81].mxu1 }
 0x6e4   : > { %v6532_v43 = vadd.f32 %v13179_v63, %v6254_v40  ;;  %v11116_v51 = vpop.f32.mrb[82].mxu1  ;;  %11253 = vmatprep.mubr.bf16.mxu0 %v6746_v49 }
 0x6e5   : > { %v6535_v53 = vadd.f32 %v11116_v51, %v13179_v63  ;;  %v6257_v55 = vpop.f32.mrb[83].mxu1  ;;  %11254 = vmatmul.mubr.bf16.gmra.mrb[204].mxu0 %v6747_v48  ;;  %v6662_v22 = vmax.f32 %v6534_v29, 0.0 }
 0x6e6   : > { %v6533_v56 = vadd.f32 %v13179_v63, %v6257_v55  ;;  %v6660_v58 = vmax.f32 %v6532_v43, 0.0 }
 0x6e7   : > { %v6663_v57 = vmax.f32 %v6535_v53, 0.0 }
 0x6e8   : > { %v6661_v59 = vmax.f32 %v6533_v56, 0.0 }
 0x6e9   : > { %v6749_v60 = vpack.c.bf16 %v6663_v57, %v6662_v22 }
 0x6ea   : > { %v6748_v61 = vpack.c.bf16 %v6661_v59, %v6660_v58  ;;  %v11119_v62 = vpop.f32.mrb[84].mxu1 }
 0x6eb   : > { %v6538_v52 = vadd.f32 %v11119_v62, %v13179_v63  ;;  %v6270_v0 = vpop.f32.mrb[85].mxu1 }
 0x6ec   : > { %v6536_v1 = vadd.f32 %v13179_v63, %v6270_v0  ;;  %v11120_v2 = vpop.f32.mrb[86].mxu1  ;;  %11257 = vmatprep.mubr.bf16.mxu0 %v6748_v61 }
 0x6ed   : > { %v6539_v5 = vadd.f32 %v11120_v2, %v13179_v63  ;;  %v6273_v6 = vpop.f32.mrb[87].mxu1  ;;  %11258 = vmatmul.mubr.bf16.gmra.mrb[208].mxu0 %v6749_v60  ;;  %v6666_v54 = vmax.f32 %v6538_v52, 0.0 }
 0x6ee   : > { %v6537_v4 = vadd.f32 %v13179_v63, %v6273_v6  ;;  %v6664_v46 = vmax.f32 %v6536_v1, 0.0 }
 0x6ef   : > { %v6667_v7 = vmax.f32 %v6539_v5, 0.0 }
 0x6f0   : > { %v6665_v9 = vmax.f32 %v6537_v4, 0.0 }
 0x6f1   : > { %v6751_v10 = vpack.c.bf16 %v6667_v7, %v6666_v54 }
 0x6f2   : > { %v6750_v12 = vpack.c.bf16 %v6665_v9, %v6664_v46  ;;  %v11123_v3 = vpop.f32.mrb[88].mxu1 }
 0x6f3   : > { %v6542_v13 = vadd.f32 %v11123_v3, %v13179_v63  ;;  %v6286_v14 = vpop.f32.mrb[89].mxu1 }
 0x6f4   : > { %v6540_v15 = vadd.f32 %v13179_v63, %v6286_v14  ;;  %v11124_v16 = vpop.f32.mrb[90].mxu1  ;;  %11261 = vmatprep.mubr.bf16.mxu0 %v6750_v12 }
 0x6f5   : > { %v6543_v17 = vadd.f32 %v11124_v16, %v13179_v63  ;;  %v6289_v18 = vpop.f32.mrb[91].mxu1  ;;  %11262 = vmatmul.mubr.bf16.gmra.mrb[212].mxu0 %v6751_v10  ;;  %v6670_v11 = vmax.f32 %v6542_v13, 0.0 }
 0x6f6   : > { %v6541_v19 = vadd.f32 %v13179_v63, %v6289_v18  ;;  %v6668_v23 = vmax.f32 %v6540_v15, 0.0  ;;  %v13356_v18 = vld [vmem:[%s14237_s10 + $0x18] sm:$0xff]  }
 0x6f7   : > { %v6671_v20 = vmax.f32 %v6543_v17, 0.0  ;;  %11596 = vmatprep.subr.bf16.mxu1 %v13356_v18 }
 0x6f8   : > { %v6669_v24 = vmax.f32 %v6541_v19, 0.0  ;;  %11604 = vmatpush3.bf16.msra.mxu1 %v13356_v18 }
 0x6f9   : > { %v6753_v25 = vpack.c.bf16 %v6671_v20, %v6670_v11 }
 0x6fa   : > { %v6752_v26 = vpack.c.bf16 %v6669_v24, %v6668_v23  ;;  %v11127_v28 = vpop.f32.mrb[92].mxu1 }
 0x6fb   : > { %v6546_v30 = vadd.f32 %v11127_v28, %v13179_v63  ;;  %v6302_v31 = vpop.f32.mrb[93].mxu1 }
 0x6fc   : > { %v6544_v32 = vadd.f32 %v13179_v63, %v6302_v31  ;;  %v11128_v33 = vpop.f32.mrb[94].mxu1  ;;  %11265 = vmatprep.mubr.bf16.mxu0 %v6752_v26 }
 0x6fd   : > { %v6547_v35 = vadd.f32 %v11128_v33, %v13179_v63  ;;  %v6305_v34 = vpop.f32.mrb[95].mxu1  ;;  %11266 = vmatmul.mubr.bf16.gmra.mrb[216].mxu0 %v6753_v25  ;;  %v6674_v37 = vmax.f32 %v6546_v30, 0.0 }
 0x6fe   : > { %v6545_v36 = vadd.f32 %v13179_v63, %v6305_v34  ;;  %v6672_v39 = vmax.f32 %v6544_v32, 0.0 }
 0x6ff   : > { %v6675_v38 = vmax.f32 %v6547_v35, 0.0  ;;  %v13367_v35 = vld [vmem:[%s14244_s17] ss:$0 sm:$0xff] }
 0x700   : > { %v6673_v41 = vmax.f32 %v6545_v36, 0.0 }
 0x701   : > { %v6755_v42 = vpack.c.bf16 %v6675_v38, %v6674_v37 }
 0x702   : > { %v6754_v44 = vpack.c.bf16 %v6673_v41, %v6672_v39  ;;  %v11131_v45 = vpop.f32.mrb[96].mxu1 }
 0x703   : > { %v6550_v47 = vadd.f32 %v11131_v45, %v13179_v63  ;;  %v6318_v48 = vpop.f32.mrb[97].mxu1 }
 0x704   : > { %v6548_v49 = vadd.f32 %v13179_v63, %v6318_v48  ;;  %v11132_v50 = vpop.f32.mrb[98].mxu1  ;;  %11269 = vmatprep.mubr.bf16.mxu0 %v6754_v44 }
 0x705   : > { %v6551_v29 = vadd.f32 %v11132_v50, %v13179_v63  ;;  %v6321_v40 = vpop.f32.mrb[99].mxu1  ;;  %11270 = vmatmul.mubr.bf16.gmra.mrb[220].mxu0 %v6755_v42  ;;  %v6678_v51 = vmax.f32 %v6550_v47, 0.0 }
 0x706   : > { %v6549_v43 = vadd.f32 %v13179_v63, %v6321_v40  ;;  %v6676_v55 = vmax.f32 %v6548_v49, 0.0 }
 0x707   : > { %v6679_v53 = vmax.f32 %v6551_v29, 0.0 }
 0x708   : > { %v6677_v56 = vmax.f32 %v6549_v43, 0.0 }
 0x709   : > { %v6757_v22 = vpack.c.bf16 %v6679_v53, %v6678_v51 }
 0x70a   : > { %v6756_v57 = vpack.c.bf16 %v6677_v56, %v6676_v55  ;;  %v11135_v58 = vpop.f32.mrb[100].mxu1 }
 0x70b   : > { %v6554_v59 = vadd.f32 %v11135_v58, %v13179_v63  ;;  %v6334_v60 = vpop.f32.mrb[101].mxu1 }
 0x70c   : > { %v6552_v61 = vadd.f32 %v13179_v63, %v6334_v60  ;;  %v11136_v62 = vpop.f32.mrb[102].mxu1  ;;  %11273 = vmatprep.mubr.bf16.mxu0 %v6756_v57 }
 0x70d   : > { %v6555_v52 = vadd.f32 %v11136_v62, %v13179_v63  ;;  %v6337_v0 = vpop.f32.mrb[103].mxu1  ;;  %11274 = vmatmul.mubr.bf16.gmra.mrb[224].mxu0 %v6757_v22  ;;  %v6682_v2 = vmax.f32 %v6554_v59, 0.0 }
 0x70e   : > { %v6553_v1 = vadd.f32 %v13179_v63, %v6337_v0  ;;  %v6680_v6 = vmax.f32 %v6552_v61, 0.0  ;;  %v13379_v61 = vld [vmem:[%s14243_s16] ss:$0 sm:$0xff] }
 0x70f   : > { %v6683_v5 = vmax.f32 %v6555_v52, 0.0 }
 0x710   : > { %v6681_v4 = vmax.f32 %v6553_v1, 0.0 }
 0x711   : > { %v6759_v54 = vpack.c.bf16 %v6683_v5, %v6682_v2 }
 0x712   : > { %v6758_v7 = vpack.c.bf16 %v6681_v4, %v6680_v6  ;;  %v11139_v46 = vpop.f32.mrb[104].mxu1 }
 0x713   : > { %v6558_v9 = vadd.f32 %v11139_v46, %v13179_v63  ;;  %v6350_v10 = vpop.f32.mrb[105].mxu1 }
 0x714   : > { %v6556_v12 = vadd.f32 %v13179_v63, %v6350_v10  ;;  %v11140_v3 = vpop.f32.mrb[106].mxu1  ;;  %11277 = vmatprep.mubr.bf16.mxu0 %v6758_v7 }
 0x715   : > { %v6559_v13 = vadd.f32 %v11140_v3, %v13179_v63  ;;  %v6353_v14 = vpop.f32.mrb[107].mxu1  ;;  %11278 = vmatmul.mubr.bf16.gmra.mrb[228].mxu0 %v6759_v54  ;;  %v6686_v16 = vmax.f32 %v6558_v9, 0.0 }
 0x716   : > { %v6557_v15 = vadd.f32 %v13179_v63, %v6353_v14  ;;  %v6684_v19 = vmax.f32 %v6556_v12, 0.0 }
 0x717   : > { %v6687_v17 = vmax.f32 %v6559_v13, 0.0 }
 0x718   : > { %v6685_v11 = vmax.f32 %v6557_v15, 0.0 }
 0x719   : > { %v6761_v20 = vpack.c.bf16 %v6687_v17, %v6686_v16 }
 0x71a   : > { %v6760_v23 = vpack.c.bf16 %v6685_v11, %v6684_v19  ;;  %v11143_v24 = vpop.f32.mrb[108].mxu1 }
 0x71b   : > { %v6562_v25 = vadd.f32 %v11143_v24, %v13179_v63  ;;  %v6366_v26 = vpop.f32.mrb[109].mxu1 }
 0x71c   : > { %v6560_v28 = vadd.f32 %v13179_v63, %v6366_v26  ;;  %v11144_v30 = vpop.f32.mrb[110].mxu1  ;;  %11281 = vmatprep.mubr.bf16.mxu0 %v6760_v23 }
 0x71d   : > { %v6563_v31 = vadd.f32 %v11144_v30, %v13179_v63  ;;  %v6369_v32 = vpop.f32.mrb[111].mxu1  ;;  %11282 = vmatmul.mubr.bf16.gmra.mrb[232].mxu0 %v6761_v20  ;;  %v6690_v34 = vmax.f32 %v6562_v25, 0.0 }
 0x71e   : > { %v6561_v33 = vadd.f32 %v13179_v63, %v6369_v32  ;;  %v6688_v37 = vmax.f32 %v6560_v28, 0.0 }
 0x71f   : > { %v6691_v36 = vmax.f32 %v6563_v31, 0.0 }
 0x720   : > { %v6689_v38 = vmax.f32 %v6561_v33, 0.0  ;;  %v11179_v39 = vpop.f32.mrb[128].mxu0 }
 0x721   : > { %v6763_v41 = vpack.c.bf16 %v6691_v36, %v6690_v34  ;;  %v6886_v42 = vadd.f32 %v11179_v39, %v13367_v35  ;;  %v6877_v44 = vpop.f32.mrb[129].mxu0 }
 0x722   : > { %v6762_v45 = vpack.c.bf16 %v6689_v38, %v6688_v37  ;;  %v6878_v47 = vadd.f32 %v13367_v35, %v6877_v44  ;;  %v11147_v48 = vpop.f32.mrb[112].mxu1  ;;  %v11180_v49 = vpop.f32.mrb[130].mxu0 }
 0x723   : > { %v6566_v50 = vadd.f32 %v11147_v48, %v13179_v63  ;;  %v6889_v29 = vadd.f32 %v11180_v49, %v13367_v35  ;;  %v6382_v40 = vpop.f32.mrb[113].mxu1  ;;  %v6880_v43 = vpop.f32.mrb[131].mxu0  ;;  %v7390_v56 = vmax.f32 %v6886_v42, 0.0 }
 0x724   : > { %v6564_v51 = vadd.f32 %v13179_v63, %v6382_v40  ;;  %v6881_v53 = vadd.f32 %v13367_v35, %v6880_v43  ;;  %v11148_v55 = vpop.f32.mrb[114].mxu1  ;;  %11285 = vmatprep.mubr.bf16.mxu0 %v6762_v45  ;;  %v7388_v59 = vmax.f32 %v6878_v47, 0.0 }
 0x725   : > { %v7391_v22 = vmax.f32 %v6889_v29, 0.0  ;;  %v6567_v57 = vadd.f32 %v11148_v55, %v13179_v63  ;;  %v6385_v58 = vpop.f32.mrb[115].mxu1  ;;  %11286 = vmatmul.mubr.bf16.gmra.mrb[236].mxu0 %v6763_v41  ;;  %v6694_v52 = vmax.f32 %v6566_v50, 0.0 }
 0x726   : > { %v7389_v60 = vmax.f32 %v6881_v53, 0.0  ;;  %v6565_v62 = vadd.f32 %v13379_v61, %v6385_v58  ;;  %v6692_v2 = vmax.f32 %v6564_v51, 0.0 }
 0x727   : > { %v13382_v0 = vpack.c.bf16 %v7391_v22, %v7390_v56  ;;  %v6695_v1 = vmax.f32 %v6567_v57, 0.0 }
 0x728   : > { %v6693_v5 = vmax.f32 %v6565_v62, 0.0  ;;  %v11183_v6 = vpop.f32.mrb[132].mxu0  ;;  %v13384_v4 = vpack.c.bf16 %v7389_v60, %v7388_v59 }
 0x729   : > { %v6765_v63 = vpack.c.bf16 %v6695_v1, %v6694_v52  ;;  %v6902_v54 = vadd.f32 %v11183_v6, %v13367_v35  ;;  %v6893_v7 = vpop.f32.mrb[133].mxu0  ;;  %v13411_v1 = vld [vmem:[%s14237_s10 + $0x20] sm:$0xff]  }
 0x72a   : > { %v6764_v46 = vpack.c.bf16 %v6693_v5, %v6692_v2  ;;  %v6894_v9 = vadd.f32 %v13367_v35, %v6893_v7  ;;  %v11151_v10 = vpop.f32.mrb[116].mxu1  ;;  %v11184_v12 = vpop.f32.mrb[134].mxu0  ;;  %11597 = vmatprep.subr.bf16.mxu1 %v13411_v1 }
 0x72b   : > { %v6570_v3 = vadd.f32 %v13379_v61, %v11151_v10  ;;  %v6905_v13 = vadd.f32 %v11184_v12, %v13367_v35  ;;  %v6398_v14 = vpop.f32.mrb[117].mxu1  ;;  %v6896_v15 = vpop.f32.mrb[135].mxu0  ;;  %v7394_v11 = vmax.f32 %v6902_v54, 0.0  ;;  %11605 = vmatpush3.bf16.msra.mxu1 %v13411_v1 }
 0x72c   : > { %v6568_v16 = vadd.f32 %v13379_v61, %v6398_v14  ;;  %v6897_v17 = vadd.f32 %v13367_v35, %v6896_v15  ;;  %v11152_v19 = vpop.f32.mrb[118].mxu1  ;;  %11289 = vmatprep.mubr.bf16.mxu0 %v6764_v46  ;;  %v7392_v25 = vmax.f32 %v6894_v9, 0.0 }
 0x72d   : > { %v7395_v20 = vmax.f32 %v6905_v13, 0.0  ;;  %v6571_v23 = vadd.f32 %v13379_v61, %v11152_v19  ;;  %v6401_v24 = vpop.f32.mrb[119].mxu1  ;;  %11290 = vmatmul.mubr.bf16.gmra.mrb[240].mxu0 %v6765_v63  ;;  %v6698_v30 = vmax.f32 %v6570_v3, 0.0 }
 0x72e   : > { %v7393_v26 = vmax.f32 %v6897_v17, 0.0  ;;  %v6569_v28 = vadd.f32 %v13379_v61, %v6401_v24  ;;  %v6696_v33 = vmax.f32 %v6568_v16, 0.0 }
 0x72f   : > { %v13394_v31 = vpack.c.bf16 %v7395_v20, %v7394_v11  ;;  %v6699_v32 = vmax.f32 %v6571_v23, 0.0 }
 0x730   : > { %v13396_v34 = vpack.c.bf16 %v7393_v26, %v7392_v25  ;;  %v6697_v36 = vmax.f32 %v6569_v28, 0.0  ;;  %v11187_v37 = vpop.f32.mrb[136].mxu0 }
 0x731   : > { %v6767_v38 = vpack.c.bf16 %v6699_v32, %v6698_v30  ;;  %v6918_v39 = vadd.f32 %v11187_v37, %v13367_v35  ;;  %v6909_v41 = vpop.f32.mrb[137].mxu0 }
 0x732   : > { %v6766_v42 = vpack.c.bf16 %v6697_v36, %v6696_v33  ;;  %v6910_v44 = vadd.f32 %v13367_v35, %v6909_v41  ;;  %v11155_v45 = vpop.f32.mrb[120].mxu1  ;;  %v11188_v47 = vpop.f32.mrb[138].mxu0 }
 0x733   : > { %v6574_v48 = vadd.f32 %v13379_v61, %v11155_v45  ;;  %v6921_v49 = vadd.f32 %v11188_v47, %v13367_v35  ;;  %v6414_v50 = vpop.f32.mrb[121].mxu1  ;;  %v6912_v29 = vpop.f32.mrb[139].mxu0  ;;  %v7398_v53 = vmax.f32 %v6918_v39, 0.0 }
 0x734   : > { %v6572_v40 = vadd.f32 %v13379_v61, %v6414_v50  ;;  %v6913_v43 = vadd.f32 %v13367_v35, %v6912_v29  ;;  %v11156_v51 = vpop.f32.mrb[122].mxu1  ;;  %11293 = vmatprep.mubr.bf16.mxu0 %v6766_v42  ;;  %v7396_v57 = vmax.f32 %v6910_v44, 0.0 }
 0x735   : > { %v7399_v55 = vmax.f32 %v6921_v49, 0.0  ;;  %v6575_v56 = vadd.f32 %v13379_v61, %v11156_v51  ;;  %v6417_v22 = vpop.f32.mrb[123].mxu1  ;;  %11294 = vmatmul.mubr.bf16.gmra.mrb[244].mxu0 %v6767_v38  ;;  %v6702_v60 = vmax.f32 %v6574_v48, 0.0 }
 0x736   : > { %v7397_v58 = vmax.f32 %v6913_v43, 0.0  ;;  %v6573_v59 = vadd.f32 %v13379_v61, %v6417_v22  ;;  %v6700_v2 = vmax.f32 %v6572_v40, 0.0 }
 0x737   : > { %v13406_v62 = vpack.c.bf16 %v7399_v55, %v7398_v53  ;;  %v6703_v52 = vmax.f32 %v6575_v56, 0.0 }
 0x738   : > { %v13413_v5 = vpack.c.bf16 %v7397_v58, %v7396_v57  ;;  %v6701_v6 = vmax.f32 %v6573_v59, 0.0  ;;  %v11191_v63 = vpop.f32.mrb[140].mxu0 }
 0x739   : > { %v6769_v54 = vpack.c.bf16 %v6703_v52, %v6702_v60  ;;  %v6934_v7 = vadd.f32 %v11191_v63, %v13367_v35  ;;  %v6925_v46 = vpop.f32.mrb[141].mxu0 }
 0x73a   : > { %v6768_v9 = vpack.c.bf16 %v6701_v6, %v6700_v2  ;;  %v6926_v10 = vadd.f32 %v13367_v35, %v6925_v46  ;;  %v11159_v12 = vpop.f32.mrb[124].mxu1  ;;  %v11192_v3 = vpop.f32.mrb[142].mxu0 }
 0x73b   : > { %v6578_v13 = vadd.f32 %v13379_v61, %v11159_v12  ;;  %v6937_v14 = vadd.f32 %v11192_v3, %v13367_v35  ;;  %v6430_v15 = vpop.f32.mrb[125].mxu1  ;;  %v6928_v16 = vpop.f32.mrb[143].mxu0  ;;  %v7402_v20 = vmax.f32 %v6934_v7, 0.0 }
 0x73c   : > { %v6576_v17 = vadd.f32 %v13379_v61, %v6430_v15  ;;  %v6929_v19 = vadd.f32 %v13367_v35, %v6928_v16  ;;  %v11160_v11 = vpop.f32.mrb[126].mxu1  ;;  %11297 = vmatprep.mubr.bf16.mxu0 %v6768_v9  ;;  %v7400_v26 = vmax.f32 %v6926_v10, 0.0 }
 0x73d   : > { %v7403_v23 = vmax.f32 %v6937_v14, 0.0  ;;  %v6579_v24 = vadd.f32 %v13379_v61, %v11160_v11  ;;  %v6433_v25 = vpop.f32.mrb[127].mxu1  ;;  %11298 = vmatmul.mubr.bf16.gmra.mrb[248].mxu0 %v6769_v54  ;;  %v6706_v32 = vmax.f32 %v6578_v13, 0.0 }
 0x73e   : > { %v7401_v28 = vmax.f32 %v6929_v19, 0.0  ;;  %v6577_v30 = vadd.f32 %v13379_v61, %v6433_v25  ;;  %v6704_v37 = vmax.f32 %v6576_v17, 0.0 }
 0x73f   : > { %v13425_v33 = vpack.c.bf16 %v7403_v23, %v7402_v20  ;;  %v6707_v36 = vmax.f32 %v6579_v24, 0.0 }
 0x740   : > { %v13427_v38 = vpack.c.bf16 %v7401_v28, %v7400_v26  ;;  %v6705_v39 = vmax.f32 %v6577_v30, 0.0  ;;  %v11195_v41 = vpop.f32.mrb[144].mxu0 }
 0x741   : > { %v6771_v42 = vpack.c.bf16 %v6707_v36, %v6706_v32  ;;  %v6950_v44 = vadd.f32 %v11195_v41, %v13367_v35  ;;  %v6941_v45 = vpop.f32.mrb[145].mxu0 }
 0x742   : > { %v6770_v47 = vpack.c.bf16 %v6705_v39, %v6704_v37  ;;  %v6942_v48 = vadd.f32 %v13367_v35, %v6941_v45  ;;  %v11196_v49 = vpop.f32.mrb[146].mxu0 }
 0x743   : > { %v6953_v50 = vadd.f32 %v11196_v49, %v13367_v35  ;;  %v6944_v61 = vpop.f32.mrb[147].mxu0  ;;  %v7406_v40 = vmax.f32 %v6950_v44, 0.0 }
 0x744   : > { %v6945_v29 = vadd.f32 %v13367_v35, %v6944_v61  ;;  %11301 = vmatprep.mubr.bf16.mxu0 %v6770_v47  ;;  %v7404_v51 = vmax.f32 %v6942_v48, 0.0 }
 0x745   : > { %v7407_v43 = vmax.f32 %v6953_v50, 0.0  ;;  %11302 = vmatmul.mubr.bf16.gmra.mrb[252].mxu0 %v6771_v42 }
 0x746   : > { %v7405_v53 = vmax.f32 %v6945_v29, 0.0  ;;  %11321 = vmatprep.mubr.bf16.mxu0 %v13384_v4 }
 0x747   : > { %v13434_v55 = vpack.c.bf16 %v7407_v43, %v7406_v40 }
 0x748   : > { %v13436_v56 = vpack.c.bf16 %v7405_v53, %v7404_v51  ;;  %v11199_v22 = vpop.f32.mrb[148].mxu0 }
 0x749   : > { %v6966_v57 = vadd.f32 %v11199_v22, %v13367_v35  ;;  %v6957_v58 = vpop.f32.mrb[149].mxu0 }
 0x74a   : > { %v6958_v59 = vadd.f32 %v13367_v35, %v6957_v58  ;;  %v11200_v60 = vpop.f32.mrb[150].mxu0 }
 0x74b   : > { %v6969_v52 = vadd.f32 %v11200_v60, %v13367_v35  ;;  %v6960_v2 = vpop.f32.mrb[151].mxu0  ;;  %v7410_v63 = vmax.f32 %v6966_v57, 0.0 }
 0x74c   : > { %v6961_v6 = vadd.f32 %v13367_v35, %v6960_v2  ;;  %v7408_v4 = vmax.f32 %v6958_v59, 0.0 }
 0x74d   : > { %v7411_v54 = vmax.f32 %v6969_v52, 0.0  ;;  %11322 = vmatmul.mubr.bf16.vlgmr.msra.gmra.mrb[0].mxu0 %v13382_v0 }
 0x74e   : > { %v7409_v7 = vmax.f32 %v6961_v6, 0.0  ;;  %11325 = vmatprep.mubr.bf16.mxu0 %v13396_v34  ;;  %11450 = vmatpush3.bf16.msra.mxu0 %v13286_v8 }
 0x74f   : > { %v13445_v46 = vpack.c.bf16 %v7411_v54, %v7410_v63  ;;  %11451 = vmatprep.subr.bf16.mxu0 %v13310_v27 }
 0x750   : > { %v13448_v9 = vpack.c.bf16 %v7409_v7, %v7408_v4  ;;  %v11203_v10 = vpop.f32.mrb[152].mxu0 }
 0x751   : > { %v6982_v12 = vadd.f32 %v11203_v10, %v13367_v35  ;;  %v6973_v3 = vpop.f32.mrb[153].mxu0 }
 0x752   : > { %v6974_v13 = vadd.f32 %v13367_v35, %v6973_v3  ;;  %v11204_v14 = vpop.f32.mrb[154].mxu0  ;;  %11452 = vmatpush3.bf16.msra.mxu0 %v13310_v27  ;;  %v11875_v27 = vld [vmem:[%s14237_s10 + $0x28] sm:$0xff]  }
 0x753   : > { %v6985_v0 = vadd.f32 %v11204_v14, %v13367_v35  ;;  %v6976_v34 = vpop.f32.mrb[155].mxu0  ;;  %11453 = vmatprep.subr.bf16.mxu0 %v13333_v21  ;;  %v7414_v15 = vmax.f32 %v6982_v12, 0.0  ;;  %11598 = vmatprep.subr.bf16.mxu1 %v11875_v27 }
 0x754   : > { %v6977_v8 = vadd.f32 %v13367_v35, %v6976_v34  ;;  %v7412_v17 = vmax.f32 %v6974_v13, 0.0  ;;  %11606 = vmatpush3.bf16.msra.mxu1 %v11875_v27 }
 0x755   : > { %v7415_v16 = vmax.f32 %v6985_v0, 0.0  ;;  %11326 = vmatmul.mubr.bf16.gmra.mrb[4].mxu0 %v13394_v31 }
 0x756   : > { %v7413_v19 = vmax.f32 %v6977_v8, 0.0  ;;  %11329 = vmatprep.mubr.bf16.mxu0 %v13413_v5  ;;  %11454 = vmatpush3.bf16.msra.mxu0 %v13333_v21 }
 0x757   : > { %v13459_v11 = vpack.c.bf16 %v7415_v16, %v7414_v15  ;;  %11455 = vmatprep.subr.bf16.mxu0 %v13356_v18  ;;  %v11876_v15 = vld [vmem:[%s14237_s10 + $0x30] sm:$0xff]  }
 0x758   : > { %v13465_v20 = vpack.c.bf16 %v7413_v19, %v7412_v17  ;;  %v11207_v23 = vpop.f32.mrb[156].mxu0  ;;  %11599 = vmatprep.subr.bf16.mxu1 %v11876_v15 }
 0x759   : > { %v6998_v24 = vadd.f32 %v11207_v23, %v13367_v35  ;;  %v6989_v31 = vpop.f32.mrb[157].mxu0  ;;  %11607 = vmatpush3.bf16.msra.mxu1 %v11876_v15 }
 0x75a   : > { %v6990_v25 = vadd.f32 %v13367_v35, %v6989_v31  ;;  %v11208_v5 = vpop.f32.mrb[158].mxu0  ;;  %11456 = vmatpush3.bf16.msra.mxu0 %v13356_v18 }
 0x75b   : > { %v7001_v21 = vadd.f32 %v11208_v5, %v13367_v35  ;;  %v6992_v26 = vpop.f32.mrb[159].mxu0  ;;  %11457 = vmatprep.subr.bf16.mxu0 %v13411_v1  ;;  %v7418_v30 = vmax.f32 %v6998_v24, 0.0 }
 0x75c   : > { %v6993_v28 = vadd.f32 %v13367_v35, %v6992_v26  ;;  %v7416_v36 = vmax.f32 %v6990_v25, 0.0 }
 0x75d   : > { %v7419_v32 = vmax.f32 %v7001_v21, 0.0  ;;  %11330 = vmatmul.mubr.bf16.gmra.mrb[8].mxu0 %v13406_v62 }
 0x75e   : > { %v7417_v37 = vmax.f32 %v6993_v28, 0.0  ;;  %11333 = vmatprep.mubr.bf16.mxu0 %v13427_v38  ;;  %11458 = vmatpush3.bf16.msra.mxu0 %v13411_v1 }
 0x75f   : > { %v13476_v39 = vpack.c.bf16 %v7419_v32, %v7418_v30  ;;  %11459 = vmatprep.subr.bf16.mxu0 %v11875_v27 }
 0x760   : > { %v13478_v18 = vpack.c.bf16 %v7417_v37, %v7416_v36  ;;  %v11211_v41 = vpop.f32.mrb[160].mxu0 }
 0x761   : > { %v7014_v42 = vadd.f32 %v11211_v41, %v13367_v35  ;;  %v7005_v44 = vpop.f32.mrb[161].mxu0 }
 0x762   : > { %v7006_v45 = vadd.f32 %v13367_v35, %v7005_v44  ;;  %v11212_v47 = vpop.f32.mrb[162].mxu0  ;;  %11460 = vmatpush3.bf16.msra.mxu0 %v11875_v27 }
 0x763   : > { %v7017_v62 = vadd.f32 %v11212_v47, %v13367_v35  ;;  %v7008_v48 = vpop.f32.mrb[163].mxu0  ;;  %v7422_v49 = vmax.f32 %v7014_v42, 0.0  ;;  %11461 = vmatprep.subr.bf16.mxu0 %v11876_v15 }
 0x764   : > { %v7009_v38 = vadd.f32 %v13367_v35, %v7008_v48  ;;  %v7420_v50 = vmax.f32 %v7006_v45, 0.0 }
 0x765   : > { %v7423_v1 = vmax.f32 %v7017_v62, 0.0  ;;  %11334 = vmatmul.mubr.bf16.gmra.mrb[12].mxu0 %v13425_v33 }
 0x766   : > { %v7421_v61 = vmax.f32 %v7009_v38, 0.0  ;;  %11337 = vmatprep.mubr.bf16.mxu0 %v13436_v56  ;;  %11462 = vmatpush3.bf16.msra.mxu0 %v11876_v15 }
 0x767   : > { %v13486_v29 = vpack.c.bf16 %v7423_v1, %v7422_v49 }
 0x768   : > { %v13488_v40 = vpack.c.bf16 %v7421_v61, %v7420_v50  ;;  %v11215_v43 = vpop.f32.mrb[164].mxu0 }
 0x769   : > { %v7030_v51 = vadd.f32 %v11215_v43, %v13367_v35  ;;  %v7021_v53 = vpop.f32.mrb[165].mxu0 }
 0x76a   : > { %v7022_v22 = vadd.f32 %v13367_v35, %v7021_v53  ;;  %v11216_v57 = vpop.f32.mrb[166].mxu0 }
 0x76b   : > { %v7033_v58 = vadd.f32 %v11216_v57, %v13367_v35  ;;  %v7024_v59 = vpop.f32.mrb[167].mxu0  ;;  %v7426_v60 = vmax.f32 %v7030_v51, 0.0 }
 0x76c   : > { %v7025_v33 = vadd.f32 %v13367_v35, %v7024_v59  ;;  %v7424_v56 = vmax.f32 %v7022_v22, 0.0 }
 0x76d   : > { %v7427_v52 = vmax.f32 %v7033_v58, 0.0  ;;  %11338 = vmatmul.mubr.bf16.gmra.mrb[16].mxu0 %v13434_v55 }
 0x76e   : > { %v7425_v2 = vmax.f32 %v7025_v33, 0.0  ;;  %11341 = vmatprep.mubr.bf16.mxu0 %v13448_v9 }
 0x76f   : > { %v13496_v6 = vpack.c.bf16 %v7427_v52, %v7426_v60 }
 0x770   : > { %v13498_v63 = vpack.c.bf16 %v7425_v2, %v7424_v56  ;;  %v11219_v54 = vpop.f32.mrb[168].mxu0 }
 0x771   : > { %v7046_v4 = vadd.f32 %v11219_v54, %v13367_v35  ;;  %v7037_v7 = vpop.f32.mrb[169].mxu0 }
 0x772   : > { %v7038_v10 = vadd.f32 %v13367_v35, %v7037_v7  ;;  %v11220_v12 = vpop.f32.mrb[170].mxu0 }
 0x773   : > { %v7049_v3 = vadd.f32 %v11220_v12, %v13367_v35  ;;  %v7040_v13 = vpop.f32.mrb[171].mxu0  ;;  %v7430_v14 = vmax.f32 %v7046_v4, 0.0 }
 0x774   : > { %v7041_v55 = vadd.f32 %v13367_v35, %v7040_v13  ;;  %v7428_v9 = vmax.f32 %v7038_v10, 0.0 }
 0x775   : > { %v7431_v0 = vmax.f32 %v7049_v3, 0.0  ;;  %11342 = vmatmul.mubr.bf16.gmra.mrb[20].mxu0 %v13445_v46 }
 0x776   : > { %v7429_v34 = vmax.f32 %v7041_v55, 0.0  ;;  %11345 = vmatprep.mubr.bf16.mxu0 %v13465_v20 }
 0x777   : > { %v13506_v8 = vpack.c.bf16 %v7431_v0, %v7430_v14  ;;  %v11877_v14 = vld [vmem:[%s14237_s10 + $0x38] sm:$0xff]  }
 0x778   : > { %v13511_v16 = vpack.c.bf16 %v7429_v34, %v7428_v9  ;;  %v11223_v17 = vpop.f32.mrb[172].mxu0  ;;  %11600 = vmatprep.subr.bf16.mxu1 %v11877_v14  ;;  %11463 = vmatprep.subr.bf16.mxu0 %v11877_v14 }
 0x779   : > { %v7062_v19 = vadd.f32 %v11223_v17, %v13367_v35  ;;  %v7053_v27 = vpop.f32.mrb[173].mxu0  ;;  %11608 = vmatpush3.bf16.msra.mxu1 %v11877_v14  ;;  %11464 = vmatpush3.bf16.msra.mxu0 %v11877_v14 }
 0x77a   : > { %v7054_v46 = vadd.f32 %v13367_v35, %v7053_v27  ;;  %v11224_v23 = vpop.f32.mrb[174].mxu0 }
 0x77b   : > { %v7065_v20 = vadd.f32 %v11224_v23, %v13367_v35  ;;  %v7056_v24 = vpop.f32.mrb[175].mxu0  ;;  %v7434_v25 = vmax.f32 %v7062_v19, 0.0 }
 0x77c   : > { %v7057_v31 = vadd.f32 %v13367_v35, %v7056_v24  ;;  %v7432_v21 = vmax.f32 %v7054_v46, 0.0 }
 0x77d   : > { %v7435_v5 = vmax.f32 %v7065_v20, 0.0  ;;  %11346 = vmatmul.mubr.bf16.gmra.mrb[24].mxu0 %v13459_v11 }
 0x77e   : > { %v7433_v26 = vmax.f32 %v7057_v31, 0.0  ;;  %11349 = vmatprep.mubr.bf16.mxu0 %v13478_v18 }
 0x77f   : > { %v13519_v28 = vpack.c.bf16 %v7435_v5, %v7434_v25 }
 0x780   : > { %v13521_v30 = vpack.c.bf16 %v7433_v26, %v7432_v21  ;;  %v11227_v32 = vpop.f32.mrb[176].mxu0 }
 0x781   : > { %v7078_v36 = vadd.f32 %v11227_v32, %v13367_v35  ;;  %v7069_v37 = vpop.f32.mrb[177].mxu0 }
 0x782   : > { %v7070_v41 = vadd.f32 %v13367_v35, %v7069_v37  ;;  %v11228_v42 = vpop.f32.mrb[178].mxu0 }
 0x783   : > { %v7081_v44 = vadd.f32 %v11228_v42, %v13367_v35  ;;  %v7072_v45 = vpop.f32.mrb[179].mxu0  ;;  %v7438_v47 = vmax.f32 %v7078_v36, 0.0 }
 0x784   : > { %v7073_v11 = vadd.f32 %v13367_v35, %v7072_v45  ;;  %v7436_v18 = vmax.f32 %v7070_v41, 0.0 }
 0x785   : > { %v7439_v62 = vmax.f32 %v7081_v44, 0.0  ;;  %11350 = vmatmul.mubr.bf16.gmra.mrb[28].mxu0 %v13476_v39 }
 0x786   : > { %v7437_v48 = vmax.f32 %v7073_v11, 0.0  ;;  %11353 = vmatprep.mubr.bf16.mxu0 %v13488_v40 }
 0x787   : > { %v13529_v38 = vpack.c.bf16 %v7439_v62, %v7438_v47 }
 0x788   : > { %v13531_v49 = vpack.c.bf16 %v7437_v48, %v7436_v18  ;;  %v11231_v1 = vpop.f32.mrb[180].mxu0 }
 0x789   : > { %v7094_v50 = vadd.f32 %v11231_v1, %v13367_v35  ;;  %v7085_v61 = vpop.f32.mrb[181].mxu0 }
 0x78a   : > { %v7086_v43 = vadd.f32 %v13367_v35, %v7085_v61  ;;  %v11232_v51 = vpop.f32.mrb[182].mxu0 }
 0x78b   : > { %v7097_v53 = vadd.f32 %v11232_v51, %v13367_v35  ;;  %v7088_v22 = vpop.f32.mrb[183].mxu0  ;;  %v7442_v57 = vmax.f32 %v7094_v50, 0.0 }
 0x78c   : > { %v7089_v39 = vadd.f32 %v13367_v35, %v7088_v22  ;;  %v7440_v40 = vmax.f32 %v7086_v43, 0.0 }
 0x78d   : > { %v7443_v58 = vmax.f32 %v7097_v53, 0.0  ;;  %11354 = vmatmul.mubr.bf16.gmra.mrb[32].mxu0 %v13486_v29 }
 0x78e   : > { %v7441_v59 = vmax.f32 %v7089_v39, 0.0  ;;  %11357 = vmatprep.mubr.bf16.mxu0 %v13498_v63 }
 0x78f   : > { %v13539_v33 = vpack.c.bf16 %v7443_v58, %v7442_v57 }
 0x790   : > { %v13541_v60 = vpack.c.bf16 %v7441_v59, %v7440_v40  ;;  %v11235_v52 = vpop.f32.mrb[184].mxu0 }
 0x791   : > { %v7110_v56 = vadd.f32 %v11235_v52, %v13367_v35  ;;  %v7101_v2 = vpop.f32.mrb[185].mxu0 }
 0x792   : > { %v7102_v54 = vadd.f32 %v13367_v35, %v7101_v2  ;;  %v11236_v4 = vpop.f32.mrb[186].mxu0 }
 0x793   : > { %v7113_v7 = vadd.f32 %v11236_v4, %v13367_v35  ;;  %v7104_v10 = vpop.f32.mrb[187].mxu0  ;;  %v7446_v12 = vmax.f32 %v7110_v56, 0.0 }
 0x794   : > { %v7105_v29 = vadd.f32 %v13367_v35, %v7104_v10  ;;  %v7444_v63 = vmax.f32 %v7102_v54, 0.0 }
 0x795   : > { %v7447_v3 = vmax.f32 %v7113_v7, 0.0  ;;  %11358 = vmatmul.mubr.bf16.gmra.mrb[36].mxu0 %v13496_v6 }
 0x796   : > { %v7445_v13 = vmax.f32 %v7105_v29, 0.0  ;;  %11361 = vmatprep.mubr.bf16.mxu0 %v13511_v16 }
 0x797   : > { %v13549_v55 = vpack.c.bf16 %v7447_v3, %v7446_v12 }
 0x798   : > { %v13554_v0 = vpack.c.bf16 %v7445_v13, %v7444_v63  ;;  %v11239_v9 = vpop.f32.mrb[188].mxu0 }
 0x799   : > { %v7126_v34 = vadd.f32 %v11239_v9, %v13367_v35  ;;  %v7117_v15 = vpop.f32.mrb[189].mxu0 }
 0x79a   : > { %v7118_v6 = vadd.f32 %v13367_v35, %v7117_v15  ;;  %v11240_v17 = vpop.f32.mrb[190].mxu0 }
 0x79b   : > { %v7129_v16 = vadd.f32 %v11240_v17, %v13367_v35  ;;  %v7120_v19 = vpop.f32.mrb[191].mxu0  ;;  %v7450_v46 = vmax.f32 %v7126_v34, 0.0 }
 0x79c   : > { %v7121_v27 = vadd.f32 %v13367_v35, %v7120_v19  ;;  %v7448_v20 = vmax.f32 %v7118_v6, 0.0 }
 0x79d   : > { %v7451_v23 = vmax.f32 %v7129_v16, 0.0  ;;  %11362 = vmatmul.mubr.bf16.gmra.mrb[40].mxu0 %v13506_v8 }
 0x79e   : > { %v7449_v24 = vmax.f32 %v7121_v27, 0.0  ;;  %11365 = vmatprep.mubr.bf16.mxu0 %v13521_v30 }
 0x79f   : > { %v13562_v31 = vpack.c.bf16 %v7451_v23, %v7450_v46 }
 0x7a0   : > { %v7546_v25 = vpack.c.bf16 %v7449_v24, %v7448_v20  ;;  %v11243_v5 = vpop.f32.mrb[192].mxu0 }
 0x7a1   : > { %v7142_v21 = vadd.f32 %v11243_v5, %v13367_v35  ;;  %v7133_v26 = vpop.f32.mrb[193].mxu0 }
 0x7a2   : > { %v7134_v32 = vadd.f32 %v13367_v35, %v7133_v26  ;;  %v11244_v36 = vpop.f32.mrb[194].mxu0 }
 0x7a3   : > { %v7145_v37 = vadd.f32 %v11244_v36, %v13367_v35  ;;  %v7136_v41 = vpop.f32.mrb[195].mxu0  ;;  %v7454_v8 = vmax.f32 %v7142_v21, 0.0 }
 0x7a4   : > { %v7137_v42 = vadd.f32 %v13367_v35, %v7136_v41  ;;  %v7452_v30 = vmax.f32 %v7134_v32, 0.0 }
 0x7a5   : > { %v7455_v44 = vmax.f32 %v7145_v37, 0.0  ;;  %11366 = vmatmul.mubr.bf16.gmra.mrb[44].mxu0 %v13519_v28 }
 0x7a6   : > { %v7453_v45 = vmax.f32 %v7137_v42, 0.0  ;;  %11369 = vmatprep.mubr.bf16.mxu0 %v13531_v49 }
 0x7a7   : > { %v13570_v11 = vpack.c.bf16 %v7455_v44, %v7454_v8 }
 0x7a8   : > { %v7548_v47 = vpack.c.bf16 %v7453_v45, %v7452_v30  ;;  %v11247_v62 = vpop.f32.mrb[196].mxu0 }
 0x7a9   : > { %v7158_v18 = vadd.f32 %v11247_v62, %v13367_v35  ;;  %v7149_v48 = vpop.f32.mrb[197].mxu0 }
 0x7aa   : > { %v7150_v1 = vadd.f32 %v13367_v35, %v7149_v48  ;;  %v11248_v50 = vpop.f32.mrb[198].mxu0 }
 0x7ab   : > { %v7161_v61 = vadd.f32 %v11248_v50, %v13367_v35  ;;  %v7152_v43 = vpop.f32.mrb[199].mxu0  ;;  %v7458_v28 = vmax.f32 %v7158_v18, 0.0 }
 0x7ac   : > { %v7153_v51 = vadd.f32 %v13367_v35, %v7152_v43  ;;  %v7456_v49 = vmax.f32 %v7150_v1, 0.0 }
 0x7ad   : > { %v7459_v53 = vmax.f32 %v7161_v61, 0.0  ;;  %11370 = vmatmul.mubr.bf16.gmra.mrb[48].mxu0 %v13529_v38 }
 0x7ae   : > { %v7457_v22 = vmax.f32 %v7153_v51, 0.0  ;;  %11373 = vmatprep.mubr.bf16.mxu0 %v13541_v60 }
 0x7af   : > { %v13578_v39 = vpack.c.bf16 %v7459_v53, %v7458_v28 }
 0x7b0   : > { %v7550_v57 = vpack.c.bf16 %v7457_v22, %v7456_v49  ;;  %v11251_v58 = vpop.f32.mrb[200].mxu0 }
 0x7b1   : > { %v7174_v40 = vadd.f32 %v11251_v58, %v13367_v35  ;;  %v7165_v59 = vpop.f32.mrb[201].mxu0 }
 0x7b2   : > { %v7166_v52 = vadd.f32 %v13367_v35, %v7165_v59  ;;  %v11252_v56 = vpop.f32.mrb[202].mxu0 }
 0x7b3   : > { %v7177_v2 = vadd.f32 %v11252_v56, %v13367_v35  ;;  %v7168_v54 = vpop.f32.mrb[203].mxu0  ;;  %v7462_v38 = vmax.f32 %v7174_v40, 0.0 }
 0x7b4   : > { %v7169_v4 = vadd.f32 %v13367_v35, %v7168_v54  ;;  %v7460_v60 = vmax.f32 %v7166_v52, 0.0 }
 0x7b5   : > { %v7463_v7 = vmax.f32 %v7177_v2, 0.0  ;;  %11374 = vmatmul.mubr.bf16.gmra.mrb[52].mxu0 %v13539_v33 }
 0x7b6   : > { %v7461_v10 = vmax.f32 %v7169_v4, 0.0  ;;  %11377 = vmatprep.mubr.bf16.mxu0 %v13554_v0 }
 0x7b7   : > { %v13586_v29 = vpack.c.bf16 %v7463_v7, %v7462_v38 }
 0x7b8   : > { %v7552_v12 = vpack.c.bf16 %v7461_v10, %v7460_v60  ;;  %v11255_v3 = vpop.f32.mrb[204].mxu0 }
 0x7b9   : > { %v7190_v63 = vadd.f32 %v11255_v3, %v13367_v35  ;;  %v7181_v13 = vpop.f32.mrb[205].mxu0 }
 0x7ba   : > { %v7182_v14 = vadd.f32 %v13367_v35, %v7181_v13  ;;  %v11256_v9 = vpop.f32.mrb[206].mxu0 }
 0x7bb   : > { %v7193_v34 = vadd.f32 %v11256_v9, %v13367_v35  ;;  %v7184_v15 = vpop.f32.mrb[207].mxu0  ;;  %v7466_v33 = vmax.f32 %v7190_v63, 0.0 }
 0x7bc   : > { %v7185_v6 = vadd.f32 %v13367_v35, %v7184_v15  ;;  %v7464_v0 = vmax.f32 %v7182_v14, 0.0 }
 0x7bd   : > { %v7467_v17 = vmax.f32 %v7193_v34, 0.0  ;;  %11378 = vmatmul.mubr.bf16.gmra.mrb[56].mxu0 %v13549_v55 }
 0x7be   : > { %v7465_v16 = vmax.f32 %v7185_v6, 0.0  ;;  %11381 = vmatprep.mubr.bf16.mxu0 %v7546_v25 }
 0x7bf   : > { %v13593_v19 = vpack.c.bf16 %v7467_v17, %v7466_v33 }
 0x7c0   : > { %v7554_v27 = vpack.c.bf16 %v7465_v16, %v7464_v0  ;;  %v11259_v46 = vpop.f32.mrb[208].mxu0 }
 0x7c1   : > { %v7206_v23 = vadd.f32 %v11259_v46, %v13367_v35  ;;  %v7197_v20 = vpop.f32.mrb[209].mxu0 }
 0x7c2   : > { %v7198_v24 = vadd.f32 %v13367_v35, %v7197_v20  ;;  %v11260_v5 = vpop.f32.mrb[210].mxu0 }
 0x7c3   : > { %v7209_v21 = vadd.f32 %v11260_v5, %v13367_v35  ;;  %v7200_v26 = vpop.f32.mrb[211].mxu0  ;;  %v7470_v36 = vmax.f32 %v7206_v23, 0.0 }
 0x7c4   : > { %v7201_v32 = vadd.f32 %v13367_v35, %v7200_v26  ;;  %v7468_v25 = vmax.f32 %v7198_v24, 0.0 }
 0x7c5   : > { %v7471_v55 = vmax.f32 %v7209_v21, 0.0  ;;  %11382 = vmatmul.mubr.bf16.gmra.mrb[60].mxu0 %v13562_v31 }
 0x7c6   : > { %v7469_v37 = vmax.f32 %v7201_v32, 0.0  ;;  %11385 = vmatprep.mubr.bf16.mxu0 %v7548_v47 }
 0x7c7   : > { %v13600_v41 = vpack.c.bf16 %v7471_v55, %v7470_v36 }
 0x7c8   : > { %v7556_v42 = vpack.c.bf16 %v7469_v37, %v7468_v25  ;;  %v11263_v8 = vpop.f32.mrb[212].mxu0 }
 0x7c9   : > { %v7222_v44 = vadd.f32 %v11263_v8, %v13367_v35  ;;  %v7213_v30 = vpop.f32.mrb[213].mxu0 }
 0x7ca   : > { %v7214_v45 = vadd.f32 %v13367_v35, %v7213_v30  ;;  %v11264_v62 = vpop.f32.mrb[214].mxu0 }
 0x7cb   : > { %v7225_v18 = vadd.f32 %v11264_v62, %v13367_v35  ;;  %v7216_v48 = vpop.f32.mrb[215].mxu0  ;;  %v7474_v50 = vmax.f32 %v7222_v44, 0.0 }
 0x7cc   : > { %v7217_v1 = vadd.f32 %v13367_v35, %v7216_v48  ;;  %v7472_v47 = vmax.f32 %v7214_v45, 0.0 }
 0x7cd   : > { %v7475_v31 = vmax.f32 %v7225_v18, 0.0  ;;  %11386 = vmatmul.mubr.bf16.gmra.mrb[64].mxu0 %v13570_v11 }
 0x7ce   : > { %v7473_v61 = vmax.f32 %v7217_v1, 0.0  ;;  %11389 = vmatprep.mubr.bf16.mxu0 %v7550_v57 }
 0x7cf   : > { %v13607_v43 = vpack.c.bf16 %v7475_v31, %v7474_v50 }
 0x7d0   : > { %v7558_v51 = vpack.c.bf16 %v7473_v61, %v7472_v47  ;;  %v11267_v28 = vpop.f32.mrb[216].mxu0 }
 0x7d1   : > { %v7238_v53 = vadd.f32 %v11267_v28, %v13367_v35  ;;  %v7229_v49 = vpop.f32.mrb[217].mxu0 }
 0x7d2   : > { %v7230_v22 = vadd.f32 %v13367_v35, %v7229_v49  ;;  %v11268_v58 = vpop.f32.mrb[218].mxu0 }
 0x7d3   : > { %v7241_v40 = vadd.f32 %v11268_v58, %v13367_v35  ;;  %v7232_v59 = vpop.f32.mrb[219].mxu0  ;;  %v7478_v56 = vmax.f32 %v7238_v53, 0.0  ;;  %v13642_v53 = vld [vmem:[%s14244_s17] ss:$0 sm:$0xff] }
 0x7d4   : > { %v7233_v52 = vadd.f32 %v13367_v35, %v7232_v59  ;;  %v7476_v57 = vmax.f32 %v7230_v22, 0.0 }
 0x7d5   : > { %v7479_v11 = vmax.f32 %v7241_v40, 0.0  ;;  %11390 = vmatmul.mubr.bf16.gmra.mrb[68].mxu0 %v13578_v39 }
 0x7d6   : > { %v7477_v2 = vmax.f32 %v7233_v52, 0.0  ;;  %11393 = vmatprep.mubr.bf16.mxu0 %v7552_v12 }
 0x7d7   : > { %v13614_v54 = vpack.c.bf16 %v7479_v11, %v7478_v56 }
 0x7d8   : > { %v7560_v4 = vpack.c.bf16 %v7477_v2, %v7476_v57  ;;  %v11271_v38 = vpop.f32.mrb[220].mxu0 }
 0x7d9   : > { %v7254_v7 = vadd.f32 %v11271_v38, %v13367_v35  ;;  %v7245_v60 = vpop.f32.mrb[221].mxu0 }
 0x7da   : > { %v7246_v10 = vadd.f32 %v13367_v35, %v7245_v60  ;;  %v11272_v3 = vpop.f32.mrb[222].mxu0 }
 0x7db   : > { %v7257_v63 = vadd.f32 %v11272_v3, %v13367_v35  ;;  %v7248_v13 = vpop.f32.mrb[223].mxu0  ;;  %v7482_v9 = vmax.f32 %v7254_v7, 0.0 }
 0x7dc   : > { %v7249_v14 = vadd.f32 %v13367_v35, %v7248_v13  ;;  %v7480_v12 = vmax.f32 %v7246_v10, 0.0 }
 0x7dd   : > { %v7483_v39 = vmax.f32 %v7257_v63, 0.0  ;;  %11394 = vmatmul.mubr.bf16.gmra.mrb[72].mxu0 %v13586_v29 }
 0x7de   : > { %v7481_v34 = vmax.f32 %v7249_v14, 0.0  ;;  %11397 = vmatprep.mubr.bf16.mxu0 %v7554_v27 }
 0x7df   : > { %v13621_v15 = vpack.c.bf16 %v7483_v39, %v7482_v9 }
 0x7e0   : > { %v7562_v6 = vpack.c.bf16 %v7481_v34, %v7480_v12  ;;  %v11275_v33 = vpop.f32.mrb[224].mxu0 }
 0x7e1   : > { %v7270_v17 = vadd.f32 %v11275_v33, %v13367_v35  ;;  %v7261_v0 = vpop.f32.mrb[225].mxu0 }
 0x7e2   : > { %v7262_v16 = vadd.f32 %v13367_v35, %v7261_v0  ;;  %v11276_v46 = vpop.f32.mrb[226].mxu0 }
 0x7e3   : > { %v7273_v23 = vadd.f32 %v11276_v46, %v13367_v35  ;;  %v7264_v20 = vpop.f32.mrb[227].mxu0  ;;  %v7486_v5 = vmax.f32 %v7270_v17, 0.0 }
 0x7e4   : > { %v7265_v24 = vadd.f32 %v13367_v35, %v7264_v20  ;;  %v7484_v27 = vmax.f32 %v7262_v16, 0.0 }
 0x7e5   : > { %v7487_v29 = vmax.f32 %v7273_v23, 0.0  ;;  %11398 = vmatmul.mubr.bf16.gmra.mrb[76].mxu0 %v13593_v19 }
 0x7e6   : > { %v7485_v21 = vmax.f32 %v7265_v24, 0.0  ;;  %11401 = vmatprep.mubr.bf16.mxu0 %v7556_v42 }
 0x7e7   : > { %v13628_v26 = vpack.c.bf16 %v7487_v29, %v7486_v5 }
 0x7e8   : > { %v7564_v32 = vpack.c.bf16 %v7485_v21, %v7484_v27  ;;  %v11279_v36 = vpop.f32.mrb[228].mxu0 }
 0x7e9   : > { %v7286_v55 = vadd.f32 %v11279_v36, %v13367_v35  ;;  %v7277_v25 = vpop.f32.mrb[229].mxu0 }
 0x7ea   : > { %v7278_v37 = vadd.f32 %v13367_v35, %v7277_v25  ;;  %v11280_v8 = vpop.f32.mrb[230].mxu0 }
 0x7eb   : > { %v7289_v44 = vadd.f32 %v11280_v8, %v13367_v35  ;;  %v7280_v30 = vpop.f32.mrb[231].mxu0  ;;  %v7490_v62 = vmax.f32 %v7286_v55, 0.0 }
 0x7ec   : > { %v7281_v45 = vadd.f32 %v13367_v35, %v7280_v30  ;;  %v7488_v42 = vmax.f32 %v7278_v37, 0.0 }
 0x7ed   : > { %v7491_v19 = vmax.f32 %v7289_v44, 0.0  ;;  %11402 = vmatmul.mubr.bf16.gmra.mrb[80].mxu0 %v13600_v41 }
 0x7ee   : > { %v7489_v18 = vmax.f32 %v7281_v45, 0.0  ;;  %11405 = vmatprep.mubr.bf16.mxu0 %v7558_v51 }
 0x7ef   : > { %v13635_v48 = vpack.c.bf16 %v7491_v19, %v7490_v62 }
 0x7f0   : > { %v7566_v1 = vpack.c.bf16 %v7489_v18, %v7488_v42  ;;  %v11283_v50 = vpop.f32.mrb[232].mxu0 }
 0x7f1   : > { %v7302_v31 = vadd.f32 %v11283_v50, %v13367_v35  ;;  %v7293_v47 = vpop.f32.mrb[233].mxu0 }
 0x7f2   : > { %v7294_v61 = vadd.f32 %v13367_v35, %v7293_v47  ;;  %v11284_v28 = vpop.f32.mrb[234].mxu0 }
 0x7f3   : > { %v7305_v41 = vadd.f32 %v13642_v53, %v11284_v28  ;;  %v7296_v49 = vpop.f32.mrb[235].mxu0  ;;  %v7494_v22 = vmax.f32 %v7302_v31, 0.0 }
 0x7f4   : > { %v7297_v51 = vadd.f32 %v13642_v53, %v7296_v49  ;;  %v7492_v40 = vmax.f32 %v7294_v61, 0.0 }
 0x7f5   : > { %v7495_v58 = vmax.f32 %v7305_v41, 0.0  ;;  %11406 = vmatmul.mubr.bf16.gmra.mrb[84].mxu0 %v13607_v43 }
 0x7f6   : > { %v7493_v59 = vmax.f32 %v7297_v51, 0.0  ;;  %11409 = vmatprep.mubr.bf16.mxu0 %v7560_v4 }
 0x7f7   : > { %v13647_v52 = vpack.c.bf16 %v7495_v58, %v7494_v22 }
 0x7f8   : > { %v7568_v35 = vpack.c.bf16 %v7493_v59, %v7492_v40  ;;  %v11287_v56 = vpop.f32.mrb[236].mxu0 }
 0x7f9   : > { %v7318_v11 = vadd.f32 %v13642_v53, %v11287_v56  ;;  %v7309_v57 = vpop.f32.mrb[237].mxu0 }
 0x7fa   : > { %v7310_v2 = vadd.f32 %v13642_v53, %v7309_v57  ;;  %v11288_v38 = vpop.f32.mrb[238].mxu0 }
 0x7fb   : > { %v7321_v7 = vadd.f32 %v13642_v53, %v11288_v38  ;;  %v7312_v60 = vpop.f32.mrb[239].mxu0  ;;  %v7498_v3 = vmax.f32 %v7318_v11, 0.0 }
 0x7fc   : > { %v7313_v10 = vadd.f32 %v13642_v53, %v7312_v60  ;;  %v7496_v4 = vmax.f32 %v7310_v2, 0.0  ;;  %v13687_v60 = vld [vmem:[%s14245_s18] ss:$0 sm:$0xff] }
 0x7fd   : > { %v7499_v43 = vmax.f32 %v7321_v7, 0.0  ;;  %11410 = vmatmul.mubr.bf16.gmra.mrb[88].mxu0 %v13614_v54 }
 0x7fe   : > { %v7497_v63 = vmax.f32 %v7313_v10, 0.0  ;;  %11413 = vmatprep.mubr.bf16.mxu0 %v7562_v6 }
 0x7ff   : > { %v13654_v13 = vpack.c.bf16 %v7499_v43, %v7498_v3 }
 0x800   : > { %v7570_v14 = vpack.c.bf16 %v7497_v63, %v7496_v4  ;;  %v11291_v9 = vpop.f32.mrb[240].mxu0 }
 0x801   : > { %v7334_v39 = vadd.f32 %v13642_v53, %v11291_v9  ;;  %v7325_v12 = vpop.f32.mrb[241].mxu0 }
 0x802   : > { %v7326_v34 = vadd.f32 %v13642_v53, %v7325_v12  ;;  %v11292_v33 = vpop.f32.mrb[242].mxu0 }
 0x803   : > { %v7337_v17 = vadd.f32 %v13642_v53, %v11292_v33  ;;  %v7328_v0 = vpop.f32.mrb[243].mxu0  ;;  %v7502_v46 = vmax.f32 %v7334_v39, 0.0 }
 0x804   : > { %v7329_v16 = vadd.f32 %v13642_v53, %v7328_v0  ;;  %v7500_v6 = vmax.f32 %v7326_v34, 0.0 }
 0x805   : > { %v7503_v54 = vmax.f32 %v7337_v17, 0.0  ;;  %11414 = vmatmul.mubr.bf16.gmra.mrb[92].mxu0 %v13621_v15 }
 0x806   : > { %v7501_v23 = vmax.f32 %v7329_v16, 0.0  ;;  %11417 = vmatprep.mubr.bf16.mxu0 %v7564_v32 }
 0x807   : > { %v13661_v20 = vpack.c.bf16 %v7503_v54, %v7502_v46 }
 0x808   : > { %v7572_v24 = vpack.c.bf16 %v7501_v23, %v7500_v6  ;;  %v11295_v5 = vpop.f32.mrb[244].mxu0 }
 0x809   : > { %v7350_v29 = vadd.f32 %v13642_v53, %v11295_v5  ;;  %v7341_v27 = vpop.f32.mrb[245].mxu0 }
 0x80a   : > { %v7342_v21 = vadd.f32 %v13642_v53, %v7341_v27  ;;  %v11296_v36 = vpop.f32.mrb[246].mxu0 }
 0x80b   : > { %v7353_v55 = vadd.f32 %v13642_v53, %v11296_v36  ;;  %v7344_v25 = vpop.f32.mrb[247].mxu0  ;;  %v7506_v8 = vmax.f32 %v7350_v29, 0.0 }
 0x80c   : > { %v7345_v37 = vadd.f32 %v13642_v53, %v7344_v25  ;;  %v7504_v32 = vmax.f32 %v7342_v21, 0.0 }
 0x80d   : > { %v7507_v15 = vmax.f32 %v7353_v55, 0.0  ;;  %11418 = vmatmul.mubr.bf16.gmra.mrb[96].mxu0 %v13628_v26 }
 0x80e   : > { %v7505_v44 = vmax.f32 %v7345_v37, 0.0  ;;  %11421 = vmatprep.mubr.bf16.mxu0 %v7566_v1 }
 0x80f   : > { %v13668_v30 = vpack.c.bf16 %v7507_v15, %v7506_v8 }
 0x810   : > { %v7574_v45 = vpack.c.bf16 %v7505_v44, %v7504_v32  ;;  %v11299_v62 = vpop.f32.mrb[248].mxu0 }
 0x811   : > { %v7366_v19 = vadd.f32 %v13642_v53, %v11299_v62  ;;  %v7357_v42 = vpop.f32.mrb[249].mxu0 }
 0x812   : > { %v7358_v18 = vadd.f32 %v13642_v53, %v7357_v42  ;;  %v11300_v50 = vpop.f32.mrb[250].mxu0 }
 0x813   : > { %v7369_v31 = vadd.f32 %v13642_v53, %v11300_v50  ;;  %v7360_v47 = vpop.f32.mrb[251].mxu0  ;;  %v7510_v28 = vmax.f32 %v7366_v19, 0.0 }
 0x814   : > { %v7361_v61 = vadd.f32 %v13642_v53, %v7360_v47  ;;  %v7508_v1 = vmax.f32 %v7358_v18, 0.0 }
 0x815   : > { %v7511_v26 = vmax.f32 %v7369_v31, 0.0  ;;  %11422 = vmatmul.mubr.bf16.gmra.mrb[100].mxu0 %v13635_v48 }
 0x816   : > { %v7509_v41 = vmax.f32 %v7361_v61, 0.0  ;;  %11425 = vmatprep.mubr.bf16.mxu0 %v7568_v35 }
 0x817   : > { %v13675_v49 = vpack.c.bf16 %v7511_v26, %v7510_v28 }
 0x818   : > { %v13677_v51 = vpack.c.bf16 %v7509_v41, %v7508_v1  ;;  %v11303_v22 = vpop.f32.mrb[252].mxu0 }
 0x819   : > { %v7382_v58 = vadd.f32 %v13642_v53, %v11303_v22  ;;  %v7373_v40 = vpop.f32.mrb[253].mxu0 }
 0x81a   : > { %v7374_v59 = vadd.f32 %v13642_v53, %v7373_v40  ;;  %v11304_v56 = vpop.f32.mrb[254].mxu0 }
 0x81b   : > { %v7385_v11 = vadd.f32 %v13642_v53, %v11304_v56  ;;  %v7376_v57 = vpop.f32.mrb[255].mxu0  ;;  %v7514_v48 = vmax.f32 %v7382_v58, 0.0 }
 0x81c   : > { %v7377_v2 = vadd.f32 %v13642_v53, %v7376_v57  ;;  %v7512_v35 = vmax.f32 %v7374_v59, 0.0 }
 0x81d   : > { %v7515_v38 = vmax.f32 %v7385_v11, 0.0  ;;  %11426 = vmatmul.mubr.bf16.gmra.mrb[104].mxu0 %v13647_v52 }
 0x81e   : > { %v7513_v7 = vmax.f32 %v7377_v2, 0.0  ;;  %11429 = vmatprep.mubr.bf16.mxu0 %v7570_v14 }
 0x81f   : > { %v13689_v10 = vpack.c.bf16 %v7515_v38, %v7514_v48 }
 0x820   : > { %v13691_v3 = vpack.c.bf16 %v7513_v7, %v7512_v35  ;;  %v11323_v43 = vpop.f32.mrb[0].mxu0 }
 0x821   : > { %v7694_v4 = vadd.f32 %v11323_v43, %v13687_v60  ;;  %v7685_v53 = vpop.f32.mrb[1].mxu0 }
 0x822   : > { %v7686_v63 = vadd.f32 %v13687_v60, %v7685_v53  ;;  %v11324_v9 = vpop.f32.mrb[2].mxu0 }
 0x823   : > { %v7697_v52 = vadd.f32 %v11324_v9, %v13687_v60  ;;  %v7688_v39 = vpop.f32.mrb[3].mxu0  ;;  %v8198_v12 = vmax.f32 %v7694_v4, 0.0 }
 0x824   : > { %v7689_v14 = vadd.f32 %v13687_v60, %v7688_v39  ;;  %v8196_v33 = vmax.f32 %v7686_v63, 0.0 }
 0x825   : > { %v8199_v34 = vmax.f32 %v7697_v52, 0.0  ;;  %11430 = vmatmul.mubr.bf16.gmra.mrb[108].mxu0 %v13654_v13 }
 0x826   : > { %v8197_v17 = vmax.f32 %v7689_v14, 0.0  ;;  %11433 = vmatprep.mubr.bf16.mxu0 %v7572_v24 }
 0x827   : > { %v13698_v0 = vpack.c.bf16 %v8199_v34, %v8198_v12 }
 0x828   : > { %v13700_v16 = vpack.c.bf16 %v8197_v17, %v8196_v33  ;;  %v11327_v46 = vpop.f32.mrb[4].mxu0 }
 0x829   : > { %v7710_v54 = vadd.f32 %v11327_v46, %v13687_v60  ;;  %v7701_v6 = vpop.f32.mrb[5].mxu0 }
 0x82a   : > { %v7702_v23 = vadd.f32 %v13687_v60, %v7701_v6  ;;  %v11328_v5 = vpop.f32.mrb[6].mxu0 }
 0x82b   : > { %v7713_v29 = vadd.f32 %v11328_v5, %v13687_v60  ;;  %v7704_v27 = vpop.f32.mrb[7].mxu0  ;;  %v8202_v13 = vmax.f32 %v7710_v54, 0.0 }
 0x82c   : > { %v7705_v21 = vadd.f32 %v13687_v60, %v7704_v27  ;;  %v8200_v24 = vmax.f32 %v7702_v23, 0.0 }
 0x82d   : > { %v8203_v36 = vmax.f32 %v7713_v29, 0.0  ;;  %11434 = vmatmul.mubr.bf16.gmra.mrb[112].mxu0 %v13661_v20 }
 0x82e   : > { %v8201_v55 = vmax.f32 %v7705_v21, 0.0  ;;  %11437 = vmatprep.mubr.bf16.mxu0 %v7574_v45 }
 0x82f   : > { %v8327_v25 = vpack.c.bf16 %v8203_v36, %v8202_v13 }
 0x830   : > { %v8326_v37 = vpack.c.bf16 %v8201_v55, %v8200_v24  ;;  %v11331_v8 = vpop.f32.mrb[8].mxu0 }
 0x831   : > { %v7726_v15 = vadd.f32 %v11331_v8, %v13687_v60  ;;  %v7717_v32 = vpop.f32.mrb[9].mxu0 }
 0x832   : > { %v7718_v44 = vadd.f32 %v13687_v60, %v7717_v32  ;;  %v11332_v62 = vpop.f32.mrb[10].mxu0  ;;  %11469 = vmatprep.mubr.bf16.mxu1 %v8326_v37 }
 0x833   : > { %v7729_v19 = vadd.f32 %v11332_v62, %v13687_v60  ;;  %v7720_v42 = vpop.f32.mrb[11].mxu0  ;;  %11470 = vmatmul.mubr.bf16.vlgmr.msra.gmra.mrb[128].mxu1 %v8327_v25  ;;  %v8206_v20 = vmax.f32 %v7726_v15, 0.0 }
 0x834   : > { %v7721_v18 = vadd.f32 %v13687_v60, %v7720_v42  ;;  %v8204_v45 = vmax.f32 %v7718_v44, 0.0 }
 0x835   : > { %v8207_v50 = vmax.f32 %v7729_v19, 0.0  ;;  %11438 = vmatmul.mubr.bf16.gmra.mrb[116].mxu0 %v13668_v30 }
 0x836   : > { %v8205_v31 = vmax.f32 %v7721_v18, 0.0  ;;  %11441 = vmatprep.mubr.bf16.mxu0 %v13677_v51 }
 0x837   : > { %v8329_v47 = vpack.c.bf16 %v8207_v50, %v8206_v20 }
 0x838   : > { %v8328_v61 = vpack.c.bf16 %v8205_v31, %v8204_v45  ;;  %v11335_v28 = vpop.f32.mrb[12].mxu0 }
 0x839   : > { %v7742_v26 = vadd.f32 %v11335_v28, %v13687_v60  ;;  %v7733_v1 = vpop.f32.mrb[13].mxu0 }
 0x83a   : > { %v7734_v41 = vadd.f32 %v13687_v60, %v7733_v1  ;;  %v11336_v22 = vpop.f32.mrb[14].mxu0  ;;  %11473 = vmatprep.mubr.bf16.mxu1 %v8328_v61 }
 0x83b   : > { %v7745_v58 = vadd.f32 %v11336_v22, %v13687_v60  ;;  %v7736_v40 = vpop.f32.mrb[15].mxu0  ;;  %11474 = vmatmul.mubr.bf16.gmra.mrb[132].mxu1 %v8329_v47  ;;  %v8210_v59 = vmax.f32 %v7742_v26, 0.0 }
 0x83c   : > { %v7737_v30 = vadd.f32 %v13687_v60, %v7736_v40  ;;  %v8208_v51 = vmax.f32 %v7734_v41, 0.0 }
 0x83d   : > { %v8211_v56 = vmax.f32 %v7745_v58, 0.0  ;;  %11442 = vmatmul.mubr.bf16.gmra.mrb[120].mxu0 %v13675_v49 }
 0x83e   : > { %v8209_v11 = vmax.f32 %v7737_v30, 0.0  ;;  %11445 = vmatprep.mubr.bf16.mxu0 %v13691_v3 }
 0x83f   : > { %v8331_v57 = vpack.c.bf16 %v8211_v56, %v8210_v59 }
 0x840   : > { %v8330_v2 = vpack.c.bf16 %v8209_v11, %v8208_v51  ;;  %v11339_v48 = vpop.f32.mrb[16].mxu0 }
 0x841   : > { %v7758_v38 = vadd.f32 %v11339_v48, %v13687_v60  ;;  %v7749_v35 = vpop.f32.mrb[17].mxu0 }
 0x842   : > { %v7750_v7 = vadd.f32 %v13687_v60, %v7749_v35  ;;  %v11340_v43 = vpop.f32.mrb[18].mxu0  ;;  %11477 = vmatprep.mubr.bf16.mxu1 %v8330_v2 }
 0x843   : > { %v7761_v4 = vadd.f32 %v11340_v43, %v13687_v60  ;;  %v7752_v53 = vpop.f32.mrb[19].mxu0  ;;  %11478 = vmatmul.mubr.bf16.gmra.mrb[136].mxu1 %v8331_v57  ;;  %v8214_v63 = vmax.f32 %v7758_v38, 0.0 }
 0x844   : > { %v7753_v49 = vadd.f32 %v13687_v60, %v7752_v53  ;;  %v8212_v3 = vmax.f32 %v7750_v7, 0.0 }
 0x845   : > { %v8215_v9 = vmax.f32 %v7761_v4, 0.0  ;;  %11446 = vmatmul.mubr.bf16.gmra.mrb[124].mxu0 %v13689_v10 }
 0x846   : > { %v8213_v52 = vmax.f32 %v7753_v49, 0.0  ;;  %11465 = vmatprep.mubr.bf16.mxu0 %v13700_v16 }
 0x847   : > { %v8333_v39 = vpack.c.bf16 %v8215_v9, %v8214_v63 }
 0x848   : > { %v8332_v14 = vpack.c.bf16 %v8213_v52, %v8212_v3  ;;  %v11343_v12 = vpop.f32.mrb[20].mxu0 }
 0x849   : > { %v7774_v34 = vadd.f32 %v11343_v12, %v13687_v60  ;;  %v7765_v33 = vpop.f32.mrb[21].mxu0 }
 0x84a   : > { %v7766_v17 = vadd.f32 %v13687_v60, %v7765_v33  ;;  %v11344_v46 = vpop.f32.mrb[22].mxu0  ;;  %11481 = vmatprep.mubr.bf16.mxu1 %v8332_v14 }
 0x84b   : > { %v7777_v54 = vadd.f32 %v11344_v46, %v13687_v60  ;;  %v7768_v6 = vpop.f32.mrb[23].mxu0  ;;  %11482 = vmatmul.mubr.bf16.gmra.mrb[140].mxu1 %v8333_v39  ;;  %v8218_v23 = vmax.f32 %v7774_v34, 0.0 }
 0x84c   : > { %v7769_v10 = vadd.f32 %v13687_v60, %v7768_v6  ;;  %v8216_v16 = vmax.f32 %v7766_v17, 0.0 }
 0x84d   : > { %v8219_v5 = vmax.f32 %v7777_v54, 0.0  ;;  %11466 = vmatmul.mubr.bf16.vlgmr.msra.gmra.mrb[128].mxu0 %v13698_v0 }
 0x84e   : > { %v8217_v29 = vmax.f32 %v7769_v10, 0.0 }
 0x84f   : > { %v8335_v27 = vpack.c.bf16 %v8219_v5, %v8218_v23 }
 0x850   : > { %v8334_v21 = vpack.c.bf16 %v8217_v29, %v8216_v16  ;;  %v11347_v13 = vpop.f32.mrb[24].mxu0 }
 0x851   : > { %v7790_v36 = vadd.f32 %v11347_v13, %v13687_v60  ;;  %v7781_v24 = vpop.f32.mrb[25].mxu0 }
 0x852   : > { %v7782_v55 = vadd.f32 %v13687_v60, %v7781_v24  ;;  %v11348_v25 = vpop.f32.mrb[26].mxu0  ;;  %11485 = vmatprep.mubr.bf16.mxu1 %v8334_v21 }
 0x853   : > { %v7793_v37 = vadd.f32 %v11348_v25, %v13687_v60  ;;  %v7784_v8 = vpop.f32.mrb[27].mxu0  ;;  %11486 = vmatmul.mubr.bf16.gmra.mrb[144].mxu1 %v8335_v27  ;;  %v8222_v32 = vmax.f32 %v7790_v36, 0.0 }
 0x854   : > { %v7785_v15 = vadd.f32 %v13687_v60, %v7784_v8  ;;  %v8220_v44 = vmax.f32 %v7782_v55, 0.0 }
 0x855   : > { %v8223_v0 = vmax.f32 %v7793_v37, 0.0 }
 0x856   : > { %v8221_v62 = vmax.f32 %v7785_v15, 0.0 }
 0x857   : > { %v8337_v19 = vpack.c.bf16 %v8223_v0, %v8222_v32 }
 0x858   : > { %v8336_v42 = vpack.c.bf16 %v8221_v62, %v8220_v44  ;;  %v11351_v18 = vpop.f32.mrb[28].mxu0 }
 0x859   : > { %v7806_v20 = vadd.f32 %v11351_v18, %v13687_v60  ;;  %v7797_v50 = vpop.f32.mrb[29].mxu0 }
 0x85a   : > { %v7798_v45 = vadd.f32 %v13687_v60, %v7797_v50  ;;  %v11352_v31 = vpop.f32.mrb[30].mxu0  ;;  %11489 = vmatprep.mubr.bf16.mxu1 %v8336_v42 }
 0x85b   : > { %v7809_v47 = vadd.f32 %v11352_v31, %v13687_v60  ;;  %v7800_v61 = vpop.f32.mrb[31].mxu0  ;;  %11490 = vmatmul.mubr.bf16.gmra.mrb[148].mxu1 %v8337_v19  ;;  %v8226_v26 = vmax.f32 %v7806_v20, 0.0 }
 0x85c   : > { %v7801_v28 = vadd.f32 %v13687_v60, %v7800_v61  ;;  %v8224_v41 = vmax.f32 %v7798_v45, 0.0 }
 0x85d   : > { %v8227_v1 = vmax.f32 %v7809_v47, 0.0 }
 0x85e   : > { %v8225_v22 = vmax.f32 %v7801_v28, 0.0 }
 0x85f   : > { %v8339_v58 = vpack.c.bf16 %v8227_v1, %v8226_v26 }
 0x860   : > { %v8338_v40 = vpack.c.bf16 %v8225_v22, %v8224_v41  ;;  %v11355_v30 = vpop.f32.mrb[32].mxu0 }
 0x861   : > { %v7822_v59 = vadd.f32 %v11355_v30, %v13687_v60  ;;  %v7813_v56 = vpop.f32.mrb[33].mxu0 }
 0x862   : > { %v7814_v51 = vadd.f32 %v13687_v60, %v7813_v56  ;;  %v11356_v11 = vpop.f32.mrb[34].mxu0  ;;  %11493 = vmatprep.mubr.bf16.mxu1 %v8338_v40 }
 0x863   : > { %v7825_v57 = vadd.f32 %v11356_v11, %v13687_v60  ;;  %v7816_v2 = vpop.f32.mrb[35].mxu0  ;;  %11494 = vmatmul.mubr.bf16.gmra.mrb[152].mxu1 %v8339_v58  ;;  %v8230_v38 = vmax.f32 %v7822_v59, 0.0 }
 0x864   : > { %v7817_v48 = vadd.f32 %v13687_v60, %v7816_v2  ;;  %v8228_v7 = vmax.f32 %v7814_v51, 0.0 }
 0x865   : > { %v8231_v35 = vmax.f32 %v7825_v57, 0.0 }
 0x866   : > { %v8229_v43 = vmax.f32 %v7817_v48, 0.0 }
 0x867   : > { %v8341_v4 = vpack.c.bf16 %v8231_v35, %v8230_v38 }
 0x868   : > { %v8340_v53 = vpack.c.bf16 %v8229_v43, %v8228_v7  ;;  %v11359_v49 = vpop.f32.mrb[36].mxu0 }
 0x869   : > { %v7838_v63 = vadd.f32 %v11359_v49, %v13687_v60  ;;  %v7829_v9 = vpop.f32.mrb[37].mxu0 }
 0x86a   : > { %v7830_v3 = vadd.f32 %v13687_v60, %v7829_v9  ;;  %v11360_v52 = vpop.f32.mrb[38].mxu0  ;;  %11497 = vmatprep.mubr.bf16.mxu1 %v8340_v53 }
 0x86b   : > { %v7841_v39 = vadd.f32 %v11360_v52, %v13687_v60  ;;  %v7832_v14 = vpop.f32.mrb[39].mxu0  ;;  %11498 = vmatmul.mubr.bf16.gmra.mrb[156].mxu1 %v8341_v4  ;;  %v8234_v34 = vmax.f32 %v7838_v63, 0.0 }
 0x86c   : > { %v7833_v12 = vadd.f32 %v13687_v60, %v7832_v14  ;;  %v8232_v17 = vmax.f32 %v7830_v3, 0.0 }
 0x86d   : > { %v8235_v33 = vmax.f32 %v7841_v39, 0.0 }
 0x86e   : > { %v8233_v46 = vmax.f32 %v7833_v12, 0.0 }
 0x86f   : > { %v8343_v54 = vpack.c.bf16 %v8235_v33, %v8234_v34 }
 0x870   : > { %v8342_v6 = vpack.c.bf16 %v8233_v46, %v8232_v17  ;;  %v11363_v10 = vpop.f32.mrb[40].mxu0 }
 0x871   : > { %v7854_v23 = vadd.f32 %v11363_v10, %v13687_v60  ;;  %v7845_v5 = vpop.f32.mrb[41].mxu0 }
 0x872   : > { %v7846_v16 = vadd.f32 %v13687_v60, %v7845_v5  ;;  %v11364_v29 = vpop.f32.mrb[42].mxu0  ;;  %11501 = vmatprep.mubr.bf16.mxu1 %v8342_v6 }
 0x873   : > { %v7857_v27 = vadd.f32 %v11364_v29, %v13687_v60  ;;  %v7848_v21 = vpop.f32.mrb[43].mxu0  ;;  %11502 = vmatmul.mubr.bf16.gmra.mrb[160].mxu1 %v8343_v54  ;;  %v8238_v36 = vmax.f32 %v7854_v23, 0.0 }
 0x874   : > { %v7849_v13 = vadd.f32 %v13687_v60, %v7848_v21  ;;  %v8236_v55 = vmax.f32 %v7846_v16, 0.0 }
 0x875   : > { %v8239_v24 = vmax.f32 %v7857_v27, 0.0 }
 0x876   : > { %v8237_v25 = vmax.f32 %v7849_v13, 0.0 }
 0x877   : > { %v8345_v37 = vpack.c.bf16 %v8239_v24, %v8238_v36 }
 0x878   : > { %v8344_v8 = vpack.c.bf16 %v8237_v25, %v8236_v55  ;;  %v11367_v15 = vpop.f32.mrb[44].mxu0 }
 0x879   : > { %v7870_v32 = vadd.f32 %v11367_v15, %v13687_v60  ;;  %v7861_v0 = vpop.f32.mrb[45].mxu0 }
 0x87a   : > { %v7862_v44 = vadd.f32 %v13687_v60, %v7861_v0  ;;  %v11368_v62 = vpop.f32.mrb[46].mxu0  ;;  %11505 = vmatprep.mubr.bf16.mxu1 %v8344_v8 }
 0x87b   : > { %v7873_v19 = vadd.f32 %v11368_v62, %v13687_v60  ;;  %v7864_v42 = vpop.f32.mrb[47].mxu0  ;;  %11506 = vmatmul.mubr.bf16.gmra.mrb[164].mxu1 %v8345_v37  ;;  %v8242_v20 = vmax.f32 %v7870_v32, 0.0 }
 0x87c   : > { %v7865_v18 = vadd.f32 %v13687_v60, %v7864_v42  ;;  %v8240_v45 = vmax.f32 %v7862_v44, 0.0 }
 0x87d   : > { %v8243_v50 = vmax.f32 %v7873_v19, 0.0 }
 0x87e   : > { %v8241_v31 = vmax.f32 %v7865_v18, 0.0 }
 0x87f   : > { %v8347_v47 = vpack.c.bf16 %v8243_v50, %v8242_v20 }
 0x880   : > { %v8346_v61 = vpack.c.bf16 %v8241_v31, %v8240_v45  ;;  %v11371_v28 = vpop.f32.mrb[48].mxu0 }
 0x881   : > { %v7886_v26 = vadd.f32 %v11371_v28, %v13687_v60  ;;  %v7877_v1 = vpop.f32.mrb[49].mxu0 }
 0x882   : > { %v7878_v41 = vadd.f32 %v13687_v60, %v7877_v1  ;;  %v11372_v22 = vpop.f32.mrb[50].mxu0  ;;  %11509 = vmatprep.mubr.bf16.mxu1 %v8346_v61 }
 0x883   : > { %v7889_v58 = vadd.f32 %v11372_v22, %v13687_v60  ;;  %v7880_v40 = vpop.f32.mrb[51].mxu0  ;;  %11510 = vmatmul.mubr.bf16.gmra.mrb[168].mxu1 %v8347_v47  ;;  %v8246_v59 = vmax.f32 %v7886_v26, 0.0 }
 0x884   : > { %v7881_v30 = vadd.f32 %v13687_v60, %v7880_v40  ;;  %v8244_v51 = vmax.f32 %v7878_v41, 0.0 }
 0x885   : > { %v8247_v56 = vmax.f32 %v7889_v58, 0.0 }
 0x886   : > { %v8245_v11 = vmax.f32 %v7881_v30, 0.0 }
 0x887   : > { %v8349_v57 = vpack.c.bf16 %v8247_v56, %v8246_v59 }
 0x888   : > { %v8348_v2 = vpack.c.bf16 %v8245_v11, %v8244_v51  ;;  %v11375_v48 = vpop.f32.mrb[52].mxu0 }
 0x889   : > { %v7902_v38 = vadd.f32 %v11375_v48, %v13687_v60  ;;  %v7893_v35 = vpop.f32.mrb[53].mxu0 }
 0x88a   : > { %v7894_v7 = vadd.f32 %v13687_v60, %v7893_v35  ;;  %v11376_v43 = vpop.f32.mrb[54].mxu0  ;;  %11513 = vmatprep.mubr.bf16.mxu1 %v8348_v2 }
 0x88b   : > { %v7905_v4 = vadd.f32 %v11376_v43, %v13687_v60  ;;  %v7896_v53 = vpop.f32.mrb[55].mxu0  ;;  %11514 = vmatmul.mubr.bf16.gmra.mrb[172].mxu1 %v8349_v57  ;;  %v8250_v63 = vmax.f32 %v7902_v38, 0.0 }
 0x88c   : > { %v7897_v49 = vadd.f32 %v13687_v60, %v7896_v53  ;;  %v8248_v3 = vmax.f32 %v7894_v7, 0.0 }
 0x88d   : > { %v8251_v9 = vmax.f32 %v7905_v4, 0.0 }
 0x88e   : > { %v8249_v52 = vmax.f32 %v7897_v49, 0.0 }
 0x88f   : > { %v8351_v39 = vpack.c.bf16 %v8251_v9, %v8250_v63 }
 0x890   : > { %v8350_v14 = vpack.c.bf16 %v8249_v52, %v8248_v3  ;;  %v11379_v12 = vpop.f32.mrb[56].mxu0 }
 0x891   : > { %v7918_v34 = vadd.f32 %v11379_v12, %v13687_v60  ;;  %v7909_v33 = vpop.f32.mrb[57].mxu0 }
 0x892   : > { %v7910_v17 = vadd.f32 %v13687_v60, %v7909_v33  ;;  %v11380_v46 = vpop.f32.mrb[58].mxu0  ;;  %11517 = vmatprep.mubr.bf16.mxu1 %v8350_v14 }
 0x893   : > { %v7921_v54 = vadd.f32 %v11380_v46, %v13687_v60  ;;  %v7912_v6 = vpop.f32.mrb[59].mxu0  ;;  %11518 = vmatmul.mubr.bf16.gmra.mrb[176].mxu1 %v8351_v39  ;;  %v8254_v23 = vmax.f32 %v7918_v34, 0.0 }
 0x894   : > { %v7913_v10 = vadd.f32 %v13687_v60, %v7912_v6  ;;  %v8252_v16 = vmax.f32 %v7910_v17, 0.0 }
 0x895   : > { %v8255_v5 = vmax.f32 %v7921_v54, 0.0 }
 0x896   : > { %v8253_v29 = vmax.f32 %v7913_v10, 0.0 }
 0x897   : > { %v8353_v27 = vpack.c.bf16 %v8255_v5, %v8254_v23 }
 0x898   : > { %v8352_v21 = vpack.c.bf16 %v8253_v29, %v8252_v16  ;;  %v11383_v13 = vpop.f32.mrb[60].mxu0 }
 0x899   : > { %v7934_v36 = vadd.f32 %v11383_v13, %v13687_v60  ;;  %v7925_v24 = vpop.f32.mrb[61].mxu0 }
 0x89a   : > { %v7926_v55 = vadd.f32 %v13687_v60, %v7925_v24  ;;  %v11384_v25 = vpop.f32.mrb[62].mxu0  ;;  %11521 = vmatprep.mubr.bf16.mxu1 %v8352_v21 }
 0x89b   : > { %v7937_v37 = vadd.f32 %v11384_v25, %v13687_v60  ;;  %v7928_v8 = vpop.f32.mrb[63].mxu0  ;;  %11522 = vmatmul.mubr.bf16.gmra.mrb[180].mxu1 %v8353_v27  ;;  %v8258_v32 = vmax.f32 %v7934_v36, 0.0 }
 0x89c   : > { %v7929_v15 = vadd.f32 %v13687_v60, %v7928_v8  ;;  %v8256_v44 = vmax.f32 %v7926_v55, 0.0 }
 0x89d   : > { %v8259_v0 = vmax.f32 %v7937_v37, 0.0 }
 0x89e   : > { %v8257_v62 = vmax.f32 %v7929_v15, 0.0 }
 0x89f   : > { %v8355_v19 = vpack.c.bf16 %v8259_v0, %v8258_v32 }
 0x8a0   : > { %v8354_v42 = vpack.c.bf16 %v8257_v62, %v8256_v44  ;;  %v11387_v18 = vpop.f32.mrb[64].mxu0 }
 0x8a1   : > { %v7950_v20 = vadd.f32 %v11387_v18, %v13687_v60  ;;  %v7941_v50 = vpop.f32.mrb[65].mxu0 }
 0x8a2   : > { %v7942_v45 = vadd.f32 %v13687_v60, %v7941_v50  ;;  %v11388_v31 = vpop.f32.mrb[66].mxu0  ;;  %11525 = vmatprep.mubr.bf16.mxu1 %v8354_v42 }
 0x8a3   : > { %v7953_v47 = vadd.f32 %v11388_v31, %v13687_v60  ;;  %v7944_v61 = vpop.f32.mrb[67].mxu0  ;;  %11526 = vmatmul.mubr.bf16.gmra.mrb[184].mxu1 %v8355_v19  ;;  %v8262_v26 = vmax.f32 %v7950_v20, 0.0 }
 0x8a4   : > { %v7945_v28 = vadd.f32 %v13687_v60, %v7944_v61  ;;  %v8260_v41 = vmax.f32 %v7942_v45, 0.0 }
 0x8a5   : > { %v8263_v1 = vmax.f32 %v7953_v47, 0.0 }
 0x8a6   : > { %v8261_v22 = vmax.f32 %v7945_v28, 0.0 }
 0x8a7   : > { %v8357_v58 = vpack.c.bf16 %v8263_v1, %v8262_v26 }
 0x8a8   : > { %v8356_v40 = vpack.c.bf16 %v8261_v22, %v8260_v41  ;;  %v11391_v30 = vpop.f32.mrb[68].mxu0 }
 0x8a9   : > { %v7966_v59 = vadd.f32 %v11391_v30, %v13687_v60  ;;  %v7957_v56 = vpop.f32.mrb[69].mxu0 }
 0x8aa   : > { %v7958_v51 = vadd.f32 %v13687_v60, %v7957_v56  ;;  %v11392_v11 = vpop.f32.mrb[70].mxu0  ;;  %11529 = vmatprep.mubr.bf16.mxu1 %v8356_v40 }
 0x8ab   : > { %v7969_v57 = vadd.f32 %v11392_v11, %v13687_v60  ;;  %v7960_v2 = vpop.f32.mrb[71].mxu0  ;;  %11530 = vmatmul.mubr.bf16.gmra.mrb[188].mxu1 %v8357_v58  ;;  %v8266_v38 = vmax.f32 %v7966_v59, 0.0 }
 0x8ac   : > { %v7961_v48 = vadd.f32 %v13687_v60, %v7960_v2  ;;  %v8264_v7 = vmax.f32 %v7958_v51, 0.0 }
 0x8ad   : > { %v8267_v35 = vmax.f32 %v7969_v57, 0.0 }
 0x8ae   : > { %v8265_v43 = vmax.f32 %v7961_v48, 0.0 }
 0x8af   : > { %v8359_v4 = vpack.c.bf16 %v8267_v35, %v8266_v38 }
 0x8b0   : > { %v8358_v53 = vpack.c.bf16 %v8265_v43, %v8264_v7  ;;  %v11395_v49 = vpop.f32.mrb[72].mxu0 }
 0x8b1   : > { %v7982_v63 = vadd.f32 %v11395_v49, %v13687_v60  ;;  %v7973_v9 = vpop.f32.mrb[73].mxu0 }
 0x8b2   : > { %v7974_v3 = vadd.f32 %v13687_v60, %v7973_v9  ;;  %v11396_v52 = vpop.f32.mrb[74].mxu0  ;;  %11533 = vmatprep.mubr.bf16.mxu1 %v8358_v53 }
 0x8b3   : > { %v7985_v39 = vadd.f32 %v11396_v52, %v13687_v60  ;;  %v7976_v14 = vpop.f32.mrb[75].mxu0  ;;  %11534 = vmatmul.mubr.bf16.gmra.mrb[192].mxu1 %v8359_v4  ;;  %v8270_v34 = vmax.f32 %v7982_v63, 0.0 }
 0x8b4   : > { %v7977_v12 = vadd.f32 %v13687_v60, %v7976_v14  ;;  %v8268_v17 = vmax.f32 %v7974_v3, 0.0 }
 0x8b5   : > { %v8271_v33 = vmax.f32 %v7985_v39, 0.0 }
 0x8b6   : > { %v8269_v46 = vmax.f32 %v7977_v12, 0.0 }
 0x8b7   : > { %v8361_v54 = vpack.c.bf16 %v8271_v33, %v8270_v34 }
 0x8b8   : > { %v8360_v6 = vpack.c.bf16 %v8269_v46, %v8268_v17  ;;  %v11399_v10 = vpop.f32.mrb[76].mxu0 }
 0x8b9   : > { %v7998_v23 = vadd.f32 %v11399_v10, %v13687_v60  ;;  %v7989_v5 = vpop.f32.mrb[77].mxu0 }
 0x8ba   : > { %v7990_v16 = vadd.f32 %v13687_v60, %v7989_v5  ;;  %v11400_v29 = vpop.f32.mrb[78].mxu0  ;;  %11537 = vmatprep.mubr.bf16.mxu1 %v8360_v6 }
 0x8bb   : > { %v8001_v27 = vadd.f32 %v11400_v29, %v13687_v60  ;;  %v7992_v21 = vpop.f32.mrb[79].mxu0  ;;  %11538 = vmatmul.mubr.bf16.gmra.mrb[196].mxu1 %v8361_v54  ;;  %v8274_v36 = vmax.f32 %v7998_v23, 0.0 }
 0x8bc   : > { %v7993_v13 = vadd.f32 %v13687_v60, %v7992_v21  ;;  %v8272_v55 = vmax.f32 %v7990_v16, 0.0 }
 0x8bd   : > { %v8275_v24 = vmax.f32 %v8001_v27, 0.0 }
 0x8be   : > { %v8273_v25 = vmax.f32 %v7993_v13, 0.0 }
 0x8bf   : > { %v8363_v37 = vpack.c.bf16 %v8275_v24, %v8274_v36 }
 0x8c0   : > { %v8362_v8 = vpack.c.bf16 %v8273_v25, %v8272_v55  ;;  %v11403_v15 = vpop.f32.mrb[80].mxu0 }
 0x8c1   : > { %v8014_v32 = vadd.f32 %v11403_v15, %v13687_v60  ;;  %v8005_v0 = vpop.f32.mrb[81].mxu0 }
 0x8c2   : > { %v8006_v44 = vadd.f32 %v13687_v60, %v8005_v0  ;;  %v11404_v62 = vpop.f32.mrb[82].mxu0  ;;  %11541 = vmatprep.mubr.bf16.mxu1 %v8362_v8 }
 0x8c3   : > { %v8017_v19 = vadd.f32 %v11404_v62, %v13687_v60  ;;  %v8008_v42 = vpop.f32.mrb[83].mxu0  ;;  %11542 = vmatmul.mubr.bf16.gmra.mrb[200].mxu1 %v8363_v37  ;;  %v8278_v20 = vmax.f32 %v8014_v32, 0.0 }
 0x8c4   : > { %v8009_v18 = vadd.f32 %v13687_v60, %v8008_v42  ;;  %v8276_v45 = vmax.f32 %v8006_v44, 0.0 }
 0x8c5   : > { %v8279_v50 = vmax.f32 %v8017_v19, 0.0 }
 0x8c6   : > { %v8277_v31 = vmax.f32 %v8009_v18, 0.0 }
 0x8c7   : > { %v8365_v47 = vpack.c.bf16 %v8279_v50, %v8278_v20 }
 0x8c8   : > { %v8364_v61 = vpack.c.bf16 %v8277_v31, %v8276_v45  ;;  %v11407_v28 = vpop.f32.mrb[84].mxu0 }
 0x8c9   : > { %v8030_v26 = vadd.f32 %v11407_v28, %v13687_v60  ;;  %v8021_v1 = vpop.f32.mrb[85].mxu0 }
 0x8ca   : > { %v8022_v41 = vadd.f32 %v13687_v60, %v8021_v1  ;;  %v11408_v22 = vpop.f32.mrb[86].mxu0  ;;  %11545 = vmatprep.mubr.bf16.mxu1 %v8364_v61 }
 0x8cb   : > { %v8033_v58 = vadd.f32 %v11408_v22, %v13687_v60  ;;  %v8024_v40 = vpop.f32.mrb[87].mxu0  ;;  %11546 = vmatmul.mubr.bf16.gmra.mrb[204].mxu1 %v8365_v47  ;;  %v8282_v59 = vmax.f32 %v8030_v26, 0.0 }
 0x8cc   : > { %v8025_v30 = vadd.f32 %v13687_v60, %v8024_v40  ;;  %v8280_v51 = vmax.f32 %v8022_v41, 0.0 }
 0x8cd   : > { %v8283_v56 = vmax.f32 %v8033_v58, 0.0 }
 0x8ce   : > { %v8281_v11 = vmax.f32 %v8025_v30, 0.0 }
 0x8cf   : > { %v8367_v57 = vpack.c.bf16 %v8283_v56, %v8282_v59 }
 0x8d0   : > { %v8366_v2 = vpack.c.bf16 %v8281_v11, %v8280_v51  ;;  %v11411_v48 = vpop.f32.mrb[88].mxu0 }
 0x8d1   : > { %v8046_v38 = vadd.f32 %v11411_v48, %v13687_v60  ;;  %v8037_v35 = vpop.f32.mrb[89].mxu0 }
 0x8d2   : > { %v8038_v7 = vadd.f32 %v13687_v60, %v8037_v35  ;;  %v11412_v43 = vpop.f32.mrb[90].mxu0  ;;  %11549 = vmatprep.mubr.bf16.mxu1 %v8366_v2 }
 0x8d3   : > { %v8049_v4 = vadd.f32 %v11412_v43, %v13687_v60  ;;  %v8040_v53 = vpop.f32.mrb[91].mxu0  ;;  %11550 = vmatmul.mubr.bf16.gmra.mrb[208].mxu1 %v8367_v57  ;;  %v8286_v63 = vmax.f32 %v8046_v38, 0.0 }
 0x8d4   : > { %v8041_v49 = vadd.f32 %v13687_v60, %v8040_v53  ;;  %v8284_v3 = vmax.f32 %v8038_v7, 0.0 }
 0x8d5   : > { %v8287_v9 = vmax.f32 %v8049_v4, 0.0 }
 0x8d6   : > { %v8285_v52 = vmax.f32 %v8041_v49, 0.0 }
 0x8d7   : > { %v8369_v39 = vpack.c.bf16 %v8287_v9, %v8286_v63 }
 0x8d8   : > { %v8368_v14 = vpack.c.bf16 %v8285_v52, %v8284_v3  ;;  %v11415_v12 = vpop.f32.mrb[92].mxu0 }
 0x8d9   : > { %v8062_v34 = vadd.f32 %v11415_v12, %v13687_v60  ;;  %v8053_v33 = vpop.f32.mrb[93].mxu0 }
 0x8da   : > { %v8054_v17 = vadd.f32 %v13687_v60, %v8053_v33  ;;  %v11416_v46 = vpop.f32.mrb[94].mxu0  ;;  %11553 = vmatprep.mubr.bf16.mxu1 %v8368_v14 }
 0x8db   : > { %v8065_v54 = vadd.f32 %v11416_v46, %v13687_v60  ;;  %v8056_v6 = vpop.f32.mrb[95].mxu0  ;;  %11554 = vmatmul.mubr.bf16.gmra.mrb[212].mxu1 %v8369_v39  ;;  %v8290_v23 = vmax.f32 %v8062_v34, 0.0 }
 0x8dc   : > { %v8057_v10 = vadd.f32 %v13687_v60, %v8056_v6  ;;  %v8288_v16 = vmax.f32 %v8054_v17, 0.0 }
 0x8dd   : > { %v8291_v5 = vmax.f32 %v8065_v54, 0.0 }
 0x8de   : > { %v8289_v29 = vmax.f32 %v8057_v10, 0.0 }
 0x8df   : > { %v8371_v27 = vpack.c.bf16 %v8291_v5, %v8290_v23 }
 0x8e0   : > { %v8370_v21 = vpack.c.bf16 %v8289_v29, %v8288_v16  ;;  %v11419_v13 = vpop.f32.mrb[96].mxu0 }
 0x8e1   : > { %v8078_v36 = vadd.f32 %v11419_v13, %v13687_v60  ;;  %v8069_v24 = vpop.f32.mrb[97].mxu0 }
 0x8e2   : > { %v8070_v55 = vadd.f32 %v13687_v60, %v8069_v24  ;;  %v11420_v25 = vpop.f32.mrb[98].mxu0  ;;  %11557 = vmatprep.mubr.bf16.mxu1 %v8370_v21 }
 0x8e3   : > { %v8081_v37 = vadd.f32 %v11420_v25, %v13687_v60  ;;  %v8072_v8 = vpop.f32.mrb[99].mxu0  ;;  %11558 = vmatmul.mubr.bf16.gmra.mrb[216].mxu1 %v8371_v27  ;;  %v8294_v32 = vmax.f32 %v8078_v36, 0.0  ;;  %v13826_v36 = vld [vmem:[%s14246_s19] ss:$0 sm:$0xff] }
 0x8e4   : > { %v8073_v15 = vadd.f32 %v13687_v60, %v8072_v8  ;;  %v8292_v44 = vmax.f32 %v8070_v55, 0.0 }
 0x8e5   : > { %v8295_v0 = vmax.f32 %v8081_v37, 0.0 }
 0x8e6   : > { %v8293_v62 = vmax.f32 %v8073_v15, 0.0 }
 0x8e7   : > { %v8373_v19 = vpack.c.bf16 %v8295_v0, %v8294_v32 }
 0x8e8   : > { %v8372_v42 = vpack.c.bf16 %v8293_v62, %v8292_v44  ;;  %v11423_v18 = vpop.f32.mrb[100].mxu0 }
 0x8e9   : > { %v8094_v20 = vadd.f32 %v11423_v18, %v13687_v60  ;;  %v8085_v50 = vpop.f32.mrb[101].mxu0 }
 0x8ea   : > { %v8086_v45 = vadd.f32 %v13687_v60, %v8085_v50  ;;  %v11424_v31 = vpop.f32.mrb[102].mxu0  ;;  %11561 = vmatprep.mubr.bf16.mxu1 %v8372_v42 }
 0x8eb   : > { %v8097_v47 = vadd.f32 %v11424_v31, %v13687_v60  ;;  %v8088_v61 = vpop.f32.mrb[103].mxu0  ;;  %11562 = vmatmul.mubr.bf16.gmra.mrb[220].mxu1 %v8373_v19  ;;  %v8298_v26 = vmax.f32 %v8094_v20, 0.0 }
 0x8ec   : > { %v8089_v28 = vadd.f32 %v13687_v60, %v8088_v61  ;;  %v8296_v41 = vmax.f32 %v8086_v45, 0.0 }
 0x8ed   : > { %v8299_v1 = vmax.f32 %v8097_v47, 0.0 }
 0x8ee   : > { %v8297_v22 = vmax.f32 %v8089_v28, 0.0 }
 0x8ef   : > { %v8375_v58 = vpack.c.bf16 %v8299_v1, %v8298_v26 }
 0x8f0   : > { %v8374_v40 = vpack.c.bf16 %v8297_v22, %v8296_v41  ;;  %v11427_v30 = vpop.f32.mrb[104].mxu0 }
 0x8f1   : > { %v8110_v59 = vadd.f32 %v11427_v30, %v13687_v60  ;;  %v8101_v56 = vpop.f32.mrb[105].mxu0 }
 0x8f2   : > { %v8102_v51 = vadd.f32 %v13687_v60, %v8101_v56  ;;  %v11428_v11 = vpop.f32.mrb[106].mxu0  ;;  %11565 = vmatprep.mubr.bf16.mxu1 %v8374_v40 }
 0x8f3   : > { %v8113_v57 = vadd.f32 %v11428_v11, %v13687_v60  ;;  %v8104_v2 = vpop.f32.mrb[107].mxu0  ;;  %11566 = vmatmul.mubr.bf16.gmra.mrb[224].mxu1 %v8375_v58  ;;  %v8302_v38 = vmax.f32 %v8110_v59, 0.0 }
 0x8f4   : > { %v8105_v48 = vadd.f32 %v13687_v60, %v8104_v2  ;;  %v8300_v7 = vmax.f32 %v8102_v51, 0.0 }
 0x8f5   : > { %v8303_v35 = vmax.f32 %v8113_v57, 0.0 }
 0x8f6   : > { %v8301_v43 = vmax.f32 %v8105_v48, 0.0 }
 0x8f7   : > { %v8377_v4 = vpack.c.bf16 %v8303_v35, %v8302_v38 }
 0x8f8   : > { %v8376_v53 = vpack.c.bf16 %v8301_v43, %v8300_v7  ;;  %v11431_v49 = vpop.f32.mrb[108].mxu0 }
 0x8f9   : > { %v8126_v63 = vadd.f32 %v11431_v49, %v13687_v60  ;;  %v8117_v9 = vpop.f32.mrb[109].mxu0 }
 0x8fa   : > { %v8118_v3 = vadd.f32 %v13687_v60, %v8117_v9  ;;  %v11432_v52 = vpop.f32.mrb[110].mxu0  ;;  %11569 = vmatprep.mubr.bf16.mxu1 %v8376_v53 }
 0x8fb   : > { %v8129_v39 = vadd.f32 %v11432_v52, %v13687_v60  ;;  %v8120_v14 = vpop.f32.mrb[111].mxu0  ;;  %11570 = vmatmul.mubr.bf16.gmra.mrb[228].mxu1 %v8377_v4  ;;  %v8306_v34 = vmax.f32 %v8126_v63, 0.0 }
 0x8fc   : > { %v8121_v12 = vadd.f32 %v13687_v60, %v8120_v14  ;;  %v8304_v17 = vmax.f32 %v8118_v3, 0.0 }
 0x8fd   : > { %v8307_v33 = vmax.f32 %v8129_v39, 0.0 }
 0x8fe   : > { %v8305_v46 = vmax.f32 %v8121_v12, 0.0 }
 0x8ff   : > { %v8379_v54 = vpack.c.bf16 %v8307_v33, %v8306_v34 }
 0x900   : > { %v8378_v6 = vpack.c.bf16 %v8305_v46, %v8304_v17  ;;  %v11435_v10 = vpop.f32.mrb[112].mxu0 }
 0x901   : > { %v8142_v23 = vadd.f32 %v11435_v10, %v13687_v60  ;;  %v8133_v5 = vpop.f32.mrb[113].mxu0 }
 0x902   : > { %v8134_v16 = vadd.f32 %v13687_v60, %v8133_v5  ;;  %v11436_v29 = vpop.f32.mrb[114].mxu0  ;;  %11573 = vmatprep.mubr.bf16.mxu1 %v8378_v6 }
 0x903   : > { %v8145_v27 = vadd.f32 %v11436_v29, %v13687_v60  ;;  %v8136_v21 = vpop.f32.mrb[115].mxu0  ;;  %11574 = vmatmul.mubr.bf16.gmra.mrb[232].mxu1 %v8379_v54  ;;  %v8310_v24 = vmax.f32 %v8142_v23, 0.0 }
 0x904   : > { %v8137_v13 = vadd.f32 %v13687_v60, %v8136_v21  ;;  %v8308_v25 = vmax.f32 %v8134_v16, 0.0 }
 0x905   : > { %v8311_v55 = vmax.f32 %v8145_v27, 0.0 }
 0x906   : > { %v8309_v37 = vmax.f32 %v8137_v13, 0.0  ;;  %v11471_v8 = vpop.f32.mrb[128].mxu1 }
 0x907   : > { %v8381_v15 = vpack.c.bf16 %v8311_v55, %v8310_v24  ;;  %v8518_v32 = vadd.f32 %v11471_v8, %v13826_v36  ;;  %v8509_v0 = vpop.f32.mrb[129].mxu1 }
 0x908   : > { %v8380_v44 = vpack.c.bf16 %v8309_v37, %v8308_v25  ;;  %v8510_v62 = vadd.f32 %v13826_v36, %v8509_v0  ;;  %v11439_v19 = vpop.f32.mrb[116].mxu0  ;;  %v11472_v42 = vpop.f32.mrb[130].mxu1 }
 0x909   : > { %9011 = vst.msk [vmem:[%s13831_s0 + $0x30] sm:$0xff] %vm9004_vm3, %v8518_v32  ;;  %v8158_v18 = vadd.f32 %v11439_v19, %v13687_v60  ;;  %v8521_v20 = vadd.f32 %v11472_v42, %v13826_v36  ;;  %v8149_v50 = vpop.f32.mrb[117].mxu0  ;;  %v8512_v45 = vpop.f32.mrb[131].mxu1 }
 0x90a   : > { %9009 = vst.msk [vmem:[%s13831_s0 + $0x20] sm:$0xff] %vm9004_vm3, %v8510_v62  ;;  %v8150_v31 = vadd.f32 %v13687_v60, %v8149_v50  ;;  %v8513_v47 = vadd.f32 %v13826_v36, %v8512_v45  ;;  %v11440_v61 = vpop.f32.mrb[118].mxu0  ;;  %11577 = vmatprep.mubr.bf16.mxu1 %v8380_v44 }
 0x90b   : > { %9012 = vst.msk [vmem:[%s13831_s0 + $0x38] sm:$0xff] %vm9004_vm3, %v8521_v20  ;;  %v8161_v28 = vadd.f32 %v11440_v61, %v13687_v60  ;;  %v8152_v26 = vpop.f32.mrb[119].mxu0  ;;  %11578 = vmatmul.mubr.bf16.gmra.mrb[236].mxu1 %v8381_v15  ;;  %v8314_v41 = vmax.f32 %v8158_v18, 0.0 }
 0x90c   : > { %9010 = vst.msk [vmem:[%s13831_s0 + $0x28] sm:$0xff] %vm9004_vm3, %v8513_v47  ;;  %v8153_v1 = vadd.f32 %v13687_v60, %v8152_v26  ;;  %v8312_v58 = vmax.f32 %v8150_v31, 0.0  ;;  %v11949_v60 = vld [vmem:[%s14245_s18] ss:$0 sm:$0xff] }
 0x90d   : > { %v8315_v22 = vmax.f32 %v8161_v28, 0.0 }
 0x90e   : > { %v8313_v40 = vmax.f32 %v8153_v1, 0.0  ;;  %v11475_v30 = vpop.f32.mrb[132].mxu1 }
 0x90f   : > { %v8383_v59 = vpack.c.bf16 %v8315_v22, %v8314_v41  ;;  %v8534_v56 = vadd.f32 %v11475_v30, %v13826_v36  ;;  %v8525_v51 = vpop.f32.mrb[133].mxu1 }
 0x910   : > { %v8382_v11 = vpack.c.bf16 %v8313_v40, %v8312_v58  ;;  %v8526_v57 = vadd.f32 %v13826_v36, %v8525_v51  ;;  %v11443_v2 = vpop.f32.mrb[120].mxu0  ;;  %v11476_v48 = vpop.f32.mrb[134].mxu1 }
 0x911   : > { %9015 = vst.msk [vmem:[%s13831_s0 + $0x50] sm:$0xff] %vm9004_vm3, %v8534_v56  ;;  %v8174_v38 = vadd.f32 %v11949_v60, %v11443_v2  ;;  %v8537_v35 = vadd.f32 %v11476_v48, %v13826_v36  ;;  %v8165_v7 = vpop.f32.mrb[121].mxu0  ;;  %v8528_v43 = vpop.f32.mrb[135].mxu1 }
 0x912   : > { %9013 = vst.msk [vmem:[%s13831_s0 + $0x40] sm:$0xff] %vm9004_vm3, %v8526_v57  ;;  %v8166_v4 = vadd.f32 %v11949_v60, %v8165_v7  ;;  %v8529_v53 = vadd.f32 %v13826_v36, %v8528_v43  ;;  %v11444_v49 = vpop.f32.mrb[122].mxu0  ;;  %11581 = vmatprep.mubr.bf16.mxu1 %v8382_v11 }
 0x913   : > { %9016 = vst.msk [vmem:[%s13831_s0 + $0x58] sm:$0xff] %vm9004_vm3, %v8537_v35  ;;  %v8177_v63 = vadd.f32 %v11949_v60, %v11444_v49  ;;  %v8168_v9 = vpop.f32.mrb[123].mxu0  ;;  %11582 = vmatmul.mubr.bf16.gmra.mrb[240].mxu1 %v8383_v59  ;;  %v8318_v52 = vmax.f32 %v8174_v38, 0.0 }
 0x914   : > { %9014 = vst.msk [vmem:[%s13831_s0 + $0x48] sm:$0xff] %vm9004_vm3, %v8529_v53  ;;  %v8169_v3 = vadd.f32 %v11949_v60, %v8168_v9  ;;  %v8316_v14 = vmax.f32 %v8166_v4, 0.0 }
 0x915   : > { %v8319_v39 = vmax.f32 %v8177_v63, 0.0 }
 0x916   : > { %v8317_v12 = vmax.f32 %v8169_v3, 0.0  ;;  %v11479_v34 = vpop.f32.mrb[136].mxu1 }
 0x917   : > { %v8385_v33 = vpack.c.bf16 %v8319_v39, %v8318_v52  ;;  %v8550_v17 = vadd.f32 %v11479_v34, %v13826_v36  ;;  %v8541_v46 = vpop.f32.mrb[137].mxu1 }
 0x918   : > { %v8384_v54 = vpack.c.bf16 %v8317_v12, %v8316_v14  ;;  %v8542_v6 = vadd.f32 %v13826_v36, %v8541_v46  ;;  %v11447_v10 = vpop.f32.mrb[124].mxu0  ;;  %v11480_v23 = vpop.f32.mrb[138].mxu1 }
 0x919   : > { %9019 = vst.msk [vmem:[%s13831_s0 + $0x70] sm:$0xff] %vm9004_vm3, %v8550_v17  ;;  %v8190_v5 = vadd.f32 %v11949_v60, %v11447_v10  ;;  %v8553_v16 = vadd.f32 %v11480_v23, %v13826_v36  ;;  %v8181_v29 = vpop.f32.mrb[125].mxu0  ;;  %v8544_v27 = vpop.f32.mrb[139].mxu1 }
 0x91a   : > { %9017 = vst.msk [vmem:[%s13831_s0 + $0x60] sm:$0xff] %vm9004_vm3, %v8542_v6  ;;  %v8182_v21 = vadd.f32 %v11949_v60, %v8181_v29  ;;  %v8545_v13 = vadd.f32 %v13826_v36, %v8544_v27  ;;  %v11448_v24 = vpop.f32.mrb[126].mxu0  ;;  %11585 = vmatprep.mubr.bf16.mxu1 %v8384_v54 }
 0x91b   : > { %9020 = vst.msk [vmem:[%s13831_s0 + $0x78] sm:$0xff] %vm9004_vm3, %v8553_v16  ;;  %v8193_v55 = vadd.f32 %v11949_v60, %v11448_v24  ;;  %v8184_v25 = vpop.f32.mrb[127].mxu0  ;;  %11586 = vmatmul.mubr.bf16.gmra.mrb[244].mxu1 %v8385_v33  ;;  %v8322_v8 = vmax.f32 %v8190_v5, 0.0 }
 0x91c   : > { %9018 = vst.msk [vmem:[%s13831_s0 + $0x68] sm:$0xff] %vm9004_vm3, %v8545_v13  ;;  %v8185_v37 = vadd.f32 %v11949_v60, %v8184_v25  ;;  %v8320_v32 = vmax.f32 %v8182_v21, 0.0 }
 0x91d   : > { %v8323_v15 = vmax.f32 %v8193_v55, 0.0 }
 0x91e   : > { %v8321_v0 = vmax.f32 %v8185_v37, 0.0  ;;  %v11483_v44 = vpop.f32.mrb[140].mxu1 }
 0x91f   : > { %v8387_v62 = vpack.c.bf16 %v8323_v15, %v8322_v8  ;;  %v8566_v19 = vadd.f32 %v11483_v44, %v13826_v36  ;;  %v8557_v42 = vpop.f32.mrb[141].mxu1 }
 0x920   : > { %v8386_v18 = vpack.c.bf16 %v8321_v0, %v8320_v32  ;;  %v8558_v20 = vadd.f32 %v13826_v36, %v8557_v42  ;;  %v11467_v50 = vpop.f32.mrb[128].mxu0  ;;  %v11484_v45 = vpop.f32.mrb[142].mxu1 }
 0x921   : > { %9023 = vst.msk [vmem:[%s13831_s0 + $0x90] sm:$0xff] %vm9004_vm3, %v8566_v19  ;;  %v8502_v31 = vadd.f32 %v11467_v50, %v13826_v36  ;;  %v8569_v47 = vadd.f32 %v11484_v45, %v13826_v36  ;;  %v8493_v61 = vpop.f32.mrb[129].mxu0  ;;  %v8560_v28 = vpop.f32.mrb[143].mxu1 }
 0x922   : > { %9021 = vst.msk [vmem:[%s13831_s0 + $0x80] sm:$0xff] %vm9004_vm3, %v8558_v20  ;;  %v8494_v26 = vadd.f32 %v13826_v36, %v8493_v61  ;;  %v8561_v1 = vadd.f32 %v13826_v36, %v8560_v28  ;;  %v11468_v41 = vpop.f32.mrb[130].mxu0  ;;  %11589 = vmatprep.mubr.bf16.mxu1 %v8386_v18 }
 0x923   : > { %9007 = vst.msk [vmem:[%s13831_s0 + $0x10] sm:$0xff] %vm9004_vm3, %v8502_v31  ;;  %9024 = vst.msk [vmem:[%s13831_s0 + $0x98] sm:$0xff] %vm9004_vm3, %v8569_v47  ;;  %v8505_v22 = vadd.f32 %v11468_v41, %v13826_v36  ;;  %v8496_v58 = vpop.f32.mrb[131].mxu0  ;;  %11590 = vmatmul.mubr.bf16.gmra.mrb[248].mxu1 %v8387_v62 }
 0x924   : > { %9005 = vst.msk [vmem:[%s13831_s0] sm:$0xff] %vm9004_vm3, %v8494_v26  ;;  %9022 = vst.msk [vmem:[%s13831_s0 + $0x88] sm:$0xff] %vm9004_vm3, %v8561_v1  ;;  %v8497_v40 = vadd.f32 %v13826_v36, %v8496_v58 }
 0x925   : > { %9008 = vst.msk [vmem:[%s13831_s0 + $0x18] sm:$0xff] %vm9004_vm3, %v8505_v22 }
 0x926   : > { %9006 = vst.msk [vmem:[%s13831_s0 + $0x8] sm:$0xff] %vm9004_vm3, %v8497_v40  ;;  %v11487_v30 = vpop.f32.mrb[144].mxu1 }
 0x927   : > { %v8582_v59 = vadd.f32 %v11487_v30, %v13826_v36  ;;  %v8573_v56 = vpop.f32.mrb[145].mxu1 }
 0x928   : > { %v8574_v51 = vadd.f32 %v13826_v36, %v8573_v56  ;;  %v11488_v11 = vpop.f32.mrb[146].mxu1 }
 0x929   : > { %9027 = vst.msk [vmem:[%s13831_s0 + $0xb0] sm:$0xff] %vm9004_vm3, %v8582_v59  ;;  %v8585_v57 = vadd.f32 %v11488_v11, %v13826_v36  ;;  %v8576_v2 = vpop.f32.mrb[147].mxu1 }
 0x92a   : > { %9025 = vst.msk [vmem:[%s13831_s0 + $0xa0] sm:$0xff] %vm9004_vm3, %v8574_v51  ;;  %v8577_v48 = vadd.f32 %v13826_v36, %v8576_v2 }
 0x92b   : > { %9028 = vst.msk [vmem:[%s13831_s0 + $0xb8] sm:$0xff] %vm9004_vm3, %v8585_v57 }
 0x92c   : > { %9026 = vst.msk [vmem:[%s13831_s0 + $0xa8] sm:$0xff] %vm9004_vm3, %v8577_v48 }
 0x92e   : > { %v11491_v60 = vpop.f32.mrb[148].mxu1 }
 0x92f   : > { %v8598_v38 = vadd.f32 %v11491_v60, %v13826_v36  ;;  %v8589_v35 = vpop.f32.mrb[149].mxu1 }
 0x930   : > { %v8590_v7 = vadd.f32 %v13826_v36, %v8589_v35  ;;  %v11492_v43 = vpop.f32.mrb[150].mxu1 }
 0x931   : > { %9031 = vst.msk [vmem:[%s13831_s0 + $0xd0] sm:$0xff] %vm9004_vm3, %v8598_v38  ;;  %v8601_v4 = vadd.f32 %v11492_v43, %v13826_v36  ;;  %v8592_v53 = vpop.f32.mrb[151].mxu1 }
 0x932   : > { %9029 = vst.msk [vmem:[%s13831_s0 + $0xc0] sm:$0xff] %vm9004_vm3, %v8590_v7  ;;  %v8593_v49 = vadd.f32 %v13826_v36, %v8592_v53 }
 0x933   : > { %9032 = vst.msk [vmem:[%s13831_s0 + $0xd8] sm:$0xff] %vm9004_vm3, %v8601_v4 }
 0x934   : > { %9030 = vst.msk [vmem:[%s13831_s0 + $0xc8] sm:$0xff] %vm9004_vm3, %v8593_v49 }
 0x936   : > { %v11495_v63 = vpop.f32.mrb[152].mxu1 }
 0x937   : > { %v8614_v9 = vadd.f32 %v11495_v63, %v13826_v36  ;;  %v8605_v3 = vpop.f32.mrb[153].mxu1 }
 0x938   : > { %v8606_v52 = vadd.f32 %v13826_v36, %v8605_v3  ;;  %v11496_v39 = vpop.f32.mrb[154].mxu1 }
 0x939   : > { %9035 = vst.msk [vmem:[%s13831_s0 + $0xf0] sm:$0xff] %vm9004_vm3, %v8614_v9  ;;  %v8617_v14 = vadd.f32 %v11496_v39, %v13826_v36  ;;  %v8608_v12 = vpop.f32.mrb[155].mxu1 }
 0x93a   : > { %9033 = vst.msk [vmem:[%s13831_s0 + $0xe0] sm:$0xff] %vm9004_vm3, %v8606_v52  ;;  %v8609_v34 = vadd.f32 %v13826_v36, %v8608_v12 }
 0x93b   : > { %9036 = vst.msk [vmem:[%s13831_s0 + $0xf8] sm:$0xff] %vm9004_vm3, %v8617_v14 }
 0x93c   : > { %9034 = vst.msk [vmem:[%s13831_s0 + $0xe8] sm:$0xff] %vm9004_vm3, %v8609_v34 }
 0x93e   : > { %v11499_v33 = vpop.f32.mrb[156].mxu1 }
 0x93f   : > { %v8630_v17 = vadd.f32 %v11499_v33, %v13826_v36  ;;  %v8621_v46 = vpop.f32.mrb[157].mxu1 }
 0x940   : > { %v8622_v54 = vadd.f32 %v13826_v36, %v8621_v46  ;;  %v11500_v6 = vpop.f32.mrb[158].mxu1 }
 0x941   : > { %9039 = vst.msk [vmem:[%s13831_s0 + $0x110] sm:$0xff] %vm9004_vm3, %v8630_v17  ;;  %v8633_v10 = vadd.f32 %v11500_v6, %v13826_v36  ;;  %v8624_v23 = vpop.f32.mrb[159].mxu1 }
 0x942   : > { %9037 = vst.msk [vmem:[%s13831_s0 + $0x100] sm:$0xff] %vm9004_vm3, %v8622_v54  ;;  %v8625_v5 = vadd.f32 %v13826_v36, %v8624_v23 }
 0x943   : > { %9040 = vst.msk [vmem:[%s13831_s0 + $0x118] sm:$0xff] %vm9004_vm3, %v8633_v10 }
 0x944   : > { %9038 = vst.msk [vmem:[%s13831_s0 + $0x108] sm:$0xff] %vm9004_vm3, %v8625_v5 }
 0x946   : > { %v11503_v16 = vpop.f32.mrb[160].mxu1 }
 0x947   : > { %v8646_v29 = vadd.f32 %v11503_v16, %v13826_v36  ;;  %v8637_v27 = vpop.f32.mrb[161].mxu1 }
 0x948   : > { %v8638_v21 = vadd.f32 %v13826_v36, %v8637_v27  ;;  %v11504_v13 = vpop.f32.mrb[162].mxu1 }
 0x949   : > { %9043 = vst.msk [vmem:[%s13831_s0 + $0x130] sm:$0xff] %vm9004_vm3, %v8646_v29  ;;  %v8649_v24 = vadd.f32 %v11504_v13, %v13826_v36  ;;  %v8640_v55 = vpop.f32.mrb[163].mxu1 }
 0x94a   : > { %9041 = vst.msk [vmem:[%s13831_s0 + $0x120] sm:$0xff] %vm9004_vm3, %v8638_v21  ;;  %v8641_v25 = vadd.f32 %v13826_v36, %v8640_v55 }
 0x94b   : > { %9044 = vst.msk [vmem:[%s13831_s0 + $0x138] sm:$0xff] %vm9004_vm3, %v8649_v24 }
 0x94c   : > { %9042 = vst.msk [vmem:[%s13831_s0 + $0x128] sm:$0xff] %vm9004_vm3, %v8641_v25 }
 0x94e   : > { %v11507_v37 = vpop.f32.mrb[164].mxu1 }
 0x94f   : > { %v8662_v8 = vadd.f32 %v11507_v37, %v13826_v36  ;;  %v8653_v15 = vpop.f32.mrb[165].mxu1 }
 0x950   : > { %v8654_v32 = vadd.f32 %v13826_v36, %v8653_v15  ;;  %v11508_v0 = vpop.f32.mrb[166].mxu1 }
 0x951   : > { %9047 = vst.msk [vmem:[%s13831_s0 + $0x150] sm:$0xff] %vm9004_vm3, %v8662_v8  ;;  %v8665_v44 = vadd.f32 %v11508_v0, %v13826_v36  ;;  %v8656_v62 = vpop.f32.mrb[167].mxu1 }
 0x952   : > { %9045 = vst.msk [vmem:[%s13831_s0 + $0x140] sm:$0xff] %vm9004_vm3, %v8654_v32  ;;  %v8657_v19 = vadd.f32 %v13826_v36, %v8656_v62 }
 0x953   : > { %9048 = vst.msk [vmem:[%s13831_s0 + $0x158] sm:$0xff] %vm9004_vm3, %v8665_v44 }
 0x954   : > { %9046 = vst.msk [vmem:[%s13831_s0 + $0x148] sm:$0xff] %vm9004_vm3, %v8657_v19 }
 0x956   : > { %v11511_v42 = vpop.f32.mrb[168].mxu1 }
 0x957   : > { %v8678_v18 = vadd.f32 %v11511_v42, %v13826_v36  ;;  %v8669_v20 = vpop.f32.mrb[169].mxu1 }
 0x958   : > { %v8670_v50 = vadd.f32 %v13826_v36, %v8669_v20  ;;  %v11512_v45 = vpop.f32.mrb[170].mxu1 }
 0x959   : > { %9051 = vst.msk [vmem:[%s13831_s0 + $0x170] sm:$0xff] %vm9004_vm3, %v8678_v18  ;;  %v8681_v31 = vadd.f32 %v11512_v45, %v13826_v36  ;;  %v8672_v47 = vpop.f32.mrb[171].mxu1 }
 0x95a   : > { %9049 = vst.msk [vmem:[%s13831_s0 + $0x160] sm:$0xff] %vm9004_vm3, %v8670_v50  ;;  %v8673_v61 = vadd.f32 %v13826_v36, %v8672_v47 }
 0x95b   : > { %9052 = vst.msk [vmem:[%s13831_s0 + $0x178] sm:$0xff] %vm9004_vm3, %v8681_v31 }
 0x95c   : > { %9050 = vst.msk [vmem:[%s13831_s0 + $0x168] sm:$0xff] %vm9004_vm3, %v8673_v61 }
 0x95e   : > { %v11515_v28 = vpop.f32.mrb[172].mxu1 }
 0x95f   : > { %v8694_v26 = vadd.f32 %v11515_v28, %v13826_v36  ;;  %v8685_v1 = vpop.f32.mrb[173].mxu1 }
 0x960   : > { %v8686_v41 = vadd.f32 %v13826_v36, %v8685_v1  ;;  %v11516_v22 = vpop.f32.mrb[174].mxu1 }
 0x961   : > { %9055 = vst.msk [vmem:[%s13831_s0 + $0x190] sm:$0xff] %vm9004_vm3, %v8694_v26  ;;  %v8697_v58 = vadd.f32 %v11516_v22, %v13826_v36  ;;  %v8688_v40 = vpop.f32.mrb[175].mxu1 }
 0x962   : > { %9053 = vst.msk [vmem:[%s13831_s0 + $0x180] sm:$0xff] %vm9004_vm3, %v8686_v41  ;;  %v8689_v30 = vadd.f32 %v13826_v36, %v8688_v40 }
 0x963   : > { %9056 = vst.msk [vmem:[%s13831_s0 + $0x198] sm:$0xff] %vm9004_vm3, %v8697_v58 }
 0x964   : > { %9054 = vst.msk [vmem:[%s13831_s0 + $0x188] sm:$0xff] %vm9004_vm3, %v8689_v30 }
 0x966   : > { %v11519_v59 = vpop.f32.mrb[176].mxu1 }
 0x967   : > { %v8710_v56 = vadd.f32 %v11519_v59, %v13826_v36  ;;  %v8701_v51 = vpop.f32.mrb[177].mxu1 }
 0x968   : > { %v8702_v11 = vadd.f32 %v13826_v36, %v8701_v51  ;;  %v11520_v57 = vpop.f32.mrb[178].mxu1 }
 0x969   : > { %9059 = vst.msk [vmem:[%s13831_s0 + $0x1b0] sm:$0xff] %vm9004_vm3, %v8710_v56  ;;  %v8713_v2 = vadd.f32 %v11520_v57, %v13826_v36  ;;  %v8704_v48 = vpop.f32.mrb[179].mxu1 }
 0x96a   : > { %9057 = vst.msk [vmem:[%s13831_s0 + $0x1a0] sm:$0xff] %vm9004_vm3, %v8702_v11  ;;  %v8705_v60 = vadd.f32 %v13826_v36, %v8704_v48 }
 0x96b   : > { %9060 = vst.msk [vmem:[%s13831_s0 + $0x1b8] sm:$0xff] %vm9004_vm3, %v8713_v2 }
 0x96c   : > { %9058 = vst.msk [vmem:[%s13831_s0 + $0x1a8] sm:$0xff] %vm9004_vm3, %v8705_v60 }
 0x96e   : > { %v11523_v38 = vpop.f32.mrb[180].mxu1 }
 0x96f   : > { %v8726_v35 = vadd.f32 %v11523_v38, %v13826_v36  ;;  %v8717_v7 = vpop.f32.mrb[181].mxu1 }
 0x970   : > { %v8718_v43 = vadd.f32 %v13826_v36, %v8717_v7  ;;  %v11524_v4 = vpop.f32.mrb[182].mxu1 }
 0x971   : > { %9063 = vst.msk [vmem:[%s13831_s0 + $0x1d0] sm:$0xff] %vm9004_vm3, %v8726_v35  ;;  %v8729_v53 = vadd.f32 %v11524_v4, %v13826_v36  ;;  %v8720_v49 = vpop.f32.mrb[183].mxu1 }
 0x972   : > { %9061 = vst.msk [vmem:[%s13831_s0 + $0x1c0] sm:$0xff] %vm9004_vm3, %v8718_v43  ;;  %v8721_v63 = vadd.f32 %v13826_v36, %v8720_v49 }
 0x973   : > { %9064 = vst.msk [vmem:[%s13831_s0 + $0x1d8] sm:$0xff] %vm9004_vm3, %v8729_v53 }
 0x974   : > { %9062 = vst.msk [vmem:[%s13831_s0 + $0x1c8] sm:$0xff] %vm9004_vm3, %v8721_v63 }
 0x976   : > { %v11527_v9 = vpop.f32.mrb[184].mxu1 }
 0x977   : > { %v8742_v3 = vadd.f32 %v11527_v9, %v13826_v36  ;;  %v8733_v52 = vpop.f32.mrb[185].mxu1 }
 0x978   : > { %v8734_v39 = vadd.f32 %v13826_v36, %v8733_v52  ;;  %v11528_v14 = vpop.f32.mrb[186].mxu1 }
 0x979   : > { %9067 = vst.msk [vmem:[%s13831_s0 + $0x1f0] sm:$0xff] %vm9004_vm3, %v8742_v3  ;;  %v8745_v12 = vadd.f32 %v11528_v14, %v13826_v36  ;;  %v8736_v34 = vpop.f32.mrb[187].mxu1 }
 0x97a   : > { %9065 = vst.msk [vmem:[%s13831_s0 + $0x1e0] sm:$0xff] %vm9004_vm3, %v8734_v39  ;;  %v8737_v33 = vadd.f32 %v13826_v36, %v8736_v34 }
 0x97b   : > { %9068 = vst.msk [vmem:[%s13831_s0 + $0x1f8] sm:$0xff] %vm9004_vm3, %v8745_v12 }
 0x97c   : > { %9066 = vst.msk [vmem:[%s13831_s0 + $0x1e8] sm:$0xff] %vm9004_vm3, %v8737_v33 }
 0x97e   : > { %v11531_v17 = vpop.f32.mrb[188].mxu1 }
 0x97f   : > { %v8758_v46 = vadd.f32 %v11531_v17, %v13826_v36  ;;  %v8749_v54 = vpop.f32.mrb[189].mxu1 }
 0x980   : > { %v8750_v6 = vadd.f32 %v13826_v36, %v8749_v54  ;;  %v11532_v10 = vpop.f32.mrb[190].mxu1 }
 0x981   : > { %9071 = vst.msk [vmem:[%s13831_s0 + $0x210] sm:$0xff] %vm9004_vm3, %v8758_v46  ;;  %v8761_v23 = vadd.f32 %v11532_v10, %v13826_v36  ;;  %v8752_v5 = vpop.f32.mrb[191].mxu1 }
 0x982   : > { %9069 = vst.msk [vmem:[%s13831_s0 + $0x200] sm:$0xff] %vm9004_vm3, %v8750_v6  ;;  %v8753_v16 = vadd.f32 %v13826_v36, %v8752_v5 }
 0x983   : > { %9072 = vst.msk [vmem:[%s13831_s0 + $0x218] sm:$0xff] %vm9004_vm3, %v8761_v23 }
 0x984   : > { %9070 = vst.msk [vmem:[%s13831_s0 + $0x208] sm:$0xff] %vm9004_vm3, %v8753_v16 }
 0x986   : > { %v11535_v29 = vpop.f32.mrb[192].mxu1 }
 0x987   : > { %v8774_v27 = vadd.f32 %v11535_v29, %v13826_v36  ;;  %v8765_v21 = vpop.f32.mrb[193].mxu1 }
 0x988   : > { %v8766_v13 = vadd.f32 %v13826_v36, %v8765_v21  ;;  %v11536_v24 = vpop.f32.mrb[194].mxu1 }
 0x989   : > { %9075 = vst.msk [vmem:[%s13831_s0 + $0x230] sm:$0xff] %vm9004_vm3, %v8774_v27  ;;  %v8777_v55 = vadd.f32 %v11536_v24, %v13826_v36  ;;  %v8768_v25 = vpop.f32.mrb[195].mxu1 }
 0x98a   : > { %9073 = vst.msk [vmem:[%s13831_s0 + $0x220] sm:$0xff] %vm9004_vm3, %v8766_v13  ;;  %v8769_v37 = vadd.f32 %v13826_v36, %v8768_v25 }
 0x98b   : > { %9076 = vst.msk [vmem:[%s13831_s0 + $0x238] sm:$0xff] %vm9004_vm3, %v8777_v55 }
 0x98c   : > { %9074 = vst.msk [vmem:[%s13831_s0 + $0x228] sm:$0xff] %vm9004_vm3, %v8769_v37 }
 0x98e   : > { %v11539_v8 = vpop.f32.mrb[196].mxu1 }
 0x98f   : > { %v8790_v15 = vadd.f32 %v11539_v8, %v13826_v36  ;;  %v8781_v32 = vpop.f32.mrb[197].mxu1 }
 0x990   : > { %v8782_v0 = vadd.f32 %v13826_v36, %v8781_v32  ;;  %v11540_v44 = vpop.f32.mrb[198].mxu1 }
 0x991   : > { %9079 = vst.msk [vmem:[%s13831_s0 + $0x250] sm:$0xff] %vm9004_vm3, %v8790_v15  ;;  %v8793_v62 = vadd.f32 %v11540_v44, %v13826_v36  ;;  %v8784_v19 = vpop.f32.mrb[199].mxu1 }
 0x992   : > { %9077 = vst.msk [vmem:[%s13831_s0 + $0x240] sm:$0xff] %vm9004_vm3, %v8782_v0  ;;  %v8785_v42 = vadd.f32 %v13826_v36, %v8784_v19 }
 0x993   : > { %9080 = vst.msk [vmem:[%s13831_s0 + $0x258] sm:$0xff] %vm9004_vm3, %v8793_v62 }
 0x994   : > { %9078 = vst.msk [vmem:[%s13831_s0 + $0x248] sm:$0xff] %vm9004_vm3, %v8785_v42 }
 0x996   : > { %v11543_v18 = vpop.f32.mrb[200].mxu1 }
 0x997   : > { %v8806_v20 = vadd.f32 %v11543_v18, %v13826_v36  ;;  %v8797_v50 = vpop.f32.mrb[201].mxu1 }
 0x998   : > { %v8798_v45 = vadd.f32 %v13826_v36, %v8797_v50  ;;  %v11544_v31 = vpop.f32.mrb[202].mxu1 }
 0x999   : > { %9083 = vst.msk [vmem:[%s13831_s0 + $0x270] sm:$0xff] %vm9004_vm3, %v8806_v20  ;;  %v8809_v47 = vadd.f32 %v11544_v31, %v13826_v36  ;;  %v8800_v61 = vpop.f32.mrb[203].mxu1 }
 0x99a   : > { %9081 = vst.msk [vmem:[%s13831_s0 + $0x260] sm:$0xff] %vm9004_vm3, %v8798_v45  ;;  %v8801_v28 = vadd.f32 %v13826_v36, %v8800_v61 }
 0x99b   : > { %9084 = vst.msk [vmem:[%s13831_s0 + $0x278] sm:$0xff] %vm9004_vm3, %v8809_v47 }
 0x99c   : > { %9082 = vst.msk [vmem:[%s13831_s0 + $0x268] sm:$0xff] %vm9004_vm3, %v8801_v28 }
 0x99e   : > { %v11547_v26 = vpop.f32.mrb[204].mxu1 }
 0x99f   : > { %v8822_v1 = vadd.f32 %v11547_v26, %v13826_v36  ;;  %v8813_v41 = vpop.f32.mrb[205].mxu1 }
 0x9a0   : > { %v8814_v22 = vadd.f32 %v13826_v36, %v8813_v41  ;;  %v11548_v58 = vpop.f32.mrb[206].mxu1 }
 0x9a1   : > { %9087 = vst.msk [vmem:[%s13831_s0 + $0x290] sm:$0xff] %vm9004_vm3, %v8822_v1  ;;  %v8825_v40 = vadd.f32 %v11548_v58, %v13826_v36  ;;  %v8816_v30 = vpop.f32.mrb[207].mxu1 }
 0x9a2   : > { %9085 = vst.msk [vmem:[%s13831_s0 + $0x280] sm:$0xff] %vm9004_vm3, %v8814_v22  ;;  %v8817_v59 = vadd.f32 %v13826_v36, %v8816_v30 }
 0x9a3   : > { %9088 = vst.msk [vmem:[%s13831_s0 + $0x298] sm:$0xff] %vm9004_vm3, %v8825_v40 }
 0x9a4   : > { %9086 = vst.msk [vmem:[%s13831_s0 + $0x288] sm:$0xff] %vm9004_vm3, %v8817_v59 }
 0x9a6   : > { %v11551_v56 = vpop.f32.mrb[208].mxu1 }
 0x9a7   : > { %v8838_v51 = vadd.f32 %v11551_v56, %v13826_v36  ;;  %v8829_v11 = vpop.f32.mrb[209].mxu1 }
 0x9a8   : > { %v8830_v57 = vadd.f32 %v13826_v36, %v8829_v11  ;;  %v11552_v2 = vpop.f32.mrb[210].mxu1 }
 0x9a9   : > { %9091 = vst.msk [vmem:[%s13831_s0 + $0x2b0] sm:$0xff] %vm9004_vm3, %v8838_v51  ;;  %v8841_v48 = vadd.f32 %v11552_v2, %v13826_v36  ;;  %v8832_v60 = vpop.f32.mrb[211].mxu1 }
 0x9aa   : > { %9089 = vst.msk [vmem:[%s13831_s0 + $0x2a0] sm:$0xff] %vm9004_vm3, %v8830_v57  ;;  %v8833_v38 = vadd.f32 %v13826_v36, %v8832_v60 }
 0x9ab   : > { %9092 = vst.msk [vmem:[%s13831_s0 + $0x2b8] sm:$0xff] %vm9004_vm3, %v8841_v48 }
 0x9ac   : > { %9090 = vst.msk [vmem:[%s13831_s0 + $0x2a8] sm:$0xff] %vm9004_vm3, %v8833_v38 }
 0x9ae   : > { %v11555_v35 = vpop.f32.mrb[212].mxu1 }
 0x9af   : > { %v8854_v7 = vadd.f32 %v11555_v35, %v13826_v36  ;;  %v8845_v43 = vpop.f32.mrb[213].mxu1 }
 0x9b0   : > { %v8846_v4 = vadd.f32 %v13826_v36, %v8845_v43  ;;  %v11556_v53 = vpop.f32.mrb[214].mxu1 }
 0x9b1   : > { %9095 = vst.msk [vmem:[%s13831_s0 + $0x2d0] sm:$0xff] %vm9004_vm3, %v8854_v7  ;;  %v8857_v49 = vadd.f32 %v11556_v53, %v13826_v36  ;;  %v8848_v63 = vpop.f32.mrb[215].mxu1 }
 0x9b2   : > { %9093 = vst.msk [vmem:[%s13831_s0 + $0x2c0] sm:$0xff] %vm9004_vm3, %v8846_v4  ;;  %v8849_v9 = vadd.f32 %v13826_v36, %v8848_v63 }
 0x9b3   : > { %9096 = vst.msk [vmem:[%s13831_s0 + $0x2d8] sm:$0xff] %vm9004_vm3, %v8857_v49 }
 0x9b4   : > { %9094 = vst.msk [vmem:[%s13831_s0 + $0x2c8] sm:$0xff] %vm9004_vm3, %v8849_v9 }
 0x9b6   : > { %v11559_v3 = vpop.f32.mrb[216].mxu1 }
 0x9b7   : > { %v8870_v52 = vadd.f32 %v11559_v3, %v13826_v36  ;;  %v8861_v39 = vpop.f32.mrb[217].mxu1 }
 0x9b8   : > { %v8862_v14 = vadd.f32 %v13826_v36, %v8861_v39  ;;  %v11560_v12 = vpop.f32.mrb[218].mxu1 }
 0x9b9   : > { %9099 = vst.msk [vmem:[%s13831_s0 + $0x2f0] sm:$0xff] %vm9004_vm3, %v8870_v52  ;;  %v8873_v34 = vadd.f32 %v11560_v12, %v13826_v36  ;;  %v8864_v33 = vpop.f32.mrb[219].mxu1 }
 0x9ba   : > { %9097 = vst.msk [vmem:[%s13831_s0 + $0x2e0] sm:$0xff] %vm9004_vm3, %v8862_v14  ;;  %v8865_v17 = vadd.f32 %v13826_v36, %v8864_v33 }
 0x9bb   : > { %9100 = vst.msk [vmem:[%s13831_s0 + $0x2f8] sm:$0xff] %vm9004_vm3, %v8873_v34 }
 0x9bc   : > { %9098 = vst.msk [vmem:[%s13831_s0 + $0x2e8] sm:$0xff] %vm9004_vm3, %v8865_v17 }
 0x9be   : > { %v11563_v46 = vpop.f32.mrb[220].mxu1 }
 0x9bf   : > { %v8886_v54 = vadd.f32 %v11563_v46, %v13826_v36  ;;  %v8877_v6 = vpop.f32.mrb[221].mxu1 }
 0x9c0   : > { %v8878_v10 = vadd.f32 %v13826_v36, %v8877_v6  ;;  %v11564_v23 = vpop.f32.mrb[222].mxu1 }
 0x9c1   : > { %9103 = vst.msk [vmem:[%s13831_s0 + $0x310] sm:$0xff] %vm9004_vm3, %v8886_v54  ;;  %v8889_v5 = vadd.f32 %v11564_v23, %v13826_v36  ;;  %v8880_v16 = vpop.f32.mrb[223].mxu1 }
 0x9c2   : > { %9101 = vst.msk [vmem:[%s13831_s0 + $0x300] sm:$0xff] %vm9004_vm3, %v8878_v10  ;;  %v8881_v29 = vadd.f32 %v13826_v36, %v8880_v16 }
 0x9c3   : > { %9104 = vst.msk [vmem:[%s13831_s0 + $0x318] sm:$0xff] %vm9004_vm3, %v8889_v5 }
 0x9c4   : > { %9102 = vst.msk [vmem:[%s13831_s0 + $0x308] sm:$0xff] %vm9004_vm3, %v8881_v29 }
 0x9c6   : > { %v11567_v27 = vpop.f32.mrb[224].mxu1 }
 0x9c7   : > { %v8902_v21 = vadd.f32 %v11567_v27, %v13826_v36  ;;  %v8893_v13 = vpop.f32.mrb[225].mxu1 }
 0x9c8   : > { %v8894_v24 = vadd.f32 %v13826_v36, %v8893_v13  ;;  %v11568_v55 = vpop.f32.mrb[226].mxu1 }
 0x9c9   : > { %9107 = vst.msk [vmem:[%s13831_s0 + $0x330] sm:$0xff] %vm9004_vm3, %v8902_v21  ;;  %v8905_v25 = vadd.f32 %v11568_v55, %v13826_v36  ;;  %v8896_v37 = vpop.f32.mrb[227].mxu1 }
 0x9ca   : > { %9105 = vst.msk [vmem:[%s13831_s0 + $0x320] sm:$0xff] %vm9004_vm3, %v8894_v24  ;;  %v8897_v8 = vadd.f32 %v13826_v36, %v8896_v37 }
 0x9cb   : > { %9108 = vst.msk [vmem:[%s13831_s0 + $0x338] sm:$0xff] %vm9004_vm3, %v8905_v25 }
 0x9cc   : > { %9106 = vst.msk [vmem:[%s13831_s0 + $0x328] sm:$0xff] %vm9004_vm3, %v8897_v8 }
 0x9ce   : > { %v11571_v15 = vpop.f32.mrb[228].mxu1 }
 0x9cf   : > { %v8918_v32 = vadd.f32 %v11571_v15, %v13826_v36  ;;  %v8909_v0 = vpop.f32.mrb[229].mxu1 }
 0x9d0   : > { %v8910_v44 = vadd.f32 %v13826_v36, %v8909_v0  ;;  %v11572_v62 = vpop.f32.mrb[230].mxu1 }
 0x9d1   : > { %9111 = vst.msk [vmem:[%s13831_s0 + $0x350] sm:$0xff] %vm9004_vm3, %v8918_v32  ;;  %v8921_v19 = vadd.f32 %v11572_v62, %v13826_v36  ;;  %v8912_v42 = vpop.f32.mrb[231].mxu1 }
 0x9d2   : > { %9109 = vst.msk [vmem:[%s13831_s0 + $0x340] sm:$0xff] %vm9004_vm3, %v8910_v44  ;;  %v8913_v18 = vadd.f32 %v13826_v36, %v8912_v42 }
 0x9d3   : > { %9112 = vst.msk [vmem:[%s13831_s0 + $0x358] sm:$0xff] %vm9004_vm3, %v8921_v19 }
 0x9d4   : > { %9110 = vst.msk [vmem:[%s13831_s0 + $0x348] sm:$0xff] %vm9004_vm3, %v8913_v18 }
 0x9d6   : > { %v11575_v20 = vpop.f32.mrb[232].mxu1 }
 0x9d7   : > { %v8934_v50 = vadd.f32 %v11575_v20, %v13826_v36  ;;  %v8925_v45 = vpop.f32.mrb[233].mxu1 }
 0x9d8   : > { %v8926_v31 = vadd.f32 %v13826_v36, %v8925_v45  ;;  %v11576_v47 = vpop.f32.mrb[234].mxu1 }
 0x9d9   : > { %9115 = vst.msk [vmem:[%s13831_s0 + $0x370] sm:$0xff] %vm9004_vm3, %v8934_v50  ;;  %v8937_v61 = vadd.f32 %v11576_v47, %v13826_v36  ;;  %v8928_v28 = vpop.f32.mrb[235].mxu1 }
 0x9da   : > { %9113 = vst.msk [vmem:[%s13831_s0 + $0x360] sm:$0xff] %vm9004_vm3, %v8926_v31  ;;  %v8929_v26 = vadd.f32 %v13826_v36, %v8928_v28 }
 0x9db   : > { %9116 = vst.msk [vmem:[%s13831_s0 + $0x378] sm:$0xff] %vm9004_vm3, %v8937_v61 }
 0x9dc   : > { %9114 = vst.msk [vmem:[%s13831_s0 + $0x368] sm:$0xff] %vm9004_vm3, %v8929_v26 }
 0x9de   : > { %v11579_v1 = vpop.f32.mrb[236].mxu1 }
 0x9df   : > { %v8950_v41 = vadd.f32 %v11579_v1, %v13826_v36  ;;  %v8941_v22 = vpop.f32.mrb[237].mxu1 }
 0x9e0   : > { %v8942_v58 = vadd.f32 %v13826_v36, %v8941_v22  ;;  %v11580_v40 = vpop.f32.mrb[238].mxu1 }
 0x9e1   : > { %9119 = vst.msk [vmem:[%s13831_s0 + $0x390] sm:$0xff] %vm9004_vm3, %v8950_v41  ;;  %v8953_v30 = vadd.f32 %v11580_v40, %v13826_v36  ;;  %v8944_v59 = vpop.f32.mrb[239].mxu1 }
 0x9e2   : > { %9117 = vst.msk [vmem:[%s13831_s0 + $0x380] sm:$0xff] %vm9004_vm3, %v8942_v58  ;;  %v8945_v56 = vadd.f32 %v13826_v36, %v8944_v59 }
 0x9e3   : > { %9120 = vst.msk [vmem:[%s13831_s0 + $0x398] sm:$0xff] %vm9004_vm3, %v8953_v30 }
 0x9e4   : > { %9118 = vst.msk [vmem:[%s13831_s0 + $0x388] sm:$0xff] %vm9004_vm3, %v8945_v56 }
 0x9e6   : > { %v11583_v51 = vpop.f32.mrb[240].mxu1 }
 0x9e7   : > { %v8966_v11 = vadd.f32 %v11583_v51, %v13826_v36  ;;  %v8957_v57 = vpop.f32.mrb[241].mxu1 }
 0x9e8   : > { %v8958_v2 = vadd.f32 %v13826_v36, %v8957_v57  ;;  %v11584_v48 = vpop.f32.mrb[242].mxu1 }
 0x9e9   : > { %9123 = vst.msk [vmem:[%s13831_s0 + $0x3b0] sm:$0xff] %vm9004_vm3, %v8966_v11  ;;  %v8969_v60 = vadd.f32 %v11584_v48, %v13826_v36  ;;  %v8960_v38 = vpop.f32.mrb[243].mxu1 }
 0x9ea   : > { %9121 = vst.msk [vmem:[%s13831_s0 + $0x3a0] sm:$0xff] %vm9004_vm3, %v8958_v2  ;;  %v8961_v35 = vadd.f32 %v13826_v36, %v8960_v38 }
 0x9eb   : > { %9124 = vst.msk [vmem:[%s13831_s0 + $0x3b8] sm:$0xff] %vm9004_vm3, %v8969_v60 }
 0x9ec   : > { %9122 = vst.msk [vmem:[%s13831_s0 + $0x3a8] sm:$0xff] %vm9004_vm3, %v8961_v35 }
 0x9ee   : > { %v11587_v7 = vpop.f32.mrb[244].mxu1 }
 0x9ef   : > { %v8982_v43 = vadd.f32 %v11587_v7, %v13826_v36  ;;  %v8973_v4 = vpop.f32.mrb[245].mxu1 }
 0x9f0   : > { %v8974_v53 = vadd.f32 %v13826_v36, %v8973_v4  ;;  %v11588_v49 = vpop.f32.mrb[246].mxu1 }
 0x9f1   : > { %9127 = vst.msk [vmem:[%s13831_s0 + $0x3d0] sm:$0xff] %vm9004_vm3, %v8982_v43  ;;  %v8985_v63 = vadd.f32 %v11588_v49, %v13826_v36  ;;  %v8976_v9 = vpop.f32.mrb[247].mxu1 }
 0x9f2   : > { %9125 = vst.msk [vmem:[%s13831_s0 + $0x3c0] sm:$0xff] %vm9004_vm3, %v8974_v53  ;;  %v8977_v3 = vadd.f32 %v13826_v36, %v8976_v9 }
 0x9f3   : > { %9128 = vst.msk [vmem:[%s13831_s0 + $0x3d8] sm:$0xff] %vm9004_vm3, %v8985_v63 }
 0x9f4   : > { %9126 = vst.msk [vmem:[%s13831_s0 + $0x3c8] sm:$0xff] %vm9004_vm3, %v8977_v3 }
 0x9f6   : > { %v11591_v52 = vpop.f32.mrb[248].mxu1 }
 0x9f7   : > { %v8998_v39 = vadd.f32 %v11591_v52, %v13826_v36  ;;  %v8989_v14 = vpop.f32.mrb[249].mxu1 }
 0x9f8   : > { %v8990_v12 = vadd.f32 %v13826_v36, %v8989_v14  ;;  %v11592_v34 = vpop.f32.mrb[250].mxu1 }
 0x9f9   : > { %9131 = vst.msk [vmem:[%s13831_s0 + $0x3f0] sm:$0xff] %vm9004_vm3, %v8998_v39  ;;  %v9001_v33 = vadd.f32 %v11592_v34, %v13826_v36  ;;  %v8992_v17 = vpop.f32.mrb[251].mxu1 }
 0x9fa   : > { %9129 = vst.msk [vmem:[%s13831_s0 + $0x3e0] sm:$0xff] %vm9004_vm3, %v8990_v12  ;;  %v8993_v46 = vadd.f32 %v13826_v36, %v8992_v17 }
 0x9fb   : > { %9132 = vst.msk [vmem:[%s13831_s0 + $0x3f8] sm:$0xff] %vm9004_vm3, %v9001_v33 }
 0x9fc   : > { %9130 = vst.msk [vmem:[%s13831_s0 + $0x3e8] sm:$0xff] %vm9004_vm3, %v8993_v46 }
 0x9fd PF: > { %s30_s1 = sadd.s32 1, %s11956_s1  }
 0x9fe   : > { %p27_p4 = scmp.ge.s32.totalorder %s30_s1, 4  }
 0xa00   :  { %29 = sbr.rel (!%p27_p4) target bundleno = 6 (0x6), region = 130 }

</bundles_post_ra>
